<compile_context>
chip_gen: v7x
topology: tpu7x:2x2x1
jax: 0.10.0
libtpu: 0.0.40
codegen_flags: <defaults>
</compile_context>

<pallas_src>
import functools

import jax
import jax.numpy as jnp
from jax import lax
from jax.experimental import pallas as pl
from jax.experimental.pallas import tpu as pltpu


def _vmem_limit_bytes():
    # Chip-aware VMEM budget: leave ~25% headroom for compiler scratch and
    # double-buffered BlockSpec DMAs (v7x only has 64 MiB physical per core).
    try:
        cap = int(pltpu.get_tpu_info().vmem_capacity_bytes)
    except Exception:  # pragma: no cover - conservative fallback
        cap = 64 * 1024 * 1024
    return min(cap * 3 // 4, 100 * 1024 * 1024)


# ----------------------------------------------------------------------------
# Kernel 1: both separable large-kernel conv branches (summed) for one sample,
# plus packed per-sample partial BatchNorm statistics.
# Layout: channels on sublanes, H on the row (sublane) axis, W on lanes; the
# final y is flattened to a lane-dense (CHO, H*W) slab before the store.
# ----------------------------------------------------------------------------
def _conv_branches_kernel(x_ref, wl1_ref, wl2_ref, wr1_ref, wr2_ref,
                          y_ref, stat_ref, xp_ref,
                          *, H, W, P, K, D, CHI, CHO):
    Hp = H + 2 * P
    Wp = W + 2 * P
    hw = float(H * W)

    # ---- zero-pad the sample directly in VMEM (no padw matmul) -------------
    # Only the halo strips are zeroed; the interior is fully overwritten every
    # step.  The strips are re-zeroed every step (not gated on program_id==0)
    # because with "parallel" N-sharding each TensorCore owns its own scratch
    # and only one core ever runs step 0; the strips are tiny anyway.
    if P > 0:
        zrow = jnp.zeros((CHI, P, Wp), jnp.float32)
        xp_ref[:, 0:P, :] = zrow
        xp_ref[:, P + H:Hp, :] = zrow
        zcol = jnp.zeros((CHI, H, P), jnp.float32)
        xp_ref[:, P:P + H, 0:P] = zcol
        xp_ref[:, P:P + H, P + W:Wp] = zcol
    xp_ref[:, P:P + H, P:P + W] = x_ref[0].astype(jnp.float32)
    xp = xp_ref[...]                                        # (CHI, Hp, Wp)

    # ---- per-tap accumulated 1-D convs (K small matmuls, no concat slabs) ---
    def conv_rows(src, w_ref, cin, cout, rows_out, row_len):
        # (k,1)-style conv along the row (sublane) axis + channel mixing.
        acc = jnp.zeros((cout, rows_out * row_len), jnp.float32)
        for t in range(K):
            xt = src[:, t * D:t * D + rows_out, :].reshape(cin, rows_out * row_len)
            acc = acc + jnp.dot(w_ref[t], xt, preferred_element_type=jnp.float32)
        return acc.reshape(cout, rows_out, row_len)

    def conv_cols(src, w_ref, cin, cout, rows, cols_out):
        # (1,k)-style conv along the column (lane) axis + channel mixing.
        acc = jnp.zeros((cout, rows * cols_out), jnp.float32)
        for t in range(K):
            xt = src[:, :, t * D:t * D + cols_out].reshape(cin, rows * cols_out)
            acc = acc + jnp.dot(w_ref[t], xt, preferred_element_type=jnp.float32)
        return acc.reshape(cout, rows, cols_out)

    # gcl branch: (k,1) over H (chi->cho), then (1,k) over W (cho->cho).
    # y1's W-halo columns are exactly zero (xp is zero there), so the second
    # stage gets its zero padding for free.
    y1 = conv_rows(xp, wl1_ref, CHI, CHO, H, Wp)             # (CHO, H, Wp)
    gcl = conv_cols(y1, wl2_ref, CHO, CHO, H, W)             # (CHO, H, W)

    # gcr branch: (1,k) over W (chi->cho), then (k,1) over H (cho->cho).
    # z1's H-halo rows are exactly zero for the same reason.
    z1 = conv_cols(xp, wr1_ref, CHI, CHO, Hp, W)             # (CHO, Hp, W)
    gcr = conv_rows(z1, wr2_ref, CHO, CHO, H, W)             # (CHO, H, W)

    y = (gcl + gcr).reshape(CHO, H * W)                      # lane-dense slab
    y_ref[0] = y

    # Packed per-sample BatchNorm partials: per-channel sum and CENTERED
    # sum-of-squares (stable parallel-variance combination happens outside).
    s = jnp.sum(y, axis=1, keepdims=True)                    # (CHO, 1)
    mu = s * (1.0 / hw)
    d0 = y - mu
    m2 = jnp.sum(d0 * d0, axis=1, keepdims=True)             # (CHO, 1)
    stat_ref[0] = jnp.concatenate([s, m2], axis=1)           # (CHO, 2)


# ----------------------------------------------------------------------------
# Kernel 2: fused BatchNorm (pre-folded per-channel scale/shift) + ReLU, tiled
# over the batch, writing in place over the intermediate.
# ----------------------------------------------------------------------------
def _bn_relu_kernel(y_ref, scale_ref, shift_ref, o_ref):
    o_ref[...] = jnp.maximum(
        y_ref[...] * scale_ref[...] + shift_ref[...], 0.0)


def global_conv_forward(x_nchw, params, *, k=7, d=1, eps=1e-5):
    """Forward pass of GlobalConv.  x_nchw: (N, chi, H, W) float32, NCHW in/out."""
    wl1, wl2, wr1, wr2, gamma, beta = params     # convs stored as (K, Cin, Cout)
    N, chi, H, W = x_nchw.shape
    cho = wl1.shape[-1]
    P = d * (k // 2)
    Hp, Wp = H + 2 * P, W + 2 * P
    HW = H * W
    vmem_limit = _vmem_limit_bytes()

    # Per-tap weight slabs: (K, Cout, Cin) so tap t's matmul LHS is the
    # contiguous slice w_ref[t].
    def taps(w):
        return jnp.transpose(w, (0, 2, 1)).astype(jnp.float32)

    wl1t, wl2t, wr1t, wr2t = taps(wl1), taps(wl2), taps(wr1), taps(wr2)

    conv_kernel = functools.partial(
        _conv_branches_kernel, H=H, W=W, P=P, K=k, D=d, CHI=chi, CHO=cho)

    flops = 2 * N * k * (cho * chi * (H * Wp + Hp * W) + 2 * cho * cho * HW)
    bytes_accessed = 4 * (x_nchw.size + N * cho * HW + 2 * N * cho
                          + wl1t.size + wl2t.size + wr1t.size + wr2t.size)

    def wspec(shape):
        return pl.BlockSpec(shape, lambda n: (0,) * len(shape))

    # TODO(synk): for production-sized activations (e.g. 128x128 spatial and
    # 128-256 channels) add an H-tile grid axis with a k*d halo sized against
    # the per-chip VMEM budget, tile CHO to fill the 128/256-wide MXU, spatially
    # tile the BN pass, and (tolerance permitting) feed bf16 matmul operands;
    # the test shapes fit a whole sample per grid step.
    y, stats = pl.pallas_call(
        conv_kernel,
        out_shape=(
            jax.ShapeDtypeStruct((N, cho, HW), jnp.float32),
            jax.ShapeDtypeStruct((N, cho, 2), jnp.float32),
        ),
        grid=(N,),
        in_specs=[
            pl.BlockSpec((1, chi, H, W), lambda n: (n, 0, 0, 0)),
            wspec((k, cho, chi)),
            wspec((k, cho, cho)),
            wspec((k, cho, chi)),
            wspec((k, cho, cho)),
        ],
        out_specs=(
            pl.BlockSpec((1, cho, HW), lambda n: (n, 0, 0)),
            pl.BlockSpec((1, cho, 2), lambda n: (n, 0, 0)),
        ),
        scratch_shapes=[pltpu.VMEM((chi, Hp, Wp), jnp.float32)],
        compiler_params=pltpu.CompilerParams(
            dimension_semantics=("parallel",),
            vmem_limit_bytes=vmem_limit),
        cost_estimate=pl.CostEstimate(
            flops=flops, transcendentals=0, bytes_accessed=bytes_accessed),
    )(x_nchw.astype(jnp.float32), wl1t, wl2t, wr1t, wr2t)

    # Training-mode BatchNorm statistics (biased variance) folded into a
    # per-channel scale/shift using the stable parallel-variance combination
    # of the per-sample partials (tiny (N, cho) reductions, never re-reads y).
    cnt = float(N * HW)
    sums = stats[:, :, 0]                                    # (N, cho)
    m2s = stats[:, :, 1]                                     # (N, cho)
    mean = jnp.sum(sums, axis=0) / cnt                       # (cho,)
    mu_n = sums / float(HW)
    var = (jnp.sum(m2s, axis=0)
           + float(HW) * jnp.sum(jnp.square(mu_n - mean), axis=0)) / cnt
    scale = (gamma * lax.rsqrt(var + eps)).reshape(cho, 1)
    shift = beta.reshape(cho, 1) - mean.reshape(cho, 1) * scale

    out = pl.pallas_call(
        _bn_relu_kernel,
        out_shape=jax.ShapeDtypeStruct((N, cho, HW), jnp.float32),
        grid=(N,),
        in_specs=[
            pl.BlockSpec((1, cho, HW), lambda n: (n, 0, 0)),
            pl.BlockSpec((cho, 1), lambda n: (0, 0)),
            pl.BlockSpec((cho, 1), lambda n: (0, 0)),
        ],
        out_specs=pl.BlockSpec((1, cho, HW), lambda n: (n, 0, 0)),
        input_output_aliases={0: 0},
        compiler_params=pltpu.CompilerParams(
            dimension_semantics=("parallel",),
            vmem_limit_bytes=vmem_limit),
    )(y, scale, shift)

    # (N, cho, H*W) already holds NCHW data; this reshape is metadata-only.
    return out.reshape(N, cho, H, W)


# ----------------------------------------------------------------------------
# Pure-JAX reference (lax convs, NCHW, PyTorch semantics) for validation.
# ----------------------------------------------------------------------------
def _ref_forward(x, wl1, wl2, wr1, wr2, gamma, beta, *, k, d, eps=1e-5):
    p = d * (k // 2)
    dn = ("NCHW", "OIHW", "NCHW")

    def to_oihw_h(w_kio):   # (k, Cin, Cout) -> (Cout, Cin, k, 1)
        return jnp.transpose(w_kio, (2, 1, 0))[:, :, :, None]

    def to_oihw_w(w_kio):   # (k, Cin, Cout) -> (Cout, Cin, 1, k)
        return jnp.transpose(w_kio, (2, 1, 0))[:, :, None, :]

    def conv(x, w, pad):
        return lax.conv_general_dilated(
            x, w, window_strides=(1, 1), padding=pad,
            rhs_dilation=(d, d), dimension_numbers=dn)

    gcl = conv(conv(x, to_oihw_h(wl1), [(p, p), (0, 0)]),
               to_oihw_w(wl2), [(0, 0), (p, p)])
    gcr = conv(conv(x, to_oihw_w(wr1), [(0, 0), (p, p)]),
               to_oihw_h(wr2), [(p, p), (0, 0)])
    y = gcl + gcr
    mean = jnp.mean(y, axis=(0, 2, 3), keepdims=True)
    var = jnp.mean(jnp.square(y - mean), axis=(0, 2, 3), keepdims=True)
    yhat = (y - mean) / jnp.sqrt(var + eps)
    return jnp.maximum(yhat * gamma.reshape(1, -1, 1, 1)
                       + beta.reshape(1, -1, 1, 1), 0.0)


if __name__ == "__main__":
    N, CHI, CHO, H, W = 2, 4, 8, 16, 16
    K, D = 7, 1

    key = jax.random.PRNGKey(0)
    kx, k1, k2, k3, k4 = jax.random.split(key, 5)

    x = jax.random.normal(kx, (N, CHI, H, W), dtype=jnp.float32)

    # Deterministic synthetic weights, stored as (tap, Cin, Cout).
    wl1 = jax.random.normal(k1, (K, CHI, CHO), jnp.float32) * 0.1   # gcl conv (k,1)
    wl2 = jax.random.normal(k2, (K, CHO, CHO), jnp.float32) * 0.1   # gcl conv (1,k)
    wr1 = jax.random.normal(k3, (K, CHI, CHO), jnp.float32) * 0.1   # gcr conv (1,k)
    wr2 = jax.random.normal(k4, (K, CHO, CHO), jnp.float32) * 0.1   # gcr conv (k,1)
    gamma = jnp.ones((CHO,), jnp.float32)                           # BN default init
    beta = jnp.zeros((CHO,), jnp.float32)

    params = (wl1, wl2, wr1, wr2, gamma, beta)

    out = jax.block_until_ready(
        jax.jit(functools.partial(global_conv_forward, k=K, d=D))(x, params))

    ref = _ref_forward(x, wl1, wl2, wr1, wr2, gamma, beta, k=K, d=D)
    assert out.shape == (N, CHO, H, W)
    assert jnp.allclose(out, ref, atol=1e-4, rtol=1e-4), \
        float(jnp.max(jnp.abs(out - ref)))

    print("KERNEL_OK")
</pallas_src>

<mosaic_0001>
module attributes {stable_mosaic.version = 11 : i64} {
  func.func @_conv_branches_kernel(%arg0: i32, %arg1: memref<1x4x16x16xf32, #tpu.memory_space<vmem>>, %arg2: memref<7x8x4xf32, #tpu.memory_space<vmem>>, %arg3: memref<7x8x8xf32, #tpu.memory_space<vmem>>, %arg4: memref<7x8x4xf32, #tpu.memory_space<vmem>>, %arg5: memref<7x8x8xf32, #tpu.memory_space<vmem>>, %arg6: memref<1x8x256xf32, #tpu.memory_space<vmem>>, %arg7: memref<1x8x2xf32, #tpu.memory_space<vmem>>, %arg8: memref<4x22x22xf32, #tpu.memory_space<vmem>>) attributes {dimension_semantics = [#tpu.dimension_semantics<parallel>], iteration_bounds = array<i64: 2>, scalar_prefetch = 0 : i64, scratch_operands = 1 : i64, tpu.core_type = #tpu.core_type<tc>, window_params = [{transform_indices = @transform_0, window_bounds = array<i64: 1, 4, 16, 16>}, {pipeline_mode = #tpu.pipeline_mode<synchronous>, transform_indices = @transform_1, window_bounds = array<i64: 7, 8, 4>}, {pipeline_mode = #tpu.pipeline_mode<synchronous>, transform_indices = @transform_2, window_bounds = array<i64: 7, 8, 8>}, {pipeline_mode = #tpu.pipeline_mode<synchronous>, transform_indices = @transform_3, window_bounds = array<i64: 7, 8, 4>}, {pipeline_mode = #tpu.pipeline_mode<synchronous>, transform_indices = @transform_4, window_bounds = array<i64: 7, 8, 8>}, {transform_indices = @transform_5, window_bounds = array<i64: 1, 8, 256>}, {transform_indices = @transform_6, window_bounds = array<i64: 1, 8, 2>}]} {
    %cst = arith.constant 0.000000e+00 : f32
    %0 = vector.broadcast %cst : f32 to vector<4x3x22xf32>
    %c0 = arith.constant 0 : index
    %c0_0 = arith.constant 0 : index
    %c0_1 = arith.constant 0 : index
    %1 = vector.load %arg8[%c0, %c0_0, %c0_1] : memref<4x22x22xf32, #tpu.memory_space<vmem>>, vector<4x3x22xf32>
    tpu.vector_store %arg8[%c0, %c0_0, %c0_1], %0 {strides = array<i32>} : memref<4x22x22xf32, #tpu.memory_space<vmem>>, vector<4x3x22xf32>,
    %c0_2 = arith.constant 0 : index
    %c19 = arith.constant 19 : index
    %c0_3 = arith.constant 0 : index
    %2 = vector.load %arg8[%c0_2, %c19, %c0_3] : memref<4x22x22xf32, #tpu.memory_space<vmem>>, vector<4x3x22xf32>
    tpu.vector_store %arg8[%c0_2, %c19, %c0_3], %0 {strides = array<i32>} : memref<4x22x22xf32, #tpu.memory_space<vmem>>, vector<4x3x22xf32>,
    %cst_4 = arith.constant 0.000000e+00 : f32
    %3 = vector.broadcast %cst_4 : f32 to vector<4x16x3xf32>
    %c0_5 = arith.constant 0 : index
    %c3 = arith.constant 3 : index
    %c0_6 = arith.constant 0 : index
    %4 = vector.load %arg8[%c0_5, %c3, %c0_6] : memref<4x22x22xf32, #tpu.memory_space<vmem>>, vector<4x16x3xf32>
    tpu.vector_store %arg8[%c0_5, %c3, %c0_6], %3 {strides = array<i32>} : memref<4x22x22xf32, #tpu.memory_space<vmem>>, vector<4x16x3xf32>,
    %c0_7 = arith.constant 0 : index
    %c3_8 = arith.constant 3 : index
    %c19_9 = arith.constant 19 : index
    %5 = vector.load %arg8[%c0_7, %c3_8, %c19_9] : memref<4x22x22xf32, #tpu.memory_space<vmem>>, vector<4x16x3xf32>
    tpu.vector_store %arg8[%c0_7, %c3_8, %c19_9], %3 {strides = array<i32>} : memref<4x22x22xf32, #tpu.memory_space<vmem>>, vector<4x16x3xf32>,
    %c0_10 = arith.constant 0 : index
    %c0_11 = arith.constant 0 : index
    %c0_12 = arith.constant 0 : index
    %c0_13 = arith.constant 0 : index
    %6 = vector.load %arg1[%c0_10, %c0_11, %c0_12, %c0_13] : memref<1x4x16x16xf32, #tpu.memory_space<vmem>>, vector<1x4x16x16xf32>
    %7 = vector.shape_cast %6 : vector<1x4x16x16xf32> to vector<4x16x16xf32>
    %c0_14 = arith.constant 0 : index
    %c3_15 = arith.constant 3 : index
    %c3_16 = arith.constant 3 : index
    %8 = vector.load %arg8[%c0_14, %c3_15, %c3_16] : memref<4x22x22xf32, #tpu.memory_space<vmem>>, vector<4x16x16xf32>
    tpu.vector_store %arg8[%c0_14, %c3_15, %c3_16], %7 {strides = array<i32>} : memref<4x22x22xf32, #tpu.memory_space<vmem>>, vector<4x16x16xf32>,
    %c0_17 = arith.constant 0 : index
    %c0_18 = arith.constant 0 : index
    %c0_19 = arith.constant 0 : index
    %9 = vector.load %arg8[%c0_17, %c0_18, %c0_19] : memref<4x22x22xf32, #tpu.memory_space<vmem>>, vector<4x22x22xf32>
    %cst_20 = arith.constant 0.000000e+00 : f32
    %10 = vector.broadcast %cst_20 : f32 to vector<8x352xf32>
    %11 = vector.extract_strided_slice %9 {offsets = [0, 0, 0], sizes = [4, 16, 22], strides = [1, 1, 1]} : vector<4x22x22xf32> to vector<4x16x22xf32>
    %12 = vector.shape_cast %11 : vector<4x16x22xf32> to vector<4x352xf32>
    %c0_21 = arith.constant 0 : index
    %c0_22 = arith.constant 0 : index
    %c0_23 = arith.constant 0 : index
    %13 = vector.load %arg2[%c0_21, %c0_22, %c0_23] : memref<7x8x4xf32, #tpu.memory_space<vmem>>, vector<1x8x4xf32>
    %14 = vector.shape_cast %13 : vector<1x8x4xf32> to vector<8x4xf32>
    %cst_24 = arith.constant dense<0.000000e+00> : vector<8x352xf32>
    %15 = tpu.matmul %14, %12, %cst_24 {dimension_numbers = #tpu.dot_dimension_numbers<[1], [0], [0], [1], [0, 0, 1, 1], [], []>} : vector<8x4xf32>, vector<4x352xf32>, vector<8x352xf32> -> vector<8x352xf32>
    %16 = arith.addf %10, %15 : vector<8x352xf32>
    %17 = vector.extract_strided_slice %9 {offsets = [0, 1, 0], sizes = [4, 16, 22], strides = [1, 1, 1]} : vector<4x22x22xf32> to vector<4x16x22xf32>
    %18 = vector.shape_cast %17 : vector<4x16x22xf32> to vector<4x352xf32>
    %c1 = arith.constant 1 : index
    %c0_25 = arith.constant 0 : index
    %c0_26 = arith.constant 0 : index
    %19 = vector.load %arg2[%c1, %c0_25, %c0_26] : memref<7x8x4xf32, #tpu.memory_space<vmem>>, vector<1x8x4xf32>
    %20 = vector.shape_cast %19 : vector<1x8x4xf32> to vector<8x4xf32>
    %cst_27 = arith.constant dense<0.000000e+00> : vector<8x352xf32>
    %21 = tpu.matmul %20, %18, %cst_27 {dimension_numbers = #tpu.dot_dimension_numbers<[1], [0], [0], [1], [0, 0, 1, 1], [], []>} : vector<8x4xf32>, vector<4x352xf32>, vector<8x352xf32> -> vector<8x352xf32>
    %22 = arith.addf %16, %21 : vector<8x352xf32>
    %23 = vector.extract_strided_slice %9 {offsets = [0, 2, 0], sizes = [4, 16, 22], strides = [1, 1, 1]} : vector<4x22x22xf32> to vector<4x16x22xf32>
    %24 = vector.shape_cast %23 : vector<4x16x22xf32> to vector<4x352xf32>
    %c2 = arith.constant 2 : index
    %c0_28 = arith.constant 0 : index
    %c0_29 = arith.constant 0 : index
    %25 = vector.load %arg2[%c2, %c0_28, %c0_29] : memref<7x8x4xf32, #tpu.memory_space<vmem>>, vector<1x8x4xf32>
    %26 = vector.shape_cast %25 : vector<1x8x4xf32> to vector<8x4xf32>
    %cst_30 = arith.constant dense<0.000000e+00> : vector<8x352xf32>
    %27 = tpu.matmul %26, %24, %cst_30 {dimension_numbers = #tpu.dot_dimension_numbers<[1], [0], [0], [1], [0, 0, 1, 1], [], []>} : vector<8x4xf32>, vector<4x352xf32>, vector<8x352xf32> -> vector<8x352xf32>
    %28 = arith.addf %22, %27 : vector<8x352xf32>
    %29 = vector.extract_strided_slice %9 {offsets = [0, 3, 0], sizes = [4, 16, 22], strides = [1, 1, 1]} : vector<4x22x22xf32> to vector<4x16x22xf32>
    %30 = vector.shape_cast %29 : vector<4x16x22xf32> to vector<4x352xf32>
    %c3_31 = arith.constant 3 : index
    %c0_32 = arith.constant 0 : index
    %c0_33 = arith.constant 0 : index
    %31 = vector.load %arg2[%c3_31, %c0_32, %c0_33] : memref<7x8x4xf32, #tpu.memory_space<vmem>>, vector<1x8x4xf32>
    %32 = vector.shape_cast %31 : vector<1x8x4xf32> to vector<8x4xf32>
    %cst_34 = arith.constant dense<0.000000e+00> : vector<8x352xf32>
    %33 = tpu.matmul %32, %30, %cst_34 {dimension_numbers = #tpu.dot_dimension_numbers<[1], [0], [0], [1], [0, 0, 1, 1], [], []>} : vector<8x4xf32>, vector<4x352xf32>, vector<8x352xf32> -> vector<8x352xf32>
    %34 = arith.addf %28, %33 : vector<8x352xf32>
    %35 = vector.extract_strided_slice %9 {offsets = [0, 4, 0], sizes = [4, 16, 22], strides = [1, 1, 1]} : vector<4x22x22xf32> to vector<4x16x22xf32>
    %36 = vector.shape_cast %35 : vector<4x16x22xf32> to vector<4x352xf32>
    %c4 = arith.constant 4 : index
    %c0_35 = arith.constant 0 : index
    %c0_36 = arith.constant 0 : index
    %37 = vector.load %arg2[%c4, %c0_35, %c0_36] : memref<7x8x4xf32, #tpu.memory_space<vmem>>, vector<1x8x4xf32>
    %38 = vector.shape_cast %37 : vector<1x8x4xf32> to vector<8x4xf32>
    %cst_37 = arith.constant dense<0.000000e+00> : vector<8x352xf32>
    %39 = tpu.matmul %38, %36, %cst_37 {dimension_numbers = #tpu.dot_dimension_numbers<[1], [0], [0], [1], [0, 0, 1, 1], [], []>} : vector<8x4xf32>, vector<4x352xf32>, vector<8x352xf32> -> vector<8x352xf32>
    %40 = arith.addf %34, %39 : vector<8x352xf32>
    %41 = vector.extract_strided_slice %9 {offsets = [0, 5, 0], sizes = [4, 16, 22], strides = [1, 1, 1]} : vector<4x22x22xf32> to vector<4x16x22xf32>
    %42 = vector.shape_cast %41 : vector<4x16x22xf32> to vector<4x352xf32>
    %c5 = arith.constant 5 : index
    %c0_38 = arith.constant 0 : index
    %c0_39 = arith.constant 0 : index
    %43 = vector.load %arg2[%c5, %c0_38, %c0_39] : memref<7x8x4xf32, #tpu.memory_space<vmem>>, vector<1x8x4xf32>
    %44 = vector.shape_cast %43 : vector<1x8x4xf32> to vector<8x4xf32>
    %cst_40 = arith.constant dense<0.000000e+00> : vector<8x352xf32>
    %45 = tpu.matmul %44, %42, %cst_40 {dimension_numbers = #tpu.dot_dimension_numbers<[1], [0], [0], [1], [0, 0, 1, 1], [], []>} : vector<8x4xf32>, vector<4x352xf32>, vector<8x352xf32> -> vector<8x352xf32>
    %46 = arith.addf %40, %45 : vector<8x352xf32>
    %47 = vector.extract_strided_slice %9 {offsets = [0, 6, 0], sizes = [4, 16, 22], strides = [1, 1, 1]} : vector<4x22x22xf32> to vector<4x16x22xf32>
    %48 = vector.shape_cast %47 : vector<4x16x22xf32> to vector<4x352xf32>
    %c6 = arith.constant 6 : index
    %c0_41 = arith.constant 0 : index
    %c0_42 = arith.constant 0 : index
    %49 = vector.load %arg2[%c6, %c0_41, %c0_42] : memref<7x8x4xf32, #tpu.memory_space<vmem>>, vector<1x8x4xf32>
    %50 = vector.shape_cast %49 : vector<1x8x4xf32> to vector<8x4xf32>
    %cst_43 = arith.constant dense<0.000000e+00> : vector<8x352xf32>
    %51 = tpu.matmul %50, %48, %cst_43 {dimension_numbers = #tpu.dot_dimension_numbers<[1], [0], [0], [1], [0, 0, 1, 1], [], []>} : vector<8x4xf32>, vector<4x352xf32>, vector<8x352xf32> -> vector<8x352xf32>
    %52 = arith.addf %46, %51 : vector<8x352xf32>
    %53 = vector.shape_cast %52 : vector<8x352xf32> to vector<8x16x22xf32>
    %cst_44 = arith.constant 0.000000e+00 : f32
    %54 = vector.broadcast %cst_44 : f32 to vector<8x256xf32>
    %55 = vector.extract_strided_slice %53 {offsets = [0, 0, 0], sizes = [8, 16, 16], strides = [1, 1, 1]} : vector<8x16x22xf32> to vector<8x16x16xf32>
    %56 = vector.shape_cast %55 : vector<8x16x16xf32> to vector<8x256xf32>
    %c0_45 = arith.constant 0 : index
    %c0_46 = arith.constant 0 : index
    %c0_47 = arith.constant 0 : index
    %57 = vector.load %arg3[%c0_45, %c0_46, %c0_47] : memref<7x8x8xf32, #tpu.memory_space<vmem>>, vector<1x8x8xf32>
    %58 = vector.shape_cast %57 : vector<1x8x8xf32> to vector<8x8xf32>
    %cst_48 = arith.constant dense<0.000000e+00> : vector<8x256xf32>
    %59 = tpu.matmul %58, %56, %cst_48 {dimension_numbers = #tpu.dot_dimension_numbers<[1], [0], [0], [1], [0, 0, 1, 1], [], []>} : vector<8x8xf32>, vector<8x256xf32>, vector<8x256xf32> -> vector<8x256xf32>
    %60 = arith.addf %54, %59 : vector<8x256xf32>
    %61 = vector.extract_strided_slice %53 {offsets = [0, 0, 1], sizes = [8, 16, 16], strides = [1, 1, 1]} : vector<8x16x22xf32> to vector<8x16x16xf32>
    %62 = vector.shape_cast %61 : vector<8x16x16xf32> to vector<8x256xf32>
    %c1_49 = arith.constant 1 : index
    %c0_50 = arith.constant 0 : index
    %c0_51 = arith.constant 0 : index
    %63 = vector.load %arg3[%c1_49, %c0_50, %c0_51] : memref<7x8x8xf32, #tpu.memory_space<vmem>>, vector<1x8x8xf32>
    %64 = vector.shape_cast %63 : vector<1x8x8xf32> to vector<8x8xf32>
    %cst_52 = arith.constant dense<0.000000e+00> : vector<8x256xf32>
    %65 = tpu.matmul %64, %62, %cst_52 {dimension_numbers = #tpu.dot_dimension_numbers<[1], [0], [0], [1], [0, 0, 1, 1], [], []>} : vector<8x8xf32>, vector<8x256xf32>, vector<8x256xf32> -> vector<8x256xf32>
    %66 = arith.addf %60, %65 : vector<8x256xf32>
    %67 = vector.extract_strided_slice %53 {offsets = [0, 0, 2], sizes = [8, 16, 16], strides = [1, 1, 1]} : vector<8x16x22xf32> to vector<8x16x16xf32>
    %68 = vector.shape_cast %67 : vector<8x16x16xf32> to vector<8x256xf32>
    %c2_53 = arith.constant 2 : index
    %c0_54 = arith.constant 0 : index
    %c0_55 = arith.constant 0 : index
    %69 = vector.load %arg3[%c2_53, %c0_54, %c0_55] : memref<7x8x8xf32, #tpu.memory_space<vmem>>, vector<1x8x8xf32>
    %70 = vector.shape_cast %69 : vector<1x8x8xf32> to vector<8x8xf32>
    %cst_56 = arith.constant dense<0.000000e+00> : vector<8x256xf32>
    %71 = tpu.matmul %70, %68, %cst_56 {dimension_numbers = #tpu.dot_dimension_numbers<[1], [0], [0], [1], [0, 0, 1, 1], [], []>} : vector<8x8xf32>, vector<8x256xf32>, vector<8x256xf32> -> vector<8x256xf32>
    %72 = arith.addf %66, %71 : vector<8x256xf32>
    %73 = vector.extract_strided_slice %53 {offsets = [0, 0, 3], sizes = [8, 16, 16], strides = [1, 1, 1]} : vector<8x16x22xf32> to vector<8x16x16xf32>
    %74 = vector.shape_cast %73 : vector<8x16x16xf32> to vector<8x256xf32>
    %c3_57 = arith.constant 3 : index
    %c0_58 = arith.constant 0 : index
    %c0_59 = arith.constant 0 : index
    %75 = vector.load %arg3[%c3_57, %c0_58, %c0_59] : memref<7x8x8xf32, #tpu.memory_space<vmem>>, vector<1x8x8xf32>
    %76 = vector.shape_cast %75 : vector<1x8x8xf32> to vector<8x8xf32>
    %cst_60 = arith.constant dense<0.000000e+00> : vector<8x256xf32>
    %77 = tpu.matmul %76, %74, %cst_60 {dimension_numbers = #tpu.dot_dimension_numbers<[1], [0], [0], [1], [0, 0, 1, 1], [], []>} : vector<8x8xf32>, vector<8x256xf32>, vector<8x256xf32> -> vector<8x256xf32>
    %78 = arith.addf %72, %77 : vector<8x256xf32>
    %79 = vector.extract_strided_slice %53 {offsets = [0, 0, 4], sizes = [8, 16, 16], strides = [1, 1, 1]} : vector<8x16x22xf32> to vector<8x16x16xf32>
    %80 = vector.shape_cast %79 : vector<8x16x16xf32> to vector<8x256xf32>
    %c4_61 = arith.constant 4 : index
    %c0_62 = arith.constant 0 : index
    %c0_63 = arith.constant 0 : index
    %81 = vector.load %arg3[%c4_61, %c0_62, %c0_63] : memref<7x8x8xf32, #tpu.memory_space<vmem>>, vector<1x8x8xf32>
    %82 = vector.shape_cast %81 : vector<1x8x8xf32> to vector<8x8xf32>
    %cst_64 = arith.constant dense<0.000000e+00> : vector<8x256xf32>
    %83 = tpu.matmul %82, %80, %cst_64 {dimension_numbers = #tpu.dot_dimension_numbers<[1], [0], [0], [1], [0, 0, 1, 1], [], []>} : vector<8x8xf32>, vector<8x256xf32>, vector<8x256xf32> -> vector<8x256xf32>
    %84 = arith.addf %78, %83 : vector<8x256xf32>
    %85 = vector.extract_strided_slice %53 {offsets = [0, 0, 5], sizes = [8, 16, 16], strides = [1, 1, 1]} : vector<8x16x22xf32> to vector<8x16x16xf32>
    %86 = vector.shape_cast %85 : vector<8x16x16xf32> to vector<8x256xf32>
    %c5_65 = arith.constant 5 : index
    %c0_66 = arith.constant 0 : index
    %c0_67 = arith.constant 0 : index
    %87 = vector.load %arg3[%c5_65, %c0_66, %c0_67] : memref<7x8x8xf32, #tpu.memory_space<vmem>>, vector<1x8x8xf32>
    %88 = vector.shape_cast %87 : vector<1x8x8xf32> to vector<8x8xf32>
    %cst_68 = arith.constant dense<0.000000e+00> : vector<8x256xf32>
    %89 = tpu.matmul %88, %86, %cst_68 {dimension_numbers = #tpu.dot_dimension_numbers<[1], [0], [0], [1], [0, 0, 1, 1], [], []>} : vector<8x8xf32>, vector<8x256xf32>, vector<8x256xf32> -> vector<8x256xf32>
    %90 = arith.addf %84, %89 : vector<8x256xf32>
    %91 = vector.extract_strided_slice %53 {offsets = [0, 0, 6], sizes = [8, 16, 16], strides = [1, 1, 1]} : vector<8x16x22xf32> to vector<8x16x16xf32>
    %92 = vector.shape_cast %91 : vector<8x16x16xf32> to vector<8x256xf32>
    %c6_69 = arith.constant 6 : index
    %c0_70 = arith.constant 0 : index
    %c0_71 = arith.constant 0 : index
    %93 = vector.load %arg3[%c6_69, %c0_70, %c0_71] : memref<7x8x8xf32, #tpu.memory_space<vmem>>, vector<1x8x8xf32>
    %94 = vector.shape_cast %93 : vector<1x8x8xf32> to vector<8x8xf32>
    %cst_72 = arith.constant dense<0.000000e+00> : vector<8x256xf32>
    %95 = tpu.matmul %94, %92, %cst_72 {dimension_numbers = #tpu.dot_dimension_numbers<[1], [0], [0], [1], [0, 0, 1, 1], [], []>} : vector<8x8xf32>, vector<8x256xf32>, vector<8x256xf32> -> vector<8x256xf32>
    %96 = arith.addf %90, %95 : vector<8x256xf32>
    %97 = vector.shape_cast %96 : vector<8x256xf32> to vector<8x16x16xf32>
    %cst_73 = arith.constant 0.000000e+00 : f32
    %98 = vector.broadcast %cst_73 : f32 to vector<8x352xf32>
    %99 = vector.extract_strided_slice %9 {offsets = [0, 0, 0], sizes = [4, 22, 16], strides = [1, 1, 1]} : vector<4x22x22xf32> to vector<4x22x16xf32>
    %100 = vector.shape_cast %99 : vector<4x22x16xf32> to vector<4x352xf32>
    %c0_74 = arith.constant 0 : index
    %c0_75 = arith.constant 0 : index
    %c0_76 = arith.constant 0 : index
    %101 = vector.load %arg4[%c0_74, %c0_75, %c0_76] : memref<7x8x4xf32, #tpu.memory_space<vmem>>, vector<1x8x4xf32>
    %102 = vector.shape_cast %101 : vector<1x8x4xf32> to vector<8x4xf32>
    %cst_77 = arith.constant dense<0.000000e+00> : vector<8x352xf32>
    %103 = tpu.matmul %102, %100, %cst_77 {dimension_numbers = #tpu.dot_dimension_numbers<[1], [0], [0], [1], [0, 0, 1, 1], [], []>} : vector<8x4xf32>, vector<4x352xf32>, vector<8x352xf32> -> vector<8x352xf32>
    %104 = arith.addf %98, %103 : vector<8x352xf32>
    %105 = vector.extract_strided_slice %9 {offsets = [0, 0, 1], sizes = [4, 22, 16], strides = [1, 1, 1]} : vector<4x22x22xf32> to vector<4x22x16xf32>
    %106 = vector.shape_cast %105 : vector<4x22x16xf32> to vector<4x352xf32>
    %c1_78 = arith.constant 1 : index
    %c0_79 = arith.constant 0 : index
    %c0_80 = arith.constant 0 : index
    %107 = vector.load %arg4[%c1_78, %c0_79, %c0_80] : memref<7x8x4xf32, #tpu.memory_space<vmem>>, vector<1x8x4xf32>
    %108 = vector.shape_cast %107 : vector<1x8x4xf32> to vector<8x4xf32>
    %cst_81 = arith.constant dense<0.000000e+00> : vector<8x352xf32>
    %109 = tpu.matmul %108, %106, %cst_81 {dimension_numbers = #tpu.dot_dimension_numbers<[1], [0], [0], [1], [0, 0, 1, 1], [], []>} : vector<8x4xf32>, vector<4x352xf32>, vector<8x352xf32> -> vector<8x352xf32>
    %110 = arith.addf %104, %109 : vector<8x352xf32>
    %111 = vector.extract_strided_slice %9 {offsets = [0, 0, 2], sizes = [4, 22, 16], strides = [1, 1, 1]} : vector<4x22x22xf32> to vector<4x22x16xf32>
    %112 = vector.shape_cast %111 : vector<4x22x16xf32> to vector<4x352xf32>
    %c2_82 = arith.constant 2 : index
    %c0_83 = arith.constant 0 : index
    %c0_84 = arith.constant 0 : index
    %113 = vector.load %arg4[%c2_82, %c0_83, %c0_84] : memref<7x8x4xf32, #tpu.memory_space<vmem>>, vector<1x8x4xf32>
    %114 = vector.shape_cast %113 : vector<1x8x4xf32> to vector<8x4xf32>
    %cst_85 = arith.constant dense<0.000000e+00> : vector<8x352xf32>
    %115 = tpu.matmul %114, %112, %cst_85 {dimension_numbers = #tpu.dot_dimension_numbers<[1], [0], [0], [1], [0, 0, 1, 1], [], []>} : vector<8x4xf32>, vector<4x352xf32>, vector<8x352xf32> -> vector<8x352xf32>
    %116 = arith.addf %110, %115 : vector<8x352xf32>
    %117 = vector.extract_strided_slice %9 {offsets = [0, 0, 3], sizes = [4, 22, 16], strides = [1, 1, 1]} : vector<4x22x22xf32> to vector<4x22x16xf32>
    %118 = vector.shape_cast %117 : vector<4x22x16xf32> to vector<4x352xf32>
    %c3_86 = arith.constant 3 : index
    %c0_87 = arith.constant 0 : index
    %c0_88 = arith.constant 0 : index
    %119 = vector.load %arg4[%c3_86, %c0_87, %c0_88] : memref<7x8x4xf32, #tpu.memory_space<vmem>>, vector<1x8x4xf32>
    %120 = vector.shape_cast %119 : vector<1x8x4xf32> to vector<8x4xf32>
    %cst_89 = arith.constant dense<0.000000e+00> : vector<8x352xf32>
    %121 = tpu.matmul %120, %118, %cst_89 {dimension_numbers = #tpu.dot_dimension_numbers<[1], [0], [0], [1], [0, 0, 1, 1], [], []>} : vector<8x4xf32>, vector<4x352xf32>, vector<8x352xf32> -> vector<8x352xf32>
    %122 = arith.addf %116, %121 : vector<8x352xf32>
    %123 = vector.extract_strided_slice %9 {offsets = [0, 0, 4], sizes = [4, 22, 16], strides = [1, 1, 1]} : vector<4x22x22xf32> to vector<4x22x16xf32>
    %124 = vector.shape_cast %123 : vector<4x22x16xf32> to vector<4x352xf32>
    %c4_90 = arith.constant 4 : index
    %c0_91 = arith.constant 0 : index
    %c0_92 = arith.constant 0 : index
    %125 = vector.load %arg4[%c4_90, %c0_91, %c0_92] : memref<7x8x4xf32, #tpu.memory_space<vmem>>, vector<1x8x4xf32>
    %126 = vector.shape_cast %125 : vector<1x8x4xf32> to vector<8x4xf32>
    %cst_93 = arith.constant dense<0.000000e+00> : vector<8x352xf32>
    %127 = tpu.matmul %126, %124, %cst_93 {dimension_numbers = #tpu.dot_dimension_numbers<[1], [0], [0], [1], [0, 0, 1, 1], [], []>} : vector<8x4xf32>, vector<4x352xf32>, vector<8x352xf32> -> vector<8x352xf32>
    %128 = arith.addf %122, %127 : vector<8x352xf32>
    %129 = vector.extract_strided_slice %9 {offsets = [0, 0, 5], sizes = [4, 22, 16], strides = [1, 1, 1]} : vector<4x22x22xf32> to vector<4x22x16xf32>
    %130 = vector.shape_cast %129 : vector<4x22x16xf32> to vector<4x352xf32>
    %c5_94 = arith.constant 5 : index
    %c0_95 = arith.constant 0 : index
    %c0_96 = arith.constant 0 : index
    %131 = vector.load %arg4[%c5_94, %c0_95, %c0_96] : memref<7x8x4xf32, #tpu.memory_space<vmem>>, vector<1x8x4xf32>
    %132 = vector.shape_cast %131 : vector<1x8x4xf32> to vector<8x4xf32>
    %cst_97 = arith.constant dense<0.000000e+00> : vector<8x352xf32>
    %133 = tpu.matmul %132, %130, %cst_97 {dimension_numbers = #tpu.dot_dimension_numbers<[1], [0], [0], [1], [0, 0, 1, 1], [], []>} : vector<8x4xf32>, vector<4x352xf32>, vector<8x352xf32> -> vector<8x352xf32>
    %134 = arith.addf %128, %133 : vector<8x352xf32>
    %135 = vector.extract_strided_slice %9 {offsets = [0, 0, 6], sizes = [4, 22, 16], strides = [1, 1, 1]} : vector<4x22x22xf32> to vector<4x22x16xf32>
    %136 = vector.shape_cast %135 : vector<4x22x16xf32> to vector<4x352xf32>
    %c6_98 = arith.constant 6 : index
    %c0_99 = arith.constant 0 : index
    %c0_100 = arith.constant 0 : index
    %137 = vector.load %arg4[%c6_98, %c0_99, %c0_100] : memref<7x8x4xf32, #tpu.memory_space<vmem>>, vector<1x8x4xf32>
    %138 = vector.shape_cast %137 : vector<1x8x4xf32> to vector<8x4xf32>
    %cst_101 = arith.constant dense<0.000000e+00> : vector<8x352xf32>
    %139 = tpu.matmul %138, %136, %cst_101 {dimension_numbers = #tpu.dot_dimension_numbers<[1], [0], [0], [1], [0, 0, 1, 1], [], []>} : vector<8x4xf32>, vector<4x352xf32>, vector<8x352xf32> -> vector<8x352xf32>
    %140 = arith.addf %134, %139 : vector<8x352xf32>
    %141 = vector.shape_cast %140 : vector<8x352xf32> to vector<8x22x16xf32>
    %cst_102 = arith.constant 0.000000e+00 : f32
    %142 = vector.broadcast %cst_102 : f32 to vector<8x256xf32>
    %143 = vector.extract_strided_slice %141 {offsets = [0, 0, 0], sizes = [8, 16, 16], strides = [1, 1, 1]} : vector<8x22x16xf32> to vector<8x16x16xf32>
    %144 = vector.shape_cast %143 : vector<8x16x16xf32> to vector<8x256xf32>
    %c0_103 = arith.constant 0 : index
    %c0_104 = arith.constant 0 : index
    %c0_105 = arith.constant 0 : index
    %145 = vector.load %arg5[%c0_103, %c0_104, %c0_105] : memref<7x8x8xf32, #tpu.memory_space<vmem>>, vector<1x8x8xf32>
    %146 = vector.shape_cast %145 : vector<1x8x8xf32> to vector<8x8xf32>
    %cst_106 = arith.constant dense<0.000000e+00> : vector<8x256xf32>
    %147 = tpu.matmul %146, %144, %cst_106 {dimension_numbers = #tpu.dot_dimension_numbers<[1], [0], [0], [1], [0, 0, 1, 1], [], []>} : vector<8x8xf32>, vector<8x256xf32>, vector<8x256xf32> -> vector<8x256xf32>
    %148 = arith.addf %142, %147 : vector<8x256xf32>
    %149 = vector.extract_strided_slice %141 {offsets = [0, 1, 0], sizes = [8, 16, 16], strides = [1, 1, 1]} : vector<8x22x16xf32> to vector<8x16x16xf32>
    %150 = vector.shape_cast %149 : vector<8x16x16xf32> to vector<8x256xf32>
    %c1_107 = arith.constant 1 : index
    %c0_108 = arith.constant 0 : index
    %c0_109 = arith.constant 0 : index
    %151 = vector.load %arg5[%c1_107, %c0_108, %c0_109] : memref<7x8x8xf32, #tpu.memory_space<vmem>>, vector<1x8x8xf32>
    %152 = vector.shape_cast %151 : vector<1x8x8xf32> to vector<8x8xf32>
    %cst_110 = arith.constant dense<0.000000e+00> : vector<8x256xf32>
    %153 = tpu.matmul %152, %150, %cst_110 {dimension_numbers = #tpu.dot_dimension_numbers<[1], [0], [0], [1], [0, 0, 1, 1], [], []>} : vector<8x8xf32>, vector<8x256xf32>, vector<8x256xf32> -> vector<8x256xf32>
    %154 = arith.addf %148, %153 : vector<8x256xf32>
    %155 = vector.extract_strided_slice %141 {offsets = [0, 2, 0], sizes = [8, 16, 16], strides = [1, 1, 1]} : vector<8x22x16xf32> to vector<8x16x16xf32>
    %156 = vector.shape_cast %155 : vector<8x16x16xf32> to vector<8x256xf32>
    %c2_111 = arith.constant 2 : index
    %c0_112 = arith.constant 0 : index
    %c0_113 = arith.constant 0 : index
    %157 = vector.load %arg5[%c2_111, %c0_112, %c0_113] : memref<7x8x8xf32, #tpu.memory_space<vmem>>, vector<1x8x8xf32>
    %158 = vector.shape_cast %157 : vector<1x8x8xf32> to vector<8x8xf32>
    %cst_114 = arith.constant dense<0.000000e+00> : vector<8x256xf32>
    %159 = tpu.matmul %158, %156, %cst_114 {dimension_numbers = #tpu.dot_dimension_numbers<[1], [0], [0], [1], [0, 0, 1, 1], [], []>} : vector<8x8xf32>, vector<8x256xf32>, vector<8x256xf32> -> vector<8x256xf32>
    %160 = arith.addf %154, %159 : vector<8x256xf32>
    %161 = vector.extract_strided_slice %141 {offsets = [0, 3, 0], sizes = [8, 16, 16], strides = [1, 1, 1]} : vector<8x22x16xf32> to vector<8x16x16xf32>
    %162 = vector.shape_cast %161 : vector<8x16x16xf32> to vector<8x256xf32>
    %c3_115 = arith.constant 3 : index
    %c0_116 = arith.constant 0 : index
    %c0_117 = arith.constant 0 : index
    %163 = vector.load %arg5[%c3_115, %c0_116, %c0_117] : memref<7x8x8xf32, #tpu.memory_space<vmem>>, vector<1x8x8xf32>
    %164 = vector.shape_cast %163 : vector<1x8x8xf32> to vector<8x8xf32>
    %cst_118 = arith.constant dense<0.000000e+00> : vector<8x256xf32>
    %165 = tpu.matmul %164, %162, %cst_118 {dimension_numbers = #tpu.dot_dimension_numbers<[1], [0], [0], [1], [0, 0, 1, 1], [], []>} : vector<8x8xf32>, vector<8x256xf32>, vector<8x256xf32> -> vector<8x256xf32>
    %166 = arith.addf %160, %165 : vector<8x256xf32>
    %167 = vector.extract_strided_slice %141 {offsets = [0, 4, 0], sizes = [8, 16, 16], strides = [1, 1, 1]} : vector<8x22x16xf32> to vector<8x16x16xf32>
    %168 = vector.shape_cast %167 : vector<8x16x16xf32> to vector<8x256xf32>
    %c4_119 = arith.constant 4 : index
    %c0_120 = arith.constant 0 : index
    %c0_121 = arith.constant 0 : index
    %169 = vector.load %arg5[%c4_119, %c0_120, %c0_121] : memref<7x8x8xf32, #tpu.memory_space<vmem>>, vector<1x8x8xf32>
    %170 = vector.shape_cast %169 : vector<1x8x8xf32> to vector<8x8xf32>
    %cst_122 = arith.constant dense<0.000000e+00> : vector<8x256xf32>
    %171 = tpu.matmul %170, %168, %cst_122 {dimension_numbers = #tpu.dot_dimension_numbers<[1], [0], [0], [1], [0, 0, 1, 1], [], []>} : vector<8x8xf32>, vector<8x256xf32>, vector<8x256xf32> -> vector<8x256xf32>
    %172 = arith.addf %166, %171 : vector<8x256xf32>
    %173 = vector.extract_strided_slice %141 {offsets = [0, 5, 0], sizes = [8, 16, 16], strides = [1, 1, 1]} : vector<8x22x16xf32> to vector<8x16x16xf32>
    %174 = vector.shape_cast %173 : vector<8x16x16xf32> to vector<8x256xf32>
    %c5_123 = arith.constant 5 : index
    %c0_124 = arith.constant 0 : index
    %c0_125 = arith.constant 0 : index
    %175 = vector.load %arg5[%c5_123, %c0_124, %c0_125] : memref<7x8x8xf32, #tpu.memory_space<vmem>>, vector<1x8x8xf32>
    %176 = vector.shape_cast %175 : vector<1x8x8xf32> to vector<8x8xf32>
    %cst_126 = arith.constant dense<0.000000e+00> : vector<8x256xf32>
    %177 = tpu.matmul %176, %174, %cst_126 {dimension_numbers = #tpu.dot_dimension_numbers<[1], [0], [0], [1], [0, 0, 1, 1], [], []>} : vector<8x8xf32>, vector<8x256xf32>, vector<8x256xf32> -> vector<8x256xf32>
    %178 = arith.addf %172, %177 : vector<8x256xf32>
    %179 = vector.extract_strided_slice %141 {offsets = [0, 6, 0], sizes = [8, 16, 16], strides = [1, 1, 1]} : vector<8x22x16xf32> to vector<8x16x16xf32>
    %180 = vector.shape_cast %179 : vector<8x16x16xf32> to vector<8x256xf32>
    %c6_127 = arith.constant 6 : index
    %c0_128 = arith.constant 0 : index
    %c0_129 = arith.constant 0 : index
    %181 = vector.load %arg5[%c6_127, %c0_128, %c0_129] : memref<7x8x8xf32, #tpu.memory_space<vmem>>, vector<1x8x8xf32>
    %182 = vector.shape_cast %181 : vector<1x8x8xf32> to vector<8x8xf32>
    %cst_130 = arith.constant dense<0.000000e+00> : vector<8x256xf32>
    %183 = tpu.matmul %182, %180, %cst_130 {dimension_numbers = #tpu.dot_dimension_numbers<[1], [0], [0], [1], [0, 0, 1, 1], [], []>} : vector<8x8xf32>, vector<8x256xf32>, vector<8x256xf32> -> vector<8x256xf32>
    %184 = arith.addf %178, %183 : vector<8x256xf32>
    %185 = vector.shape_cast %184 : vector<8x256xf32> to vector<8x16x16xf32>
    %186 = arith.addf %97, %185 : vector<8x16x16xf32>
    %187 = vector.shape_cast %186 : vector<8x16x16xf32> to vector<8x256xf32>
    %c0_131 = arith.constant 0 : index
    %c0_132 = arith.constant 0 : index
    %c0_133 = arith.constant 0 : index
    %188 = vector.load %arg6[%c0_131, %c0_132, %c0_133] : memref<1x8x256xf32, #tpu.memory_space<vmem>>, vector<1x8x256xf32>
    %189 = vector.shape_cast %188 : vector<1x8x256xf32> to vector<8x256xf32>
    %190 = vector.shape_cast %187 : vector<8x256xf32> to vector<1x8x256xf32>
    tpu.vector_store %arg6[%c0_131, %c0_132, %c0_133], %190 {strides = array<i32>} : memref<1x8x256xf32, #tpu.memory_space<vmem>>, vector<1x8x256xf32>,
    %cst_134 = arith.constant dense<0.000000e+00> : vector<8xf32>
    %191 = vector.multi_reduction <add>, %187, %cst_134 [1] : vector<8x256xf32> to vector<8xf32>
    %192 = vector.shape_cast %191 : vector<8xf32> to vector<8x1xf32>
    %cst_135 = arith.constant 3.906250e-03 : f32
    %193 = vector.broadcast %cst_135 : f32 to vector<8x1xf32>
    %194 = arith.mulf %192, %193 : vector<8x1xf32>
    %195 = vector.broadcast %194 : vector<8x1xf32> to vector<8x256xf32>
    %196 = arith.subf %187, %195 : vector<8x256xf32>
    %197 = arith.mulf %196, %196 : vector<8x256xf32>
    %cst_136 = arith.constant dense<0.000000e+00> : vector<8xf32>
    %198 = vector.multi_reduction <add>, %197, %cst_136 [1] : vector<8x256xf32> to vector<8xf32>
    %199 = vector.shape_cast %198 : vector<8xf32> to vector<8x1xf32>
    %200 = tpu.concatenate %192, %199 in 1 : vector<8x1xf32>, vector<8x1xf32> -> vector<8x2xf32>
    %c0_137 = arith.constant 0 : index
    %c0_138 = arith.constant 0 : index
    %c0_139 = arith.constant 0 : index
    %201 = vector.load %arg7[%c0_137, %c0_138, %c0_139] : memref<1x8x2xf32, #tpu.memory_space<vmem>>, vector<1x8x2xf32>
    %202 = vector.shape_cast %201 : vector<1x8x2xf32> to vector<8x2xf32>
    %203 = vector.shape_cast %200 : vector<8x2xf32> to vector<1x8x2xf32>
    tpu.vector_store %arg7[%c0_137, %c0_138, %c0_139], %203 {strides = array<i32>} : memref<1x8x2xf32, #tpu.memory_space<vmem>>, vector<1x8x2xf32>,
    return
  }
  func.func @transform_0(%arg0: i32) -> (i32, i32, i32, i32) {
    %c0_i32 = arith.constant 0 : i32
    %c0_i32_0 = arith.constant 0 : i32
    %c0_i32_1 = arith.constant 0 : i32
    %c0_i32_2 = arith.constant 0 : i32
    return %arg0, %c0_i32, %c0_i32_0, %c0_i32_1 : i32, i32, i32, i32
  }
  func.func @transform_1(%arg0: i32) -> (i32, i32, i32) {
    %c0_i32 = arith.constant 0 : i32
    %c0_i32_0 = arith.constant 0 : i32
    %c0_i32_1 = arith.constant 0 : i32
    %c0_i32_2 = arith.constant 0 : i32
    return %c0_i32, %c0_i32_0, %c0_i32_1 : i32, i32, i32
  }
  func.func @transform_2(%arg0: i32) -> (i32, i32, i32) {
    %c0_i32 = arith.constant 0 : i32
    %c0_i32_0 = arith.constant 0 : i32
    %c0_i32_1 = arith.constant 0 : i32
    %c0_i32_2 = arith.constant 0 : i32
    return %c0_i32, %c0_i32_0, %c0_i32_1 : i32, i32, i32
  }
  func.func @transform_3(%arg0: i32) -> (i32, i32, i32) {
    %c0_i32 = arith.constant 0 : i32
    %c0_i32_0 = arith.constant 0 : i32
    %c0_i32_1 = arith.constant 0 : i32
    %c0_i32_2 = arith.constant 0 : i32
    return %c0_i32, %c0_i32_0, %c0_i32_1 : i32, i32, i32
  }
  func.func @transform_4(%arg0: i32) -> (i32, i32, i32) {
    %c0_i32 = arith.constant 0 : i32
    %c0_i32_0 = arith.constant 0 : i32
    %c0_i32_1 = arith.constant 0 : i32
    %c0_i32_2 = arith.constant 0 : i32
    return %c0_i32, %c0_i32_0, %c0_i32_1 : i32, i32, i32
  }
  func.func @transform_5(%arg0: i32) -> (i32, i32, i32) {
    %c0_i32 = arith.constant 0 : i32
    %c0_i32_0 = arith.constant 0 : i32
    %c0_i32_1 = arith.constant 0 : i32
    return %arg0, %c0_i32, %c0_i32_0 : i32, i32, i32
  }
  func.func @transform_6(%arg0: i32) -> (i32, i32, i32) {
    %c0_i32 = arith.constant 0 : i32
    %c0_i32_0 = arith.constant 0 : i32
    %c0_i32_1 = arith.constant 0 : i32
    return %arg0, %c0_i32, %c0_i32_0 : i32, i32, i32
  }
}

module attributes {stable_mosaic.version = 11 : i64} {
  func.func @_bn_relu_kernel(%arg0: i32, %arg1: memref<1x8x256xf32, #tpu.memory_space<vmem>>, %arg2: memref<8x1xf32, #tpu.memory_space<vmem>>, %arg3: memref<8x1xf32, #tpu.memory_space<vmem>>, %arg4: memref<1x8x256xf32, #tpu.memory_space<vmem>>) attributes {dimension_semantics = [#tpu.dimension_semantics<parallel>], iteration_bounds = array<i64: 2>, scalar_prefetch = 0 : i64, scratch_operands = 0 : i64, tpu.core_type = #tpu.core_type<tc>, window_params = [{transform_indices = @transform_0, window_bounds = array<i64: 1, 8, 256>}, {pipeline_mode = #tpu.pipeline_mode<synchronous>, transform_indices = @transform_1, window_bounds = array<i64: 8, 1>}, {pipeline_mode = #tpu.pipeline_mode<synchronous>, transform_indices = @transform_2, window_bounds = array<i64: 8, 1>}, {transform_indices = @transform_3, window_bounds = array<i64: 1, 8, 256>}]} {
    %c0 = arith.constant 0 : index
    %c0_0 = arith.constant 0 : index
    %c0_1 = arith.constant 0 : index
    %0 = vector.load %arg1[%c0, %c0_0, %c0_1] : memref<1x8x256xf32, #tpu.memory_space<vmem>>, vector<1x8x256xf32>
    %c0_2 = arith.constant 0 : index
    %c0_3 = arith.constant 0 : index
    %1 = vector.load %arg2[%c0_2, %c0_3] : memref<8x1xf32, #tpu.memory_space<vmem>>, vector<8x1xf32>
    %2 = vector.shape_cast %1 : vector<8x1xf32> to vector<1x8x1xf32>
    %3 = vector.broadcast %2 : vector<1x8x1xf32> to vector<1x8x256xf32>
    %4 = arith.mulf %0, %3 : vector<1x8x256xf32>
    %c0_4 = arith.constant 0 : index
    %c0_5 = arith.constant 0 : index
    %5 = vector.load %arg3[%c0_4, %c0_5] : memref<8x1xf32, #tpu.memory_space<vmem>>, vector<8x1xf32>
    %6 = vector.shape_cast %5 : vector<8x1xf32> to vector<1x8x1xf32>
    %7 = vector.broadcast %6 : vector<1x8x1xf32> to vector<1x8x256xf32>
    %8 = arith.addf %4, %7 : vector<1x8x256xf32>
    %cst = arith.constant 0.000000e+00 : f32
    %9 = vector.broadcast %cst : f32 to vector<1x8x256xf32>
    %10 = arith.maximumf %8, %9 : vector<1x8x256xf32>
    %c0_6 = arith.constant 0 : index
    %c0_7 = arith.constant 0 : index
    %c0_8 = arith.constant 0 : index
    %11 = vector.load %arg4[%c0_6, %c0_7, %c0_8] : memref<1x8x256xf32, #tpu.memory_space<vmem>>, vector<1x8x256xf32>
    tpu.vector_store %arg4[%c0_6, %c0_7, %c0_8], %10 {strides = array<i32>} : memref<1x8x256xf32, #tpu.memory_space<vmem>>, vector<1x8x256xf32>,
    return
  }
  func.func @transform_0(%arg0: i32) -> (i32, i32, i32) {
    %c0_i32 = arith.constant 0 : i32
    %c0_i32_0 = arith.constant 0 : i32
    %c0_i32_1 = arith.constant 0 : i32
    return %arg0, %c0_i32, %c0_i32_0 : i32, i32, i32
  }
  func.func @transform_1(%arg0: i32) -> (i32, i32) {
    %c0_i32 = arith.constant 0 : i32
    %c0_i32_0 = arith.constant 0 : i32
    %c0_i32_1 = arith.constant 0 : i32
    return %c0_i32, %c0_i32_0 : i32, i32
  }
  func.func @transform_2(%arg0: i32) -> (i32, i32) {
    %c0_i32 = arith.constant 0 : i32
    %c0_i32_0 = arith.constant 0 : i32
    %c0_i32_1 = arith.constant 0 : i32
    return %c0_i32, %c0_i32_0 : i32, i32
  }
  func.func @transform_3(%arg0: i32) -> (i32, i32, i32) {
    %c0_i32 = arith.constant 0 : i32
    %c0_i32_0 = arith.constant 0 : i32
    %c0_i32_1 = arith.constant 0 : i32
    return %arg0, %c0_i32, %c0_i32_0 : i32, i32, i32
  }
}

</mosaic_0001>

<bundles_post_ra>
// kernel: global_conv_forward.3
= control target key start
LH: loop header
LB: loop body
LE: loop exit
PB: predicated region body
PF: predicated region fallthrough
CT: control target
= control target key end

     0   :  { %s300_s12 = smov 0   ;;  %s323_s0 = inlined_call_operand.vmem [shape: f32[2,8,256], index: 0, kind: input, shape index: {}, may-alias: {0,3}]   ;;  %s324_s1 = inlined_call_operand.vmem [shape: f32[8,1], index: 1, kind: input, shape index: {}]   ;;  %s325_s2 = inlined_call_operand.vmem [shape: f32[8,1], index: 2, kind: input, shape index: {}]   ;;  %s326_s3 = inlined_call_operand.vmem [shape: f32[2,8,256], index: 3, kind: output, shape index: {}, may-alias: {0,3}]  }
   0x1 LB: > { %s248_s13 = sadd.s32 4294967295, %s277_s12   ;;  %p252_p0 = scmp.ge.s32.totalorder %s277_s12, 1  ;;  %s277_s12 = sphi %s300_s12, %s13_s12  }
   0x2   : > { %p137_p1 = scmp.lt.s32.totalorder %s277_s12, 3 }
   0x4   : > { %p138_p2 = pnand %p252_p0, %p137_p1 }
   0x5   : > { %v173_v0 = vld [vmem:[%s324_s1] sm:$0xff] (!%p138_p2)  ;;  %v279_v1 = vmov (!%p138_p2), 0   ;;  %p161_p3 = scmp.lt.s32.totalorder (!%p138_p2), %s248_s13, 1 }
   0x6   : > { %141 = sbr.rel (%p138_p2) target bundleno = 144 (0x90), region = 32  ;;  %270 = vset.pattern.permute.xlu0 (!%p138_p2), %v279_v1  ;;  %v181_v2 = vld [vmem:[%s325_s2] sm:$0xff] (!%p138_p2) }
   0x7   : > { %176 = vperm.xlu0 (!%p138_p2), %270, %v173_v0  }
   0xb   : > { %184 = vperm.xlu0 (!%p138_p2), %270, %v181_v2  }
   0xd   : > { %s328_s13 = smov (!%p161_p3, %s248_s13), 1 }
   0xe   : > { %s259_s18 = sshll.u32 %s328_s13, 4 }
   0xf   : > { %s165_s21 = scalar_lea.vmem %s323_s0, %s259_s18  ;;  %s170_s24 = scalar_lea.vmem %s326_s3, %s259_s18 }
  0x10   : > { %v171_v4 = vld [vmem:[%s165_s21] sm:$0xff]  ;;  %v172_v5 = vld [vmem:[%s165_s21 + $0x8] sm:$0xff] }
  0x86   : > { %v177_v3 = vpop.permute.xlu0 %176 }
  0x87   : > { %v179_v6 = vmul.f32 %v177_v3, %v171_v4  ;;  %v180_v7 = vmul.f32 %v177_v3, %v172_v5 }
  0x8a   : > { %v185_v8 = vpop.permute.xlu0 %184 }
  0x8b   : > { %v187_v9 = vadd.f32 %v185_v8, %v179_v6  ;;  %v188_v10 = vadd.f32 %v185_v8, %v180_v7 }
  0x8d   : > { %v189_v11 = vmax.f32 %v187_v9, 0.0  ;;  %v190_v12 = vmax.f32 %v188_v10, 0.0 }
  0x8f   : > { %191 = vst [vmem:[%s170_s24] sm:$0xff] %v189_v11  ;;  %192 = vst [vmem:[%s170_s24 + $0x8] sm:$0xff] %v190_v12 }
  0x90 PF: > { %s13_s12 = sadd.s32 1, %s277_s12  }
  0x91   : > { %p10_p4 = scmp.ge.s32.totalorder %s13_s12, 4  }
  0x93   :  { %12 = sbr.rel (!%p10_p4) target bundleno = 1 (0x1), region = 62 }

// kernel: global_conv_forward.2
= control target key start
LH: loop header
LB: loop body
LE: loop exit
PB: predicated region body
PF: predicated region fallthrough
CT: control target
= control target key end

     0   :  { %s15227_s21 = smov 0   ;;  %s22410_s0 = inlined_call_operand.vmem [shape: f32[2,4,16,16], index: 0, kind: input, shape index: {}]   ;;  %s22411_s1 = inlined_call_operand.vmem [shape: f32[7,8,4], index: 1, kind: input, shape index: {}]   ;;  %s22412_s2 = inlined_call_operand.vmem [shape: f32[7,8,8], index: 2, kind: input, shape index: {}]   ;;  %s22413_s3 = inlined_call_operand.vmem [shape: f32[7,8,4], index: 3, kind: input, shape index: {}]   ;;  %s22414_s4 = inlined_call_operand.vmem [shape: f32[7,8,8], index: 4, kind: input, shape index: {}]   ;;  %s22415_s5 = inlined_call_operand.vmem [shape: f32[2,8,256], index: 5, kind: output, shape index: {0}]   ;;  %s22416_s6 = inlined_call_operand.vmem [shape: f32[2,8,2], index: 6, kind: output, shape index: {1}]  }
   0x1 LB: > { %s14750_s22 = sadd.s32 4294967295, %s15145_s21   ;;  %p14754_p0 = scmp.ge.s32.totalorder %s15145_s21, 1  ;;  %s15145_s21 = sphi %s15227_s21, %s17_s21  }
   0x2   : > { %p215_p1 = scmp.lt.s32.totalorder %s15145_s21, 3 }
   0x4   : > { %p216_p2 = pnand %p14754_p0, %p215_p1 }
   0x6   : > { %219 = sbr.rel (%p216_p2) target bundleno = 2652 (0xa5c), region = 40 }
   0xd   : > { %p15235_p3 = scmp.lt.s32.totalorder %s14750_s22, 1  ;;  %vm263_vm0 = vcmask 174080   ;;  %vm272_vm1 = vcmask 23552   ;;  %vm281_vm2 = vcmask 179352   ;;  %v22417_v0 = vmov 0.0   ;;  %s15148_s28 = smov 3  }
   0xe   : > { %265 = vst.msk [vmem:[#allocation2 + $0x18] sm:$0x7] %vm263_vm0, %v22417_v0  ;;  %264 = vst.msk [vmem:[#allocation2] sm:$0x7] %vm263_vm0, %v22417_v0  ;;  %909 = vmatprep.mubr.f32.mxu0 %v22417_v0  ;;  %14932 = vmatprep.subr.mxu1 %v22417_v0  ;;  %vm330_vm3 = vcmask 154648   ;;  %v356_v17 = vlaneseq  ;;  %s15151_s29 = smov 44  }
   0xf   : > { %275 = vst.msk [vmem:[#allocation2 + $0x1b] sm:$0xff] %vm272_vm1, %v22417_v0  ;;  %273 = vst.msk [vmem:[#allocation2 + $0x3] sm:$0xff] %vm272_vm1, %v22417_v0  ;;  %s23780_s22 = smov (!%p15235_p3, %s14750_s22), 1  ;;  %v15149_v15 = vmov 1983009808   ;;  %s15152_s30 = smov 22  }
  0x10   : > { %266 = vst.msk [vmem:[#allocation2 + $0x30] sm:$0x7] %vm263_vm0, %v22417_v0  ;;  %267 = vst.msk [vmem:[#allocation2 + $0x48] sm:$0x7] %vm263_vm0, %v22417_v0  ;;  %s14902_s24 = sshll.u32 %s23780_s22, 6  ;;  %v354_v16 = vunpack.c.l.s4 %v15149_v15  ;;  %v357_v21 = vshrl.u32 %v356_v17, 7 }
  0x11   : > { %268 = vst.msk [vmem:[#allocation2 + $0x13] sm:$0x7] %vm263_vm0, %v22417_v0  ;;  %269 = vst.msk [vmem:[#allocation2 + $0x2b] sm:$0x7] %vm263_vm0, %v22417_v0  ;;  %s253_s27 = scalar_lea.vmem %s22410_s0, %s14902_s24  ;;  %v15150_v22 = vmov 1934713408  }
  0x12   : > { %270 = vst.msk [vmem:[#allocation2 + $0x43] sm:$0x7] %vm263_vm0, %v22417_v0  ;;  %271 = vst.msk [vmem:[#allocation2 + $0x5b] sm:$0x7] %vm263_vm0, %v22417_v0  ;;  %v292_v1 = vld [vmem:[%s253_s27 + $0x10] sm:$0xff]  ;;  %v290_v2 = vld [vmem:[%s253_s27] sm:$0xff]  ;;  %v355_v20 = vunpack.c.0.s8 %v354_v16  ;;  %v386_v23 = vunpack.c.l.s4 %v15150_v22 }
  0x13   : > { %274 = vst.msk [vmem:[#allocation2 + $0xb] sm:$0xff] %vm272_vm1, %v22417_v0  ;;  %276 = vst.msk [vmem:[#allocation2 + $0x23] sm:$0xff] %vm272_vm1, %v22417_v0  ;;  %310 = vrot.lane.b32.xlu1 %v292_v1, %s15148_s28  ;;  %306 = vrot.lane.b32.xlu0 %v290_v2, %s15148_s28  ;;  %v293_v3 = vld [vmem:[%s253_s27 + $0x18] sm:$0xff]  ;;  %v291_v4 = vld [vmem:[%s253_s27 + $0x8] sm:$0xff]  ;;  %s15153_s7 = smov 88   ;;  %s15154_s8 = smov 66  }
  0x14   : > { %277 = vst.msk [vmem:[#allocation2 + $0x33] sm:$0xff] %vm272_vm1, %v22417_v0  ;;  %278 = vst.msk [vmem:[#allocation2 + $0x3b] sm:$0xff] %vm272_vm1, %v22417_v0  ;;  %v295_v5 = vld [vmem:[%s253_s27 + $0x28] sm:$0xff]  ;;  %v294_v6 = vld [vmem:[%s253_s27 + $0x20] sm:$0xff]  ;;  %v15305_v28 = vsub.s32 %v355_v20, %v357_v21  ;;  %v387_v29 = vunpack.c.0.s8 %v386_v23  ;;  %s15155_s9 = smov 4   ;;  %vm22443_vm4 = vcmask 1045504  }
  0x15   : > { %279 = vst.msk [vmem:[#allocation2 + $0x4b] sm:$0xff] %vm272_vm1, %v22417_v0  ;;  %280 = vst.msk [vmem:[#allocation2 + $0x53] sm:$0xff] %vm272_vm1, %v22417_v0  ;;  %v297_v7 = vld [vmem:[%s253_s27 + $0x38] sm:$0xff]  ;;  %v296_v8 = vld [vmem:[%s253_s27 + $0x30] sm:$0xff]  ;;  %s15156_s10 = smov 110   ;;  %s15157_s11 = smov 48  }
  0x16   : > { %284 = vst.msk [vmem:[#allocation2 + $0x1b] sm:$0xff] %vm281_vm2, %v22417_v0  ;;  %282 = vst.msk [vmem:[#allocation2 + $0x3] sm:$0xff] %vm281_vm2, %v22417_v0  ;;  %v15317_v36 = vsub.s32 %v387_v29, %v357_v21  ;;  %s15158_s12 = smov 26   ;;  %vm22444_vm5 = vcmask 1046528   ;;  %s15159_s13 = smov 92   ;;  %vm835_vm6 = vcmask 1043456  }
  0x17   : > { %283 = vst.msk [vmem:[#allocation2 + $0xb] sm:$0xff] %vm281_vm2, %v22417_v0  ;;  %285 = vst.msk [vmem:[#allocation2 + $0x23] sm:$0xff] %vm281_vm2, %v22417_v0  ;;  %312 = vrot.lane.b32.xlu1 %v293_v3, %s15148_s28  ;;  %308 = vrot.lane.b32.xlu0 %v291_v4, %s15148_s28  ;;  %s15160_s14 = smov 70   ;;  %s15161_s15 = smov 8   ;;  %vm22442_vm7 = vcmask 1044480   ;;  %vm15166_vm8 = vmmov 0  }
  0x18   : > { %286 = vst.msk [vmem:[#allocation2 + $0x33] sm:$0xff] %vm281_vm2, %v22417_v0  ;;  %287 = vst.msk [vmem:[#allocation2 + $0x3b] sm:$0xff] %vm281_vm2, %v22417_v0  ;;  %s15162_s16 = smov 114   ;;  %s15163_s17 = smov 52   ;;  %vm22441_vm9 = vcmask 1042432   ;;  %vm22440_vm10 = vcmask 1041408  }
  0x19   : > { %288 = vst.msk [vmem:[#allocation2 + $0x4b] sm:$0xff] %vm281_vm2, %v22417_v0  ;;  %289 = vst.msk [vmem:[#allocation2 + $0x53] sm:$0xff] %vm281_vm2, %v22417_v0  ;;  %s15164_s18 = smov 30   ;;  %s15165_s19 = smov 74   ;;  %vm557_vm11 = vcmask 31744   ;;  %vm22446_vm12 = vcmask 211968  }
  0x1a   : > { %vm547_vm13 = vcmask 179200   ;;  %vm549_vm14 = vcmask 359424   ;;  %vm561_vm15 = vcmask 392192   ;;  %vm563_vm0 = vcmask 572416   ;;  %s15167_s24 = smov 127   ;;  %s15174_s20 = smov 32  }
  0x1b   : > { %316 = vrot.lane.b32.xlu1 %v295_v5, %s15148_s28  ;;  %314 = vrot.lane.b32.xlu0 %v294_v6, %s15148_s28  ;;  %vm551_vm1 = vcmask 539648   ;;  %vm553_vm2 = vcmask 719872   ;;  %s15175_s23 = smov 64   ;;  %s15176_s25 = smov 80  }
  0x1c   : > { %s15177_s26 = smov 96   ;;  %s15178_s27 = smov 112  }
  0x1f   : > { %320 = vrot.lane.b32.xlu1 %v297_v7, %s15148_s28  ;;  %318 = vrot.lane.b32.xlu0 %v296_v8, %s15148_s28  ;;  %s15184_s28 = smov 84  }
  0x85   : > { %v311_v9 = vpop.permute.xlu1 %310  ;;  %v307_v10 = vpop.permute.xlu0 %306 }
  0x86   : > { %333 = vst.msk [vmem:[#allocation2 + $0x1b] sm:$0xff] %vm330_vm3, %v311_v9  ;;  %331 = vst.msk [vmem:[#allocation2 + $0x3] sm:$0xff] %vm330_vm3, %v307_v10 }
  0x89   : > { %v313_v11 = vpop.permute.xlu1 %312  ;;  %v309_v12 = vpop.permute.xlu0 %308 }
  0x8a   : > { %334 = vst.msk [vmem:[#allocation2 + $0x23] sm:$0xff] %vm330_vm3, %v313_v11  ;;  %332 = vst.msk [vmem:[#allocation2 + $0xb] sm:$0xff] %vm330_vm3, %v309_v12 }
  0x8d   : > { %v317_v13 = vpop.permute.xlu1 %316  ;;  %v315_v14 = vpop.permute.xlu0 %314  ;;  %v15299_v25 = vld [vmem:[#allocation2 + $0x18] sm:$0xff]  ;;  %v15301_v26 = vld [vmem:[#allocation2] sm:$0xff] }
  0x8e   : > { %336 = vst.msk [vmem:[#allocation2 + $0x3b] sm:$0xff] %vm330_vm3, %v317_v13  ;;  %335 = vst.msk [vmem:[#allocation2 + $0x33] sm:$0xff] %vm330_vm3, %v315_v14  ;;  %v1145_v59 = vrot.slane %v15299_v25, 2  ;;  %v596_v7 = vrot.slane %v15299_v25, 1  ;;  %v1140_v16 = vrot.slane %v15301_v26, 2 }
  0x91   : > { %v321_v18 = vpop.permute.xlu1 %320  ;;  %v319_v19 = vpop.permute.xlu0 %318  ;;  %v15320_v38 = vld [vmem:[#allocation2 + $0x20] sm:$0xff]  ;;  %v15335_v48 = vld [vmem:[#allocation2 + $0x8] sm:$0xff] }
  0x92   : > { %338 = vst.msk [vmem:[#allocation2 + $0x53] sm:$0xff] %vm330_vm3, %v321_v18  ;;  %337 = vst.msk [vmem:[#allocation2 + $0x4b] sm:$0xff] %vm330_vm3, %v319_v19  ;;  %v1146_v60 = vrot.slane %v15320_v38, 2  ;;  %v1141_v8 = vrot.slane %v15335_v48, 2  ;;  %v597_v11 = vrot.slane %v15320_v38, 1  ;;  %vm565_vm3 = vcmask 752640  }
  0x93   : > { %v15409_v20 = vld [vmem:[#allocation2 + $0x28] sm:$0x3f] }
  0x94   : > { %v1147_v9 = vsel %vm22443_vm4, %v1145_v59, %v1146_v60  ;;  %v1142_v29 = vsel %vm22443_vm4, %v1140_v16, %v1141_v8 }
  0x95   : > { %v15297_v24 = vld [vmem:[#allocation2 + $0x30] sm:$0xff]  ;;  %v15325_v43 = vld [vmem:[#allocation2 + $0x38] sm:$0xff] }
  0x96   : > { %v351_v27 = vcombine.low %v15301_v26, %v15297_v24  ;;  %v352_v32 = vcombine.high %v15301_v26, %v15297_v24  ;;  %v419_v50 = vcombine.low %v15335_v48, %v15325_v43  ;;  %v420_v1 = vcombine.high %v15335_v48, %v15325_v43 }
  0x97   : > { %v1150_v2 = vrot.slane %v15297_v24, 2  ;;  %v1151_v3 = vrot.slane %v15325_v43, 2  ;;  %v601_v18 = vrot.slane %v15297_v24, 1  ;;  %v602_v19 = vrot.slane %v15325_v43, 1 }
  0x98   : > { %v359_v34 = vrot.slane %v351_v27, %v15305_v28  ;;  %v366_v42 = vrot.slane %v352_v32, %v15305_v28  ;;  %v427_v55 = vrot.slane %v419_v50, %v15305_v28  ;;  %v434_v13 = vrot.slane %v420_v1, %v15305_v28  ;;  %v15416_v27 = vld [vmem:[#allocation2 + $0x40] sm:$0x3f] }
  0x99   : > { %v15307_v30 = vld [vmem:[#allocation2 + $0x48] sm:$0xff]  ;;  %v15322_v39 = vld [vmem:[#allocation2 + $0x50] sm:$0xff]  ;;  %v1152_v17 = vsel %vm22443_vm4, %v1150_v2, %v1151_v3  ;;  %v15422_v32 = vld [vmem:[#allocation2 + $0x58] sm:$0x3f] }
  0x9a   : > { %v367_v31 = vcombine.low %v15299_v25, %v15307_v30  ;;  %v368_v33 = vcombine.high %v15299_v25, %v15307_v30  ;;  %v435_v47 = vcombine.low %v15320_v38, %v15322_v39  ;;  %v436_v58 = vcombine.high %v15320_v38, %v15322_v39 }
  0x9b   : > { %v1155_v61 = vrot.slane %v15307_v30, 2  ;;  %v1156_v62 = vrot.slane %v15322_v39, 2  ;;  %v606_v14 = vrot.slane %v15307_v30, 1  ;;  %v607_v15 = vrot.slane %v15322_v39, 1 }
  0x9c   : > { %v375_v35 = vrot.slane %v367_v31, %v15305_v28  ;;  %v382_v37 = vrot.slane %v368_v33, %v15305_v28  ;;  %v443_v53 = vrot.slane %v435_v47, %v15305_v28  ;;  %v450_v6 = vrot.slane %v436_v58, %v15305_v28 }
  0x9d   : > { %v1157_v10 = vsel %vm22443_vm4, %v1155_v61, %v1156_v62  ;;  %v22419_v31 = vrot.slane %v15335_v48, 1  ;;  %v1148_v47 = vrot.slane %v15409_v20, 2  ;;  %v1158_v59 = vrot.slane %v15422_v32, 2 }
  0x9e   : > { %v384_v40 = vcombine.high %v359_v34, %v375_v35  ;;  %v383_v41 = vcombine.low %v359_v34, %v375_v35  ;;  %v399_v46 = vcombine.low %v366_v42, %v382_v37  ;;  %v400_v52 = vcombine.high %v366_v42, %v382_v37 }
  0x9f   : > { %v451_v57 = vcombine.low %v427_v55, %v443_v53  ;;  %v452_v5 = vcombine.high %v427_v55, %v443_v53  ;;  %v467_v22 = vcombine.low %v434_v13, %v450_v6  ;;  %v1184_v23 = vcombine.low %v1147_v9, %v1157_v10 }
  0xa0   : > { %v15328_v44 = vrot.slane %v384_v40, %v15317_v36  ;;  %v15331_v45 = vrot.slane %v383_v41, %v15317_v36  ;;  %v15348_v51 = vrot.slane %v399_v46, %v15317_v36  ;;  %v15361_v56 = vrot.slane %v400_v52, %v15317_v36  ;;  %v15436_v40 = vld [vmem:[#allocation2 + $0x10] sm:$0x3f] }
  0xa1   : > { %v15382_v4 = vrot.slane %v451_v57, %v15317_v36  ;;  %v15414_v21 = vrot.slane %v452_v5, %v15317_v36  ;;  %v1168_v34 = vcombine.low %v1142_v29, %v1152_v17  ;;  %v598_v35 = vsel %vm22444_vm5, %v596_v7, %v597_v11 }
  0xa2   : > { %22826 = vst [vmem:[#allocation3_spill] sm:$0xff] %v15328_v44  ;;  %492 = vrot.lane.b32.xlu1 %v15328_v44, %s15151_s29  ;;  %v15341_v49 = vcombine.high %v15331_v45, %v22417_v0  ;;  %22828 = vst [vmem:[#allocation5_spill] sm:$0xff] %v15348_v51  ;;  %v15355_v54 = vcombine.high %v15328_v44, %v22417_v0  ;;  %v15373_v63 = vcombine.high %v15348_v51, %v22417_v0 }
  0xa3   : > { %22830 = vst [vmem:[#allocation7_spill] sm:$0xff] %v15361_v56  ;;  %22832 = vst [vmem:[#allocation9_spill] sm:$0xff] %v15382_v4  ;;  %v15398_v12 = vcombine.high %v15361_v56, %v22417_v0  ;;  %v15428_v33 = vcombine.high %v15382_v4, %v22417_v0  ;;  %v608_v37 = vsel %vm22444_vm5, %v606_v14, %v607_v15  ;;  %v591_v42 = vrot.slane %v15301_v26, 1 }
  0xa4   : > { %22827 = vst [vmem:[#allocation4_spill] sm:$0xff] %v15341_v49  ;;  %488 = vrot.lane.b32.xlu0 %v15341_v49, %s15152_s30  ;;  %22829 = vst [vmem:[#allocation6_spill] sm:$0xff] %v15355_v54  ;;  %v1185_v41 = vcombine.high %v1147_v9, %v1157_v10  ;;  %v603_v46 = vsel %vm22444_vm5, %v601_v18, %v602_v19  ;;  %v15446_v50 = vrot.slane %v467_v22, %v15317_v36 }
  0xa5   : > { %22831 = vst [vmem:[#allocation8_spill] sm:$0xff] %v15373_v63  ;;  %22833 = vst [vmem:[#allocation10_spill] sm:$0xff] %v15398_v12  ;;  %v468_v52 = vcombine.high %v434_v13, %v450_v6  ;;  %v15449_v53 = vrot.slane %v1184_v23, %v15305_v28  ;;  %v1153_v55 = vrot.slane %v15416_v27, 2  ;;  %v1169_v57 = vcombine.high %v1142_v29, %v1152_v17 }
  0xa6   : > { %500 = vrot.lane.b32.xlu1 %v15348_v51, %s15153_s7  ;;  %22834 = vst [vmem:[#allocation11_spill] sm:$0xff] %v15414_v21  ;;  %22835 = vst [vmem:[#allocation12_spill] sm:$0xff] %v15428_v33  ;;  %v635_v58 = vcombine.low %v598_v35, %v608_v37  ;;  %v15457_v61 = vcombine.high %v15414_v21, %v22417_v0  ;;  %v15460_v1 = vrot.slane %v1168_v34, %v15305_v28 }
  0xa7   : > { %22836 = vst [vmem:[#allocation13_spill] sm:$0xff] %v15446_v50  ;;  %v593_v2 = vsel %vm22444_vm5, %v591_v42, %v22419_v31  ;;  %v1143_v5 = vrot.slane %v15436_v40, 2  ;;  %v1199_v6 = vrot.slane %v1185_v41, %v15305_v28  ;;  %v599_v9 = vrot.slane %v15409_v20, 1 }
  0xa8   : > { %496 = vrot.lane.b32.xlu0 %v15355_v54, %s15154_s8  ;;  %22837 = vst [vmem:[#allocation14_spill] sm:$0xff] %v15457_v61  ;;  %v619_v7 = vcombine.low %v593_v2, %v603_v46  ;;  %v15471_v10 = vrot.slane %v468_v52, %v15317_v36  ;;  %v1201_v13 = vcombine.high %v15460_v1, %v15449_v53  ;;  %v1940_v34 = vrot.slane %v15299_v25, 4 }
  0xa9   : > { %v1149_v14 = vsel %vm22443_vm4, %v1146_v60, %v1148_v47  ;;  %v15481_v16 = vsel %vm22443_vm4, %v1151_v3, %v1153_v55  ;;  %v1183_v17 = vrot.slane %v1169_v57, %v15305_v28  ;;  %v15485_v18 = vrot.slane %v635_v58, %v15305_v28 }
  0xaa   : > { %508 = vrot.lane.b32.xlu1 %v15361_v56, %s15155_s9  ;;  %22838 = vst [vmem:[#allocation15_spill] sm:$0xff] %v15471_v10  ;;  %v636_v22 = vcombine.high %v598_v35, %v608_v37  ;;  %v1159_v23 = vsel %vm22443_vm4, %v1156_v62, %v1158_v59  ;;  %v15494_v60 = vcombine.high %v15446_v50, %v22417_v0  ;;  %v609_v41 = vrot.slane %v15422_v32, 1 }
  0xab   : > { %v620_v3 = vcombine.high %v593_v2, %v603_v46  ;;  %v1144_v29 = vsel %vm22443_vm4, %v1141_v8, %v1143_v5  ;;  %v1216_v35 = vcombine.low %v1183_v17, %v1199_v6  ;;  %v15501_v37 = vrot.slane %v619_v7, %v15305_v28 }
  0xac   : > { %504 = vrot.lane.b32.xlu0 %v15373_v63, %s15156_s10  ;;  %22839 = vst [vmem:[#allocation16_spill] sm:$0xff] %v15494_v60  ;;  %v1236_v62 = vcombine.low %v1144_v29, %v15481_v16  ;;  %v15508_v42 = vrot.slane %v1201_v13, %v15317_v36  ;;  %v1252_v46 = vcombine.low %v1149_v14, %v1159_v23  ;;  %v594_v8 = vrot.slane %v15436_v40, 1 }
  0xad   : > { %v600_v47 = vsel %vm22444_vm5, %v597_v11, %v599_v9  ;;  %v15516_v52 = vcombine.high %v15471_v10, %v22417_v0  ;;  %v652_v55 = vcombine.high %v15501_v37, %v15485_v18  ;;  %v650_v57 = vrot.slane %v636_v22, %v15305_v28 }
  0xae   : > { %516 = vrot.lane.b32.xlu1 %v15382_v4, %s15157_s11  ;;  %v604_v58 = vrot.slane %v15416_v27, 1  ;;  %v634_v59 = vrot.slane %v620_v3, %v15305_v28  ;;  %v22420_v2 = vrot.slane %v15320_v38, 4  ;;  %v1950_v11 = vrot.slane %v15307_v30, 4 }
  0xaf   : > { %22840 = vst [vmem:[#allocation17_spill] sm:$0xff] %v15516_v52  ;;  %v15529_v7 = vrot.slane %v1216_v35, %v15317_v36  ;;  %v1217_v9 = vcombine.high %v1183_v17, %v1199_v6  ;;  %v1244_v13 = vrot.slane %v1236_v62, %v15305_v28  ;;  %v610_v22 = vsel %vm22444_vm5, %v607_v15, %v609_v41 }
  0xb0   : > { %512 = vrot.lane.b32.xlu0 %v15398_v12, %s15158_s12  ;;  %v1260_v3 = vrot.slane %v1252_v46, %v15305_v28  ;;  %v1253_v0 = vcombine.high %v1149_v14, %v1159_v23  ;;  %v1945_v31 = vrot.slane %v15297_v24, 4  ;;  %v15541_v35 = vrot.slane %v652_v55, %v15317_v36 }
  0xb1   : > { %v667_v6 = vcombine.low %v634_v59, %v650_v57  ;;  %v605_v17 = vsel %vm22444_vm5, %v602_v19, %v604_v58  ;;  %v1237_v15 = vcombine.high %v1144_v29, %v15481_v16  ;;  %v703_v62 = vcombine.low %v600_v47, %v610_v22 }
  0xb2   : > { %524 = vrot.lane.b32.xlu1 %v15414_v21, %s15159_s13  ;;  %v1942_v23 = vsel %vm835_vm6, %v1940_v34, %v22420_v2  ;;  %v22841_v41 = vrot.slane %v15322_v39, 4  ;;  %v15557_v55 = vrot.slane %v1217_v9, %v15317_v36  ;;  %v668_v19 = vcombine.high %v634_v59, %v650_v57 }
  0xb3   : > { %v22842_v16 = vrot.slane %v15335_v48, 1  ;;  %v1935_v58 = vrot.slane %v15301_v26, 4  ;;  %v1268_v14 = vcombine.low %v1244_v13, %v1260_v3  ;;  %v1267_v34 = vrot.slane %v1253_v0, %v15305_v28 }
  0xb4   : > { %520 = vrot.lane.b32.xlu0 %v15428_v33, %s15160_s14  ;;  %v1952_v46 = vsel %vm835_vm6, %v1950_v11, %v22841_v41  ;;  %v22843_v2 = vrot.slane %v15325_v43, 4  ;;  %v704_v41 = vcombine.high %v600_v47, %v610_v22  ;;  %v1543_v59 = vrot.slane %v15299_v25, 3 }
  0xb5   : > { %v595_v29 = vsel %vm22444_vm5, %v22842_v16, %v594_v8  ;;  %v1979_v57 = vcombine.low %v1942_v23, %v1952_v46  ;;  %v15573_v8 = vrot.slane %v667_v6, %v15317_v36  ;;  %v711_v16 = vrot.slane %v703_v62, %v15305_v28 }
  0xb6   : > { %532 = vrot.lane.b32.xlu1 %v15446_v50, %s15161_s15  ;;  %v687_v5 = vcombine.low %v595_v29, %v605_v17  ;;  %v1947_v11 = vsel %vm835_vm6, %v1945_v31, %v22843_v2  ;;  %v688_v9 = vcombine.high %v595_v29, %v605_v17  ;;  %v1251_v4 = vrot.slane %v1237_v15, %v15305_v28 }
  0xb7   : > { %v22844_v0 = vrot.slane %v15335_v48, 4  ;;  %v15581_v31 = vrot.slane %v668_v19, %v15317_v36  ;;  %v1269_v47 = vcombine.high %v1244_v13, %v1260_v3  ;;  %v1980_v22 = vcombine.high %v1942_v23, %v1952_v46 }
  0xb8   : > { %528 = vrot.lane.b32.xlu0 %v15457_v61, %s15162_s16  ;;  %v15586_v6 = vrot.slane %v1268_v14, %v15317_v36  ;;  %v695_v17 = vrot.slane %v687_v5, %v15305_v28  ;;  %v1284_v62 = vcombine.low %v1251_v4, %v1267_v34  ;;  %v1285_v15 = vcombine.high %v1251_v4, %v1267_v34 }
  0xb9   : > { %v15590_v29 = vrot.slane %v688_v9, %v15305_v28  ;;  %v15596_v13 = vrot.slane %v1979_v57, %v15305_v28  ;;  %v22424_v14 = vrot.slane %v15320_v38, 3  ;;  %v1553_v5 = vrot.slane %v15307_v30, 3 }
  0xba   : > { %540 = vrot.lane.b32.xlu1 %v15471_v10, %s15163_s17  ;;  %v719_v23 = vcombine.low %v695_v17, %v711_v16  ;;  %v22423_v4 = vrot.slane %v15322_v39, 3  ;;  %v15607_v19 = vrot.slane %v1980_v22, %v15305_v28  ;;  %v1548_v34 = vrot.slane %v15297_v24, 3 }
  0xbb   : > { %v720_v9 = vcombine.high %v695_v17, %v711_v16  ;;  %v1538_v16 = vrot.slane %v15301_v26, 3  ;;  %v22846_v12 = vrot.slane %v15335_v48, 4  ;;  %v22847_v56 = vrot.slane %v15320_v38, 4 }
  0xbc   : > { %536 = vrot.lane.b32.xlu0 %v15494_v60, %s15164_s18  ;;  %v15627_v22 = vrot.slane %v719_v23, %v15317_v36  ;;  %v1555_v17 = vsel %vm22442_vm7, %v1553_v5, %v22423_v4  ;;  %v1943_v5 = vrot.slane %v15409_v20, 4  ;;  %v1953_v4 = vrot.slane %v15422_v32, 4 }
  0xbd   : > { %v22848_v60 = vrot.slane %v15325_v43, 4  ;;  %v22849_v63 = vrot.slane %v15322_v39, 4  ;;  %vm571_vm4 = vcmask 244736   ;;  %vm573_vm5 = vcmask 424960  }
  0xbe   : > { %1309 = vrot.lane.b32.xlu1 %v15508_v42, %s15151_s29 }
  0xc0   : > { %544 = vrot.lane.b32.xlu0 %v15516_v52, %s15165_s19  ;;  %v1937_v52 = vsel %vm835_vm6, %v1935_v58, %v22844_v0  ;;  %v15593_v58 = vrot.slane %v704_v41, %v15305_v28 }
  0xc1   : > { %v1963_v2 = vcombine.low %v1937_v52, %v1947_v11  ;;  %v1964_v3 = vcombine.high %v1937_v52, %v1947_v11  ;;  %v22425_v52 = vrot.slane %v15325_v43, 3  ;;  %v15614_v11 = vrot.slane %v1269_v47, %v15317_v36 }
  0xc2   : > { %1317 = vrot.lane.b32.xlu1 %v15529_v7, %s15153_s7  ;;  %v735_v41 = vcombine.low %v15590_v29, %v15593_v58  ;;  %v1545_v47 = vsel %vm22442_vm7, %v1543_v59, %v22424_v14  ;;  %v1938_v59 = vrot.slane %v15436_v40, 4 }
  0xc3   : > { %v15604_v46 = vrot.slane %v1963_v2, %v15305_v28  ;;  %v15619_v57 = vrot.slane %v1964_v3, %v15305_v28  ;;  %v15637_v3 = vrot.slane %v1284_v62, %v15317_v36  ;;  %v15640_v2 = vrot.slane %v1285_v15, %v15317_v36 }
  0xc4   : > { %760 = vrot.lane.b32.xlu0 %v15541_v35, %s15151_s29  ;;  %v1550_v23 = vsel %vm22442_vm7, %v1548_v34, %v22425_v52  ;;  %v1948_v62 = vrot.slane %v15416_v27, 4  ;;  %v15654_v15 = vrot.slane %v720_v9, %v15317_v36  ;;  %v15657_v14 = vrot.slane %v735_v41, %v15317_v36 }
  0xc5   : > { %v22845_v34 = vrot.slane %v15335_v48, 3  ;;  %v1582_v52 = vcombine.low %v1545_v47, %v1555_v17  ;;  %v1939_v10 = vsel %vm835_vm6, %v22846_v12, %v1938_v59  ;;  %v1944_v9 = vsel %vm835_vm6, %v22847_v56, %v1943_v5 }
  0xc6   : > { %1325 = vrot.lane.b32.xlu1 %v15557_v55, %s15155_s9  ;;  %v1949_v41 = vsel %vm835_vm6, %v22848_v60, %v1948_v62  ;;  %v1996_v56 = vcombine.high %v15604_v46, %v15596_v13  ;;  %v651_v12 = vcombine.low %v15501_v37, %v15485_v18  ;;  %v1583_v62 = vcombine.high %v1545_v47, %v1555_v17 }
  0xc7   : > { %v1540_v0 = vsel %vm22442_vm7, %v1538_v16, %v22845_v34  ;;  %v1954_v16 = vsel %vm835_vm6, %v22849_v63, %v1953_v4  ;;  %v736_v34 = vcombine.high %v15590_v29, %v15593_v58  ;;  %v2031_v54 = vcombine.low %v1939_v10, %v1949_v41 }
  0xc8   : > { %768 = vrot.lane.b32.xlu0 %v15573_v8, %s15153_s7  ;;  %v1566_v51 = vcombine.low %v1540_v0, %v1550_v23  ;;  %v2047_v50 = vcombine.low %v1944_v9, %v1954_v16  ;;  %v2032_v60 = vcombine.high %v1939_v10, %v1949_v41  ;;  %v2048_v59 = vcombine.high %v1944_v9, %v1954_v16 }
  0xc9   : > { %v2011_v63 = vcombine.low %v15619_v57, %v15607_v19  ;;  %v1567_v4 = vcombine.high %v1540_v0, %v1550_v23  ;;  %v15687_v29 = vrot.slane %v2031_v54, %v15305_v28  ;;  %v15695_v5 = vrot.slane %v1582_v52, %v15305_v28 }
  0xca   : > { %1333 = vrot.lane.b32.xlu1 %v15586_v6, %s15157_s11  ;;  %v15690_v58 = vrot.slane %v2047_v50, %v15305_v28  ;;  %v15698_v10 = vrot.slane %v2032_v60, %v15305_v28  ;;  %v15701_v18 = vrot.slane %v2048_v59, %v15305_v28  ;;  %v1546_v37 = vrot.slane %v15409_v20, 3 }
  0xcb   : > { %v1556_v54 = vrot.slane %v15422_v32, 3  ;;  %v15712_v52 = vrot.slane %v1996_v56, %v15317_v36  ;;  %v15715_v47 = vrot.slane %v1566_v51, %v15305_v28  ;;  %v1551_v9 = vrot.slane %v15416_v27, 3 }
  0xcc   : > { %776 = vrot.lane.b32.xlu0 %v15581_v31, %s15155_s9  ;;  %v750_v41 = vrot.slane %v736_v34, %v15317_v36  ;;  %v1597_v56 = vrot.slane %v1583_v62, %v15305_v28  ;;  %v1541_v51 = vrot.slane %v15436_v40, 3  ;;  %v22850_v60 = vrot.slane %v15320_v38, 3 }
  0xcd   : > { %v1599_v16 = vcombine.high %v15715_v47, %v15695_v5  ;;  %v22851_v23 = vrot.slane %v15322_v39, 3  ;;  %v15737_v0 = vrot.slane %v2011_v63, %v15317_v36  ;;  %v15740_v34 = vrot.slane %v651_v12, %v15317_v36 }
  0xce   : > { %1341 = vrot.lane.b32.xlu1 %v15614_v11, %s15159_s13  ;;  %v1547_v59 = vsel %vm22442_vm7, %v22850_v60, %v1546_v37  ;;  %v1581_v62 = vrot.slane %v1567_v4, %v15305_v28  ;;  %v22852_v50 = vrot.slane %v15325_v43, 3  ;;  %v22853_v60 = vrot.slane %v15335_v48, 3 }
  0xcf   : > { %v1557_v17 = vsel %vm22442_vm7, %v22851_v23, %v1556_v54  ;;  %v1613_v37 = vrot.slane %v1599_v16, %v15317_v36  ;;  %v22854_v12 = vmov 0.0  }
  0xd0   : > { %784 = vrot.lane.b32.xlu0 %v15627_v22, %s15157_s11  ;;  %v1552_v61 = vsel %vm22442_vm7, %v22852_v50, %v1551_v9  ;;  %v1614_v54 = vcombine.low %v1581_v62, %v1597_v56  ;;  %v1650_v23 = vcombine.low %v1547_v59, %v1557_v17  ;;  %v1542_v63 = vsel %vm22442_vm7, %v22853_v60, %v1541_v51 }
  0xd1   : > { %v683_v4 = vcombine.high %v15740_v34, %v22854_v12  ;;  %v1634_v44 = vcombine.low %v1542_v63, %v1552_v61  ;;  %v1615_v9 = vcombine.high %v1581_v62, %v1597_v56  ;;  %v684_v16 = vcombine.high %v15541_v35, %v22854_v12  ;;  %14934 = vmatprep.mubr.msk.f32.mxu1 %vm15166_vm8, %v22854_v12 }
  0xd2   : > { %1349 = vrot.lane.b32.xlu1 %v15637_v3, %s15161_s15  ;;  %v1622_v50 = vrot.slane %v1614_v54, %v15317_v36  ;;  %v1658_v49 = vrot.slane %v1650_v23, %v15305_v28  ;;  %v1651_v33 = vcombine.high %v1547_v59, %v1557_v17  ;;  %v685_v56 = vcombine.high %v15573_v8, %v22854_v12 }
  0xd3   : > { %v1642_v51 = vrot.slane %v1634_v44, %v15305_v28  ;;  %v1629_v60 = vrot.slane %v1615_v9, %v15317_v36  ;;  %v1635_v62 = vcombine.high %v1542_v63, %v1552_v61  ;;  %v686_v44 = vcombine.high %v15581_v31, %v22854_v12 }
  0xd4   : > { %792 = vrot.lane.b32.xlu0 %v15654_v15, %s15159_s13  ;;  %v1665_v35 = vrot.slane %v1651_v33, %v15305_v28  ;;  %v1200_v61 = vcombine.low %v15460_v1, %v15449_v53  ;;  %v752_v31 = vcombine.high %v15654_v15, %v22854_v12  ;;  %v753_v53 = vcombine.high %v15657_v14, %v22854_v12 }
  0xd5   : > { %v1666_v21 = vcombine.low %v1642_v51, %v1658_v49  ;;  %v1667_v23 = vcombine.high %v1642_v51, %v1658_v49  ;;  %v1649_v17 = vrot.slane %v1635_v62, %v15305_v28  ;;  %v1598_v1 = vcombine.low %v15715_v47, %v15695_v5 }
  0xd6   : > { %1357 = vrot.lane.b32.xlu1 %v15640_v2, %s15163_s17  ;;  %v754_v15 = vcombine.high %v750_v41, %v22854_v12  ;;  %v1234_v47 = vcombine.high %v15529_v7, %v22854_v12  ;;  %v1300_v51 = vcombine.high %v15586_v6, %v22854_v12  ;;  %v1633_v7 = vcombine.high %v1629_v60, %v22854_v12 }
  0xd7   : > { %v1674_v54 = vrot.slane %v1666_v21, %v15317_v36  ;;  %v1681_v59 = vrot.slane %v1667_v23, %v15317_v36  ;;  %v1682_v8 = vcombine.low %v1649_v17, %v1665_v35  ;;  %v751_v21 = vcombine.high %v15627_v22, %v22854_v12 }
  0xd8   : > { %800 = vrot.lane.b32.xlu0 %v15657_v14, %s15161_s15  ;;  %v1683_v33 = vcombine.high %v1649_v17, %v1665_v35  ;;  %v15804_v9 = vrot.slane %v1598_v1, %v15317_v36  ;;  %v1233_v14 = vcombine.high %v15508_v42, %v22854_v12  ;;  %v1632_v42 = vcombine.high %v1622_v50, %v22854_v12 }
  0xd9   : > { %v1690_v49 = vrot.slane %v1682_v8, %v15317_v36  ;;  %v1699_v6 = vcombine.high %v1681_v59, %v22854_v12  ;;  %v22855_v62 = vcombine.low %v15604_v46, %v15596_v13  ;;  %v2338_v46 = vrot.slane %v15299_v25, 5 }
  0xda   : > { %2104 = vrot.lane.b32.xlu1 %v15712_v52, %s15151_s29  ;;  %v1697_v63 = vrot.slane %v1683_v33, %v15317_v36  ;;  %v1630_v5 = vcombine.high %v15804_v9, %v22854_v12  ;;  %v2339_v17 = vrot.slane %v15320_v38, 5  ;;  %v2349_v8 = vrot.slane %v15322_v39, 5 }
  0xdb   : > { %v1700_v23 = vcombine.high %v1690_v49, %v22854_v12  ;;  %v2343_v33 = vrot.slane %v15297_v24, 5  ;;  %v2334_v1 = vrot.slane %v15335_v48, 5  ;;  %vm569_vm7 = vcmask 64512  }
  0xdc   : > { %808 = vrot.lane.b32.xlu0 %v750_v41, %s15163_s17  ;;  %v1631_v41 = vcombine.high %v1613_v37, %v22854_v12  ;;  %v1701_v13 = vcombine.high %v1697_v63, %v22854_v12 }
  0xde   : > { %2112 = vrot.lane.b32.xlu1 %v15737_v0, %s15153_s7 }
  0xe0   : > { %1707 = vrot.lane.b32.xlu0 %v1613_v37, %s15151_s29  ;;  %v1301_v37 = vcombine.high %v15614_v11, %v22854_v12  ;;  %v1303_v11 = vcombine.high %v15640_v2, %v22854_v12 }
  0xe2   : > { %756 = vrot.lane.b32.xlu1 %v683_v4, %s15152_s30  ;;  %v15789_v4 = vrot.slane %v1200_v61, %v15317_v36  ;;  %v2344_v61 = vrot.slane %v15325_v43, 5 }
  0xe4   : > { %1715 = vrot.lane.b32.xlu0 %v1622_v50, %s15153_s7  ;;  %v1232_v22 = vcombine.high %v15789_v4, %v22854_v12  ;;  %v1302_v50 = vcombine.high %v15637_v3, %v22854_v12 }
  0xe6   : > { %764 = vrot.lane.b32.xlu1 %v684_v16, %s15154_s8  ;;  %v1235_v16 = vcombine.high %v15557_v55, %v22854_v12  ;;  %v1698_v55 = vcombine.high %v1674_v54, %v22854_v12 }
  0xe8   : > { %1723 = vrot.lane.b32.xlu0 %v1629_v60, %s15155_s9 }
  0xea   : > { %772 = vrot.lane.b32.xlu1 %v685_v56, %s15156_s10 }
  0xec   : > { %1731 = vrot.lane.b32.xlu0 %v1674_v54, %s15157_s11  ;;  %v15848_v54 = vrot.slane %v22855_v62, %v15317_v36 }
  0xee   : > { %780 = vrot.lane.b32.xlu1 %v686_v44, %s15158_s12  ;;  %v2027_v44 = vcombine.high %v15848_v54, %v22854_v12 }
  0xf0   : > { %1739 = vrot.lane.b32.xlu0 %v1681_v59, %s15159_s13  ;;  %v2348_v59 = vrot.slane %v15307_v30, 5 }
  0xf2   : > { %788 = vrot.lane.b32.xlu1 %v751_v21, %s15160_s14 }
  0xf4   : > { %1747 = vrot.lane.b32.xlu0 %v1690_v49, %s15161_s15  ;;  %v2028_v49 = vcombine.high %v15712_v52, %v22854_v12  ;;  %v2350_v52 = vsel %vm22441_vm9, %v2348_v59, %v2349_v8  ;;  %v2341_v59 = vrot.slane %v15409_v20, 5 }
  0xf6   : > { %796 = vrot.lane.b32.xlu1 %v752_v31, %s15162_s16 }
  0xf8   : > { %1755 = vrot.lane.b32.xlu0 %v1697_v63, %s15163_s17  ;;  %v22856_v63 = vcombine.high %v15619_v57, %v15607_v19  ;;  %v22857_v57 = vcombine.low %v15687_v29, %v15690_v58 }
  0xfa   : > { %804 = vrot.lane.b32.xlu1 %v753_v53, %s15164_s18  ;;  %v2026_v53 = vrot.slane %v22856_v63, %v15317_v36 }
  0xfc   : > { %1305 = vrot.lane.b32.xlu0 %v1232_v22, %s15152_s30  ;;  %v2340_v22 = vsel %vm22441_vm9, %v2338_v46, %v2339_v17 }
  0xfd   : > { %v2378_v46 = vcombine.high %v2340_v22, %v2350_v52 }
  0xfe   : > { %812 = vrot.lane.b32.xlu1 %v754_v15, %s15165_s19 }
 0x100   : > { %1313 = vrot.lane.b32.xlu0 %v1233_v14, %s15154_s8  ;;  %v2029_v14 = vcombine.high %v15737_v0, %v22854_v12  ;;  %v2030_v0 = vcombine.high %v2026_v53, %v22854_v12 }
 0x102   : > { %1703 = vrot.lane.b32.xlu1 %v1630_v5, %s15152_s30  ;;  %v2333_v5 = vrot.slane %v15301_v26, 5 }
 0x104   : > { %1321 = vrot.lane.b32.xlu0 %v1234_v47, %s15156_s10  ;;  %v2345_v47 = vsel %vm22441_vm9, %v2343_v33, %v2344_v61 }
 0x106   : > { %1711 = vrot.lane.b32.xlu1 %v1631_v41, %s15154_s8  ;;  %v2071_v41 = vrot.slane %v22857_v57, %v15317_v36 }
 0x108   : > { %1329 = vrot.lane.b32.xlu0 %v1235_v16, %s15158_s12  ;;  %v2377_v16 = vcombine.low %v2340_v22, %v2350_v52  ;;  %v2095_v62 = vcombine.high %v2071_v41, %v22854_v12  ;;  %v22860_v22 = vcombine.high %v15698_v10, %v15701_v18 }
 0x10a   : > { %1719 = vrot.lane.b32.xlu1 %v1632_v42, %s15156_s10  ;;  %v2335_v42 = vsel %vm22441_vm9, %v2333_v5, %v2334_v1  ;;  %v2094_v52 = vrot.slane %v22860_v22, %v15317_v36 }
 0x10c   : > { %1337 = vrot.lane.b32.xlu0 %v1300_v51, %s15160_s14 }
 0x10e   : > { %1727 = vrot.lane.b32.xlu1 %v1633_v7, %s15158_s12  ;;  %v2361_v7 = vcombine.low %v2335_v42, %v2345_v47 }
 0x110   : > { %1345 = vrot.lane.b32.xlu0 %v1301_v37, %s15162_s16 }
 0x112   : > { %1735 = vrot.lane.b32.xlu1 %v1698_v55, %s15160_s14  ;;  %v22858_v55 = vcombine.high %v15687_v29, %v15690_v58 }
 0x114   : > { %v15835_v56 = vpop.permute.xlu1 %492  ;;  %1353 = vrot.lane.b32.xlu0 %v1302_v50, %s15164_s18  ;;  %v2078_v50 = vrot.slane %v22858_v55, %v15317_v36 }
 0x116   : > { %1743 = vrot.lane.b32.xlu1 %v1699_v6, %s15162_s16  ;;  %v15840_v60 = vpop.permute.xlu0 %488  ;;  %v2385_v6 = vrot.slane %v2377_v16, %v15305_v28  ;;  %v2096_v63 = vcombine.high %v2078_v50, %v22854_v12  ;;  %v2392_v16 = vrot.slane %v2378_v46, %v15305_v28 }
 0x118   : > { %v15850_v3 = vpop.permute.xlu1 %500  ;;  %1361 = vrot.lane.b32.xlu0 %v1303_v11, %s15165_s19 }
 0x11a   : > { %1751 = vrot.lane.b32.xlu1 %v1700_v23, %s15164_s18  ;;  %v15855_v35 = vpop.permute.xlu0 %496  ;;  %v2369_v23 = vrot.slane %v2361_v7, %v15305_v28 }
 0x11c   : > { %v15859_v2 = vpop.permute.xlu1 %508  ;;  %2100 = vrot.lane.b32.xlu0 %v2027_v44, %s15152_s30  ;;  %v2393_v58 = vcombine.low %v2369_v23, %v2385_v6 }
 0x11e   : > { %1759 = vrot.lane.b32.xlu1 %v1701_v13, %s15165_s19  ;;  %v15868_v21 = vpop.permute.xlu0 %504  ;;  %v22859_v13 = vcombine.low %v15698_v10, %v15701_v18  ;;  %v15938_v57 = vrot.slane %v2393_v58, %v15317_v36 }
 0x120   : > { %v15874_v31 = vpop.permute.xlu1 %516  ;;  %2108 = vrot.lane.b32.xlu0 %v2028_v49, %s15154_s8  ;;  %v2087_v29 = vrot.slane %v22859_v13, %v15317_v36  ;;  %v2351_v49 = vrot.slane %v15422_v32, 5  ;;  %22861 = vst [vmem:[#allocation18_spill] sm:$0xff] %v15938_v57 }
 0x122   : > { %2120 = vrot.lane.b32.xlu1 %v2026_v53, %s15155_s9  ;;  %v15885_v15 = vpop.permute.xlu0 %512  ;;  %v2362_v53 = vcombine.high %v2335_v42, %v2345_v47  ;;  %v2342_v47 = vsel %vm22441_vm9, %v2339_v17, %v2341_v59  ;;  %v2352_v42 = vsel %vm22441_vm9, %v2349_v8, %v2351_v49  ;;  %v2097_v55 = vcombine.high %v2087_v29, %v22854_v12 }
 0x124   : > { %v15891_v19 = vpop.permute.xlu1 %524  ;;  %2116 = vrot.lane.b32.xlu0 %v2029_v14, %s15156_s10  ;;  %v2346_v14 = vrot.slane %v15416_v27, 5  ;;  %v2376_v10 = vrot.slane %v2362_v53, %v15305_v28 }
 0x126   : > { %2128 = vrot.lane.b32.xlu1 %v2071_v41, %s15157_s11  ;;  %v15900_v51 = vpop.permute.xlu0 %520  ;;  %v2394_v41 = vcombine.high %v2369_v23, %v2385_v6  ;;  %v2347_v18 = vsel %vm22441_vm9, %v2344_v61, %v2346_v14  ;;  %v2425_v6 = vcombine.high %v15938_v57, %v22854_v12  ;;  %v2409_v8 = vcombine.low %v2376_v10, %v2392_v16 }
 0x127   : > { %v2410_v49 = vcombine.high %v2376_v10, %v2392_v16  ;;  %v2736_v10 = vrot.slane %v15299_v25, 6  ;;  %v2742_v25 = vrot.slane %v15325_v43, 6  ;;  %v2744_v57 = vrot.slane %v15416_v27, 6 }
 0x128   : > { %v15903_v37 = vpop.permute.xlu1 %532  ;;  %2124 = vrot.lane.b32.xlu0 %v2030_v0, %s15158_s12  ;;  %v2336_v0 = vrot.slane %v15436_v40, 5  ;;  %v2408_v17 = vrot.slane %v2394_v41, %v15317_v36  ;;  %v2417_v59 = vrot.slane %v2409_v8, %v15317_v36  ;;  %v2746_v8 = vrot.slane %v15307_v30, 6 }
 0x12a   : > { %2136 = vrot.lane.b32.xlu1 %v2078_v50, %s15159_s13  ;;  %v15912_v11 = vpop.permute.xlu0 %528  ;;  %v2337_v23 = vsel %vm22441_vm9, %v2334_v1, %v2336_v0  ;;  %v2426_v46 = vcombine.high %v2408_v17, %v22854_v12  ;;  %v2427_v22 = vcombine.high %v2417_v59, %v22854_v12  ;;  %v2446_v0 = vcombine.high %v2342_v47, %v2352_v42 }
 0x12b   : > { %v2429_v61 = vcombine.low %v2337_v23, %v2347_v18  ;;  %vm22445_vm9 = vcmask 900096  }
 0x12c   : > { %v15916_v44 = vpop.permute.xlu1 %540  ;;  %2132 = vrot.lane.b32.xlu0 %v2095_v62, %s15160_s14  ;;  %v2445_v62 = vcombine.low %v2342_v47, %v2352_v42 }
 0x12d   : > { %v2437_v53 = vrot.slane %v2429_v61, %v15305_v28  ;;  %v2460_v61 = vrot.slane %v2446_v0, %v15305_v28 }
 0x12e   : > { %2144 = vrot.lane.b32.xlu1 %v2087_v29, %s15161_s15  ;;  %v15926_v33 = vpop.permute.xlu0 %536  ;;  %v2098_v29 = vcombine.high %v2094_v52, %v22854_v12 }
 0x130   : > { %v15930_v5 = vpop.permute.xlu1 %1309  ;;  %2140 = vrot.lane.b32.xlu0 %v2096_v63, %s15162_s16  ;;  %v2453_v63 = vrot.slane %v2445_v62, %v15305_v28  ;;  %v2747_v62 = vrot.slane %v15322_v39, 6  ;;  %v2732_v39 = vrot.slane %v15335_v48, 6 }
 0x132   : > { %2152 = vrot.lane.b32.xlu1 %v2094_v52, %s15163_s17  ;;  %v15945_v7 = vpop.permute.xlu0 %544  ;;  %v2424_v52 = vrot.slane %v2410_v49, %v15317_v36  ;;  %v2461_v41 = vcombine.low %v2437_v53, %v2453_v63  ;;  %v2462_v42 = vcombine.high %v2437_v53, %v2453_v63  ;;  %v2731_v63 = vrot.slane %v15301_v26, 6 }
 0x134   : > { %v15950_v50 = vpop.permute.xlu1 %1317  ;;  %2148 = vrot.lane.b32.xlu0 %v2097_v55, %s15164_s18  ;;  %v2430_v55 = vcombine.high %v2337_v23, %v2347_v18  ;;  %v2469_v47 = vrot.slane %v2461_v41, %v15317_v36  ;;  %v2741_v18 = vrot.slane %v15297_v24, 6  ;;  %v2476_v43 = vrot.slane %v2462_v42, %v15317_v36 }
 0x135   : > { %v2733_v41 = vsel %vm22440_vm10, %v2731_v63, %v2732_v39 }
 0x136   : > { %2498 = vrot.lane.b32.xlu1 %v2425_v6, %s15152_s30  ;;  %v15958_v13 = vpop.permute.xlu0 %760  ;;  %v2737_v6 = vrot.slane %v15320_v38, 6  ;;  %v2444_v38 = vrot.slane %v2430_v55, %v15305_v28  ;;  %v2493_v24 = vcombine.high %v2469_v47, %v22854_v12  ;;  %v2743_v53 = vsel %vm22440_vm10, %v2741_v18, %v2742_v25 }
 0x138   : > { %v15961_v58 = vpop.permute.xlu1 %1325  ;;  %2156 = vrot.lane.b32.xlu0 %v2098_v29, %s15165_s19  ;;  %v2428_v29 = vcombine.high %v2424_v52, %v22854_v12  ;;  %v2738_v23 = vsel %vm22440_vm10, %v2736_v10, %v2737_v6  ;;  %v2477_v49 = vcombine.low %v2444_v38, %v2460_v61  ;;  %v2478_v10 = vcombine.high %v2444_v38, %v2460_v61 }
 0x139   : > { %v2739_v61 = vrot.slane %v15409_v20, 6  ;;  %v2749_v38 = vrot.slane %v15422_v32, 6  ;;  %v2734_v20 = vrot.slane %v15436_v40, 6 }
 0x13a   : > { %2506 = vrot.lane.b32.xlu1 %v2426_v46, %s15154_s8  ;;  %v15968_v1 = vpop.permute.xlu0 %768  ;;  %v2748_v46 = vsel %vm22440_vm10, %v2746_v8, %v2747_v62  ;;  %v2485_v55 = vrot.slane %v2477_v49, %v15317_v36  ;;  %v2759_v8 = vcombine.low %v2733_v41, %v2743_v53 }
 0x13b   : > { %v2776_v63 = vcombine.high %v2738_v23, %v2748_v46  ;;  %v2740_v32 = vsel %vm22440_vm10, %v2737_v6, %v2739_v61 }
 0x13c   : > { %v15971_v14 = vpop.permute.xlu1 %1333  ;;  %2502 = vrot.lane.b32.xlu0 %v2408_v17, %s15151_s29  ;;  %v2495_v18 = vcombine.high %v2485_v55, %v22854_v12 }
 0x13e   : > { %2514 = vrot.lane.b32.xlu1 %v2427_v22, %s15156_s10  ;;  %v15977_v16 = vpop.permute.xlu0 %776  ;;  %v2775_v22 = vcombine.low %v2738_v23, %v2748_v46  ;;  %v2790_v23 = vrot.slane %v2776_v63, %v15305_v28  ;;  %v2750_v46 = vsel %vm22440_vm10, %v2747_v62, %v2749_v38  ;;  %v2735_v62 = vsel %vm22440_vm10, %v2732_v39, %v2734_v20 }
 0x13f   : > { %v2843_v6 = vcombine.low %v2740_v32, %v2750_v46 }
 0x140   : > { %v15983_v17 = vpop.permute.xlu1 %1341  ;;  %2510 = vrot.lane.b32.xlu0 %v2417_v59, %s15153_s7 }
 0x142   : > { %2522 = vrot.lane.b32.xlu1 %v2428_v29, %s15158_s12  ;;  %v15992_v30 = vpop.permute.xlu0 %784  ;;  %v2783_v29 = vrot.slane %v2775_v22, %v15305_v28 }
 0x144   : > { %v15998_v59 = vpop.permute.xlu1 %1349  ;;  %2518 = vrot.lane.b32.xlu0 %v2424_v52, %s15155_s9  ;;  %v2494_v52 = vcombine.high %v2476_v43, %v22854_v12 }
 0x146   : > { %2530 = vrot.lane.b32.xlu1 %v2493_v24, %s15160_s14  ;;  %v16006_v48 = vpop.permute.xlu0 %792  ;;  %v2767_v24 = vrot.slane %v2759_v8, %v15305_v28 }
 0x148   : > { %v16009_v0 = vpop.permute.xlu1 %1357  ;;  %2526 = vrot.lane.b32.xlu0 %v2469_v47, %s15157_s11  ;;  %v2492_v47 = vrot.slane %v2478_v10, %v15317_v36  ;;  %v2791_v22 = vcombine.low %v2767_v24, %v2783_v29  ;;  %v2792_v8 = vcombine.high %v2767_v24, %v2783_v29 }
 0x14a   : > { %2538 = vrot.lane.b32.xlu1 %v2494_v52, %s15162_s16  ;;  %v16015_v26 = vpop.permute.xlu0 %800  ;;  %v2760_v52 = vcombine.high %v2733_v41, %v2743_v53  ;;  %v2496_v10 = vcombine.high %v2492_v47, %v22854_v12  ;;  %v16042_v27 = vrot.slane %v2791_v22, %v15317_v36  ;;  %v2806_v40 = vrot.slane %v2792_v8, %v15317_v36 }
 0x14c   : > { %v16018_v42 = vpop.permute.xlu1 %2104  ;;  %2534 = vrot.lane.b32.xlu0 %v2476_v43, %s15159_s13  ;;  %v2774_v41 = vrot.slane %v2760_v52, %v15305_v28  ;;  %v2823_v63 = vcombine.high %v16042_v27, %v22854_v12  ;;  %v2824_v39 = vcombine.high %v2806_v40, %v22854_v12 }
 0x14e   : > { %2546 = vrot.lane.b32.xlu1 %v2495_v18, %s15164_s18  ;;  %v16027_v49 = vpop.permute.xlu0 %808  ;;  %v2807_v18 = vcombine.low %v2774_v41, %v2790_v23 }
 0x150   : > { %v16030_v43 = vpop.permute.xlu1 %2112  ;;  %2542 = vrot.lane.b32.xlu0 %v2485_v55, %s15161_s15  ;;  %v2745_v55 = vsel %vm22440_vm10, %v2742_v25, %v2744_v57  ;;  %v2815_v57 = vrot.slane %v2807_v18, %v15317_v36  ;;  %v2808_v25 = vcombine.high %v2774_v41, %v2790_v23  ;;  %vm567_vm10 = vcmask 932864  }
 0x151   : > { %v2827_v61 = vcombine.low %v2735_v62, %v2745_v55  ;;  %v2828_v18 = vcombine.high %v2735_v62, %v2745_v55  ;;  %v558_v55 = vsel %vm557_vm11, %v15868_v21, %v15859_v2 }
 0x152   : > { %2554 = vrot.lane.b32.xlu1 %v2496_v10, %s15165_s19  ;;  %v16039_v53 = vpop.permute.xlu0 %1707  ;;  %v2822_v8 = vrot.slane %v2808_v25, %v15317_v36  ;;  %v2825_v41 = vcombine.high %v2815_v57, %v22854_v12 }
 0x153   : > { %v2835_v52 = vrot.slane %v2827_v61, %v15305_v28 }
 0x154   : > { %v757_v29 = vpop.permute.xlu1 %756  ;;  %2550 = vrot.lane.b32.xlu0 %v2492_v47, %s15163_s17  ;;  %v2851_v47 = vrot.slane %v2843_v6, %v15305_v28 }
 0x155   : > { %v815_v62 = vsel %vm547_vm13, %v15740_v34, %v757_v29 }
 0x156   : > { %2900 = vrot.lane.b32.xlu1 %v2806_v40, %s15151_s29  ;;  %v16050_v24 = vpop.permute.xlu0 %1715  ;;  %v2859_v20 = vcombine.low %v2835_v52, %v2851_v47  ;;  %v2860_v25 = vcombine.high %v2835_v52, %v2851_v47  ;;  %v2842_v47 = vrot.slane %v2828_v18, %v15305_v28  ;;  %s15168_s29 = smov 126  }
 0x158   : > { %v765_v38 = vpop.permute.xlu1 %764  ;;  %2896 = vrot.lane.b32.xlu0 %v2823_v63, %s15152_s30  ;;  %v2844_v63 = vcombine.high %v2740_v32, %v2750_v46  ;;  %v2867_v61 = vrot.slane %v2859_v20, %v15317_v36  ;;  %v2874_v34 = vrot.slane %v2860_v25, %v15317_v36  ;;  %v816_v20 = vsel %vm549_vm14, %v815_v62, %v15958_v13  ;;  %s15185_s30 = smov 106  }
 0x15a   : > { %2908 = vrot.lane.b32.xlu1 %v2815_v57, %s15153_s7  ;;  %v16058_v22 = vpop.permute.xlu0 %1723  ;;  %v2858_v32 = vrot.slane %v2844_v63, %v15305_v28  ;;  %v2826_v57 = vcombine.high %v2822_v8, %v22854_v12  ;;  %v2891_v18 = vcombine.high %v2867_v61, %v22854_v12  ;;  %s15186_s7 = smov 40  }
 0x15c   : > { %v773_v10 = vpop.permute.xlu1 %772  ;;  %2904 = vrot.lane.b32.xlu0 %v2824_v39, %s15154_s8  ;;  %v560_v39 = vsel %vm22446_vm12, %v558_v55, %v15885_v15  ;;  %v2875_v29 = vcombine.low %v2842_v47, %v2858_v32  ;;  %s15169_s8 = smov 125  }
 0x15d   : > { %v820_v40 = vsel %vm557_vm11, %v773_v10, %v15977_v16  ;;  %v562_v63 = vsel %vm561_vm15, %v560_v39, %v15874_v31 }
 0x15e   : > { %2916 = vrot.lane.b32.xlu1 %v2822_v8, %s15155_s9  ;;  %v16065_v23 = vpop.permute.xlu0 %1731  ;;  %v548_v8 = vsel %vm547_vm13, %v15331_v45, %v15840_v60  ;;  %v564_v60 = vsel %vm563_vm0, %v562_v63, %v15900_v51  ;;  %v2883_v31 = vrot.slane %v2875_v29, %v15317_v36  ;;  %v16180_v63 = vld [vmem:[#allocation2 + $0x20] sm:$0xff]  ;;  %s15187_s9 = smov 62  }
 0x15f   : > { %v550_v13 = vsel %vm549_vm14, %v548_v8, %v15835_v56  ;;  %v566_v56 = vsel %vm565_vm3, %v564_v60, %v15891_v19 }
 0x160   : > { %v781_v6 = vpop.permute.xlu1 %780  ;;  %2912 = vrot.lane.b32.xlu0 %v2825_v41, %s15156_s10  ;;  %v568_v19 = vsel %vm567_vm10, %v566_v56, %v15912_v11  ;;  %v2893_v39 = vcombine.high %v2883_v31, %v22854_v12  ;;  %s15179_s10 = smov 14  }
 0x161   : > { %v821_v46 = vsel %vm22446_vm12, %v820_v40, %v781_v6  ;;  %v2876_v6 = vcombine.high %v2842_v47, %v2858_v32  ;;  %v2892_v32 = vcombine.high %v2874_v34, %v22854_v12 }
 0x162   : > { %2924 = vrot.lane.b32.xlu1 %v2867_v61, %s15157_s11  ;;  %v16080_v16 = vpop.permute.xlu0 %1739  ;;  %v822_v2 = vsel %vm561_vm15, %v821_v46, %v15992_v30  ;;  %v817_v30 = vsel %vm551_vm1, %v816_v20, %v765_v38  ;;  %v552_v61 = vsel %vm551_vm1, %v550_v13, %v15855_v35  ;;  %v14760_v35 = vld [vmem:[%s22411_s1 + $0x8] sm:$0xff]  ;;  %v16174_v20 = vld [vmem:[#allocation2 + $0x38] sm:$0xff] }
 0x163   : > { %v818_v51 = vsel %vm553_vm2, %v817_v30, %v15968_v1  ;;  %v554_v1 = vsel %vm553_vm2, %v552_v61, %v15850_v3  ;;  %v2890_v62 = vrot.slane %v2876_v6, %v15317_v36  ;;  %v570_v3 = vsel %vm569_vm7, %v15912_v11, %v15903_v37 }
 0x164   : > { %v789_v52 = vpop.permute.xlu1 %788  ;;  %2920 = vrot.lane.b32.xlu0 %v2826_v57, %s15158_s12  ;;  %v556_v57 = vsel %vm22445_vm9, %v554_v1, %v15868_v21  ;;  %s15170_s12 = smov 124  }
 0x165   : > { %v823_v15 = vsel %vm563_vm0, %v822_v2, %v789_v52  ;;  %v572_v52 = vsel %vm571_vm4, %v570_v3, %v15926_v33  ;;  %v2894_v29 = vcombine.high %v2890_v62, %v22854_v12 }
 0x166   : > { %2932 = vrot.lane.b32.xlu1 %v2874_v34, %s15159_s13  ;;  %v16100_v41 = vpop.permute.xlu0 %1747  ;;  %v824_v38 = vsel %vm565_vm3, %v823_v15, %v16006_v48  ;;  %v819_v48 = vsel %vm22445_vm9, %v818_v51, %v773_v10  ;;  %vm575_vm9 = vcmask 605184   ;;  %v574_v2 = vsel %vm573_vm5, %v572_v52, %v15916_v44  ;;  %v16156_v34 = vld [vmem:[#allocation2 + $0x8] sm:$0xff]  ;;  %s15180_s13 = smov 120  }
 0x167   : > { %v576_v8 = vsel %vm575_vm9, %v574_v2, %v15945_v7 }
 0x168   : > { %v797_v40 = vpop.permute.xlu1 %796  ;;  %2928 = vrot.lane.b32.xlu0 %v2891_v18, %s15160_s14  ;;  %v16186_v18 = vld [vmem:[#allocation2] sm:$0xff]  ;;  %s15181_s14 = smov 98  }
 0x169   : > { %v825_v25 = vsel %vm567_vm10, %v824_v38, %v797_v40  ;;  %v826_v55 = vsel %vm569_vm7, %v797_v40, %v16015_v26  ;;  %v16194_v38 = vld [vmem:[#allocation2 + $0x50] sm:$0xff] }
 0x16a   : > { %2940 = vrot.lane.b32.xlu1 %v2883_v31, %s15161_s15  ;;  %14761 = vmatprep.subr.msk.mxu0 %vm835_vm6, %v825_v25  ;;  %v16120_v46 = vpop.permute.xlu0 %1755  ;;  %s15171_s15 = smov 123  }
 0x16b   : > { %14762 = vmatpush1.msk.msra.mxu0 %vm835_vm6, %v819_v48 }
 0x16c   : > { %v805_v10 = vpop.permute.xlu1 %804  ;;  %2936 = vrot.lane.b32.xlu0 %v2892_v32, %s15162_s16  ;;  %14766 = vmatprep.subr.msk.mxu0 %vm835_vm6, %v568_v19  ;;  %v16212_v32 = vld [vmem:[#allocation2 + $0x18] sm:$0xff]  ;;  %v16221_v19 = vld [vmem:[#allocation2 + $0x10] sm:$0x3f]  ;;  %s15182_s16 = smov 76  }
 0x16d   : > { %v827_v47 = vsel %vm571_vm4, %v826_v55, %v805_v10  ;;  %14763 = vmatmul.mubr.msk.f32.vlgmr.msra.gmra.mrb[0].mxu0 %vm557_vm11, %v14760_v35  ;;  %v14771_v10 = vld [vmem:[%s22411_s1 + $0x10] sm:$0xff] }
 0x16e   : > { %14767 = vmatpush1.msk.msra.mxu0 %vm835_vm6, %v556_v57  ;;  %2948 = vrot.lane.b32.xlu1 %v2890_v62, %s15163_s17  ;;  %v1306_v26 = vpop.permute.xlu0 %1305  ;;  %v828_v37 = vsel %vm573_vm5, %v827_v47, %v16027_v49  ;;  %v577_v49 = vld [vmem:[%s22411_s1] sm:$0xff]  ;;  %v16234_v57 = vld [vmem:[#allocation2 + $0x48] sm:$0xff]  ;;  %s15183_s17 = smov 54  }
 0x16f   : > { %1062 = vmatprep.mubr.f32.mxu0 %v22854_v12  ;;  %v1364_v40 = vsel %vm547_vm13, %v15789_v4, %v1306_v26 }
 0x170   : > { %v813_v21 = vpop.permute.xlu1 %812  ;;  %2944 = vrot.lane.b32.xlu0 %v2893_v39, %s15164_s18  ;;  %v1365_v4 = vsel %vm549_vm14, %v1364_v40, %v15930_v5  ;;  %s15172_s18 = smov 122  }
 0x171   : > { %v829_v11 = vsel %vm575_vm9, %v828_v37, %v813_v21  ;;  %v16255_v37 = vld [vmem:[#allocation2 + $0x28] sm:$0x3f] }
 0x172   : > { %7160 = vrot.lane.b32.xlu1 %v16156_v34, %s15167_s24  ;;  %14933 = vmatpush3.msk.msra.mxu1 %vm835_vm6, %v829_v11  ;;  %v1314_v33 = vpop.permute.xlu0 %1313 }
 0x173   : > { %14937 = vmatprep.subr.mxu1 %v22854_v12  ;;  %14935 = vmatmul.mubr.msk.f32.vlgmr.msra.gmra.mrb[0].mxu1 %vm557_vm11, %v14760_v35  ;;  %v1366_v51 = vsel %vm551_vm1, %v1365_v4, %v1314_v33 }
 0x174   : > { %v1704_v44 = vpop.permute.xlu1 %1703  ;;  %2952 = vrot.lane.b32.xlu0 %v2894_v29, %s15165_s19  ;;  %14938 = vmatpush3.msk.msra.mxu1 %vm835_vm6, %v576_v8  ;;  %v1367_v1 = vsel %vm553_vm2, %v1366_v51, %v15950_v50  ;;  %s15173_s19 = smov 16  }
 0x175   : > { %14768 = vmatmul.mubr.msk.f32.vlgmr.msra.gmra.mrb[0].mxu0 %vm557_vm11, %v577_v49  ;;  %14939 = vmatprep.mubr.msk.f32.mxu1 %vm15166_vm8, %v22854_v12 }
 0x176   : > { %7172 = vrot.lane.b32.xlu1 %v16174_v20, %s15167_s24  ;;  %v1322_v7 = vpop.permute.xlu0 %1321  ;;  %1457 = vmatprep.mubr.f32.mxu0 %v22854_v12 }
 0x177   : > { %14942 = vmatprep.subr.mxu1 %v22854_v12  ;;  %v1369_v30 = vsel %vm557_vm11, %v1322_v7, %v15961_v58  ;;  %v16200_v58 = vld [vmem:[#allocation2 + $0x30] sm:$0xff] }
 0x178   : > { %v1712_v15 = vpop.permute.xlu1 %1711  ;;  %7166 = vrot.lane.b32.xlu0 %v16180_v63, %s15167_s24 }
 0x17a   : > { %7158 = vrot.lane.b32.xlu1 %v16186_v18, %s15167_s24  ;;  %v1330_v60 = vpop.permute.xlu0 %1329 }
 0x17b   : > { %v1370_v13 = vsel %vm22446_vm12, %v1369_v30, %v1330_v60  ;;  %14940 = vmatmul.mubr.msk.f32.vlgmr.msra.gmra.mrb[0].mxu1 %vm557_vm11, %v577_v49 }
 0x17c   : > { %v1720_v31 = vpop.permute.xlu1 %1719  ;;  %7178 = vrot.lane.b32.xlu0 %v16194_v38, %s15167_s24  ;;  %14944 = vmatprep.mubr.msk.f32.mxu1 %vm15166_vm8, %v22854_v12  ;;  %v1371_v6 = vsel %vm561_vm15, %v1370_v13, %v15971_v14  ;;  %v1762_v14 = vsel %vm547_vm13, %v15804_v9, %v1704_v44  ;;  %v16275_v44 = vld [vmem:[#allocation2 + $0x58] sm:$0x3f] }
 0x17d   : > { %v1767_v56 = vsel %vm557_vm11, %v1720_v31, %v16058_v22  ;;  %v1763_v50 = vsel %vm549_vm14, %v1762_v14, %v16039_v53 }
 0x17e   : > { %7170 = vrot.lane.b32.xlu1 %v16200_v58, %s15167_s24  ;;  %v1338_v61 = vpop.permute.xlu0 %1337  ;;  %v1764_v3 = vsel %vm551_vm1, %v1763_v50, %v1712_v15 }
 0x17f   : > { %v1372_v25 = vsel %vm563_vm0, %v1371_v6, %v1338_v61 }
 0x180   : > { %v1728_v48 = vpop.permute.xlu1 %1727  ;;  %7164 = vrot.lane.b32.xlu0 %v16212_v32, %s15167_s24  ;;  %v1373_v5 = vsel %vm565_vm3, %v1372_v25, %v15983_v17 }
 0x181   : > { %v1768_v35 = vsel %vm22446_vm12, %v1767_v56, %v1728_v48  ;;  %vm22862_vm12 = vcmask 900096  }
 0x182   : > { %7162 = vrot.lane.b32.xlu1 %v16221_v19, %s15167_s24  ;;  %v1346_v22 = vpop.permute.xlu0 %1345  ;;  %v1368_v9 = vsel %vm22862_vm12, %v1367_v1, %v1322_v7  ;;  %v1769_v17 = vsel %vm561_vm15, %v1768_v35, %v16065_v23  ;;  %v16246_v23 = vld [vmem:[#allocation2 + $0x40] sm:$0x3f] }
 0x183   : > { %v1374_v55 = vsel %vm567_vm10, %v1373_v5, %v1346_v22  ;;  %v1375_v26 = vsel %vm569_vm7, %v1346_v22, %v15998_v59  ;;  %v1765_v59 = vsel %vm553_vm2, %v1764_v3, %v16050_v24  ;;  %v14777_v24 = vld [vmem:[%s22411_s1 + $0x18] sm:$0xff] }
 0x184   : > { %v1736_v62 = vpop.permute.xlu1 %1735  ;;  %7176 = vrot.lane.b32.xlu0 %v16234_v57, %s15167_s24  ;;  %14772 = vmatprep.subr.msk.mxu0 %vm835_vm6, %v1374_v55  ;;  %v1766_v2 = vsel %vm22862_vm12, %v1765_v59, %v1720_v31  ;;  %vm22863_vm12 = vcmask 211968   ;;  %v14783_v55 = vld [vmem:[%s22411_s1 + $0x20] sm:$0xff] }
 0x185   : > { %v1770_v47 = vsel %vm563_vm0, %v1769_v17, %v1736_v62  ;;  %14773 = vmatpush1.msk.msra.mxu0 %vm835_vm6, %v1368_v9 }
 0x186   : > { %7174 = vrot.lane.b32.xlu1 %v16246_v23, %s15167_s24  ;;  %v1354_v39 = vpop.permute.xlu0 %1353  ;;  %14774 = vmatmul.mubr.msk.f32.vlgmr.msra.gmra.mrb[0].mxu0 %vm557_vm11, %v14771_v10  ;;  %v1771_v53 = vsel %vm565_vm3, %v1770_v47, %v16080_v16 }
 0x187   : > { %v1376_v52 = vsel %vm571_vm4, %v1375_v26, %v1354_v39  ;;  %1855 = vmatprep.mubr.f32.mxu0 %v22854_v12 }
 0x188   : > { %v1744_v21 = vpop.permute.xlu1 %1743  ;;  %7168 = vrot.lane.b32.xlu0 %v16255_v37, %s15167_s24  ;;  %v1377_v16 = vsel %vm573_vm5, %v1376_v52, %v16009_v0 }
 0x189   : > { %v1772_v11 = vsel %vm567_vm10, %v1771_v53, %v1744_v21  ;;  %v1773_v49 = vsel %vm569_vm7, %v1744_v21, %v16100_v41 }
 0x18a   : > { %7794 = vrot.lane.b32.xlu1 %v16156_v34, %s15168_s29  ;;  %14778 = vmatprep.subr.msk.mxu0 %vm835_vm6, %v1772_v11  ;;  %v1362_v33 = vpop.permute.xlu0 %1361 }
 0x18b   : > { %v1378_v29 = vsel %vm575_vm9, %v1377_v16, %v1362_v33  ;;  %14779 = vmatpush1.msk.msra.mxu0 %vm835_vm6, %v1766_v2  ;;  %v22865_v33 = vld [vmem:[#allocation18_spill] sm:$0xff] }
 0x18c   : > { %v1752_v8 = vpop.permute.xlu1 %1751  ;;  %7180 = vrot.lane.b32.xlu0 %v16275_v44, %s15167_s24  ;;  %14943 = vmatpush3.msk.msra.mxu1 %vm835_vm6, %v1378_v29 }
 0x18d   : > { %v1774_v0 = vsel %vm571_vm4, %v1773_v49, %v1752_v8  ;;  %14947 = vmatprep.subr.mxu1 %v22854_v12  ;;  %14945 = vmatmul.mubr.msk.f32.vlgmr.msra.gmra.mrb[0].mxu1 %vm557_vm11, %v14771_v10 }
 0x18e   : > { %7806 = vrot.lane.b32.xlu1 %v16174_v20, %s15168_s29  ;;  %v2101_v7 = vpop.permute.xlu0 %2100  ;;  %14780 = vmatmul.mubr.msk.f32.vlgmr.msra.gmra.mrb[0].mxu0 %vm557_vm11, %v14777_v24  ;;  %v1775_v15 = vsel %vm573_vm5, %v1774_v0, %v16120_v46 }
 0x18f   : > { %14949 = vmatprep.mubr.msk.f32.mxu1 %vm15166_vm8, %v22854_v12  ;;  %2252 = vmatprep.mubr.f32.mxu0 %v22854_v12  ;;  %v2159_v4 = vsel %vm547_vm13, %v15848_v54, %v2101_v7 }
 0x190   : > { %v1760_v41 = vpop.permute.xlu1 %1759  ;;  %7800 = vrot.lane.b32.xlu0 %v16180_v63, %s15168_s29  ;;  %v2160_v48 = vsel %vm549_vm14, %v2159_v4, %v16018_v42 }
 0x191   : > { %v1776_v30 = vsel %vm575_vm9, %v1775_v15, %v1760_v41 }
 0x192   : > { %7792 = vrot.lane.b32.xlu1 %v16186_v18, %s15168_s29  ;;  %14948 = vmatpush3.msk.msra.mxu1 %vm835_vm6, %v1776_v30  ;;  %v2109_v60 = vpop.permute.xlu0 %2108 }
 0x193   : > { %14952 = vmatprep.subr.mxu1 %v22854_v12  ;;  %v2161_v14 = vsel %vm551_vm1, %v2160_v48, %v2109_v60 }
 0x194   : > { %v2121_v13 = vpop.permute.xlu1 %2120  ;;  %7812 = vrot.lane.b32.xlu0 %v16194_v38, %s15168_s29  ;;  %v2162_v1 = vsel %vm553_vm2, %v2161_v14, %v16030_v43 }
 0x195   : > { %14950 = vmatmul.mubr.msk.f32.vlgmr.msra.gmra.mrb[0].mxu1 %vm557_vm11, %v14777_v24 }
 0x196   : > { %7804 = vrot.lane.b32.xlu1 %v16200_v58, %s15168_s29  ;;  %v2117_v46 = vpop.permute.xlu0 %2116  ;;  %14954 = vmatprep.mubr.msk.f32.mxu1 %vm15166_vm8, %v22854_v12 }
 0x197   : > { %v2164_v31 = vsel %vm557_vm11, %v2117_v46, %v2121_v13 }
 0x198   : > { %v2129_v40 = vpop.permute.xlu1 %2128  ;;  %7798 = vrot.lane.b32.xlu0 %v16212_v32, %s15168_s29 }
 0x19a   : > { %7796 = vrot.lane.b32.xlu1 %v16221_v19, %s15168_s29  ;;  %v2125_v6 = vpop.permute.xlu0 %2124 }
 0x19b   : > { %v2165_v61 = vsel %vm22863_vm12, %v2164_v31, %v2125_v6  ;;  %vm22864_vm12 = vcmask 900096   ;;  %v14789_v31 = vld [vmem:[%s22411_s1 + $0x28] sm:$0xff] }
 0x19c   : > { %v2137_v25 = vpop.permute.xlu1 %2136  ;;  %7810 = vrot.lane.b32.xlu0 %v16234_v57, %s15168_s29  ;;  %v2166_v51 = vsel %vm561_vm15, %v2165_v61, %v2129_v40  ;;  %v2163_v10 = vsel %vm22864_vm12, %v2162_v1, %v2117_v46  ;;  %vm22866_vm12 = vcmask 211968  }
 0x19e   : > { %7808 = vrot.lane.b32.xlu1 %v16246_v23, %s15168_s29  ;;  %v2133_v56 = vpop.permute.xlu0 %2132 }
 0x19f   : > { %v2167_v35 = vsel %vm563_vm0, %v2166_v51, %v2133_v56 }
 0x1a0   : > { %v2145_v5 = vpop.permute.xlu1 %2144  ;;  %7802 = vrot.lane.b32.xlu0 %v16255_v37, %s15168_s29  ;;  %v2168_v54 = vsel %vm565_vm3, %v2167_v35, %v2137_v25 }
 0x1a2   : > { %8278 = vrot.lane.b32.xlu1 %v16156_v34, %s15169_s8  ;;  %v2141_v22 = vpop.permute.xlu0 %2140 }
 0x1a3   : > { %v2169_v42 = vsel %vm567_vm10, %v2168_v54, %v2141_v22  ;;  %v2170_v62 = vsel %vm569_vm7, %v2141_v22, %v2145_v5 }
 0x1a4   : > { %v2153_v9 = vpop.permute.xlu1 %2152  ;;  %7814 = vrot.lane.b32.xlu0 %v16275_v44, %s15168_s29  ;;  %14784 = vmatprep.subr.msk.mxu0 %vm835_vm6, %v2169_v42 }
 0x1a5   : > { %14785 = vmatpush1.msk.msra.mxu0 %vm835_vm6, %v2163_v10 }
 0x1a6   : > { %8290 = vrot.lane.b32.xlu1 %v16174_v20, %s15169_s8  ;;  %v2149_v43 = vpop.permute.xlu0 %2148  ;;  %14786 = vmatmul.mubr.msk.f32.vlgmr.msra.gmra.mrb[0].mxu0 %vm557_vm11, %v14783_v55 }
 0x1a7   : > { %v2171_v17 = vsel %vm571_vm4, %v2170_v62, %v2149_v43  ;;  %2650 = vmatprep.mubr.f32.mxu0 %v22854_v12 }
 0x1a8   : > { %v2499_v50 = vpop.permute.xlu1 %2498  ;;  %8284 = vrot.lane.b32.xlu0 %v16180_v63, %s15169_s8  ;;  %v2172_v47 = vsel %vm573_vm5, %v2171_v17, %v2153_v9 }
 0x1a9   : > { %v2557_v29 = vsel %vm547_vm13, %v22865_v33, %v2499_v50 }
 0x1aa   : > { %8276 = vrot.lane.b32.xlu1 %v16186_v18, %s15169_s8  ;;  %v2157_v3 = vpop.permute.xlu0 %2156 }
 0x1ab   : > { %v2173_v26 = vsel %vm575_vm9, %v2172_v47, %v2157_v3 }
 0x1ac   : > { %v2507_v39 = vpop.permute.xlu1 %2506  ;;  %8296 = vrot.lane.b32.xlu0 %v16194_v38, %s15169_s8  ;;  %14953 = vmatpush3.msk.msra.mxu1 %vm835_vm6, %v2173_v26 }
 0x1ad   : > { %14957 = vmatprep.subr.mxu1 %v22854_v12  ;;  %14955 = vmatmul.mubr.msk.f32.vlgmr.msra.gmra.mrb[0].mxu1 %vm557_vm11, %v14783_v55 }
 0x1ae   : > { %8288 = vrot.lane.b32.xlu1 %v16200_v58, %s15169_s8  ;;  %v2503_v52 = vpop.permute.xlu0 %2502  ;;  %14959 = vmatprep.mubr.msk.f32.mxu1 %vm15166_vm8, %v22854_v12 }
 0x1af   : > { %v2558_v24 = vsel %vm549_vm14, %v2557_v29, %v2503_v52 }
 0x1b0   : > { %v2515_v53 = vpop.permute.xlu1 %2514  ;;  %8282 = vrot.lane.b32.xlu0 %v16212_v32, %s15169_s8  ;;  %v2559_v41 = vsel %vm551_vm1, %v2558_v24, %v2507_v39 }
 0x1b2   : > { %8280 = vrot.lane.b32.xlu1 %v16221_v19, %s15169_s8  ;;  %v2511_v21 = vpop.permute.xlu0 %2510 }
 0x1b3   : > { %v2560_v15 = vsel %vm553_vm2, %v2559_v41, %v2511_v21 }
 0x1b4   : > { %v2523_v59 = vpop.permute.xlu1 %2522  ;;  %8294 = vrot.lane.b32.xlu0 %v16234_v57, %s15169_s8 }
 0x1b6   : > { %8292 = vrot.lane.b32.xlu1 %v16246_v23, %s15169_s8  ;;  %v2519_v11 = vpop.permute.xlu0 %2518 }
 0x1b7   : > { %v2562_v2 = vsel %vm557_vm11, %v2515_v53, %v2519_v11  ;;  %v14795_v11 = vld [vmem:[%s22411_s1 + $0x30] sm:$0xff] }
 0x1b8   : > { %v2531_v16 = vpop.permute.xlu1 %2530  ;;  %8286 = vrot.lane.b32.xlu0 %v16255_v37, %s15169_s8  ;;  %v2563_v49 = vsel %vm22866_vm12, %v2562_v2, %v2523_v59  ;;  %vm22867_vm12 = vcmask 900096  }
 0x1b9   : > { %v2561_v6 = vsel %vm22867_vm12, %v2560_v15, %v2515_v53  ;;  %vm22868_vm12 = vcmask 211968  }
 0x1ba   : > { %8762 = vrot.lane.b32.xlu1 %v16156_v34, %s15170_s12  ;;  %v2527_v8 = vpop.permute.xlu0 %2526 }
 0x1bb   : > { %v2564_v0 = vsel %vm561_vm15, %v2563_v49, %v2527_v8 }
 0x1bc   : > { %v2539_v7 = vpop.permute.xlu1 %2538  ;;  %8298 = vrot.lane.b32.xlu0 %v16275_v44, %s15169_s8  ;;  %v2565_v30 = vsel %vm563_vm0, %v2564_v0, %v2531_v16 }
 0x1be   : > { %8774 = vrot.lane.b32.xlu1 %v16174_v20, %s15170_s12  ;;  %v2535_v60 = vpop.permute.xlu0 %2534 }
 0x1bf   : > { %v2566_v13 = vsel %vm565_vm3, %v2565_v30, %v2535_v60 }
 0x1c0   : > { %v2547_v46 = vpop.permute.xlu1 %2546  ;;  %8768 = vrot.lane.b32.xlu0 %v16180_v63, %s15170_s12  ;;  %v2567_v40 = vsel %vm567_vm10, %v2566_v13, %v2539_v7 }
 0x1c1   : > { %14790 = vmatprep.subr.msk.mxu0 %vm835_vm6, %v2567_v40 }
 0x1c2   : > { %8760 = vrot.lane.b32.xlu1 %v16186_v18, %s15170_s12  ;;  %14791 = vmatpush1.msk.msra.mxu0 %vm835_vm6, %v2561_v6  ;;  %v2543_v61 = vpop.permute.xlu0 %2542 }
 0x1c3   : > { %v2568_v4 = vsel %vm569_vm7, %v2539_v7, %v2543_v61  ;;  %14792 = vmatmul.mubr.msk.f32.vlgmr.msra.gmra.mrb[0].mxu0 %vm557_vm11, %v14789_v31 }
 0x1c4   : > { %v2555_v25 = vpop.permute.xlu1 %2554  ;;  %8780 = vrot.lane.b32.xlu0 %v16194_v38, %s15170_s12  ;;  %3048 = vmatprep.mubr.f32.mxu0 %v22854_v12  ;;  %v2569_v51 = vsel %vm571_vm4, %v2568_v4, %v2547_v46 }
 0x1c6   : > { %8772 = vrot.lane.b32.xlu1 %v16200_v58, %s15170_s12  ;;  %v2551_v56 = vpop.permute.xlu0 %2550 }
 0x1c7   : > { %v2570_v48 = vsel %vm573_vm5, %v2569_v51, %v2551_v56 }
 0x1c8   : > { %v2571_v35 = vsel %vm575_vm9, %v2570_v48, %v2555_v25  ;;  %v2901_v14 = vpop.permute.xlu1 %2900  ;;  %8766 = vrot.lane.b32.xlu0 %v16212_v32, %s15170_s12 }
 0x1c9   : > { %14958 = vmatpush3.msk.msra.mxu1 %vm835_vm6, %v2571_v35 }
 0x1ca   : > { %8764 = vrot.lane.b32.xlu1 %v16221_v19, %s15170_s12  ;;  %v2897_v5 = vpop.permute.xlu0 %2896  ;;  %14960 = vmatmul.mubr.msk.f32.vlgmr.msra.gmra.mrb[0].mxu1 %vm557_vm11, %v14789_v31 }
 0x1cb   : > { %14962 = vmatprep.subr.mxu1 %v22854_v12  ;;  %14964 = vmatprep.mubr.msk.f32.mxu1 %vm15166_vm8, %v22854_v12  ;;  %v2955_v43 = vsel %vm547_vm13, %v16042_v27, %v2897_v5  ;;  %vm22869_vm13 = vcmask 900096  }
 0x1cc   : > { %v2909_v54 = vpop.permute.xlu1 %2908  ;;  %8778 = vrot.lane.b32.xlu0 %v16234_v57, %s15170_s12  ;;  %v2956_v3 = vsel %vm549_vm14, %v2955_v43, %v2901_v14  ;;  %vm3793_vm14 = vcmask 785408  }
 0x1ce   : > { %8776 = vrot.lane.b32.xlu1 %v16246_v23, %s15170_s12  ;;  %v2905_v22 = vpop.permute.xlu0 %2904 }
 0x1cf   : > { %v2957_v39 = vsel %vm551_vm1, %v2956_v3, %v2905_v22  ;;  %vm3146_vm1 = vcmask 146432  }
 0x1d0   : > { %v2917_v1 = vpop.permute.xlu1 %2916  ;;  %8770 = vrot.lane.b32.xlu0 %v16255_v37, %s15170_s12  ;;  %v2958_v21 = vsel %vm553_vm2, %v2957_v39, %v2909_v54  ;;  %vm3169_vm2 = vcmask 113664  }
 0x1d2   : > { %9246 = vrot.lane.b32.xlu1 %v16156_v34, %s15171_s15  ;;  %v2913_v42 = vpop.permute.xlu0 %2912 }
 0x1d3   : > { %v2960_v10 = vsel %vm557_vm11, %v2913_v42, %v2917_v1  ;;  %v2959_v2 = vsel %vm22869_vm13, %v2958_v21, %v2913_v42 }
 0x1d4   : > { %v2925_v55 = vpop.permute.xlu1 %2924  ;;  %8782 = vrot.lane.b32.xlu0 %v16275_v44, %s15170_s12 }
 0x1d6   : > { %9258 = vrot.lane.b32.xlu1 %v16174_v20, %s15171_s15  ;;  %v2921_v9 = vpop.permute.xlu0 %2920 }
 0x1d7   : > { %v2961_v62 = vsel %vm22868_vm12, %v2960_v10, %v2921_v9 }
 0x1d8   : > { %v2933_v17 = vpop.permute.xlu1 %2932  ;;  %9252 = vrot.lane.b32.xlu0 %v16180_v63, %s15171_s15  ;;  %v2962_v50 = vsel %vm561_vm15, %v2961_v62, %v2925_v55 }
 0x1da   : > { %9244 = vrot.lane.b32.xlu1 %v16186_v18, %s15171_s15  ;;  %v2929_v47 = vpop.permute.xlu0 %2928 }
 0x1db   : > { %v2963_v26 = vsel %vm563_vm0, %v2962_v50, %v2929_v47  ;;  %vm3795_vm0 = vcmask 916480  }
 0x1dc   : > { %v2941_v52 = vpop.permute.xlu1 %2940  ;;  %9264 = vrot.lane.b32.xlu0 %v16194_v38, %s15171_s15  ;;  %v2964_v27 = vsel %vm565_vm3, %v2963_v26, %v2933_v17 }
 0x1de   : > { %9256 = vrot.lane.b32.xlu1 %v16200_v58, %s15171_s15  ;;  %v2937_v53 = vpop.permute.xlu0 %2936 }
 0x1df   : > { %v2965_v59 = vsel %vm567_vm10, %v2964_v27, %v2937_v53  ;;  %v2966_v33 = vsel %vm569_vm7, %v2937_v53, %v2941_v52  ;;  %vm3791_vm10 = vcmask 654336  }
 0x1e0   : > { %v2949_v16 = vpop.permute.xlu1 %2948  ;;  %9250 = vrot.lane.b32.xlu0 %v16212_v32, %s15171_s15  ;;  %14796 = vmatprep.subr.msk.mxu0 %vm835_vm6, %v2965_v59 }
 0x1e1   : > { %14797 = vmatpush1.msk.msra.mxu0 %vm835_vm6, %v2959_v2 }
 0x1e2   : > { %9248 = vrot.lane.b32.xlu1 %v16221_v19, %s15171_s15  ;;  %14798 = vmatmul.mubr.msk.f32.vlgmr.msra.gmra.mrb[0].mxu0 %vm557_vm11, %v14795_v11  ;;  %v2945_v29 = vpop.permute.xlu0 %2944 }
 0x1e3   : > { %v2967_v24 = vsel %vm571_vm4, %v2966_v33, %v2945_v29  ;;  %4280 = vmatprep.mubr.f32.mxu0 %v22854_v12  ;;  %vm3784_vm4 = vcmask 130048  }
 0x1e4   : > { %v7161_v49 = vpop.permute.xlu1 %7160  ;;  %9262 = vrot.lane.b32.xlu0 %v16234_v57, %s15171_s15  ;;  %v2968_v8 = vsel %vm573_vm5, %v2967_v24, %v2949_v16  ;;  %vm3786_vm5 = vcmask 261120  }
 0x1e6   : > { %9260 = vrot.lane.b32.xlu1 %v16246_v23, %s15171_s15  ;;  %v2953_v0 = vpop.permute.xlu0 %2952 }
 0x1e7   : > { %v2969_v7 = vsel %vm575_vm9, %v2968_v8, %v2953_v0  ;;  %vm3789_vm9 = vcmask 523264  }
 0x1e8   : > { %v7173_v41 = vpop.permute.xlu1 %7172  ;;  %9254 = vrot.lane.b32.xlu0 %v16255_v37, %s15171_s15  ;;  %14963 = vmatpush3.msk.msra.mxu1 %vm835_vm6, %v2969_v7 }
 0x1e9   : > { %14965 = vmatmul.mubr.msk.f32.vlgmr.msra.gmra.mrb[0].mxu1 %vm557_vm11, %v14795_v11  ;;  %v7262_v40 = vcombine.low %v7161_v49, %v7173_v41 }
 0x1ea   : > { %9730 = vrot.lane.b32.xlu1 %v16156_v34, %s15172_s18  ;;  %v7167_v15 = vpop.permute.xlu0 %7166  ;;  %7562 = vmatprep.mubr.f32.mxu1 %v22854_v12 }
 0x1ec   : > { %v7159_v30 = vpop.permute.xlu1 %7158  ;;  %9266 = vrot.lane.b32.xlu0 %v16275_v44, %s15171_s15 }
 0x1ee   : > { %9742 = vrot.lane.b32.xlu1 %v16174_v20, %s15172_s18  ;;  %v7179_v60 = vpop.permute.xlu0 %7178  ;;  %v7270_v20 = vrot.slane %v7262_v40, %v15305_v28 }
 0x1ef   : > { %v7278_v13 = vcombine.low %v7167_v15, %v7179_v60  ;;  %v7279_v14 = vcombine.high %v7167_v15, %v7179_v60 }
 0x1f0   : > { %v7171_v46 = vpop.permute.xlu1 %7170  ;;  %9736 = vrot.lane.b32.xlu0 %v16180_v63, %s15172_s18 }
 0x1f1   : > { %v7286_v31 = vrot.slane %v7278_v13, %v15305_v28  ;;  %v7194_v25 = vcombine.low %v7159_v30, %v7171_v46  ;;  %v7293_v55 = vrot.slane %v7279_v14, %v15305_v28  ;;  %v7195_v26 = vcombine.high %v7159_v30, %v7171_v46 }
 0x1f2   : > { %9728 = vrot.lane.b32.xlu1 %v16186_v18, %s15172_s18  ;;  %v7165_v34 = vpop.permute.xlu0 %7164 }
 0x1f3   : > { %v7294_v63 = vcombine.low %v7270_v20, %v7286_v31  ;;  %v7202_v56 = vrot.slane %v7194_v25, %v15305_v28  ;;  %v7295_v5 = vcombine.high %v7270_v20, %v7286_v31  ;;  %v7209_v59 = vrot.slane %v7195_v26, %v15305_v28 }
 0x1f4   : > { %v16482_v6 = vpop.permute.xlu1 %7162  ;;  %9748 = vrot.lane.b32.xlu0 %v16194_v38, %s15172_s18 }
 0x1f5   : > { %v7309_v9 = vrot.slane %v7295_v5, %v15317_v36 }
 0x1f6   : > { %9740 = vrot.lane.b32.xlu1 %v16200_v58, %s15172_s18  ;;  %v7177_v61 = vpop.permute.xlu0 %7176  ;;  %v16504_v58 = vrot.slane %v7294_v63, %v15317_v36 }
 0x1f7   : > { %v7210_v4 = vcombine.low %v7165_v34, %v7177_v61  ;;  %v7211_v43 = vcombine.high %v7165_v34, %v7177_v61  ;;  %v7327_v52 = vcombine.high %v7309_v9, %v22854_v12 }
 0x1f8   : > { %v16489_v51 = vpop.permute.xlu1 %7174  ;;  %9734 = vrot.lane.b32.xlu0 %v16212_v32, %s15172_s18  ;;  %v7326_v22 = vcombine.high %v16504_v58, %v22854_v12 }
 0x1f9   : > { %v7218_v18 = vrot.slane %v7210_v4, %v15305_v28  ;;  %v7225_v27 = vrot.slane %v7211_v43, %v15305_v28  ;;  %v7330_v29 = vcombine.low %v16482_v6, %v16489_v51 }
 0x1fa   : > { %9732 = vrot.lane.b32.xlu1 %v16221_v19, %s15172_s18  ;;  %v16496_v38 = vpop.permute.xlu0 %7168 }
 0x1fb   : > { %v7226_v35 = vcombine.low %v7202_v56, %v7218_v18  ;;  %v7227_v17 = vcombine.high %v7202_v56, %v7218_v18  ;;  %v7242_v33 = vcombine.low %v7209_v59, %v7225_v27  ;;  %v7338_v15 = vrot.slane %v7330_v29, %v15305_v28 }
 0x1fc   : > { %v16499_v48 = vpop.permute.xlu1 %7794  ;;  %9746 = vrot.lane.b32.xlu0 %v16234_v57, %s15172_s18  ;;  %v7263_v57 = vcombine.high %v7161_v49, %v7173_v41  ;;  %v7243_v34 = vcombine.high %v7209_v59, %v7225_v27  ;;  %v22873_v27 = vld [vmem:[#allocation3_spill] sm:$0xff] }
 0x1fd   : > { %v16520_v42 = vrot.slane %v7226_v35, %v15317_v36  ;;  %v7241_v21 = vrot.slane %v7227_v17, %v15317_v36  ;;  %v7250_v60 = vrot.slane %v7242_v33, %v15317_v36 }
 0x1fe   : > { %9744 = vrot.lane.b32.xlu1 %v16246_v23, %s15172_s18  ;;  %v16508_v32 = vpop.permute.xlu0 %7180  ;;  %v7277_v62 = vrot.slane %v7263_v57, %v15305_v28  ;;  %v7257_v18 = vrot.slane %v7243_v34, %v15317_v36  ;;  %v7033_v34 = vcombine.low %v16255_v37, %v16275_v44 }
 0x1ff   : > { %v7258_v47 = vcombine.high %v16520_v42, %v22854_v12  ;;  %v7346_v11 = vcombine.low %v16496_v38, %v16508_v32  ;;  %v7259_v49 = vcombine.high %v7241_v21, %v22854_v12  ;;  %v7260_v20 = vcombine.high %v7250_v60, %v22854_v12 }
 0x200   : > { %v16510_v54 = vpop.permute.xlu1 %7806  ;;  %9738 = vrot.lane.b32.xlu0 %v16255_v37, %s15172_s18  ;;  %v7310_v3 = vcombine.low %v7277_v62, %v7293_v55  ;;  %v7311_v8 = vcombine.high %v7277_v62, %v7293_v55  ;;  %v7347_v57 = vcombine.high %v16496_v38, %v16508_v32  ;;  %v7331_v62 = vcombine.high %v16482_v6, %v16489_v51  ;;  %v22871_v32 = vld [vmem:[#allocation11_spill] sm:$0xff]  ;;  %v22872_v51 = vld [vmem:[#allocation4_spill] sm:$0xff] }
 0x201   : > { %v7354_v0 = vrot.slane %v7346_v11, %v15305_v28 }
 0x202   : > { %7418 = vrot.lane.b32.xlu1 %v7326_v22, %s15173_s19  ;;  %v16517_v1 = vpop.permute.xlu0 %7800  ;;  %v7318_v16 = vrot.slane %v7310_v3, %v15317_v36  ;;  %v7325_v40 = vrot.slane %v7311_v8, %v15317_v36  ;;  %v7261_v22 = vcombine.high %v7257_v18, %v22854_v12  ;;  %v7361_v17 = vrot.slane %v7347_v57, %v15305_v28  ;;  %v22870_v3 = vld [vmem:[#allocation12_spill] sm:$0xff]  ;;  %v22875_v8 = vld [vmem:[#allocation13_spill] sm:$0xff] }
 0x203   : > { %v7362_v13 = vcombine.low %v7338_v15, %v7354_v0  ;;  %v7363_v56 = vcombine.high %v7338_v15, %v7354_v0  ;;  %v7345_v38 = vrot.slane %v7331_v62, %v15305_v28  ;;  %v22876_v15 = vld [vmem:[#allocation6_spill] sm:$0xff]  ;;  %v7896_v57 = vcombine.low %v16499_v48, %v16510_v54  ;;  %v22879_v62 = vld [vmem:[#allocation16_spill] sm:$0xff] }
 0x204   : > { %v16523_v10 = vpop.permute.xlu1 %7792  ;;  %9750 = vrot.lane.b32.xlu0 %v16275_v44, %s15172_s18  ;;  %v7328_v41 = vcombine.high %v7318_v16, %v22854_v12  ;;  %v7329_v4 = vcombine.high %v7325_v40, %v22854_v12 }
 0x205   : > { %v16579_v63 = vrot.slane %v7362_v13, %v15317_v36 }
 0x206   : > { %7422 = vrot.lane.b32.xlu1 %v7309_v9, %s15174_s20  ;;  %v16530_v50 = vpop.permute.xlu0 %7812  ;;  %v7377_v9 = vrot.slane %v7363_v56, %v15317_v36  ;;  %v22878_v56 = vld [vmem:[#allocation8_spill] sm:$0xff] }
 0x207   : > { %v7386_v14 = vcombine.high %v16579_v63, %v22854_v12 }
 0x208   : > { %v16534_v39 = vpop.permute.xlu1 %7804  ;;  %7390 = vrot.lane.b32.xlu0 %v7258_v47, %s15173_s19  ;;  %v7387_v59 = vcombine.high %v7377_v9, %v22854_v12 }
 0x20a   : > { %7426 = vrot.lane.b32.xlu1 %v7327_v52, %s15157_s11  ;;  %v16540_v53 = vpop.permute.xlu0 %7798  ;;  %v7378_v52 = vcombine.low %v7345_v38, %v7361_v17 }
 0x20c   : > { %v16546_v2 = vpop.permute.xlu1 %7796  ;;  %7394 = vrot.lane.b32.xlu0 %v7241_v21, %s15174_s20 }
 0x20e   : > { %7430 = vrot.lane.b32.xlu1 %v7318_v16, %s15175_s23  ;;  %v16553_v24 = vpop.permute.xlu0 %7810  ;;  %v7385_v16 = vrot.slane %v7378_v52, %v15317_v36 }
 0x20f   : > { %v7844_v38 = vcombine.low %v16540_v53, %v16553_v24 }
 0x210   : > { %v16557_v7 = vpop.permute.xlu1 %7808  ;;  %7398 = vrot.lane.b32.xlu0 %v7259_v49, %s15157_s11  ;;  %v22874_v49 = vld [vmem:[#allocation14_spill] sm:$0xff] }
 0x212   : > { %7434 = vrot.lane.b32.xlu1 %v7328_v41, %s15176_s25  ;;  %v16563_v30 = vpop.permute.xlu0 %7802 }
 0x214   : > { %v16566_v46 = vpop.permute.xlu1 %8278  ;;  %7402 = vrot.lane.b32.xlu0 %v7250_v60, %s15175_s23  ;;  %v22877_v60 = vld [vmem:[#allocation5_spill] sm:$0xff] }
 0x216   : > { %7438 = vrot.lane.b32.xlu1 %v7325_v40, %s15177_s26  ;;  %v16571_v31 = vpop.permute.xlu0 %7814  ;;  %v7388_v40 = vcombine.high %v7385_v16, %v22854_v12 }
 0x218   : > { %v16574_v61 = vpop.permute.xlu1 %8290  ;;  %7406 = vrot.lane.b32.xlu0 %v7260_v20, %s15176_s25 }
 0x21a   : > { %7442 = vrot.lane.b32.xlu1 %v7329_v4, %s15178_s27  ;;  %v16582_v25 = vpop.permute.xlu0 %8284  ;;  %v7017_v4 = vcombine.low %v16221_v19, %v16246_v23 }
 0x21c   : > { %v16585_v35 = vpop.permute.xlu1 %8276  ;;  %7410 = vrot.lane.b32.xlu0 %v7257_v18, %s15177_s26  ;;  %v7912_v18 = vcombine.low %v16517_v1, %v16530_v50  ;;  %v7025_v17 = vrot.slane %v7017_v4, %v15305_v28 }
 0x21e   : > { %7446 = vrot.lane.b32.xlu1 %v7386_v14, %s15173_s19  ;;  %v16591_v5 = vpop.permute.xlu0 %8296 }
 0x220   : > { %v16596_v55 = vpop.permute.xlu1 %8288  ;;  %7414 = vrot.lane.b32.xlu0 %v7261_v22, %s15178_s27  ;;  %v7041_v22 = vrot.slane %v7033_v34, %v15305_v28 }
 0x222   : > { %7450 = vrot.lane.b32.xlu1 %v7377_v9, %s15174_s20  ;;  %v16603_v43 = vpop.permute.xlu0 %8282 }
 0x224   : > { %v16606_v47 = vpop.permute.xlu1 %8280  ;;  %7097 = vrot.lane.b32.xlu0 %v22870_v3, %s15173_s19  ;;  %v7920_v3 = vrot.slane %v7912_v18, %v15305_v28 }
 0x226   : > { %7100 = vrot.lane.b32.xlu1 %v22871_v32, %s15174_s20  ;;  %v16613_v26 = vpop.permute.xlu0 %8294  ;;  %v22880_v32 = vld [vmem:[#allocation7_spill] sm:$0xff] }
 0x228   : > { %v16615_v6 = vpop.permute.xlu1 %8292  ;;  %7076 = vrot.lane.b32.xlu0 %v22872_v51, %s15173_s19  ;;  %v7049_v51 = vcombine.low %v7025_v17, %v7041_v22 }
 0x22a   : > { %7079 = vrot.lane.b32.xlu1 %v22873_v27, %s15174_s20  ;;  %v16621_v21 = vpop.permute.xlu0 %8286  ;;  %v7904_v27 = vrot.slane %v7896_v57, %v15305_v28  ;;  %v16689_v4 = vrot.slane %v7049_v51, %v15317_v36  ;;  %v22883_v57 = vld [vmem:[#allocation17_spill] sm:$0xff] }
 0x22c   : > { %v16624_v11 = vpop.permute.xlu1 %8762  ;;  %7454 = vrot.lane.b32.xlu0 %v7387_v59, %s15157_s11  ;;  %v7828_v59 = vcombine.low %v16523_v10, %v16534_v39 }
 0x22e   : > { %7458 = vrot.lane.b32.xlu1 %v7385_v16, %s15175_s23  ;;  %v16629_v33 = vpop.permute.xlu0 %8298  ;;  %v7836_v18 = vrot.slane %v7828_v59, %v15305_v28  ;;  %v7018_v59 = vcombine.high %v16221_v19, %v16246_v23  ;;  %v7913_v23 = vcombine.high %v16517_v1, %v16530_v50 }
 0x230   : > { %v16631_v29 = vpop.permute.xlu1 %8774  ;;  %7103 = vrot.lane.b32.xlu0 %v22874_v49, %s15157_s11  ;;  %v22881_v49 = vld [vmem:[#allocation15_spill] sm:$0xff]  ;;  %v7032_v19 = vrot.slane %v7018_v59, %v15305_v28  ;;  %v7927_v1 = vrot.slane %v7913_v23, %v15305_v28 }
 0x232   : > { %7106 = vrot.lane.b32.xlu1 %v22875_v8, %s15175_s23  ;;  %v16637_v0 = vpop.permute.xlu0 %8768  ;;  %v7050_v8 = vcombine.high %v7025_v17, %v7041_v22 }
 0x234   : > { %v16639_v41 = vpop.permute.xlu1 %8760  ;;  %7082 = vrot.lane.b32.xlu0 %v22876_v15, %s15157_s11  ;;  %v7928_v15 = vcombine.low %v7904_v27, %v7920_v3  ;;  %v7064_v22 = vrot.slane %v7050_v8, %v15317_v36 }
 0x236   : > { %7085 = vrot.lane.b32.xlu1 %v22877_v60, %s15175_s23  ;;  %v16645_v13 = vpop.permute.xlu0 %8780  ;;  %v7852_v60 = vrot.slane %v7844_v38, %v15305_v28  ;;  %v16705_v51 = vrot.slane %v7928_v15, %v15317_v36 }
 0x238   : > { %v16650_v20 = vpop.permute.xlu1 %8772  ;;  %7462 = vrot.lane.b32.xlu0 %v7388_v40, %s15176_s25  ;;  %v22882_v40 = vld [vmem:[#allocation10_spill] sm:$0xff]  ;;  %v7860_v17 = vcombine.low %v7836_v18, %v7852_v60  ;;  %v7960_v15 = vcombine.high %v16705_v51, %v22854_v12 }
 0x23a   : > { %7088 = vrot.lane.b32.xlu1 %v22878_v56, %s15176_s25  ;;  %v16659_v14 = vpop.permute.xlu0 %8766 }
 0x23c   : > { %v16664_v9 = vpop.permute.xlu1 %8764  ;;  %7109 = vrot.lane.b32.xlu0 %v22879_v62, %s15176_s25  ;;  %v7034_v62 = vcombine.high %v16255_v37, %v16275_v44  ;;  %v7074_v37 = vcombine.high %v7064_v22, %v22854_v12 }
 0x23e   : > { %7091 = vrot.lane.b32.xlu1 %v22880_v32, %s15177_s26  ;;  %v16674_v52 = vpop.permute.xlu0 %8778  ;;  %v7073_v32 = vcombine.high %v16689_v4, %v22854_v12  ;;  %v7048_v44 = vrot.slane %v7034_v62, %v15305_v28 }
 0x240   : > { %v16679_v16 = vpop.permute.xlu1 %8776  ;;  %7112 = vrot.lane.b32.xlu0 %v22881_v49, %s15177_s26  ;;  %v7929_v49 = vcombine.high %v7904_v27, %v7920_v3  ;;  %v7861_v3 = vcombine.high %v7836_v18, %v7852_v60  ;;  %v7065_v62 = vcombine.low %v7032_v19, %v7048_v44  ;;  %v7829_v44 = vcombine.high %v16523_v10, %v16534_v39 }
 0x242   : > { %7094 = vrot.lane.b32.xlu1 %v22882_v40, %s15178_s27  ;;  %v16686_v34 = vpop.permute.xlu0 %8770  ;;  %v7875_v60 = vrot.slane %v7861_v3, %v15317_v36  ;;  %v7072_v18 = vrot.slane %v7065_v62, %v15317_v36  ;;  %v7980_v62 = vcombine.low %v16563_v30, %v16571_v31 }
 0x244   : > { %v16692_v56 = vpop.permute.xlu1 %9246  ;;  %7115 = vrot.lane.b32.xlu0 %v22883_v57, %s15178_s27  ;;  %v16720_v57 = vrot.slane %v7860_v17, %v15317_v36  ;;  %v7075_v19 = vcombine.high %v7072_v18, %v22854_v12 }
 0x246   : > { %7123 = vrot.lane.b32.xlu1 %v7064_v22, %s15174_s20  ;;  %v16700_v38 = vpop.permute.xlu0 %8782  ;;  %v7943_v22 = vrot.slane %v7929_v49, %v15317_v36  ;;  %v7892_v59 = vcombine.high %v16720_v57, %v22854_v12 }
 0x248   : > { %v16709_v40 = vpop.permute.xlu1 %9258  ;;  %7119 = vrot.lane.b32.xlu0 %v7073_v32, %s15173_s19  ;;  %v7897_v32 = vcombine.high %v16499_v48, %v16510_v54  ;;  %v7845_v48 = vcombine.high %v16540_v53, %v16553_v24  ;;  %v7961_v53 = vcombine.high %v7943_v22, %v22854_v12  ;;  %v7843_v24 = vrot.slane %v7829_v44, %v15305_v28 }
 0x249   : > { %v7988_v44 = vrot.slane %v7980_v62, %v15305_v28 }
 0x24a   : > { %7127 = vrot.lane.b32.xlu1 %v7074_v37, %s15157_s11  ;;  %v16715_v8 = vpop.permute.xlu0 %9252  ;;  %v7911_v49 = vrot.slane %v7897_v32, %v15305_v28  ;;  %v7859_v23 = vrot.slane %v7845_v48, %v15305_v28 }
 0x24c   : > { %v16725_v27 = vpop.permute.xlu1 %9244  ;;  %8052 = vrot.lane.b32.xlu0 %v7960_v15, %s15173_s19  ;;  %v7944_v37 = vcombine.low %v7911_v49, %v7927_v1  ;;  %v7876_v32 = vcombine.low %v7843_v24, %v7859_v23  ;;  %v7945_v48 = vcombine.high %v7911_v49, %v7927_v1 }
 0x24d   : > { %22884 = vst [vmem:[#allocation18_spill] sm:$0xff] %v16725_v27 }
 0x24e   : > { %8056 = vrot.lane.b32.xlu1 %v7943_v22, %s15174_s20  ;;  %v16732_v17 = vpop.permute.xlu0 %9264  ;;  %v7952_v39 = vrot.slane %v7944_v37, %v15317_v36  ;;  %v7893_v22 = vcombine.high %v7875_v60, %v22854_v12  ;;  %v7884_v1 = vrot.slane %v7876_v32, %v15317_v36 }
 0x250   : > { %v16737_v50 = vpop.permute.xlu1 %9256  ;;  %8024 = vrot.lane.b32.xlu0 %v7892_v59, %s15173_s19  ;;  %v7964_v59 = vcombine.low %v16546_v2, %v16557_v7  ;;  %v7962_v37 = vcombine.high %v7952_v39, %v22854_v12 }
 0x252   : > { %8028 = vrot.lane.b32.xlu1 %v7875_v60, %s15174_s20  ;;  %v16746_v54 = vpop.permute.xlu0 %9250 }
 0x254   : > { %v16750_v15 = vpop.permute.xlu1 %9248  ;;  %7131 = vrot.lane.b32.xlu0 %v7072_v18, %s15175_s23 }
 0x255   : > { %22885 = vst [vmem:[#allocation12_spill] sm:$0xff] %v16750_v15 }
 0x256   : > { %7135 = vrot.lane.b32.xlu1 %v7075_v19, %s15176_s25  ;;  %v16756_v3 = vpop.permute.xlu0 %9262  ;;  %v8396_v19 = vcombine.low %v16582_v25, %v16591_v5 }
 0x258   : > { %v16762_v10 = vpop.permute.xlu1 %9260  ;;  %8060 = vrot.lane.b32.xlu0 %v7961_v53, %s15157_s11  ;;  %v7972_v53 = vrot.slane %v7964_v59, %v15305_v28  ;;  %v8404_v62 = vrot.slane %v8396_v19, %v15305_v28  ;;  %v7877_v59 = vcombine.high %v7843_v24, %v7859_v23  ;;  %v7894_v19 = vcombine.high %v7884_v1, %v22854_v12 }
 0x259   : > { %22886 = vst [vmem:[#allocation11_spill] sm:$0xff] %v16762_v10  ;;  %v8380_v10 = vcombine.low %v16566_v46, %v16574_v61 }
 0x25a   : > { %8064 = vrot.lane.b32.xlu1 %v7952_v39, %s15175_s23  ;;  %v16769_v18 = vpop.permute.xlu0 %9254  ;;  %v7996_v49 = vcombine.low %v7972_v53, %v7988_v44  ;;  %v7959_v39 = vrot.slane %v7945_v48, %v15317_v36 }
 0x25b   : > { %22887 = vst [vmem:[#allocation4_spill] sm:$0xff] %v16769_v18  ;;  %v8388_v18 = vrot.slane %v8380_v10, %v15305_v28 }
 0x25c   : > { %v16775_v15 = vpop.permute.xlu1 %9730  ;;  %8032 = vrot.lane.b32.xlu0 %v7893_v22, %s15157_s11  ;;  %v7963_v23 = vcombine.high %v7959_v39, %v22854_v12  ;;  %v16806_v24 = vrot.slane %v7996_v49, %v15317_v36 }
 0x25d   : > { %22888 = vst [vmem:[#allocation3_spill] sm:$0xff] %v16775_v15  ;;  %v8328_v15 = vcombine.low %v16603_v43, %v16613_v26 }
 0x25e   : > { %8068 = vrot.lane.b32.xlu1 %v7962_v37, %s15176_s25  ;;  %v16783_v60 = vpop.permute.xlu0 %9266  ;;  %v8312_v37 = vcombine.low %v16585_v35, %v16596_v55  ;;  %v8020_v49 = vcombine.high %v16806_v24, %v22854_v12 }
 0x25f   : > { %22889 = vst [vmem:[#allocation14_spill] sm:$0xff] %v16783_v60  ;;  %v8412_v60 = vcombine.low %v8388_v18, %v8404_v62  ;;  %v8336_v27 = vrot.slane %v8328_v15, %v15305_v28  ;;  %v7981_v15 = vcombine.high %v16563_v30, %v16571_v31 }
 0x260   : > { %v16789_v22 = vpop.permute.xlu1 %9742  ;;  %8036 = vrot.lane.b32.xlu0 %v7884_v1, %s15175_s23  ;;  %v8320_v10 = vrot.slane %v8312_v37, %v15305_v28  ;;  %v7891_v1 = vrot.slane %v7877_v59, %v15317_v36  ;;  %v7965_v37 = vcombine.high %v16546_v2, %v16557_v7 }
 0x261   : > { %22890 = vst [vmem:[#allocation13_spill] sm:$0xff] %v16789_v22  ;;  %v7995_v31 = vrot.slane %v7981_v15, %v15305_v28 }
 0x262   : > { %8072 = vrot.lane.b32.xlu1 %v7959_v39, %s15177_s26  ;;  %v16797_v32 = vpop.permute.xlu0 %9736  ;;  %v16821_v39 = vrot.slane %v8412_v60, %v15317_v36  ;;  %v7895_v30 = vcombine.high %v7891_v1, %v22854_v12  ;;  %v7979_v2 = vrot.slane %v7965_v37, %v15305_v28 }
 0x263   : > { %22891 = vst [vmem:[#allocation6_spill] sm:$0xff] %v16797_v32  ;;  %v8344_v32 = vcombine.low %v8320_v10, %v8336_v27 }
 0x264   : > { %v16801_v22 = vpop.permute.xlu1 %9728  ;;  %8040 = vrot.lane.b32.xlu0 %v7894_v19, %s15176_s25  ;;  %22894 = vst [vmem:[#allocation16_spill] sm:$0xff] %v16821_v39  ;;  %v7997_v19 = vcombine.high %v7972_v53, %v7988_v44  ;;  %v8444_v60 = vcombine.high %v16821_v39, %v22854_v12  ;;  %v8012_v53 = vcombine.low %v7979_v2, %v7995_v31 }
 0x265   : > { %22892 = vst [vmem:[#allocation5_spill] sm:$0xff] %v16801_v22 }
 0x266   : > { %8076 = vrot.lane.b32.xlu1 %v7963_v23, %s15178_s27  ;;  %v16810_v48 = vpop.permute.xlu0 %9748  ;;  %v8011_v44 = vrot.slane %v7997_v19, %v15317_v36  ;;  %v8019_v19 = vrot.slane %v8012_v53, %v15317_v36 }
 0x268   : > { %v16815_v22 = vpop.permute.xlu1 %9740  ;;  %8044 = vrot.lane.b32.xlu0 %v7891_v1, %s15177_s26  ;;  %v8413_v1 = vcombine.high %v8388_v18, %v8404_v62  ;;  %v8021_v37 = vcombine.high %v8011_v44, %v22854_v12  ;;  %v8345_v62 = vcombine.high %v8320_v10, %v8336_v27  ;;  %v8022_v10 = vcombine.high %v8019_v19, %v22854_v12 }
 0x269   : > { %22893 = vst [vmem:[#allocation8_spill] sm:$0xff] %v16815_v22  ;;  %v16836_v22 = vrot.slane %v8344_v32, %v15317_v36 }
 0x26a   : > { %8080 = vrot.lane.b32.xlu1 %v8020_v49, %s15173_s19  ;;  %v16826_v59 = vpop.permute.xlu0 %9734  ;;  %v8427_v18 = vrot.slane %v8413_v1, %v15317_v36 }
 0x26b   : > { %22895 = vst [vmem:[#allocation7_spill] sm:$0xff] %v16826_v59  ;;  %22897 = vst [vmem:[#allocation10_spill] sm:$0xff] %v16836_v22  ;;  %v8376_v49 = vcombine.high %v16836_v22, %v22854_v12  ;;  %v22902_v59 = vld [vmem:[#allocation9_spill] sm:$0xff] }
 0x26c   : > { %v16830_v23 = vpop.permute.xlu1 %9732  ;;  %8048 = vrot.lane.b32.xlu0 %v7895_v30, %s15178_s27  ;;  %v8445_v2 = vcombine.high %v8427_v18, %v22854_v12 }
 0x26d   : > { %22896 = vst [vmem:[#allocation15_spill] sm:$0xff] %v16830_v23 }
 0x26e   : > { %8536 = vrot.lane.b32.xlu1 %v8444_v60, %s15173_s19  ;;  %v16840_v7 = vpop.permute.xlu0 %9746 }
 0x26f   : > { %22898 = vst [vmem:[#allocation17_spill] sm:$0xff] %v16840_v7 }
 0x270   : > { %v16843_v15 = vpop.permute.xlu1 %9744  ;;  %8084 = vrot.lane.b32.xlu0 %v8011_v44, %s15174_s20 }
 0x271   : > { %22899 = vst [vmem:[#allocation19_spill] sm:$0xff] %v16843_v15 }
 0x272   : > { %8508 = vrot.lane.b32.xlu1 %v8376_v49, %s15173_s19  ;;  %v16849_v32 = vpop.permute.xlu0 %9738  ;;  %v16862_v49 = vrot.slane %v8345_v62, %v15317_v36 }
 0x273   : > { %22900 = vst [vmem:[#allocation20_spill] sm:$0xff] %v16849_v32 }
 0x274   : > { %v7419_v30 = vpop.permute.xlu1 %7418  ;;  %8088 = vrot.lane.b32.xlu0 %v8021_v37, %s15157_s11 }
 0x276   : > { %8092 = vrot.lane.b32.xlu1 %v8019_v19, %s15175_s23  ;;  %v16856_v31 = vpop.permute.xlu0 %9750 }
 0x277   : > { %22901 = vst [vmem:[#allocation21_spill] sm:$0xff] %v16856_v31 }
 0x278   : > { %v7423_v60 = vpop.permute.xlu1 %7422  ;;  %8540 = vrot.lane.b32.xlu0 %v8427_v18, %s15174_s20 }
 0x27a   : > { %8544 = vrot.lane.b32.xlu1 %v8445_v2, %s15157_s11  ;;  %v7391_v44 = vpop.permute.xlu0 %7390  ;;  %v7472_v2 = vsel %vm3784_vm4, %v16504_v58, %v7419_v30 }
 0x27b   : > { %v7473_v62 = vsel %vm3786_vm5, %v7472_v2, %v7423_v60  ;;  %v7465_v58 = vsel %vm3784_vm4, %v16520_v42, %v7391_v44  ;;  %v14830_v42 = vld [vmem:[%s22413_s3 + $0x8] sm:$0xff] }
 0x27c   : > { %v7427_v37 = vpop.permute.xlu1 %7426  ;;  %8512 = vrot.lane.b32.xlu0 %v16862_v49, %s15174_s20 }
 0x27d   : > { %v7474_v32 = vsel %vm561_vm15, %v7473_v62, %v7427_v37 }
 0x27e   : > { %v7395_v27 = vpop.permute.xlu0 %7394 }
 0x27f   : > { %v7466_v60 = vsel %vm3786_vm5, %v7465_v58, %v7395_v27 }
 0x280   : > { %v7431_v53 = vpop.permute.xlu1 %7430  ;;  %8096 = vrot.lane.b32.xlu0 %v8022_v10, %s15176_s25 }
 0x281   : > { %v7475_v19 = vsel %vm3789_vm9, %v7474_v32, %v7431_v53 }
 0x282   : > { %v7399_v1 = vpop.permute.xlu0 %7398 }
 0x283   : > { %v7467_v2 = vsel %vm561_vm15, %v7466_v60, %v7399_v1 }
 0x284   : > { %v7435_v23 = vpop.permute.xlu1 %7434 }
 0x285   : > { %v7476_v10 = vsel %vm3791_vm10, %v7475_v19, %v7435_v23 }
 0x286   : > { %v7403_v18 = vpop.permute.xlu0 %7402 }
 0x287   : > { %v7468_v32 = vsel %vm3789_vm9, %v7467_v2, %v7403_v18 }
 0x288   : > { %v7439_v15 = vpop.permute.xlu1 %7438 }
 0x289   : > { %v7477_v22 = vsel %vm3793_vm14, %v7476_v10, %v7439_v15 }
 0x28a   : > { %v7407_v31 = vpop.permute.xlu0 %7406 }
 0x28b   : > { %v7469_v23 = vsel %vm3791_vm10, %v7468_v32, %v7407_v31 }
 0x28c   : > { %v7443_v39 = vpop.permute.xlu1 %7442 }
 0x28d   : > { %v7478_v30 = vsel %vm3795_vm0, %v7477_v22, %v7443_v39 }
 0x28e   : > { %14831 = vmatprep.subr.msk.mxu1 %vm835_vm6, %v7478_v30  ;;  %v7411_v37 = vpop.permute.xlu0 %7410 }
 0x28f   : > { %v7470_v15 = vsel %vm3793_vm14, %v7469_v23, %v7411_v37 }
 0x290   : > { %v7447_v53 = vpop.permute.xlu1 %7446 }
 0x291   : > { %v7479_v30 = vsel %vm3784_vm4, %v16579_v63, %v7447_v53 }
 0x292   : > { %v7415_v62 = vpop.permute.xlu0 %7414 }
 0x293   : > { %v7471_v22 = vsel %vm3795_vm0, %v7470_v15, %v7415_v62 }
 0x294   : > { %v7451_v39 = vpop.permute.xlu1 %7450  ;;  %14832 = vmatpush1.msk.msra.mxu1 %vm835_vm6, %v7471_v22 }
 0x295   : > { %14967 = vmatprep.subr.mxu1 %v22854_v12  ;;  %14833 = vmatmul.mubr.msk.f32.vlgmr.msra.gmra.mrb[2].mxu1 %vm557_vm11, %v14830_v42  ;;  %v7480_v60 = vsel %vm3786_vm5, %v7479_v30, %v7451_v39 }
 0x296   : > { %v7098_v44 = vpop.permute.xlu0 %7097  ;;  %14969 = vmatprep.mubr.msk.f32.mxu1 %vm15166_vm8, %v22854_v12 }
 0x297   : > { %v7145_v7 = vsel %vm3784_vm4, %v22902_v59, %v7098_v44 }
 0x298   : > { %v7101_v31 = vpop.permute.xlu1 %7100 }
 0x299   : > { %v7146_v39 = vsel %vm3786_vm5, %v7145_v7, %v7101_v31 }
 0x29a   : > { %v7077_v27 = vpop.permute.xlu0 %7076 }
 0x29b   : > { %v7138_v63 = vsel %vm3784_vm4, %v15331_v45, %v7077_v27 }
 0x29c   : > { %v7080_v1 = vpop.permute.xlu1 %7079 }
 0x29e   : > { %v7455_v18 = vpop.permute.xlu0 %7454 }
 0x29f   : > { %v7481_v2 = vsel %vm561_vm15, %v7480_v60, %v7455_v18 }
 0x2a0   : > { %v7459_v19 = vpop.permute.xlu1 %7458 }
 0x2a1   : > { %v7482_v23 = vsel %vm3789_vm9, %v7481_v2, %v7459_v19  ;;  %v7139_v19 = vsel %vm3786_vm5, %v7138_v63, %v7080_v1 }
 0x2a2   : > { %v7104_v10 = vpop.permute.xlu0 %7103 }
 0x2a3   : > { %v7147_v30 = vsel %vm561_vm15, %v7146_v39, %v7104_v10 }
 0x2a4   : > { %v7107_v58 = vpop.permute.xlu1 %7106 }
 0x2a5   : > { %v7148_v59 = vsel %vm3789_vm9, %v7147_v30, %v7107_v58  ;;  %v7157_v58 = vld [vmem:[%s22413_s3] sm:$0xff] }
 0x2a6   : > { %v7083_v37 = vpop.permute.xlu0 %7082 }
 0x2a7   : > { %v7140_v60 = vsel %vm561_vm15, %v7139_v19, %v7083_v37 }
 0x2a8   : > { %v7086_v32 = vpop.permute.xlu1 %7085 }
 0x2aa   : > { %v7463_v15 = vpop.permute.xlu0 %7462 }
 0x2ab   : > { %v7483_v62 = vsel %vm3791_vm10, %v7482_v23, %v7463_v15 }
 0x2ac   : > { %v7089_v22 = vpop.permute.xlu1 %7088  ;;  %14968 = vmatpush3.msk.msra.mxu1 %vm835_vm6, %v7483_v62 }
 0x2ad   : > { %14970 = vmatmul.mubr.msk.f32.vlgmr.msra.gmra.mrb[4].mxu1 %vm557_vm11, %v14830_v42  ;;  %v7141_v42 = vsel %vm3789_vm9, %v7140_v60, %v7086_v32 }
 0x2ae   : > { %v7110_v53 = vpop.permute.xlu0 %7109  ;;  %7715 = vmatprep.mubr.f32.mxu1 %v22854_v12  ;;  %v7142_v23 = vsel %vm3791_vm10, %v7141_v42, %v7089_v22 }
 0x2af   : > { %v7149_v45 = vsel %vm3791_vm10, %v7148_v59, %v7110_v53 }
 0x2b0   : > { %v7092_v18 = vpop.permute.xlu1 %7091 }
 0x2b1   : > { %v7143_v10 = vsel %vm3793_vm14, %v7142_v23, %v7092_v18 }
 0x2b2   : > { %v7113_v2 = vpop.permute.xlu0 %7112 }
 0x2b3   : > { %v7150_v7 = vsel %vm3793_vm14, %v7149_v45, %v7113_v2 }
 0x2b4   : > { %v7095_v44 = vpop.permute.xlu1 %7094 }
 0x2b5   : > { %v16913_v27 = vpop.f32.mrb[0].mxu0  ;;  %v7144_v32 = vsel %vm3795_vm0, %v7143_v10, %v7095_v44 }
 0x2b6   : > { %v16917_v31 = vpop.f32.mrb[1].mxu0  ;;  %v7116_v1 = vpop.permute.xlu0 %7115 }
 0x2b7   : > { %v7151_v37 = vsel %vm3795_vm0, %v7150_v7, %v7116_v1  ;;  %v8397_v1 = vcombine.high %v16582_v25, %v16591_v5 }
 0x2b8   : > { %v7124_v15 = vpop.permute.xlu1 %7123  ;;  %14836 = vmatprep.subr.msk.mxu1 %vm835_vm6, %v7151_v37 }
 0x2b9   : > { %14837 = vmatpush1.msk.msra.mxu1 %vm835_vm6, %v7144_v32  ;;  %v8381_v32 = vcombine.high %v16566_v46, %v16574_v61  ;;  %v8329_v61 = vcombine.high %v16603_v43, %v16613_v26 }
 0x2ba   : > { %v7120_v62 = vpop.permute.xlu0 %7119  ;;  %14972 = vmatprep.subr.mxu1 %v22854_v12  ;;  %14838 = vmatmul.mubr.msk.f32.vlgmr.msra.gmra.mrb[2].mxu1 %vm557_vm11, %v7157_v58 }
 0x2bb   : > { %14974 = vmatprep.mubr.msk.f32.mxu1 %vm15166_vm8, %v22854_v12  ;;  %v7152_v18 = vsel %vm3784_vm4, %v16689_v4, %v7120_v62  ;;  %v8395_v5 = vrot.slane %v8381_v32, %v15305_v28  ;;  %v8343_v43 = vrot.slane %v8329_v61, %v15305_v28 }
 0x2bc   : > { %v3121_v22 = vpop.f32.mrb[0].mxu1  ;;  %v7128_v63 = vpop.permute.xlu1 %7127  ;;  %v7153_v60 = vsel %vm3786_vm5, %v7152_v18, %v7124_v15  ;;  %v8411_v15 = vrot.slane %v8397_v1, %v15305_v28 }
 0x2bd   : > { %v14966_v53 = vpop.f32.mrb[1].mxu1  ;;  %3167 = vrot.lane.b32.xlu1 %v3121_v22, %s15179_s10  ;;  %3172 = vrot.lane.b32.xlu0 %v3121_v22, %s15180_s13  ;;  %v7154_v59 = vsel %vm561_vm15, %v7153_v60, %v7128_v63  ;;  %s15188_s13 = smov 18  }
 0x2be   : > { %v8053_v39 = vpop.permute.xlu0 %8052  ;;  %v8428_v46 = vcombine.low %v8395_v5, %v8411_v15 }
 0x2bf   : > { %v8106_v37 = vsel %vm3784_vm4, %v16705_v51, %v8053_v39 }
 0x2c0   : > { %v8057_v19 = vpop.permute.xlu1 %8056 }
 0x2c1   : > { %3175 = vrot.lane.b32.xlu1 %v3121_v22, %s15181_s14  ;;  %3178 = vrot.lane.b32.xlu0 %v3121_v22, %s15182_s16  ;;  %s15189_s14 = smov 102   ;;  %v8107_v62 = vsel %vm3786_vm5, %v8106_v37, %v8057_v19  ;;  %s15190_s16 = smov 58   ;;  %v8313_v19 = vcombine.high %v16585_v35, %v16596_v55  ;;  %v8436_v35 = vrot.slane %v8428_v46, %v15317_v36 }
 0x2c2   : > { %v8025_v30 = vpop.permute.xlu0 %8024  ;;  %v8464_v55 = vcombine.low %v16621_v21, %v16629_v33 }
 0x2c3   : > { %v8099_v39 = vsel %vm3784_vm4, %v16720_v57, %v8025_v30  ;;  %v8446_v32 = vcombine.high %v8436_v35, %v22854_v12 }
 0x2c4   : > { %v8029_v2 = vpop.permute.xlu1 %8028 }
 0x2c5   : > { %3181 = vrot.lane.b32.xlu1 %v3121_v22, %s15183_s17  ;;  %3132 = vrot.lane.b32.xlu0 %v16913_v27, %s15184_s28  ;;  %v8100_v26 = vsel %vm3786_vm5, %v8099_v39, %v8029_v2 }
 0x2c6   : > { %v7132_v44 = vpop.permute.xlu0 %7131 }
 0x2c7   : > { %v7155_v42 = vsel %vm3789_vm9, %v7154_v59, %v7132_v44 }
 0x2c8   : > { %v7136_v4 = vpop.permute.xlu1 %7135 }
 0x2c9   : > { %v7156_v45 = vsel %vm3791_vm10, %v7155_v42, %v7136_v4  ;;  %3129 = vrot.lane.b32.xlu1 %v16913_v27, %s15185_s30  ;;  %3138 = vrot.lane.b32.xlu0 %v16913_v27, %s15186_s7  ;;  %v8327_v42 = vrot.slane %v8313_v19, %v15305_v28  ;;  %v8796_v19 = vcombine.low %v16639_v41, %v16650_v20 }
 0x2ca   : > { %14973 = vmatpush3.msk.msra.mxu1 %vm835_vm6, %v7156_v45  ;;  %v8061_v23 = vpop.permute.xlu0 %8060  ;;  %v8448_v45 = vcombine.low %v16606_v47, %v16615_v6 }
 0x2cb   : > { %14975 = vmatmul.mubr.msk.f32.vlgmr.msra.gmra.mrb[4].mxu1 %vm557_vm11, %v7157_v58  ;;  %v8108_v25 = vsel %vm561_vm15, %v8107_v62, %v8061_v23  ;;  %v8360_v1 = vcombine.low %v8327_v42, %v8343_v43  ;;  %v8880_v62 = vcombine.low %v16637_v0, %v16645_v13 }
 0x2cc   : > { %v8065_v7 = vpop.permute.xlu1 %8064  ;;  %8196 = vmatprep.mubr.f32.mxu1 %v22854_v12 }
 0x2cd   : > { %3135 = vrot.lane.b32.xlu1 %v16913_v27, %s15187_s9  ;;  %3144 = vrot.lane.b32.xlu0 %v16917_v31, %s15188_s13  ;;  %v8109_v51 = vsel %vm3789_vm9, %v8108_v25, %v8065_v7  ;;  %v8429_v7 = vcombine.high %v8395_v5, %v8411_v15  ;;  %v17002_v15 = vld [vmem:[%s22413_s3 + $0x10] sm:$0xff]  ;;  %v8456_v25 = vrot.slane %v8448_v45, %v15305_v28 }
 0x2ce   : > { %v8033_v10 = vpop.permute.xlu0 %8032  ;;  %v8864_v5 = vcombine.low %v16624_v11, %v16631_v29  ;;  %v8888_v61 = vrot.slane %v8880_v62, %v15305_v28  ;;  %v8368_v39 = vrot.slane %v8360_v1, %v15317_v36 }
 0x2cf   : > { %v8101_v30 = vsel %vm561_vm15, %v8100_v26, %v8033_v10  ;;  %v8443_v46 = vrot.slane %v8429_v7, %v15317_v36 }
 0x2d0   : > { %v8069_v58 = vpop.permute.xlu1 %8068 }
 0x2d1   : > { %3142 = vrot.lane.b32.xlu1 %v16913_v27, %s15188_s13  ;;  %3152 = vrot.lane.b32.xlu0 %v16917_v31, %s15189_s14  ;;  %v8110_v18 = vsel %vm3791_vm10, %v8109_v51, %v8069_v58  ;;  %v16992_v58 = vrot.slane %v8464_v55, %v15305_v28  ;;  %v8812_v51 = vcombine.low %v16659_v14, %v16674_v52 }
 0x2d2   : > { %v8037_v22 = vpop.permute.xlu0 %8036 }
 0x2d3   : > { %v8102_v4 = vsel %vm3789_vm9, %v8101_v30, %v8037_v22  ;;  %v8804_v30 = vrot.slane %v8796_v19, %v15305_v28 }
 0x2d4   : > { %v8073_v63 = vpop.permute.xlu1 %8072 }
 0x2d5   : > { %3149 = vrot.lane.b32.xlu1 %v16917_v31, %s15170_s12  ;;  %3158 = vrot.lane.b32.xlu0 %v16917_v31, %s15190_s16  ;;  %v8111_v60 = vsel %vm3793_vm14, %v8110_v18, %v8073_v63  ;;  %v8872_v18 = vrot.slane %v8864_v5, %v15305_v28 }
 0x2d6   : > { %v8041_v53 = vpop.permute.xlu0 %8040 }
 0x2d7   : > { %v8103_v23 = vsel %vm3791_vm10, %v8102_v4, %v8041_v53  ;;  %v8896_v26 = vcombine.low %v8872_v18, %v8888_v61 }
 0x2d8   : > { %v8077_v59 = vpop.permute.xlu1 %8076 }
 0x2d9   : > { %v8112_v44 = vsel %vm3795_vm0, %v8111_v60, %v8077_v59  ;;  %3155 = vrot.lane.b32.xlu1 %v16917_v31, %s15176_s25  ;;  %3165 = vrot.lane.b32.xlu0 %v16917_v31, %s15179_s10  ;;  %s15191_s10 = smov 36   ;;  %v8361_v60 = vcombine.high %v8327_v42, %v8343_v43  ;;  %v8465_v43 = vcombine.high %v16621_v21, %v16629_v33 }
 0x2da   : > { %14842 = vmatprep.subr.msk.mxu1 %vm835_vm6, %v8112_v44  ;;  %v8045_v57 = vpop.permute.xlu0 %8044  ;;  %v8447_v44 = vcombine.high %v8443_v46, %v22854_v12  ;;  %v17047_v1 = vrot.slane %v8896_v26, %v15317_v36  ;;  %v8865_v26 = vcombine.high %v16624_v11, %v16631_v29 }
 0x2db   : > { %v8104_v37 = vsel %vm3793_vm14, %v8103_v23, %v8045_v57  ;;  %v8820_v57 = vrot.slane %v8812_v51, %v15305_v28  ;;  %v8375_v45 = vrot.slane %v8361_v60, %v15317_v36  ;;  %v8479_v21 = vrot.slane %v8465_v43, %v15305_v28 }
 0x2dc   : > { %v8081_v2 = vpop.permute.xlu1 %8080 }
 0x2dd   : > { %3161 = vrot.lane.b32.xlu1 %v16917_v31, %s15191_s10  ;;  %8548 = vrot.lane.b32.xlu0 %v8436_v35, %s15175_s23  ;;  %v8377_v31 = vcombine.high %v16862_v49, %v22854_v12  ;;  %v8480_v49 = vcombine.low %v8456_v25, %v16992_v58  ;;  %v8378_v35 = vcombine.high %v8368_v39, %v22854_v12 }
 0x2de   : > { %v8049_v10 = vpop.permute.xlu0 %8048  ;;  %v8828_v23 = vcombine.low %v8804_v30, %v8820_v57  ;;  %v8379_v62 = vcombine.high %v8375_v45, %v22854_v12 }
 0x2df   : > { %v8105_v22 = vsel %vm3795_vm0, %v8104_v37, %v8049_v10  ;;  %v17032_v55 = vrot.slane %v8480_v49, %v15317_v36  ;;  %v8449_v37 = vcombine.high %v16606_v47, %v16615_v6  ;;  %v8113_v10 = vsel %vm3784_vm4, %v16806_v24, %v8081_v2 }
 0x2e0   : > { %14843 = vmatpush1.msk.msra.mxu1 %vm835_vm6, %v8105_v22  ;;  %v17018_v53 = vpop.permute.xlu1 %8536  ;;  %v8481_v22 = vcombine.high %v8456_v25, %v16992_v58  ;;  %v8928_v6 = vcombine.high %v17047_v1, %v22854_v12  ;;  %v17065_v24 = vrot.slane %v8828_v23, %v15317_v36  ;;  %v8897_v58 = vcombine.high %v8872_v18, %v8888_v61 }
 0x2e1   : > { %8516 = vrot.lane.b32.xlu1 %v8377_v31, %s15157_s11  ;;  %8552 = vrot.lane.b32.xlu0 %v8446_v32, %s15176_s25  ;;  %v8504_v7 = vcombine.high %v17032_v55, %v22854_v12  ;;  %v8463_v2 = vrot.slane %v8449_v37, %v15305_v28  ;;  %v8813_v61 = vcombine.high %v16659_v14, %v16674_v52 }
 0x2e2   : > { %v8085_v63 = vpop.permute.xlu0 %8084  ;;  %14977 = vmatprep.subr.mxu1 %v22854_v12  ;;  %14844 = vmatmul.mubr.msk.f32.vlgmr.msra.gmra.mrb[2].mxu1 %vm557_vm11, %v17002_v15  ;;  %v8495_v49 = vrot.slane %v8481_v22, %v15317_v36  ;;  %v8860_v51 = vcombine.high %v17065_v24, %v22854_v12  ;;  %v8829_v18 = vcombine.high %v8804_v30, %v8820_v57 }
 0x2e3   : > { %14979 = vmatprep.mubr.msk.f32.mxu1 %vm15166_vm8, %v22854_v12  ;;  %v8114_v33 = vsel %vm3786_vm5, %v8113_v10, %v8085_v63  ;;  %v8496_v5 = vcombine.low %v8463_v2, %v8479_v21  ;;  %v8911_v60 = vrot.slane %v8897_v58, %v15317_v36  ;;  %v8948_v30 = vcombine.low %v16686_v34, %v16700_v38 }
 0x2e4   : > { %v17035_v4 = vpop.permute.xlu1 %8508  ;;  %v8505_v19 = vcombine.high %v8495_v49, %v22854_v12  ;;  %v8843_v52 = vrot.slane %v8829_v18, %v15317_v36  ;;  %v9364_v21 = vcombine.low %v16715_v8, %v16732_v17 }
 0x2e5   : > { %8520 = vrot.lane.b32.xlu1 %v8368_v39, %s15175_s23  ;;  %8556 = vrot.lane.b32.xlu0 %v8443_v46, %s15177_s26  ;;  %v8503_v39 = vrot.slane %v8496_v5, %v15317_v36  ;;  %v8929_v14 = vcombine.high %v8911_v60, %v22854_v12  ;;  %v8956_v10 = vrot.slane %v8948_v30, %v15305_v28 }
 0x2e6   : > { %v8089_v59 = vpop.permute.xlu0 %8088  ;;  %v9372_v5 = vrot.slane %v9364_v21, %v15305_v28 }
 0x2e7   : > { %v8115_v31 = vsel %vm561_vm15, %v8114_v33, %v8089_v59  ;;  %v8797_v59 = vcombine.high %v16639_v41, %v16650_v20  ;;  %v8506_v11 = vcombine.high %v8503_v39, %v22854_v12 }
 0x2e8   : > { %v8093_v47 = vpop.permute.xlu1 %8092 }
 0x2e9   : > { %8524 = vrot.lane.b32.xlu1 %v8378_v35, %s15176_s25  ;;  %8560 = vrot.lane.b32.xlu0 %v8447_v44, %s15178_s27  ;;  %v8116_v63 = vsel %vm3789_vm9, %v8115_v31, %v8093_v47  ;;  %v8827_v44 = vrot.slane %v8813_v61, %v15305_v28  ;;  %v8811_v57 = vrot.slane %v8797_v59, %v15305_v28 }
 0x2ea   : > { %v17041_v42 = vpop.permute.xlu0 %8540  ;;  %v9348_v31 = vcombine.low %v16692_v56, %v16709_v40  ;;  %v8933_v59 = vcombine.high %v16664_v9, %v16679_v16 }
 0x2eb   : > { %v8844_v20 = vcombine.low %v8811_v57, %v8827_v44  ;;  %v8845_v43 = vcombine.high %v8811_v57, %v8827_v44  ;;  %v9365_v57 = vcombine.high %v16715_v8, %v16732_v17 }
 0x2ec   : > { %v9356_v58 = vrot.slane %v9348_v31, %v15305_v28 }
 0x2ed   : > { %8528 = vrot.lane.b32.xlu1 %v8375_v45, %s15177_s26  ;;  %8564 = vrot.lane.b32.xlu0 %v8504_v7, %s15173_s19  ;;  %v8852_v29 = vrot.slane %v8844_v20, %v15317_v36  ;;  %v8932_v7 = vcombine.low %v16664_v9, %v16679_v16  ;;  %v8947_v9 = vrot.slane %v8933_v59, %v15305_v28  ;;  %v22914_v59 = vld [vmem:[#allocation7_spill] sm:$0xff] }
 0x2ee   : > { %v17057_v32 = vpop.permute.xlu0 %8512  ;;  %v9380_v61 = vcombine.low %v9356_v58, %v9372_v5  ;;  %v9381_v44 = vcombine.high %v9356_v58, %v9372_v5 }
 0x2ef   : > { %v8862_v23 = vcombine.high %v8852_v29, %v22854_v12  ;;  %v8940_v22 = vrot.slane %v8932_v7, %v15305_v28 }
 0x2f1   : > { %8532 = vrot.lane.b32.xlu1 %v8379_v62, %s15178_s27  ;;  %9020 = vrot.lane.b32.xlu0 %v8928_v6, %s15173_s19  ;;  %v8859_v62 = vrot.slane %v8845_v43, %v15317_v36  ;;  %v8964_v47 = vcombine.low %v8940_v22, %v8956_v10  ;;  %v8965_v2 = vcombine.high %v8940_v22, %v8956_v10  ;;  %v22907_v10 = vld [vmem:[#allocation4_spill] sm:$0xff] }
 0x2f2   : > { %v8097_v46 = vpop.permute.xlu0 %8096 }
 0x2f3   : > { %v8117_v25 = vsel %vm3791_vm10, %v8116_v63, %v8097_v46  ;;  %v9296_v63 = vcombine.low %v16746_v54, %v16756_v3  ;;  %v8863_v46 = vcombine.high %v8859_v62, %v22854_v12 }
 0x2f4   : > { %14978 = vmatpush3.msk.msra.mxu1 %vm835_vm6, %v8117_v25  ;;  %v22903_v25 = vld [vmem:[#allocation18_spill] sm:$0xff] }
 0x2f5   : > { %8568 = vrot.lane.b32.xlu1 %v8495_v49, %s15174_s20  ;;  %8992 = vrot.lane.b32.xlu0 %v8860_v51, %s15173_s19  ;;  %v9280_v49 = vcombine.low %v22903_v25, %v16737_v50  ;;  %v8949_v51 = vcombine.high %v16686_v34, %v16700_v38  ;;  %v9304_v18 = vrot.slane %v9296_v63, %v15305_v28  ;;  %v17201_v63 = vpop.permute.xlu1 %8544 }
 0x2f6   : > { %14980 = vmatmul.mubr.msk.f32.vlgmr.msra.gmra.mrb[4].mxu1 %vm557_vm11, %v17002_v15  ;;  %v8881_v15 = vcombine.high %v16637_v0, %v16645_v13  ;;  %v8861_v0 = vcombine.high %v8843_v52, %v22854_v12  ;;  %v8879_v13 = vrot.slane %v8865_v26, %v15305_v28  ;;  %v17155_v26 = vrot.slane %v9380_v61, %v15317_v36 }
 0x2f7   : > { %8680 = vmatprep.mubr.f32.mxu1 %v22854_v12  ;;  %v8963_v34 = vrot.slane %v8949_v51, %v15305_v28 }
 0x2f8   : > { %v8895_v41 = vrot.slane %v8881_v15, %v15305_v28  ;;  %v9288_v15 = vrot.slane %v9280_v49, %v15305_v28  ;;  %22904 = vst [vmem:[#allocation9_spill] sm:$0xff] %v17155_v26  ;;  %v9412_v20 = vcombine.high %v17155_v26, %v22854_v12  ;;  %v22912_v49 = vld [vmem:[#allocation3_spill] sm:$0xff] }
 0x2f9   : > { %8572 = vrot.lane.b32.xlu1 %v8505_v19, %s15157_s11  ;;  %8576 = vrot.lane.b32.xlu0 %v8503_v39, %s15175_s23  ;;  %v17140_v39 = vrot.slane %v8964_v47, %v15317_v36  ;;  %v8980_v16 = vcombine.low %v8947_v9, %v8963_v34 }
 0x2fa   : > { %v8912_v35 = vcombine.low %v8879_v13, %v8895_v41  ;;  %v8913_v37 = vcombine.high %v8879_v13, %v8895_v41  ;;  %v9313_v41 = vcombine.high %v9288_v15, %v9304_v18 }
 0x2fb   : > { %v8988_v38 = vcombine.high %v17140_v39, %v22854_v12 }
 0x2fc   : > { %v8920_v45 = vrot.slane %v8912_v35, %v15317_v36  ;;  %v8927_v6 = vrot.slane %v8913_v37, %v15317_v36  ;;  %v9349_v35 = vcombine.high %v16692_v56, %v16709_v40  ;;  %v9327_v17 = vrot.slane %v9313_v41, %v15317_v36  ;;  %v22906_v37 = vld [vmem:[#allocation14_spill] sm:$0xff] }
 0x2fd   : > { %9024 = vrot.lane.b32.xlu1 %v8911_v60, %s15174_s20  ;;  %9028 = vrot.lane.b32.xlu0 %v8929_v14, %s15157_s11  ;;  %v8979_v60 = vrot.slane %v8965_v2, %v15317_v36  ;;  %v9312_v14 = vcombine.low %v9288_v15, %v9304_v18  ;;  %v9297_v40 = vcombine.high %v16746_v54, %v16756_v3  ;;  %v22908_v3 = vld [vmem:[#allocation11_spill] sm:$0xff]  ;;  %v22910_v2 = vld [vmem:[#allocation6_spill] sm:$0xff] }
 0x2fe   : > { %v8930_v33 = vcombine.high %v8920_v45, %v22854_v12  ;;  %v8931_v19 = vcombine.high %v8927_v6, %v22854_v12  ;;  %v9363_v30 = vrot.slane %v9349_v35, %v15305_v28  ;;  %v9432_v21 = vcombine.low %v22907_v10, %v22906_v37 }
 0x2ff   : > { %v17166_v13 = vrot.slane %v9312_v14, %v15317_v36  ;;  %v9311_v7 = vrot.slane %v9297_v40, %v15305_v28  ;;  %v9848_v5 = vcombine.low %v22910_v2, %v16810_v48 }
 0x301   : > { %8996 = vrot.lane.b32.xlu1 %v8843_v52, %s15174_s20  ;;  %9000 = vrot.lane.b32.xlu0 %v8861_v0, %s15157_s11  ;;  %v8989_v52 = vcombine.high %v8979_v60, %v22854_v12  ;;  %v9395_v0 = vrot.slane %v9381_v44, %v15317_v36  ;;  %22905 = vst [vmem:[#allocation18_spill] sm:$0xff] %v17166_v13 }
 0x302   : > { %v9344_v8 = vcombine.high %v17166_v13, %v22854_v12 }
 0x305   : > { %8580 = vrot.lane.b32.xlu1 %v8506_v11, %s15176_s25  ;;  %9004 = vrot.lane.b32.xlu0 %v8852_v29, %s15175_s23  ;;  %v9379_v11 = vrot.slane %v9365_v57, %v15305_v28  ;;  %v8987_v29 = vrot.slane %v8980_v16, %v15317_v36  ;;  %v22915_v16 = vld [vmem:[#allocation8_spill] sm:$0xff]  ;;  %v22916_v57 = vld [vmem:[#allocation5_spill] sm:$0xff] }
 0x306   : > { %v9764_v41 = vcombine.low %v22916_v57, %v22915_v16 }
 0x307   : > { %v9396_v56 = vcombine.low %v9363_v30, %v9379_v11  ;;  %v8990_v43 = vcombine.high %v8987_v29, %v22854_v12 }
 0x309   : > { %9032 = vrot.lane.b32.xlu1 %v8920_v45, %s15175_s23  ;;  %9008 = vrot.lane.b32.xlu0 %v8862_v23, %s15176_s25  ;;  %v9281_v45 = vcombine.high %v22903_v25, %v16737_v50  ;;  %v9404_v23 = vrot.slane %v9396_v56, %v15317_v36  ;;  %v9397_v50 = vcombine.high %v9363_v30, %v9379_v11  ;;  %v22911_v25 = vld [vmem:[#allocation13_spill] sm:$0xff] }
 0x30a   : > { %v9832_v51 = vcombine.low %v22912_v49, %v22911_v25 }
 0x30b   : > { %v9295_v54 = vrot.slane %v9281_v45, %v15305_v28  ;;  %v9414_v31 = vcombine.high %v9404_v23, %v22854_v12  ;;  %v9411_v61 = vrot.slane %v9397_v50, %v15317_v36  ;;  %v17239_v45 = vrot.slane %v9764_v41, %v15305_v28 }
 0x30c   : > { %v9840_v9 = vrot.slane %v9832_v51, %v15305_v28 }
 0x30d   : > { %9036 = vrot.lane.b32.xlu1 %v8930_v33, %s15176_s25  ;;  %9012 = vrot.lane.b32.xlu0 %v8859_v62, %s15177_s26  ;;  %v9413_v33 = vcombine.high %v9395_v0, %v22854_v12  ;;  %v22909_v62 = vld [vmem:[#allocation12_spill] sm:$0xff]  ;;  %v9328_v47 = vcombine.low %v9295_v54, %v9311_v7  ;;  %v9329_v14 = vcombine.high %v9295_v54, %v9311_v7 }
 0x30e   : > { %v9416_v22 = vcombine.low %v22909_v62, %v22908_v3 }
 0x30f   : > { %v9336_v44 = vrot.slane %v9328_v47, %v15317_v36  ;;  %v9343_v56 = vrot.slane %v9329_v14, %v15317_v36 }
 0x310   : > { %v9424_v58 = vrot.slane %v9416_v22, %v15305_v28 }
 0x311   : > { %9040 = vrot.lane.b32.xlu1 %v8927_v6, %s15177_s26  ;;  %9016 = vrot.lane.b32.xlu0 %v8863_v46, %s15178_s27  ;;  %v9440_v6 = vrot.slane %v9432_v21, %v15305_v28  ;;  %v9345_v46 = vcombine.high %v9327_v17, %v22854_v12 }
 0x313   : > { %v9448_v18 = vcombine.low %v9424_v58, %v9440_v6 }
 0x315   : > { %9044 = vrot.lane.b32.xlu1 %v8931_v19, %s15178_s27  ;;  %9052 = vrot.lane.b32.xlu0 %v8979_v60, %s15174_s20  ;;  %v17211_v19 = vrot.slane %v9848_v5, %v15305_v28  ;;  %v22913_v60 = vld [vmem:[#allocation17_spill] sm:$0xff]  ;;  %v17234_v30 = vrot.slane %v9448_v18, %v15317_v36 }
 0x316   : > { %v9780_v15 = vcombine.low %v22914_v59, %v22913_v60 }
 0x317   : > { %v9864_v35 = vcombine.low %v9840_v9, %v17211_v19  ;;  %22917 = vst [vmem:[#allocation14_spill] sm:$0xff] %v17234_v30  ;;  %v9472_v54 = vcombine.high %v17234_v30, %v22854_v12  ;;  %v9865_v51 = vcombine.high %v9840_v9, %v17211_v19 }
 0x318   : > { %v17230_v11 = vrot.slane %v9780_v15, %v15305_v28 }
 0x319   : > { %9048 = vrot.lane.b32.xlu1 %v8988_v38, %s15173_s19  ;;  %9056 = vrot.lane.b32.xlu0 %v8989_v52, %s15157_s11  ;;  %v9433_v52 = vcombine.high %v22907_v10, %v22906_v37 }
 0x31a   : > { %v9796_v10 = vcombine.low %v17239_v45, %v17230_v11 }
 0x31b   : > { %v9447_v40 = vrot.slane %v9433_v52, %v15305_v28 }
 0x31d   : > { %9504 = vrot.lane.b32.xlu1 %v9412_v20, %s15173_s19  ;;  %9508 = vrot.lane.b32.xlu0 %v9395_v0, %s15174_s20  ;;  %v9417_v20 = vcombine.high %v22909_v62, %v22908_v3  ;;  %v9415_v0 = vcombine.high %v9411_v61, %v22854_v12  ;;  %v17249_v3 = vrot.slane %v9864_v35, %v15317_v36 }
 0x31f   : > { %v9431_v37 = vrot.slane %v9417_v20, %v15305_v28  ;;  %22918 = vst [vmem:[#allocation4_spill] sm:$0xff] %v17249_v3 }
 0x321   : > { %9476 = vrot.lane.b32.xlu1 %v9344_v8, %s15173_s19  ;;  %9480 = vrot.lane.b32.xlu0 %v9327_v17, %s15174_s20  ;;  %v9464_v50 = vcombine.low %v9431_v37, %v9447_v40 }
 0x323   : > { %v17273_v9 = vrot.slane %v9464_v50, %v15317_v36 }
 0x325   : > { %9060 = vrot.lane.b32.xlu1 %v8987_v29, %s15175_s23  ;;  %9064 = vrot.lane.b32.xlu0 %v8990_v43, %s15176_s25  ;;  %v9346_v29 = vcombine.high %v9336_v44, %v22854_v12  ;;  %v9449_v43 = vcombine.high %v9424_v58, %v9440_v6 }
 0x327   : > { %v9463_v47 = vrot.slane %v9449_v43, %v15317_v36 }
 0x329   : > { %9512 = vrot.lane.b32.xlu1 %v9413_v33, %s15157_s11  ;;  %9516 = vrot.lane.b32.xlu0 %v9404_v23, %s15175_s23  ;;  %v9473_v19 = vcombine.high %v9463_v47, %v22854_v12 }
 0x32d   : > { %9484 = vrot.lane.b32.xlu1 %v9345_v46, %s15157_s11  ;;  %9520 = vrot.lane.b32.xlu0 %v9414_v31, %s15176_s25  ;;  %v9347_v31 = vcombine.high %v9343_v56, %v22854_v12 }
 0x32f   : > { %v17215_v34 = vpop.permute.xlu1 %3167  ;;  %v3173_v38 = vpop.permute.xlu0 %3172 }
 0x331   : > { %9488 = vrot.lane.b32.xlu1 %v9336_v44, %s15175_s23  ;;  %9524 = vrot.lane.b32.xlu0 %v9411_v61, %s15177_s26  ;;  %v17266_v44 = vrot.slane %v9796_v10, %v15317_v36 }
 0x333   : > { %v3176_v8 = vpop.permute.xlu1 %3175  ;;  %v3179_v17 = vpop.permute.xlu0 %3178  ;;  %22919 = vst [vmem:[#allocation11_spill] sm:$0xff] %v17266_v44 }
 0x334   : > { %v3352_v23 = vcombine.low %v3173_v38, %v3179_v17  ;;  %v3353_v7 = vcombine.high %v3173_v38, %v3179_v17  ;;  %v9896_v38 = vcombine.high %v17249_v3, %v22854_v12 }
 0x335   : > { %9492 = vrot.lane.b32.xlu1 %v9346_v29, %s15176_s25  ;;  %9528 = vrot.lane.b32.xlu0 %v9415_v0, %s15178_s27  ;;  %v9797_v29 = vcombine.high %v17239_v45, %v17230_v11 }
 0x336   : > { %v3360_v6 = vrot.slane %v3352_v23, %v15305_v28  ;;  %v3367_v5 = vrot.slane %v3353_v7, %v15305_v28  ;;  %v9828_v23 = vcombine.high %v17266_v44, %v22854_v12  ;;  %v17293_v7 = vrot.slane %v9865_v51, %v15317_v36 }
 0x337   : > { %v3182_v21 = vpop.permute.xlu1 %3181  ;;  %v3133_v33 = vpop.permute.xlu0 %3132 }
 0x338   : > { %v3368_v62 = vcombine.low %v3176_v8, %v3182_v21  ;;  %v3369_v22 = vcombine.high %v3176_v8, %v3182_v21  ;;  %v3184_v61 = vcombine.low %v16913_v27, %v3133_v33  ;;  %v3185_v0 = vcombine.high %v16913_v27, %v3133_v33 }
 0x339   : > { %9496 = vrot.lane.b32.xlu1 %v9343_v56, %s15177_s26  ;;  %9532 = vrot.lane.b32.xlu0 %v9472_v54, %s15173_s19 }
 0x33a   : > { %v3376_v46 = vrot.slane %v3368_v62, %v15305_v28  ;;  %v3383_v58 = vrot.slane %v3369_v22, %v15305_v28  ;;  %v3192_v56 = vrot.slane %v3184_v61, %v15305_v28  ;;  %v3199_v11 = vrot.slane %v3185_v0, %v15305_v28 }
 0x33b   : > { %v3130_v18 = vpop.permute.xlu1 %3129  ;;  %v17261_v15 = vpop.permute.xlu0 %3138  ;;  %v17316_v61 = vrot.slane %v9797_v29, %v15317_v36 }
 0x33c   : > { %v3416_v14 = vcombine.low %v3360_v6, %v3376_v46  ;;  %v3417_v52 = vcombine.high %v3360_v6, %v3376_v46  ;;  %v3432_v41 = vcombine.low %v3367_v5, %v3383_v58  ;;  %v3433_v20 = vcombine.high %v3367_v5, %v3383_v58  ;;  %v22920_v6 = vld [vmem:[#allocation16_spill] sm:$0xff] }
 0x33d   : > { %9500 = vrot.lane.b32.xlu1 %v9347_v31, %s15178_s27  ;;  %9988 = vrot.lane.b32.xlu0 %v9896_v38, %s15173_s19 }
 0x33e   : > { %v17276_v35 = vrot.slane %v3416_v14, %v15317_v36  ;;  %v17279_v8 = vrot.slane %v3417_v52, %v15317_v36  ;;  %v17282_v17 = vrot.slane %v3432_v41, %v15317_v36  ;;  %v17285_v27 = vrot.slane %v3433_v20, %v15317_v36 }
 0x33f   : > { %v3136_v40 = vpop.permute.xlu1 %3135  ;;  %v3145_v43 = vpop.permute.xlu0 %3144 }
 0x340   : > { %v3200_v37 = vcombine.low %v3130_v18, %v3136_v40  ;;  %v3201_v10 = vcombine.high %v3130_v18, %v3136_v40  ;;  %v14810_v21 = vcombine.low %v17276_v35, %v17279_v8  ;;  %v14812_v33 = vcombine.high %v17276_v35, %v17279_v8 }
 0x341   : > { %9536 = vrot.lane.b32.xlu1 %v9463_v47, %s15174_s20  ;;  %9960 = vrot.lane.b32.xlu0 %v9828_v23, %s15173_s19  ;;  %v14814_v45 = vcombine.low %v17282_v17, %v17285_v27  ;;  %v14816_v54 = vcombine.high %v17282_v17, %v17285_v27  ;;  %v8590_v47 = vsel %vm3784_vm4, %v22920_v6, %v17018_v53 }
 0x342   : > { %v3208_v62 = vrot.slane %v3200_v37, %v15305_v28  ;;  %v3215_v22 = vrot.slane %v3201_v10, %v15305_v28  ;;  %v3607_v50 = vrot.slane %v14810_v21, %v15305_v28  ;;  %v3623_v31 = vrot.slane %v14812_v33, %v15305_v28 }
 0x343   : > { %v3143_v5 = vpop.permute.xlu1 %3142  ;;  %v3153_v46 = vpop.permute.xlu0 %3152  ;;  %v3639_v58 = vrot.slane %v14814_v45, %v15305_v28  ;;  %v3655_v51 = vrot.slane %v14816_v54, %v15305_v28 }
 0x344   : > { %v3248_v18 = vcombine.low %v3192_v56, %v3208_v62  ;;  %v3249_v38 = vcombine.high %v3192_v56, %v3208_v62  ;;  %v3264_v14 = vcombine.low %v3199_v11, %v3215_v22  ;;  %v3265_v52 = vcombine.high %v3199_v11, %v3215_v22 }
 0x345   : > { %v3147_v41 = vsel %vm3146_vm1, %v3143_v5, %v3145_v43  ;;  %9540 = vrot.lane.b32.xlu1 %v9473_v19, %s15157_s11  ;;  %9544 = vrot.lane.b32.xlu0 %v17273_v9, %s15175_s23  ;;  %v3672_v53 = vcombine.low %v3607_v50, %v3623_v31  ;;  %v3704_v20 = vcombine.low %v3639_v58, %v3655_v51 }
 0x346   : > { %v17323_v0 = vrot.slane %v3248_v18, %v15317_v36  ;;  %v17326_v29 = vrot.slane %v3249_v38, %v15317_v36  ;;  %v17329_v56 = vrot.slane %v3264_v14, %v15317_v36  ;;  %v17332_v40 = vrot.slane %v3265_v52, %v15317_v36 }
 0x347   : > { %v3232_v43 = vcombine.low %v3147_v41, %v3153_v46  ;;  %v3233_v19 = vcombine.high %v3147_v41, %v3153_v46  ;;  %v3150_v23 = vpop.permute.xlu1 %3149  ;;  %v3159_v37 = vpop.permute.xlu0 %3158  ;;  %v3680_v10 = vrot.slane %v3672_v53, %v15317_v36  ;;  %v3712_v21 = vrot.slane %v3704_v20, %v15317_v36 }
 0x348   : > { %v3216_v33 = vcombine.low %v17261_v15, %v3150_v23  ;;  %v3217_v11 = vcombine.high %v17261_v15, %v3150_v23  ;;  %v3673_v45 = vcombine.high %v3607_v50, %v3623_v31  ;;  %v3705_v54 = vcombine.high %v3639_v58, %v3655_v51 }
 0x349   : > { %v8591_v62 = vsel %vm3786_vm5, %v8590_v47, %v17041_v42  ;;  %v3240_v22 = vrot.slane %v3232_v43, %v15305_v28  ;;  %v3247_v6 = vrot.slane %v3233_v19, %v15305_v28  ;;  %9992 = vrot.lane.b32.xlu1 %v17293_v7, %s15174_s20  ;;  %v3724_v5 = vcombine.low %v3680_v10, %v3712_v21 }
 0x34a   : > { %v3224_v46 = vrot.slane %v3216_v33, %v15305_v28  ;;  %v3231_v18 = vrot.slane %v3217_v11, %v15305_v28  ;;  %v17347_v38 = vrot.slane %v3673_v45, %v15317_v36  ;;  %v17350_v15 = vrot.slane %v3705_v54, %v15317_v36 }
 0x34b   : > { %3769 = vrot.lane.b32.xlu0 %v3724_v5, %s15175_s23  ;;  %v3156_v42 = vpop.permute.xlu1 %3155  ;;  %v3166_v50 = vpop.permute.xlu0 %3165  ;;  %v14801_v31 = vcombine.low %v17323_v0, %v17326_v29  ;;  %v14803_v47 = vcombine.high %v17323_v0, %v17326_v29  ;;  %v14805_v58 = vcombine.low %v17329_v56, %v17332_v40  ;;  %v14807_v51 = vcombine.high %v17329_v56, %v17332_v40 }
 0x34c   : > { %22921 = vst [vmem:[#allocation12_spill] sm:$0xff] %v17347_v38  ;;  %22922 = vst [vmem:[#allocation6_spill] sm:$0xff] %v17350_v15  ;;  %v3280_v14 = vcombine.low %v3224_v46, %v3240_v22  ;;  %v3281_v52 = vcombine.high %v3224_v46, %v3240_v22  ;;  %v3296_v41 = vcombine.low %v3231_v18, %v3247_v6 }
 0x34d   : > { %v3297_v53 = vcombine.high %v3231_v18, %v3247_v6  ;;  %v3170_v20 = vsel %vm3169_vm2, %v3166_v50, %v17215_v34  ;;  %9964 = vrot.lane.b32.xlu1 %v17316_v61, %s15174_s20  ;;  %v3726_v43 = vcombine.low %v17347_v38, %v17350_v15  ;;  %v3464_v19 = vrot.slane %v14801_v31, %v15305_v28 }
 0x34e   : > { %v3480_v23 = vrot.slane %v14803_v47, %v15305_v28  ;;  %v17370_v33 = vrot.slane %v3280_v14, %v15317_v36  ;;  %v17373_v11 = vrot.slane %v3281_v52, %v15317_v36  ;;  %v17376_v45 = vrot.slane %v3296_v41, %v15317_v36 }
 0x34f   : > { %v3725_v34 = vcombine.high %v3680_v10, %v3712_v21  ;;  %v3336_v54 = vcombine.low %v3159_v37, %v3170_v20  ;;  %v3337_v22 = vcombine.high %v3159_v37, %v3170_v20  ;;  %3777 = vrot.lane.b32.xlu0 %v3726_v43, %s15177_s26  ;;  %v3162_v6 = vpop.permute.xlu1 %3161  ;;  %v8549_v5 = vpop.permute.xlu0 %8548  ;;  %v3496_v46 = vrot.slane %v14805_v58, %v15305_v28 }
 0x350   : > { %v3512_v18 = vrot.slane %v14807_v51, %v15305_v28  ;;  %v17382_v50 = vrot.slane %v3297_v53, %v15317_v36  ;;  %v3320_v31 = vcombine.low %v3156_v42, %v3162_v6  ;;  %v3321_v47 = vcombine.high %v3156_v42, %v3162_v6 }
 0x351   : > { %v3520_v14 = vcombine.low %v3464_v19, %v3480_v23  ;;  %v3344_v52 = vrot.slane %v3336_v54, %v15305_v28  ;;  %v3351_v10 = vrot.slane %v3337_v22, %v15305_v28  ;;  %3773 = vrot.lane.b32.xlu1 %v3725_v34, %s15176_s25  ;;  %v3521_v21 = vcombine.high %v3464_v19, %v3480_v23 }
 0x352   : > { %v3552_v37 = vcombine.low %v3496_v46, %v3512_v18  ;;  %v3328_v41 = vrot.slane %v3320_v31, %v15305_v28  ;;  %v3335_v58 = vrot.slane %v3321_v47, %v15305_v28  ;;  %v3553_v53 = vcombine.high %v3496_v46, %v3512_v18  ;;  %v22923_v47 = vld [vmem:[#allocation10_spill] sm:$0xff] }
 0x353   : > { %v17390_v51 = vrot.slane %v3520_v14, %v15317_v36  ;;  %v8517_v42 = vpop.permute.xlu1 %8516  ;;  %v8553_v43 = vpop.permute.xlu0 %8552  ;;  %v3535_v54 = vrot.slane %v3521_v21, %v15317_v36  ;;  %v14802_v34 = vcombine.low %v17370_v33, %v17373_v11  ;;  %v14804_v19 = vcombine.high %v17370_v33, %v17373_v11 }
 0x354   : > { %v17393_v20 = vrot.slane %v3552_v37, %v15317_v36  ;;  %v3384_v23 = vcombine.low %v3328_v41, %v3344_v52  ;;  %v3385_v22 = vcombine.high %v3328_v41, %v3344_v52  ;;  %v3400_v6 = vcombine.low %v3335_v58, %v3351_v10 }
 0x355   : > { %v3401_v31 = vcombine.high %v3335_v58, %v3351_v10  ;;  %v8583_v46 = vsel %vm3784_vm4, %v22923_v47, %v17035_v4  ;;  %v8592_v18 = vsel %vm561_vm15, %v8591_v62, %v17201_v63  ;;  %v3567_v37 = vrot.slane %v3553_v53, %v15317_v36 }
 0x356   : > { %v3585_v14 = vcombine.high %v17390_v51, %v17393_v20  ;;  %v17409_v21 = vrot.slane %v3384_v23, %v15317_v36  ;;  %v17412_v44 = vrot.slane %v3385_v22, %v15317_v36  ;;  %v17415_v52 = vrot.slane %v3400_v6, %v15317_v36 }
 0x357   : > { %v17418_v10 = vrot.slane %v3401_v31, %v15317_v36  ;;  %v8593_v4 = vsel %vm3789_vm9, %v8592_v18, %v8549_v5  ;;  %v3586_v63 = vcombine.low %v3535_v54, %v3567_v37  ;;  %v8521_v62 = vpop.permute.xlu1 %8520  ;;  %v8557_v41 = vpop.permute.xlu0 %8556  ;;  %v3471_v58 = vrot.slane %v14802_v34, %v15305_v28 }
 0x358   : > { %3729 = vrot.lane.b32.xlu0 %v3585_v14, %s15173_s19  ;;  %v3487_v53 = vrot.slane %v14804_v19, %v15305_v28  ;;  %v8584_v23 = vsel %vm3786_vm5, %v8583_v46, %v17057_v32  ;;  %v8594_v22 = vsel %vm3791_vm10, %v8593_v4, %v8553_v43  ;;  %v14806_v6 = vcombine.low %v17376_v45, %v17382_v50 }
 0x359   : > { %22924 = vst [vmem:[#allocation13_spill] sm:$0xff] %v17418_v10  ;;  %v14808_v5 = vcombine.high %v17376_v45, %v17382_v50  ;;  %3733 = vrot.lane.b32.xlu1 %v3586_v63, %s15174_s20  ;;  %v3587_v31 = vcombine.high %v3535_v54, %v3567_v37  ;;  %v14809_v34 = vcombine.low %v17409_v21, %v17412_v44 }
 0x35a   : > { %v3536_v47 = vcombine.low %v3471_v58, %v3487_v53  ;;  %v14811_v19 = vcombine.high %v17409_v21, %v17412_v44  ;;  %v3503_v32 = vrot.slane %v14806_v6, %v15305_v28  ;;  %v14813_v46 = vcombine.low %v17415_v52, %v17418_v10 }
 0x35b   : > { %v3519_v43 = vrot.slane %v14808_v5, %v15305_v28  ;;  %v14815_v18 = vcombine.high %v17415_v52, %v17418_v10  ;;  %v8595_v54 = vsel %vm3793_vm14, %v8594_v22, %v8557_v41  ;;  %v8525_v14 = vpop.permute.xlu1 %8524  ;;  %v8561_v37 = vpop.permute.xlu0 %8560  ;;  %v3537_v4 = vcombine.high %v3471_v58, %v3487_v53 }
 0x35c   : > { %3737 = vrot.lane.b32.xlu0 %v3587_v31, %s15157_s11  ;;  %v3600_v63 = vrot.slane %v14809_v34, %v15305_v28  ;;  %v3616_v3 = vrot.slane %v14811_v19, %v15305_v28  ;;  %v3544_v6 = vrot.slane %v3536_v47, %v15317_v36  ;;  %v8596_v30 = vsel %vm3795_vm0, %v8595_v54, %v8561_v37 }
 0x35d   : > { %v3568_v5 = vcombine.low %v3503_v32, %v3519_v43  ;;  %v3569_v13 = vcombine.high %v3503_v32, %v3519_v43  ;;  %14848 = vmatprep.subr.msk.mxu1 %vm835_vm6, %v8596_v30  ;;  %v3632_v26 = vrot.slane %v14813_v46, %v15305_v28  ;;  %v3648_v31 = vrot.slane %v14815_v18, %v15305_v28 }
 0x35e   : > { %v3657_v41 = vcombine.high %v3600_v63, %v3616_v3  ;;  %v3656_v22 = vcombine.low %v3600_v63, %v3616_v3  ;;  %v8585_v58 = vsel %vm561_vm15, %v8584_v23, %v8517_v42  ;;  %v3551_v34 = vrot.slane %v3537_v4, %v15317_v36 }
 0x35f   : > { %v3576_v53 = vrot.slane %v3568_v5, %v15317_v36  ;;  %v3583_v47 = vrot.slane %v3569_v13, %v15317_v36  ;;  %v8529_v19 = vpop.permute.xlu1 %8528  ;;  %v17455_v10 = vpop.permute.xlu0 %8564  ;;  %v3689_v32 = vcombine.high %v3632_v26, %v3648_v31  ;;  %v3688_v43 = vcombine.low %v3632_v26, %v3648_v31 }
 0x360   : > { %v3671_v46 = vrot.slane %v3657_v41, %v15317_v36  ;;  %v17459_v18 = vrot.slane %v3656_v22, %v15317_v36  ;;  %v8586_v3 = vsel %vm3789_vm9, %v8585_v58, %v8521_v62  ;;  %v17478_v41 = vld [vmem:[%s22413_s3 + $0x18] sm:$0xff]  ;;  %v17487_v22 = vcombine.high %v17323_v0, %v17370_v33 }
 0x361   : > { %v3589_v30 = vcombine.high %v3544_v6, %v3576_v53  ;;  %v3588_v54 = vcombine.low %v3544_v6, %v3576_v53  ;;  %v3703_v42 = vrot.slane %v3689_v32, %v15317_v36  ;;  %v17464_v23 = vrot.slane %v3688_v43, %v15317_v36 }
 0x362   : > { %v8587_v26 = vsel %vm3791_vm10, %v8586_v3, %v8525_v14  ;;  %v3591_v13 = vcombine.high %v3551_v34, %v3583_v47  ;;  %v3590_v6 = vcombine.low %v3551_v34, %v3583_v47  ;;  %v17483_v14 = vcombine.low %v17323_v0, %v17370_v33 }
 0x363   : > { %3745 = vrot.lane.b32.xlu0 %v3589_v30, %s15176_s25  ;;  %3741 = vrot.lane.b32.xlu1 %v3588_v54, %s15175_s23  ;;  %v8588_v37 = vsel %vm3793_vm14, %v8587_v26, %v8529_v19  ;;  %v8533_v4 = vpop.permute.xlu1 %8532  ;;  %v17470_v63 = vpop.permute.xlu0 %9020  ;;  %v3722_v5 = vcombine.low %v3671_v46, %v3703_v42  ;;  %v3721_v62 = vcombine.high %v17459_v18, %v17464_v23 }
 0x364   : > { %v8589_v31 = vsel %vm3795_vm0, %v8588_v37, %v8533_v4  ;;  %v17491_v58 = vcombine.low %v17326_v29, %v17373_v11  ;;  %v17495_v53 = vcombine.high %v17326_v29, %v17373_v11  ;;  %v17501_v34 = vcombine.low %v17329_v56, %v17376_v45 }
 0x365   : > { %14849 = vmatpush1.msk.msra.mxu1 %vm835_vm6, %v8589_v31  ;;  %v17505_v0 = vcombine.high %v17329_v56, %v17376_v45  ;;  %v17509_v33 = vcombine.low %v17332_v40, %v17382_v50  ;;  %v17518_v29 = vcombine.high %v17332_v40, %v17382_v50  ;;  %v9849_v45 = vcombine.high %v22910_v2, %v16810_v48 }
 0x366   : > { %14982 = vmatprep.subr.mxu1 %v22854_v12  ;;  %14850 = vmatmul.mubr.msk.f32.vlgmr.msra.gmra.mrb[2].mxu1 %vm557_vm11, %v17478_v41  ;;  %v9781_v32 = vcombine.high %v22914_v59, %v22913_v60  ;;  %v9833_v40 = vcombine.high %v22912_v49, %v22911_v25  ;;  %v9765_v50 = vcombine.high %v22916_v57, %v22915_v16 }
 0x367   : > { %3753 = vrot.lane.b32.xlu0 %v3591_v13, %s15178_s27  ;;  %3749 = vrot.lane.b32.xlu1 %v3590_v6, %s15177_s26  ;;  %v8569_v47 = vpop.permute.xlu1 %8568  ;;  %v17511_v19 = vpop.permute.xlu0 %8992  ;;  %v9863_v60 = vrot.slane %v9849_v45, %v15305_v28  ;;  %v9897_v30 = vcombine.high %v17293_v7, %v22854_v12  ;;  %v3723_v54 = vcombine.high %v3671_v46, %v3703_v42  ;;  %v22925_v6 = vld [vmem:[#allocation21_spill] sm:$0xff]  ;;  %v22927_v45 = vld [vmem:[#allocation19_spill] sm:$0xff] }
 0x368   : > { %14984 = vmatprep.mubr.msk.f32.mxu1 %vm15166_vm8, %v22854_v12  ;;  %v9795_v59 = vrot.slane %v9781_v32, %v15305_v28  ;;  %v9847_v3 = vrot.slane %v9833_v40, %v15305_v28  ;;  %v9779_v25 = vrot.slane %v9765_v50, %v15305_v28  ;;  %v9829_v13 = vcombine.high %v17316_v61, %v22854_v12  ;;  %v22928_v32 = vld [vmem:[#allocation15_spill] sm:$0xff] }
 0x369   : > { %v9474_v37 = vcombine.high %v17273_v9, %v22854_v12  ;;  %v8597_v7 = vsel %vm3784_vm4, %v17032_v55, %v17455_v10  ;;  %v9900_v55 = vcombine.low %v22928_v32, %v22927_v45 }
 0x36a   : > { %v9880_v57 = vcombine.low %v9847_v3, %v9863_v60  ;;  %v9812_v26 = vcombine.low %v9779_v25, %v9795_v59  ;;  %v8598_v46 = vsel %vm3786_vm5, %v8597_v7, %v8569_v47  ;;  %v9881_v10 = vcombine.high %v9847_v3, %v9863_v60 }
 0x36b   : > { %3761 = vrot.lane.b32.xlu0 %v3722_v5, %s15174_s20  ;;  %3757 = vrot.lane.b32.xlu1 %v3721_v62, %s15173_s19  ;;  %v8573_v48 = vpop.permute.xlu1 %8572  ;;  %v8577_v2 = vpop.permute.xlu0 %8576  ;;  %v22926_v5 = vld [vmem:[#allocation20_spill] sm:$0xff]  ;;  %v9813_v47 = vcombine.high %v9779_v25, %v9795_v59  ;;  %v9901_v7 = vcombine.high %v22928_v32, %v22927_v45 }
 0x36c   : > { %v9916_v62 = vcombine.low %v22926_v5, %v22925_v6  ;;  %v8599_v61 = vsel %vm561_vm15, %v8598_v46, %v8573_v48  ;;  %v9820_v31 = vrot.slane %v9812_v26, %v15317_v36  ;;  %v9888_v9 = vrot.slane %v9880_v57, %v15317_v36 }
 0x36d   : > { %v8600_v40 = vsel %vm3789_vm9, %v8599_v61, %v8577_v2  ;;  %v9827_v2 = vrot.slane %v9813_v47, %v15317_v36  ;;  %v9895_v60 = vrot.slane %v9881_v10, %v15317_v36  ;;  %v9917_v25 = vcombine.high %v22926_v5, %v22925_v6 }
 0x36e   : > { %v9830_v48 = vcombine.high %v9820_v31, %v22854_v12  ;;  %v9898_v26 = vcombine.high %v9888_v9, %v22854_v12  ;;  %v9074_v6 = vsel %vm3784_vm4, %v17047_v1, %v17470_v63  ;;  %v9915_v32 = vrot.slane %v9901_v7, %v15305_v28 }
 0x36f   : > { %9996 = vrot.lane.b32.xlu0 %v9897_v30, %s15157_s11  ;;  %3765 = vrot.lane.b32.xlu1 %v3723_v54, %s15157_s11  ;;  %v9025_v49 = vpop.permute.xlu1 %9024  ;;  %v9029_v16 = vpop.permute.xlu0 %9028  ;;  %v9924_v54 = vrot.slane %v9916_v62, %v15305_v28  ;;  %v9831_v46 = vcombine.high %v9827_v2, %v22854_v12  ;;  %v9899_v62 = vcombine.high %v9895_v60, %v22854_v12 }
 0x370   : > { %v9075_v45 = vsel %vm3786_vm5, %v9074_v6, %v9025_v49  ;;  %v17629_v7 = vcombine.low %v17409_v21, %v17276_v35 }
 0x371   : > { %v9076_v63 = vsel %vm561_vm15, %v9075_v45, %v9029_v16 }
 0x373   : > { %9968 = vrot.lane.b32.xlu0 %v9829_v13, %s15157_s11  ;;  %9548 = vrot.lane.b32.xlu1 %v9474_v37, %s15176_s25  ;;  %v8997_v42 = vpop.permute.xlu1 %8996  ;;  %v9001_v4 = vpop.permute.xlu0 %9000  ;;  %v9908_v13 = vrot.slane %v9900_v55, %v15305_v28  ;;  %v9067_v55 = vsel %vm3784_vm4, %v17065_v24, %v17511_v19 }
 0x374   : > { %v9068_v10 = vsel %vm3786_vm5, %v9067_v55, %v8997_v42 }
 0x375   : > { %v9932_v37 = vcombine.low %v9908_v13, %v9924_v54  ;;  %v9069_v24 = vsel %vm561_vm15, %v9068_v10, %v9001_v4  ;;  %v17668_v10 = vcombine.high %v17415_v52, %v17282_v17 }
 0x377   : > { %9972 = vrot.lane.b32.xlu0 %v9820_v31, %s15175_s23  ;;  %10000 = vrot.lane.b32.xlu1 %v9888_v9, %s15175_s23  ;;  %v8581_v50 = vpop.permute.xlu1 %8580  ;;  %v9005_v30 = vpop.permute.xlu0 %9004  ;;  %v9933_v9 = vcombine.high %v9908_v13, %v9924_v54  ;;  %v17592_v5 = vrot.slane %v9932_v37, %v15317_v36 }
 0x378   : > { %v8601_v57 = vsel %vm3791_vm10, %v8600_v40, %v8581_v50  ;;  %v9070_v42 = vsel %vm3789_vm9, %v9069_v24, %v9005_v30  ;;  %v14853_v30 = vld [vmem:[%s22413_s3 + $0x20] sm:$0xff] }
 0x379   : > { %14983 = vmatpush3.msk.msra.mxu1 %vm835_vm6, %v8601_v57  ;;  %v9947_v50 = vrot.slane %v9933_v9, %v15317_v36  ;;  %v9956_v49 = vcombine.high %v17592_v5, %v22854_v12 }
 0x37a   : > { %14985 = vmatmul.mubr.msk.f32.vlgmr.msra.gmra.mrb[4].mxu1 %vm557_vm11, %v17478_v41  ;;  %v9931_v41 = vrot.slane %v9917_v25, %v15305_v28 }
 0x37b   : > { %9976 = vrot.lane.b32.xlu0 %v9830_v48, %s15176_s25  ;;  %10004 = vrot.lane.b32.xlu1 %v9898_v26, %s15176_s25  ;;  %v9033_v59 = vpop.permute.xlu1 %9032  ;;  %v9009_v3 = vpop.permute.xlu0 %9008 }
 0x37c   : > { %9164 = vmatprep.mubr.f32.mxu1 %v22854_v12  ;;  %v9948_v1 = vcombine.low %v9915_v32, %v9931_v41  ;;  %v9077_v54 = vsel %vm3789_vm9, %v9076_v63, %v9033_v59  ;;  %v9071_v57 = vsel %vm3791_vm10, %v9070_v42, %v9009_v3 }
 0x37e   : > { %v9955_v13 = vrot.slane %v9948_v1, %v15317_v36 }
 0x37f   : > { %9980 = vrot.lane.b32.xlu0 %v9827_v2, %s15177_s26  ;;  %10008 = vrot.lane.b32.xlu1 %v9895_v60, %s15177_s26  ;;  %v9037_v61 = vpop.permute.xlu1 %9036  ;;  %v9013_v31 = vpop.permute.xlu0 %9012  ;;  %v9957_v2 = vcombine.high %v9947_v50, %v22854_v12 }
 0x380   : > { %v9078_v19 = vsel %vm3791_vm10, %v9077_v54, %v9037_v61  ;;  %v9072_v60 = vsel %vm3793_vm14, %v9071_v57, %v9013_v31  ;;  %v9958_v37 = vcombine.high %v9955_v13, %v22854_v12  ;;  %v17640_v61 = vcombine.high %v17409_v21, %v17276_v35 }
 0x381   : > { %v17644_v31 = vcombine.low %v17412_v44, %v17279_v8  ;;  %v17655_v35 = vcombine.high %v17412_v44, %v17279_v8  ;;  %v17659_v21 = vcombine.low %v17415_v52, %v17282_v17  ;;  %v22929_v44 = vld [vmem:[#allocation13_spill] sm:$0xff] }
 0x382   : > { %v17672_v8 = vcombine.low %v22929_v44, %v17285_v27  ;;  %v17683_v17 = vcombine.high %v22929_v44, %v17285_v27  ;;  %v22930_v52 = vld [vmem:[#allocation9_spill] sm:$0xff] }
 0x383   : > { %9984 = vrot.lane.b32.xlu0 %v9831_v46, %s15178_s27  ;;  %10012 = vrot.lane.b32.xlu1 %v9899_v62, %s15178_s27  ;;  %v9041_v47 = vpop.permute.xlu1 %9040  ;;  %v9017_v40 = vpop.permute.xlu0 %9016 }
 0x384   : > { %v9079_v48 = vsel %vm3793_vm14, %v9078_v19, %v9041_v47  ;;  %v9073_v59 = vsel %vm3795_vm0, %v9072_v60, %v9017_v40 }
 0x387   : > { %10020 = vrot.lane.b32.xlu0 %v9947_v50, %s15174_s20  ;;  %10016 = vrot.lane.b32.xlu1 %v9956_v49, %s15173_s19  ;;  %v9045_v16 = vpop.permute.xlu1 %9044  ;;  %v9053_v26 = vpop.permute.xlu0 %9052 }
 0x388   : > { %v9080_v4 = vsel %vm3795_vm0, %v9079_v48, %v9045_v16 }
 0x389   : > { %14854 = vmatprep.subr.msk.mxu1 %vm835_vm6, %v9080_v4 }
 0x38a   : > { %14855 = vmatpush1.msk.msra.mxu1 %vm835_vm6, %v9073_v59 }
 0x38b   : > { %10028 = vrot.lane.b32.xlu0 %v9955_v13, %s15175_s23  ;;  %10024 = vrot.lane.b32.xlu1 %v9957_v2, %s15157_s11  ;;  %v9049_v3 = vpop.permute.xlu1 %9048  ;;  %v9057_v25 = vpop.permute.xlu0 %9056  ;;  %v22931_v2 = vld [vmem:[#allocation18_spill] sm:$0xff] }
 0x38c   : > { %14987 = vmatprep.subr.mxu1 %v22854_v12  ;;  %14856 = vmatmul.mubr.msk.f32.vlgmr.msra.gmra.mrb[2].mxu1 %vm557_vm11, %v14853_v30  ;;  %v9081_v41 = vsel %vm3784_vm4, %v17140_v39, %v9049_v3 }
 0x38d   : > { %14989 = vmatprep.mubr.msk.f32.mxu1 %vm15166_vm8, %v22854_v12  ;;  %v9082_v45 = vsel %vm3786_vm5, %v9081_v41, %v9053_v26 }
 0x38e   : > { %v9083_v39 = vsel %vm561_vm15, %v9082_v45, %v9057_v25  ;;  %v17729_v45 = vld [vmem:[%s22413_s3 + $0x28] sm:$0xff] }
 0x38f   : > { %10032 = vrot.lane.b32.xlu1 %v9958_v37, %s15176_s25  ;;  %3823 = vrot.lane.b32.xlu0 %v17629_v7, %s15167_s24  ;;  %v9505_v46 = vpop.permute.xlu1 %9504  ;;  %v9509_v62 = vpop.permute.xlu0 %9508 }
 0x390   : > { %v9558_v50 = vsel %vm3784_vm4, %v22930_v52, %v9505_v46 }
 0x391   : > { %v9559_v24 = vsel %vm3786_vm5, %v9558_v50, %v9509_v62 }
 0x393   : > { %3827 = vrot.lane.b32.xlu1 %v17640_v61, %s15167_s24  ;;  %3831 = vrot.lane.b32.xlu0 %v17644_v31, %s15167_s24  ;;  %v9477_v9 = vpop.permute.xlu1 %9476  ;;  %v9481_v6 = vpop.permute.xlu0 %9480 }
 0x394   : > { %v9551_v4 = vsel %vm3784_vm4, %v22931_v2, %v9477_v9 }
 0x397   : > { %3835 = vrot.lane.b32.xlu1 %v17655_v35, %s15167_s24  ;;  %3839 = vrot.lane.b32.xlu0 %v17659_v21, %s15167_s24  ;;  %v9061_v32 = vpop.permute.xlu1 %9060  ;;  %v9065_v55 = vpop.permute.xlu0 %9064 }
 0x398   : > { %v9084_v47 = vsel %vm3789_vm9, %v9083_v39, %v9061_v32 }
 0x399   : > { %v9085_v40 = vsel %vm3791_vm10, %v9084_v47, %v9065_v55 }
 0x39a   : > { %14988 = vmatpush3.msk.msra.mxu1 %vm835_vm6, %v9085_v40 }
 0x39b   : > { %3843 = vrot.lane.b32.xlu1 %v17668_v10, %s15167_s24  ;;  %3847 = vrot.lane.b32.xlu0 %v17672_v8, %s15167_s24  ;;  %v9513_v1 = vpop.permute.xlu1 %9512  ;;  %v9517_v63 = vpop.permute.xlu0 %9516 }
 0x39c   : > { %14990 = vmatmul.mubr.msk.f32.vlgmr.msra.gmra.mrb[4].mxu1 %vm557_vm11, %v14853_v30  ;;  %v9560_v27 = vsel %vm561_vm15, %v9559_v24, %v9513_v1  ;;  %v9552_v30 = vsel %vm3786_vm5, %v9551_v4, %v9481_v6 }
 0x39d   : > { %9648 = vmatprep.mubr.f32.mxu1 %v22854_v12  ;;  %v9561_v48 = vsel %vm3789_vm9, %v9560_v27, %v9517_v63 }
 0x39f   : > { %3851 = vrot.lane.b32.xlu1 %v17683_v17, %s15167_s24  ;;  %3821 = vrot.lane.b32.xlu0 %v17483_v14, %s15167_s24  ;;  %v9485_v49 = vpop.permute.xlu1 %9484  ;;  %v9521_v54 = vpop.permute.xlu0 %9520 }
 0x3a0   : > { %v9562_v16 = vsel %vm3791_vm10, %v9561_v48, %v9521_v54  ;;  %v9553_v25 = vsel %vm561_vm15, %v9552_v30, %v9485_v49 }
 0x3a3   : > { %3825 = vrot.lane.b32.xlu1 %v17487_v22, %s15167_s24  ;;  %3829 = vrot.lane.b32.xlu0 %v17491_v58, %s15167_s24  ;;  %v9489_v19 = vpop.permute.xlu1 %9488  ;;  %v9525_v42 = vpop.permute.xlu0 %9524 }
 0x3a4   : > { %v9563_v26 = vsel %vm3793_vm14, %v9562_v16, %v9525_v42  ;;  %v9554_v37 = vsel %vm3789_vm9, %v9553_v25, %v9489_v19 }
 0x3a7   : > { %3833 = vrot.lane.b32.xlu1 %v17495_v53, %s15167_s24  ;;  %3837 = vrot.lane.b32.xlu0 %v17501_v34, %s15167_s24  ;;  %v9493_v57 = vpop.permute.xlu1 %9492  ;;  %v9529_v13 = vpop.permute.xlu0 %9528 }
 0x3a8   : > { %v9564_v60 = vsel %vm3795_vm0, %v9563_v26, %v9529_v13  ;;  %v9555_v46 = vsel %vm3791_vm10, %v9554_v37, %v9493_v57  ;;  %v22934_v26 = vld [vmem:[#allocation14_spill] sm:$0xff] }
 0x3a9   : > { %14860 = vmatprep.subr.msk.mxu1 %vm835_vm6, %v9564_v60 }
 0x3ab   : > { %3841 = vrot.lane.b32.xlu1 %v17505_v0, %s15167_s24  ;;  %3845 = vrot.lane.b32.xlu0 %v17509_v33, %s15167_s24  ;;  %v9497_v59 = vpop.permute.xlu1 %9496  ;;  %v9533_v3 = vpop.permute.xlu0 %9532 }
 0x3ac   : > { %v9556_v62 = vsel %vm3793_vm14, %v9555_v46, %v9497_v59  ;;  %v9565_v57 = vsel %vm3784_vm4, %v22934_v26, %v9533_v3 }
 0x3af   : > { %3849 = vrot.lane.b32.xlu1 %v17518_v29, %s15167_s24  ;;  %4363 = vrot.lane.b32.xlu0 %v17629_v7, %s15168_s29  ;;  %v9501_v41 = vpop.permute.xlu1 %9500  ;;  %v17723_v9 = vpop.permute.xlu0 %9988 }
 0x3b0   : > { %v9557_v6 = vsel %vm3795_vm0, %v9556_v62, %v9501_v41 }
 0x3b1   : > { %14861 = vmatpush1.msk.msra.mxu1 %vm835_vm6, %v9557_v6  ;;  %v22935_v6 = vld [vmem:[#allocation4_spill] sm:$0xff] }
 0x3b2   : > { %14992 = vmatprep.subr.mxu1 %v22854_v12  ;;  %14862 = vmatmul.mubr.msk.f32.vlgmr.msra.gmra.mrb[2].mxu1 %vm557_vm11, %v17729_v45 }
 0x3b3   : > { %4367 = vrot.lane.b32.xlu1 %v17640_v61, %s15168_s29  ;;  %4371 = vrot.lane.b32.xlu0 %v17644_v31, %s15168_s29  ;;  %v9537_v39 = vpop.permute.xlu1 %9536  ;;  %v17736_v32 = vpop.permute.xlu0 %9960 }
 0x3b4   : > { %14994 = vmatprep.mubr.msk.f32.mxu1 %vm15166_vm8, %v22854_v12  ;;  %v9566_v13 = vsel %vm3786_vm5, %v9565_v57, %v9537_v39  ;;  %v22936_v39 = vld [vmem:[#allocation11_spill] sm:$0xff] }
 0x3b7   : > { %4375 = vrot.lane.b32.xlu1 %v17655_v35, %s15168_s29  ;;  %4379 = vrot.lane.b32.xlu0 %v17659_v21, %s15168_s29  ;;  %v9541_v55 = vpop.permute.xlu1 %9540  ;;  %v9545_v44 = vpop.permute.xlu0 %9544 }
 0x3b8   : > { %v9567_v60 = vsel %vm561_vm15, %v9566_v13, %v9541_v55  ;;  %v10035_v55 = vsel %vm3784_vm4, %v22936_v39, %v17736_v32 }
 0x3b9   : > { %v9568_v30 = vsel %vm3789_vm9, %v9567_v60, %v9545_v44 }
 0x3bb   : > { %4383 = vrot.lane.b32.xlu1 %v17668_v10, %s15168_s29  ;;  %4387 = vrot.lane.b32.xlu0 %v17672_v8, %s15168_s29  ;;  %v9993_v47 = vpop.permute.xlu1 %9992 }
 0x3bd   : > { %v17751_v40 = vpop.permute.xlu0 %3769 }
 0x3bf   : > { %4391 = vrot.lane.b32.xlu1 %v17683_v17, %s15168_s29  ;;  %4361 = vrot.lane.b32.xlu0 %v17483_v14, %s15168_s29  ;;  %v9965_v1 = vpop.permute.xlu1 %9964 }
 0x3c0   : > { %v10036_v26 = vsel %vm3786_vm5, %v10035_v55, %v9965_v1 }
 0x3c1   : > { %v17761_v63 = vpop.permute.xlu0 %3777 }
 0x3c2   : > { %22932 = vst [vmem:[#allocation3_spill] sm:$0xff] %v17761_v63 }
 0x3c3   : > { %4365 = vrot.lane.b32.xlu1 %v17487_v22, %s15168_s29  ;;  %4369 = vrot.lane.b32.xlu0 %v17491_v58, %s15168_s29  ;;  %v17767_v52 = vpop.permute.xlu1 %3773 }
 0x3c7   : > { %4373 = vrot.lane.b32.xlu1 %v17495_v53, %s15168_s29  ;;  %4377 = vrot.lane.b32.xlu0 %v17501_v34, %s15168_s29 }
 0x3ca   : > { %v17769_v50 = vpop.permute.xlu0 %3729 }
 0x3cb   : > { %4381 = vrot.lane.b32.xlu1 %v17505_v0, %s15168_s29  ;;  %4385 = vrot.lane.b32.xlu0 %v17509_v33, %s15168_s29  ;;  %v17779_v49 = vpop.permute.xlu1 %3733 }
 0x3ce   : > { %v17781_v54 = vpop.permute.xlu0 %3737 }
 0x3cf   : > { %4389 = vrot.lane.b32.xlu1 %v17518_v29, %s15168_s29  ;;  %4831 = vrot.lane.b32.xlu0 %v17629_v7, %s15169_s8 }
 0x3d3   : > { %4835 = vrot.lane.b32.xlu1 %v17640_v61, %s15169_s8  ;;  %4839 = vrot.lane.b32.xlu0 %v17644_v31, %s15169_s8 }
 0x3d5   : > { %v17787_v24 = vpop.permute.xlu1 %3741  ;;  %v17789_v27 = vpop.permute.xlu0 %3745 }
 0x3d7   : > { %4843 = vrot.lane.b32.xlu1 %v17655_v35, %s15169_s8  ;;  %4847 = vrot.lane.b32.xlu0 %v17659_v21, %s15169_s8 }
 0x3d9   : > { %v17795_v19 = vpop.permute.xlu1 %3749  ;;  %v17797_v42 = vpop.permute.xlu0 %3753 }
 0x3da   : > { %22933 = vst [vmem:[#allocation17_spill] sm:$0xff] %v17797_v42 }
 0x3db   : > { %4851 = vrot.lane.b32.xlu1 %v17668_v10, %s15169_s8  ;;  %4855 = vrot.lane.b32.xlu0 %v17672_v8, %s15169_s8 }
 0x3dd   : > { %v17803_v48 = vpop.permute.xlu1 %3757  ;;  %v17805_v16 = vpop.permute.xlu0 %3761 }
 0x3df   : > { %4859 = vrot.lane.b32.xlu1 %v17683_v17, %s15169_s8  ;;  %4829 = vrot.lane.b32.xlu0 %v17483_v14, %s15169_s8 }
 0x3e1   : > { %v17814_v2 = vpop.permute.xlu1 %3765  ;;  %v9997_v4 = vpop.permute.xlu0 %9996 }
 0x3e3   : > { %4833 = vrot.lane.b32.xlu1 %v17487_v22, %s15169_s8  ;;  %4837 = vrot.lane.b32.xlu0 %v17491_v58, %s15169_s8 }
 0x3e5   : > { %v9549_v59 = vpop.permute.xlu1 %9548  ;;  %v9969_v25 = vpop.permute.xlu0 %9968 }
 0x3e6   : > { %v9569_v37 = vsel %vm3791_vm10, %v9568_v30, %v9549_v59  ;;  %v10037_v30 = vsel %vm561_vm15, %v10036_v26, %v9969_v25 }
 0x3e7   : > { %4841 = vrot.lane.b32.xlu1 %v17495_v53, %s15169_s8  ;;  %4845 = vrot.lane.b32.xlu0 %v17501_v34, %s15169_s8 }
 0x3e8   : > { %14993 = vmatpush3.msk.msra.mxu1 %vm835_vm6, %v9569_v37 }
 0x3e9   : > { %v10001_v3 = vpop.permute.xlu1 %10000  ;;  %v9973_v46 = vpop.permute.xlu0 %9972  ;;  %14995 = vmatmul.mubr.msk.f32.vlgmr.msra.gmra.mrb[4].mxu1 %vm557_vm11, %v17729_v45  ;;  %v10042_v45 = vsel %vm3784_vm4, %v22935_v6, %v17723_v9 }
 0x3ea   : > { %10132 = vmatprep.mubr.f32.mxu1 %v22854_v12  ;;  %v10043_v44 = vsel %vm3786_vm5, %v10042_v45, %v9993_v47  ;;  %v10038_v37 = vsel %vm3789_vm9, %v10037_v30, %v9973_v46 }
 0x3eb   : > { %4849 = vrot.lane.b32.xlu1 %v17505_v0, %s15169_s8  ;;  %4853 = vrot.lane.b32.xlu0 %v17509_v33, %s15169_s8  ;;  %v10044_v60 = vsel %vm561_vm15, %v10043_v44, %v9997_v4 }
 0x3ec   : > { %v10045_v59 = vsel %vm3789_vm9, %v10044_v60, %v10001_v3 }
 0x3ed   : > { %v10005_v62 = vpop.permute.xlu1 %10004  ;;  %v9977_v41 = vpop.permute.xlu0 %9976 }
 0x3ee   : > { %v10046_v9 = vsel %vm3791_vm10, %v10045_v59, %v10005_v62  ;;  %v10039_v32 = vsel %vm3791_vm10, %v10038_v37, %v9977_v41  ;;  %v14865_v62 = vld [vmem:[%s22413_s3 + $0x30] sm:$0xff] }
 0x3ef   : > { %4857 = vrot.lane.b32.xlu1 %v17518_v29, %s15169_s8  ;;  %5299 = vrot.lane.b32.xlu0 %v17629_v7, %s15170_s12 }
 0x3f1   : > { %v10009_v57 = vpop.permute.xlu1 %10008  ;;  %v9981_v13 = vpop.permute.xlu0 %9980 }
 0x3f2   : > { %v10047_v47 = vsel %vm3793_vm14, %v10046_v9, %v10009_v57  ;;  %v10040_v1 = vsel %vm3793_vm14, %v10039_v32, %v9981_v13 }
 0x3f3   : > { %5303 = vrot.lane.b32.xlu1 %v17640_v61, %s15170_s12  ;;  %5307 = vrot.lane.b32.xlu0 %v17644_v31, %s15170_s12 }
 0x3f5   : > { %v10013_v4 = vpop.permute.xlu1 %10012  ;;  %v9985_v25 = vpop.permute.xlu0 %9984 }
 0x3f6   : > { %v10048_v3 = vsel %vm3795_vm0, %v10047_v47, %v10013_v4  ;;  %v10041_v46 = vsel %vm3795_vm0, %v10040_v1, %v9985_v25 }
 0x3f7   : > { %5311 = vrot.lane.b32.xlu1 %v17655_v35, %s15170_s12  ;;  %5315 = vrot.lane.b32.xlu0 %v17659_v21, %s15170_s12 }
 0x3f8   : > { %14866 = vmatprep.subr.msk.mxu1 %vm835_vm6, %v10048_v3 }
 0x3f9   : > { %14867 = vmatpush1.msk.msra.mxu1 %vm835_vm6, %v10041_v46  ;;  %v10017_v41 = vpop.permute.xlu1 %10016  ;;  %v10021_v6 = vpop.permute.xlu0 %10020 }
 0x3fa   : > { %v10049_v45 = vsel %vm3784_vm4, %v17592_v5, %v10017_v41  ;;  %14868 = vmatmul.mubr.msk.f32.vlgmr.msra.gmra.mrb[2].mxu1 %vm557_vm11, %v14865_v62  ;;  %14997 = vmatprep.subr.mxu1 %v22854_v12 }
 0x3fb   : > { %5319 = vrot.lane.b32.xlu1 %v17668_v10, %s15170_s12  ;;  %5323 = vrot.lane.b32.xlu0 %v17672_v8, %s15170_s12  ;;  %v10050_v39 = vsel %vm3786_vm5, %v10049_v45, %v10021_v6 }
 0x3fc   : > { %14999 = vmatprep.mubr.msk.f32.mxu1 %vm15166_vm8, %v22854_v12  ;;  %vm23199_vm8 = vcmask 1046528  }
 0x3fd   : > { %v10025_v55 = vpop.permute.xlu1 %10024  ;;  %v10029_v44 = vpop.permute.xlu0 %10028  ;;  %vm23203_vm3 = vmmov %vm23199_vm8 }
 0x3fe   : > { %v10051_v26 = vsel %vm561_vm15, %v10050_v39, %v10025_v55  ;;  %vm23206_vm12 = vmmov %vm23203_vm3 }
 0x3ff   : > { %5327 = vrot.lane.b32.xlu1 %v17683_v17, %s15170_s12  ;;  %5297 = vrot.lane.b32.xlu0 %v17483_v14, %s15170_s12  ;;  %v10052_v5 = vsel %vm3789_vm9, %v10051_v26, %v10029_v44  ;;  %vm23213_vm13 = vmmov %vm23203_vm3 }
 0x400   : > { %vm23215_vm1 = vmmov %vm23203_vm3 }
 0x401   : > { %v10033_v57 = vpop.permute.xlu1 %10032  ;;  %v17887_v13 = vpop.permute.xlu0 %3823  ;;  %vm23220_vm2 = vmmov %vm23215_vm1 }
 0x402   : > { %v10053_v60 = vsel %vm3791_vm10, %v10052_v5, %v10033_v57 }
 0x403   : > { %5301 = vrot.lane.b32.xlu1 %v17487_v22, %s15170_s12  ;;  %5305 = vrot.lane.b32.xlu0 %v17491_v58, %s15170_s12 }
 0x404   : > { %14998 = vmatpush3.msk.msra.mxu1 %vm835_vm6, %v10053_v60 }
 0x405   : > { %15000 = vmatmul.mubr.msk.f32.vlgmr.msra.gmra.mrb[4].mxu1 %vm557_vm11, %v14865_v62  ;;  %v17896_v30 = vpop.permute.xlu1 %3827  ;;  %v17898_v59 = vpop.permute.xlu0 %3831  ;;  %vm23201_vm11 = vmmov %vm23199_vm8 }
 0x406   : > { %v4005_v4 = vcombine.low %v17887_v13, %v17898_v59 }
 0x407   : > { %5309 = vrot.lane.b32.xlu1 %v17495_v53, %s15170_s12  ;;  %5313 = vrot.lane.b32.xlu0 %v17501_v34, %s15170_s12 }
 0x408   : > { %v17934_v6 = vrot.slane %v4005_v4, %v15305_v28 }
 0x409   : > { %v17904_v37 = vpop.permute.xlu1 %3835  ;;  %v17906_v9 = vpop.permute.xlu0 %3839 }
 0x40a   : > { %v4021_v1 = vcombine.low %v17896_v30, %v17904_v37 }
 0x40b   : > { %5317 = vrot.lane.b32.xlu1 %v17505_v0, %s15170_s12  ;;  %5321 = vrot.lane.b32.xlu0 %v17509_v33, %s15170_s12 }
 0x40c   : > { %v17929_v62 = vrot.slane %v4021_v1, %v15305_v28 }
 0x40d   : > { %v17912_v32 = vpop.permute.xlu1 %3843  ;;  %v17914_v47 = vpop.permute.xlu0 %3847 }
 0x40e   : > { %v4037_v25 = vcombine.low %v17906_v9, %v17914_v47  ;;  %v4069_v26 = vcombine.low %v17934_v6, %v17929_v62 }
 0x40f   : > { %5325 = vrot.lane.b32.xlu1 %v17518_v29, %s15170_s12 }
 0x410   : > { %v17937_v45 = vrot.slane %v4037_v25, %v15305_v28  ;;  %v17958_v4 = vrot.slane %v4069_v26, %v15317_v36 }
 0x411   : > { %v17924_v3 = vpop.permute.xlu1 %3851  ;;  %v17926_v46 = vpop.permute.xlu0 %3821 }
 0x412   : > { %22937 = vst [vmem:[#allocation7_spill] sm:$0xff] %v17926_v46  ;;  %v4053_v41 = vcombine.low %v17912_v32, %v17924_v3  ;;  %22941 = vst [vmem:[#allocation10_spill] sm:$0xff] %v17958_v4 }
 0x414   : > { %v17940_v39 = vrot.slane %v4053_v41, %v15305_v28 }
 0x415   : > { %v17942_v55 = vpop.permute.xlu1 %3825  ;;  %v17944_v44 = vpop.permute.xlu0 %3829 }
 0x416   : > { %22938 = vst [vmem:[#allocation8_spill] sm:$0xff] %v17944_v44  ;;  %v4101_v5 = vcombine.low %v17937_v45, %v17940_v39 }
 0x418   : > { %v17951_v57 = vrot.slane %v4101_v5, %v15317_v36  ;;  %v3869_v5 = vcombine.low %v17926_v46, %v17944_v44 }
 0x419   : > { %v17953_v60 = vpop.permute.xlu1 %3833  ;;  %v17955_v1 = vpop.permute.xlu0 %3837 }
 0x41a   : > { %22939 = vst [vmem:[#allocation5_spill] sm:$0xff] %v17951_v57  ;;  %22940 = vst [vmem:[#allocation16_spill] sm:$0xff] %v17955_v1  ;;  %v3885_v11 = vcombine.low %v17942_v55, %v17953_v60  ;;  %v17982_v38 = vrot.slane %v3869_v5, %v15305_v28 }
 0x41c   : > { %v17977_v15 = vrot.slane %v3885_v11, %v15305_v28  ;;  %22946 = vst [vmem:[#allocation13_spill] sm:$0xff] %v17982_v38 }
 0x41d   : > { %v17962_v41 = vpop.permute.xlu1 %3841  ;;  %v17964_v43 = vpop.permute.xlu0 %3845 }
 0x41e   : > { %22942 = vst [vmem:[#allocation21_spill] sm:$0xff] %v17962_v41  ;;  %22943 = vst [vmem:[#allocation20_spill] sm:$0xff] %v17964_v43  ;;  %v3901_v56 = vcombine.low %v17955_v1, %v17964_v43  ;;  %v3933_v11 = vcombine.low %v17982_v38, %v17977_v15 }
 0x41f   : > { %22945 = vst [vmem:[#allocation15_spill] sm:$0xff] %v17977_v15 }
 0x420   : > { %v17985_v4 = vrot.slane %v3901_v56, %v15305_v28 }
 0x421   : > { %v17972_v12 = vpop.permute.xlu1 %3849  ;;  %v17974_v26 = vpop.permute.xlu0 %4363 }
 0x422   : > { %22944 = vst [vmem:[#allocation19_spill] sm:$0xff] %v17974_v26  ;;  %v3917_v25 = vcombine.low %v17962_v41, %v17972_v12  ;;  %22947 = vst [vmem:[#allocation9_spill] sm:$0xff] %v17985_v4 }
 0x424   : > { %v17988_v57 = vrot.slane %v3917_v25, %v15305_v28  ;;  %v18006_v25 = vrot.slane %v3933_v11, %v15317_v36 }
 0x425   : > { %v17990_v63 = vpop.permute.xlu1 %4367  ;;  %v17992_v42 = vpop.permute.xlu0 %4371 }
 0x426   : > { %22948 = vst [vmem:[#allocation18_spill] sm:$0xff] %v17988_v57  ;;  %22949 = vst [vmem:[#allocation14_spill] sm:$0xff] %v17990_v63  ;;  %v3965_v1 = vcombine.low %v17985_v4, %v17988_v57 }
 0x427   : > { %22950 = vst [vmem:[#allocation4_spill] sm:$0xff] %v17992_v42  ;;  %22954 = vst [vmem:[#allocation24_spill] sm:$0xff] %v18006_v25 }
 0x428   : > { %v17999_v43 = vrot.slane %v3965_v1, %v15317_v36  ;;  %v4545_v1 = vcombine.low %v17974_v26, %v17992_v42 }
 0x429   : > { %v18001_v5 = vpop.permute.xlu1 %4375  ;;  %v18003_v56 = vpop.permute.xlu0 %4379 }
 0x42a   : > { %22951 = vst [vmem:[#allocation11_spill] sm:$0xff] %v17999_v43  ;;  %22952 = vst [vmem:[#allocation22_spill] sm:$0xff] %v18001_v5  ;;  %v4561_v38 = vcombine.low %v17990_v63, %v18001_v5  ;;  %v18030_v25 = vrot.slane %v4545_v1, %v15305_v28 }
 0x42b   : > { %22953 = vst [vmem:[#allocation23_spill] sm:$0xff] %v18003_v56 }
 0x42c   : > { %v18025_v57 = vrot.slane %v4561_v38, %v15305_v28  ;;  %22960 = vst [vmem:[#allocation30_spill] sm:$0xff] %v18030_v25 }
 0x42d   : > { %v18010_v44 = vpop.permute.xlu1 %4383  ;;  %v18012_v41 = vpop.permute.xlu0 %4387 }
 0x42e   : > { %22955 = vst [vmem:[#allocation25_spill] sm:$0xff] %v18010_v44  ;;  %22956 = vst [vmem:[#allocation26_spill] sm:$0xff] %v18012_v41  ;;  %v4577_v15 = vcombine.low %v18003_v56, %v18012_v41  ;;  %v4609_v38 = vcombine.low %v18030_v25, %v18025_v57 }
 0x42f   : > { %22959 = vst [vmem:[#allocation29_spill] sm:$0xff] %v18025_v57 }
 0x430   : > { %v18033_v43 = vrot.slane %v4577_v15, %v15305_v28 }
 0x431   : > { %v18020_v4 = vpop.permute.xlu1 %4391  ;;  %v18022_v11 = vpop.permute.xlu0 %4361 }
 0x432   : > { %22957 = vst [vmem:[#allocation27_spill] sm:$0xff] %v18020_v4  ;;  %22958 = vst [vmem:[#allocation28_spill] sm:$0xff] %v18022_v11  ;;  %v4593_v46 = vcombine.low %v18010_v44, %v18020_v4 }
 0x433   : > { %22961 = vst [vmem:[#allocation31_spill] sm:$0xff] %v18033_v43 }
 0x434   : > { %v18036_v26 = vrot.slane %v4593_v46, %v15305_v28  ;;  %v18054_v46 = vrot.slane %v4609_v38, %v15317_v36 }
 0x435   : > { %v18038_v56 = vpop.permute.xlu1 %4365  ;;  %v18040_v41 = vpop.permute.xlu0 %4369 }
 0x436   : > { %22962 = vst [vmem:[#allocation32_spill] sm:$0xff] %v18036_v26  ;;  %22963 = vst [vmem:[#allocation33_spill] sm:$0xff] %v18038_v56  ;;  %v4641_v42 = vcombine.low %v18033_v43, %v18036_v26 }
 0x437   : > { %22964 = vst [vmem:[#allocation34_spill] sm:$0xff] %v18040_v41  ;;  %22968 = vst [vmem:[#allocation38_spill] sm:$0xff] %v18054_v46 }
 0x438   : > { %v18047_v44 = vrot.slane %v4641_v42, %v15317_v36  ;;  %v4409_v42 = vcombine.low %v18022_v11, %v18040_v41 }
 0x439   : > { %v18049_v1 = vpop.permute.xlu1 %4373  ;;  %v18051_v15 = vpop.permute.xlu0 %4377 }
 0x43a   : > { %22965 = vst [vmem:[#allocation35_spill] sm:$0xff] %v18047_v44  ;;  %22966 = vst [vmem:[#allocation36_spill] sm:$0xff] %v18049_v1  ;;  %v4425_v25 = vcombine.low %v18038_v56, %v18049_v1  ;;  %v18078_v46 = vrot.slane %v4409_v42, %v15305_v28 }
 0x43b   : > { %22967 = vst [vmem:[#allocation37_spill] sm:$0xff] %v18051_v15 }
 0x43c   : > { %v18073_v26 = vrot.slane %v4425_v25, %v15305_v28  ;;  %22974 = vst [vmem:[#allocation44_spill] sm:$0xff] %v18078_v46 }
 0x43d   : > { %v18058_v63 = vpop.permute.xlu1 %4381  ;;  %v18060_v5 = vpop.permute.xlu0 %4385 }
 0x43e   : > { %22969 = vst [vmem:[#allocation39_spill] sm:$0xff] %v18058_v63  ;;  %22970 = vst [vmem:[#allocation40_spill] sm:$0xff] %v18060_v5  ;;  %v4441_v57 = vcombine.low %v18051_v15, %v18060_v5  ;;  %v4473_v25 = vcombine.low %v18078_v46, %v18073_v26 }
 0x43f   : > { %22973 = vst [vmem:[#allocation43_spill] sm:$0xff] %v18073_v26 }
 0x440   : > { %v18081_v44 = vrot.slane %v4441_v57, %v15305_v28 }
 0x441   : > { %v18068_v43 = vpop.permute.xlu1 %4389  ;;  %v18070_v38 = vpop.permute.xlu0 %4831 }
 0x442   : > { %22971 = vst [vmem:[#allocation41_spill] sm:$0xff] %v18068_v43  ;;  %22972 = vst [vmem:[#allocation42_spill] sm:$0xff] %v18070_v38  ;;  %v4457_v4 = vcombine.low %v18058_v63, %v18068_v43 }
 0x443   : > { %22975 = vst [vmem:[#allocation45_spill] sm:$0xff] %v18081_v44 }
 0x444   : > { %v18084_v11 = vrot.slane %v4457_v4, %v15305_v28  ;;  %v18102_v4 = vrot.slane %v4473_v25, %v15317_v36 }
 0x445   : > { %v18086_v15 = vpop.permute.xlu1 %4835  ;;  %v18088_v5 = vpop.permute.xlu0 %4839 }
 0x446   : > { %22976 = vst [vmem:[#allocation46_spill] sm:$0xff] %v18084_v11  ;;  %22977 = vst [vmem:[#allocation47_spill] sm:$0xff] %v18086_v15  ;;  %v4505_v41 = vcombine.low %v18081_v44, %v18084_v11 }
 0x447   : > { %22978 = vst [vmem:[#allocation48_spill] sm:$0xff] %v18088_v5  ;;  %22982 = vst [vmem:[#allocation52_spill] sm:$0xff] %v18102_v4 }
 0x448   : > { %v18095_v63 = vrot.slane %v4505_v41, %v15317_v36  ;;  %v5013_v41 = vcombine.low %v18070_v38, %v18088_v5 }
 0x449   : > { %v18097_v42 = vpop.permute.xlu1 %4843  ;;  %v18099_v57 = vpop.permute.xlu0 %4847 }
 0x44a   : > { %22979 = vst [vmem:[#allocation49_spill] sm:$0xff] %v18095_v63  ;;  %22980 = vst [vmem:[#allocation50_spill] sm:$0xff] %v18097_v42  ;;  %v5029_v46 = vcombine.low %v18086_v15, %v18097_v42  ;;  %v18126_v4 = vrot.slane %v5013_v41, %v15305_v28 }
 0x44b   : > { %22981 = vst [vmem:[#allocation51_spill] sm:$0xff] %v18099_v57 }
 0x44c   : > { %v18121_v11 = vrot.slane %v5029_v46, %v15305_v28  ;;  %22988 = vst [vmem:[#allocation58_spill] sm:$0xff] %v18126_v4 }
 0x44d   : > { %v18106_v56 = vpop.permute.xlu1 %4851  ;;  %v18108_v1 = vpop.permute.xlu0 %4855 }
 0x44e   : > { %22983 = vst [vmem:[#allocation53_spill] sm:$0xff] %v18106_v56  ;;  %22984 = vst [vmem:[#allocation54_spill] sm:$0xff] %v18108_v1  ;;  %v5045_v26 = vcombine.low %v18099_v57, %v18108_v1  ;;  %v5077_v46 = vcombine.low %v18126_v4, %v18121_v11 }
 0x44f   : > { %22987 = vst [vmem:[#allocation57_spill] sm:$0xff] %v18121_v11 }
 0x450   : > { %v18129_v63 = vrot.slane %v5045_v26, %v15305_v28 }
 0x451   : > { %v18116_v44 = vpop.permute.xlu1 %4859  ;;  %v18118_v25 = vpop.permute.xlu0 %4829 }
 0x452   : > { %22985 = vst [vmem:[#allocation55_spill] sm:$0xff] %v18116_v44  ;;  %22986 = vst [vmem:[#allocation56_spill] sm:$0xff] %v18118_v25  ;;  %v5061_v43 = vcombine.low %v18106_v56, %v18116_v44 }
 0x453   : > { %22989 = vst [vmem:[#allocation59_spill] sm:$0xff] %v18129_v63 }
 0x454   : > { %v18132_v38 = vrot.slane %v5061_v43, %v15305_v28  ;;  %v18150_v43 = vrot.slane %v5077_v46, %v15317_v36 }
 0x455   : > { %v18134_v57 = vpop.permute.xlu1 %4833  ;;  %v18136_v1 = vpop.permute.xlu0 %4837 }
 0x456   : > { %22990 = vst [vmem:[#allocation60_spill] sm:$0xff] %v18132_v38  ;;  %22991 = vst [vmem:[#allocation61_spill] sm:$0xff] %v18134_v57  ;;  %v5109_v5 = vcombine.low %v18129_v63, %v18132_v38 }
 0x457   : > { %22992 = vst [vmem:[#allocation62_spill] sm:$0xff] %v18136_v1  ;;  %22996 = vst [vmem:[#allocation66_spill] sm:$0xff] %v18150_v43 }
 0x458   : > { %v18143_v56 = vrot.slane %v5109_v5, %v15317_v36  ;;  %v4877_v5 = vcombine.low %v18118_v25, %v18136_v1 }
 0x459   : > { %v18145_v41 = vpop.permute.xlu1 %4841  ;;  %v18147_v26 = vpop.permute.xlu0 %4845 }
 0x45a   : > { %22993 = vst [vmem:[#allocation63_spill] sm:$0xff] %v18143_v56  ;;  %22994 = vst [vmem:[#allocation64_spill] sm:$0xff] %v18145_v41  ;;  %v4893_v4 = vcombine.low %v18134_v57, %v18145_v41  ;;  %v18174_v43 = vrot.slane %v4877_v5, %v15305_v28 }
 0x45b   : > { %22995 = vst [vmem:[#allocation65_spill] sm:$0xff] %v18147_v26 }
 0x45c   : > { %v18169_v38 = vrot.slane %v4893_v4, %v15305_v28  ;;  %23002 = vst [vmem:[#allocation72_spill] sm:$0xff] %v18174_v43 }
 0x45d   : > { %v18154_v15 = vpop.permute.xlu1 %4849  ;;  %v18156_v42 = vpop.permute.xlu0 %4853 }
 0x45e   : > { %22997 = vst [vmem:[#allocation67_spill] sm:$0xff] %v18154_v15  ;;  %22998 = vst [vmem:[#allocation68_spill] sm:$0xff] %v18156_v42  ;;  %v4909_v11 = vcombine.low %v18147_v26, %v18156_v42  ;;  %v4941_v4 = vcombine.low %v18174_v43, %v18169_v38 }
 0x45f   : > { %23001 = vst [vmem:[#allocation71_spill] sm:$0xff] %v18169_v38 }
 0x460   : > { %v18177_v56 = vrot.slane %v4909_v11, %v15305_v28 }
 0x461   : > { %v18164_v63 = vpop.permute.xlu1 %4857  ;;  %v18166_v46 = vpop.permute.xlu0 %5299 }
 0x462   : > { %22999 = vst [vmem:[#allocation69_spill] sm:$0xff] %v18164_v63  ;;  %23000 = vst [vmem:[#allocation70_spill] sm:$0xff] %v18166_v46  ;;  %v4925_v44 = vcombine.low %v18154_v15, %v18164_v63 }
 0x463   : > { %23003 = vst [vmem:[#allocation73_spill] sm:$0xff] %v18177_v56 }
 0x464   : > { %v18180_v25 = vrot.slane %v4925_v44, %v15305_v28  ;;  %v18198_v44 = vrot.slane %v4941_v4, %v15317_v36 }
 0x465   : > { %v18182_v26 = vpop.permute.xlu1 %5303  ;;  %v18184_v42 = vpop.permute.xlu0 %5307 }
 0x466   : > { %23004 = vst [vmem:[#allocation74_spill] sm:$0xff] %v18180_v25  ;;  %23005 = vst [vmem:[#allocation75_spill] sm:$0xff] %v18182_v26  ;;  %v4973_v1 = vcombine.low %v18177_v56, %v18180_v25 }
 0x467   : > { %23006 = vst [vmem:[#allocation76_spill] sm:$0xff] %v18184_v42  ;;  %23009 = vst [vmem:[#allocation79_spill] sm:$0xff] %v18198_v44 }
 0x468   : > { %v18191_v15 = vrot.slane %v4973_v1, %v15317_v36  ;;  %v5481_v1 = vcombine.low %v18166_v46, %v18184_v42 }
 0x469   : > { %v18193_v5 = vpop.permute.xlu1 %5311  ;;  %v18195_v11 = vpop.permute.xlu0 %5315 }
 0x46a   : > { %23007 = vst [vmem:[#allocation77_spill] sm:$0xff] %v18191_v15  ;;  %23008 = vst [vmem:[#allocation78_spill] sm:$0xff] %v18195_v11  ;;  %v5497_v43 = vcombine.low %v18182_v26, %v18193_v5  ;;  %v18222_v44 = vrot.slane %v5481_v1, %v15305_v28 }
 0x46c   : > { %v18217_v25 = vrot.slane %v5497_v43, %v15305_v28  ;;  %23015 = vst [vmem:[#allocation85_spill] sm:$0xff] %v18222_v44 }
 0x46d   : > { %v18202_v57 = vpop.permute.xlu1 %5319  ;;  %v18204_v41 = vpop.permute.xlu0 %5323 }
 0x46e   : > { %23010 = vst [vmem:[#allocation80_spill] sm:$0xff] %v18202_v57  ;;  %23011 = vst [vmem:[#allocation81_spill] sm:$0xff] %v18204_v41  ;;  %v5513_v38 = vcombine.low %v18195_v11, %v18204_v41  ;;  %v5545_v43 = vcombine.low %v18222_v44, %v18217_v25 }
 0x46f   : > { %23014 = vst [vmem:[#allocation84_spill] sm:$0xff] %v18217_v25 }
 0x470   : > { %v18225_v15 = vrot.slane %v5513_v38, %v15305_v28 }
 0x471   : > { %v18212_v56 = vpop.permute.xlu1 %5327  ;;  %v18214_v4 = vpop.permute.xlu0 %5297 }
 0x472   : > { %23012 = vst [vmem:[#allocation82_spill] sm:$0xff] %v18212_v56  ;;  %23013 = vst [vmem:[#allocation83_spill] sm:$0xff] %v18214_v4  ;;  %v5529_v63 = vcombine.low %v18202_v57, %v18212_v56 }
 0x473   : > { %23016 = vst [vmem:[#allocation86_spill] sm:$0xff] %v18225_v15 }
 0x474   : > { %v18228_v46 = vrot.slane %v5529_v63, %v15305_v28  ;;  %v18246_v63 = vrot.slane %v5545_v43, %v15317_v36 }
 0x475   : > { %v18230_v11 = vpop.permute.xlu1 %5301  ;;  %v18232_v41 = vpop.permute.xlu0 %5305 }
 0x476   : > { %23017 = vst [vmem:[#allocation87_spill] sm:$0xff] %v18228_v46  ;;  %23018 = vst [vmem:[#allocation88_spill] sm:$0xff] %v18230_v11  ;;  %v5577_v42 = vcombine.low %v18225_v15, %v18228_v46 }
 0x477   : > { %23019 = vst [vmem:[#allocation89_spill] sm:$0xff] %v18232_v41  ;;  %23022 = vst [vmem:[#allocation92_spill] sm:$0xff] %v18246_v63 }
 0x478   : > { %v18239_v57 = vrot.slane %v5577_v42, %v15317_v36  ;;  %v5345_v42 = vcombine.low %v18214_v4, %v18232_v41 }
 0x479   : > { %v18241_v1 = vpop.permute.xlu1 %5309  ;;  %v18243_v38 = vpop.permute.xlu0 %5313 }
 0x47a   : > { %23020 = vst [vmem:[#allocation90_spill] sm:$0xff] %v18239_v57  ;;  %23021 = vst [vmem:[#allocation91_spill] sm:$0xff] %v18243_v38  ;;  %v5361_v26 = vcombine.low %v18230_v11, %v18241_v1  ;;  %v18268_v63 = vrot.slane %v5345_v42, %v15305_v28  ;;  %v23028_v42 = vcombine.low %v17459_v18, %v17464_v23 }
 0x47b   : > { %v4054_v18 = vcombine.high %v17912_v32, %v17924_v3  ;;  %v23031_v32 = vld [vmem:[#allocation7_spill] sm:$0xff]  ;;  %v23033_v3 = vld [vmem:[#allocation16_spill] sm:$0xff] }
 0x47c   : > { %v18261_v46 = vrot.slane %v5361_v26, %v15305_v28 }
 0x47d   : > { %v18252_v44 = vpop.permute.xlu1 %5317  ;;  %v18254_v25 = vpop.permute.xlu0 %5321 }
 0x47e   : > { %23023 = vst [vmem:[#allocation93_spill] sm:$0xff] %v18254_v25  ;;  %v5377_v15 = vcombine.low %v18243_v38, %v18254_v25  ;;  %v5409_v38 = vcombine.low %v18268_v63, %v18261_v46 }
 0x480   : > { %v18271_v57 = vrot.slane %v5377_v15, %v15305_v28  ;;  %v18284_v4 = vrot.slane %v5409_v38, %v15317_v36 }
 0x481   : > { %v18263_v43 = vpop.permute.xlu1 %5325 }
 0x482   : > { %v5393_v56 = vcombine.low %v18252_v44, %v18263_v43  ;;  %23025 = vst [vmem:[#allocation95_spill] sm:$0xff] %v18284_v4 }
 0x484   : > { %v18274_v11 = vrot.slane %v5393_v56, %v15305_v28 }
 0x486   : > { %v5441_v26 = vcombine.low %v18271_v57, %v18274_v11 }
 0x488   : > { %v18281_v25 = vrot.slane %v5441_v26, %v15317_v36  ;;  %v23027_v26 = vcombine.low %v17390_v51, %v17393_v20  ;;  %v4022_v20 = vcombine.high %v17896_v30, %v17904_v37 }
 0x48a   : > { %23024 = vst [vmem:[#allocation94_spill] sm:$0xff] %v18281_v25 }
 0x4cd   : > { %v18288_v15 = vpop.f32.mrb[2].mxu1 }
 0x4ce   : > { %23026 = vst [vmem:[#allocation96_spill] sm:$0xff] %v18288_v15  ;;  %v18290_v41 = vpop.f32.mrb[3].mxu1 }
 0x4cf   : > { %10238 = vrot.lane.b32.xlu1 %v18290_v41, %s15177_s26  ;;  %10235 = vrot.lane.b32.xlu0 %v18290_v41, %s15178_s27 }
 0x4d3   : > { %10244 = vrot.lane.b32.xlu1 %v18290_v41, %s15175_s23  ;;  %10241 = vrot.lane.b32.xlu0 %v18290_v41, %s15176_s25 }
 0x4d7   : > { %10250 = vrot.lane.b32.xlu1 %v18290_v41, %s15174_s20  ;;  %10247 = vrot.lane.b32.xlu0 %v18290_v41, %s15157_s11 }
 0x4d8   : > { %v18304_v56 = vpop.f32.mrb[4].mxu1 }
 0x4d9   : > { %v15001_v38 = vpop.f32.mrb[5].mxu1 }
 0x4da   : > { %v3785_v38 = vsel %vm3784_vm4, %v23027_v26, %v17769_v50 }
 0x4db   : > { %10253 = vrot.lane.b32.xlu0 %v18290_v41, %s15173_s19  ;;  %10257 = vrot.lane.b32.xlu1 %v18304_v56, %s15178_s27 }
 0x4df   : > { %10260 = vrot.lane.b32.xlu0 %v18304_v56, %s15177_s26  ;;  %10263 = vrot.lane.b32.xlu1 %v18304_v56, %s15176_s25 }
 0x4e3   : > { %10266 = vrot.lane.b32.xlu0 %v18304_v56, %s15175_s23  ;;  %10269 = vrot.lane.b32.xlu1 %v18304_v56, %s15157_s11 }
 0x4e7   : > { %5767 = vrot.lane.b32.xlu0 %v17629_v7, %s15171_s15  ;;  %5771 = vrot.lane.b32.xlu1 %v17640_v61, %s15171_s15 }
 0x4eb   : > { %5775 = vrot.lane.b32.xlu0 %v17644_v31, %s15171_s15  ;;  %5779 = vrot.lane.b32.xlu1 %v17655_v35, %s15171_s15 }
 0x4ef   : > { %5783 = vrot.lane.b32.xlu0 %v17659_v21, %s15171_s15  ;;  %5787 = vrot.lane.b32.xlu1 %v17668_v10, %s15171_s15 }
 0x4f3   : > { %5791 = vrot.lane.b32.xlu0 %v17672_v8, %s15171_s15  ;;  %5795 = vrot.lane.b32.xlu1 %v17683_v17, %s15171_s15 }
 0x4f7   : > { %10213 = vrot.lane.b32.xlu0 %v18288_v15, %s15178_s27  ;;  %10216 = vrot.lane.b32.xlu1 %v18288_v15, %s15177_s26 }
 0x4fb   : > { %10219 = vrot.lane.b32.xlu0 %v18288_v15, %s15176_s25  ;;  %10222 = vrot.lane.b32.xlu1 %v18288_v15, %s15175_s23 }
 0x4ff   : > { %10225 = vrot.lane.b32.xlu0 %v18288_v15, %s15157_s11  ;;  %10228 = vrot.lane.b32.xlu1 %v18288_v15, %s15174_s20 }
 0x503   : > { %10231 = vrot.lane.b32.xlu0 %v18288_v15, %s15173_s19  ;;  %5765 = vrot.lane.b32.xlu1 %v17483_v14, %s15171_s15  ;;  %v3787_v15 = vsel %vm3786_vm5, %v3785_v38, %v17779_v49  ;;  %v4036_v49 = vrot.slane %v4022_v20, %v15305_v28  ;;  %v23038_v38 = vld [vmem:[#allocation18_spill] sm:$0xff]  ;;  %v23040_v20 = vld [vmem:[#allocation5_spill] sm:$0xff] }
 0x504   : > { %v3788_v23 = vsel %vm561_vm15, %v3787_v15, %v17781_v54  ;;  %v4068_v54 = vrot.slane %v4054_v18, %v15305_v28  ;;  %v23041_v18 = vld [vmem:[#allocation10_spill] sm:$0xff] }
 0x507   : > { %5769 = vrot.lane.b32.xlu0 %v17487_v22, %s15171_s15  ;;  %5773 = vrot.lane.b32.xlu1 %v17491_v58, %s15171_s15 }
 0x50b   : > { %5777 = vrot.lane.b32.xlu0 %v17495_v53, %s15171_s15  ;;  %5781 = vrot.lane.b32.xlu1 %v17501_v34, %s15171_s15 }
 0x50f   : > { %5785 = vrot.lane.b32.xlu0 %v17505_v0, %s15171_s15  ;;  %5789 = vrot.lane.b32.xlu1 %v17509_v33, %s15171_s15 }
 0x513   : > { %6235 = vrot.lane.b32.xlu1 %v17629_v7, %s15172_s18  ;;  %5793 = vrot.lane.b32.xlu0 %v17518_v29, %s15171_s15  ;;  %v3797_v7 = vsel %vm3784_vm4, %v23028_v42, %v17803_v48 }
 0x514   : > { %v3798_v51 = vsel %vm3786_vm5, %v3797_v7, %v17805_v16  ;;  %v23039_v7 = vld [vmem:[#allocation9_spill] sm:$0xff] }
 0x517   : > { %6243 = vrot.lane.b32.xlu1 %v17644_v31, %s15172_s18  ;;  %6239 = vrot.lane.b32.xlu0 %v17640_v61, %s15172_s18  ;;  %v3799_v61 = vsel %vm561_vm15, %v3798_v51, %v17814_v2  ;;  %v3790_v31 = vsel %vm3789_vm9, %v3788_v23, %v17787_v24  ;;  %v3966_v51 = vcombine.high %v23039_v7, %v23038_v38 }
 0x518   : > { %v3800_v50 = vsel %vm3789_vm9, %v3799_v61, %v17751_v40  ;;  %v3792_v24 = vsel %vm3791_vm10, %v3790_v31, %v17789_v27  ;;  %v4070_v40 = vcombine.high %v17934_v6, %v17929_v62  ;;  %v3886_v27 = vcombine.high %v17942_v55, %v17953_v60  ;;  %v23034_v62 = vld [vmem:[#allocation17_spill] sm:$0xff]  ;;  %v23036_v55 = vld [vmem:[#allocation3_spill] sm:$0xff] }
 0x519   : > { %v3801_v2 = vsel %vm3791_vm10, %v3800_v50, %v17767_v52  ;;  %v4134_v23 = vcombine.high %v23041_v18, %v23040_v20  ;;  %v23097_v20 = vld [vmem:[#allocation65_spill] sm:$0xff]  ;;  %v23115_v18 = vld [vmem:[#allocation72_spill] sm:$0xff] }
 0x51a   : > { %v18451_v60 = vsel %vm3793_vm14, %v3801_v2, %v23036_v55  ;;  %v23053_v55 = vld [vmem:[#allocation31_spill] sm:$0xff] }
 0x51b   : > { %6251 = vrot.lane.b32.xlu1 %v17659_v21, %s15172_s18  ;;  %6247 = vrot.lane.b32.xlu0 %v17655_v35, %s15172_s18  ;;  %v4006_v35 = vcombine.high %v17887_v13, %v17898_v59  ;;  %v4038_v21 = vcombine.high %v17906_v9, %v17914_v47 }
 0x51d   : > { %v4020_v48 = vrot.slane %v4006_v35, %v15305_v28  ;;  %v4052_v16 = vrot.slane %v4038_v21, %v15305_v28  ;;  %v23042_v35 = vld [vmem:[#allocation22_spill] sm:$0xff] }
 0x51e   : > { %v23043_v21 = vld [vmem:[#allocation14_spill] sm:$0xff] }
 0x51f   : > { %6259 = vrot.lane.b32.xlu1 %v17672_v8, %s15172_s18  ;;  %6255 = vrot.lane.b32.xlu0 %v17668_v10, %s15172_s18  ;;  %v4102_v8 = vcombine.high %v17937_v45, %v17940_v39  ;;  %v3794_v10 = vsel %vm3793_vm14, %v3792_v24, %v17795_v19  ;;  %v4085_v13 = vcombine.low %v4020_v48, %v4036_v49  ;;  %v23032_v19 = vld [vmem:[#allocation20_spill] sm:$0xff]  ;;  %v23045_v24 = vld [vmem:[#allocation13_spill] sm:$0xff] }
 0x520   : > { %v4086_v30 = vcombine.high %v4020_v48, %v4036_v49  ;;  %v4117_v59 = vcombine.low %v4052_v16, %v4068_v54  ;;  %v4118_v9 = vcombine.high %v4052_v16, %v4068_v54  ;;  %v3902_v45 = vcombine.high %v23033_v3, %v23032_v19  ;;  %v23044_v54 = vld [vmem:[#allocation15_spill] sm:$0xff] }
 0x521   : > { %v18439_v52 = vrot.slane %v4102_v8, %v15317_v36  ;;  %v18443_v6 = vsel %vm3795_vm0, %v3794_v10, %v23034_v62  ;;  %v18447_v39 = vrot.slane %v4070_v40, %v15317_v36  ;;  %v4562_v50 = vcombine.high %v23043_v21, %v23042_v35  ;;  %v23046_v10 = vld [vmem:[#allocation27_spill] sm:$0xff]  ;;  %v23047_v40 = vld [vmem:[#allocation25_spill] sm:$0xff] }
 0x522   : > { %v18458_v42 = vrot.slane %v4117_v59, %v15317_v36  ;;  %v18461_v15 = vrot.slane %v4086_v30, %v15317_v36  ;;  %v18469_v61 = vrot.slane %v4118_v9, %v15317_v36  ;;  %v3916_v31 = vrot.slane %v3902_v45, %v15305_v28  ;;  %v23048_v30 = vld [vmem:[#allocation4_spill] sm:$0xff]  ;;  %v23049_v59 = vld [vmem:[#allocation19_spill] sm:$0xff] }
 0x523   : > { %6233 = vrot.lane.b32.xlu1 %v17483_v14, %s15172_s18  ;;  %6263 = vrot.lane.b32.xlu0 %v17683_v17, %s15172_s18  ;;  %v23029_v14 = vld [vmem:[#allocation21_spill] sm:$0xff]  ;;  %v23030_v17 = vld [vmem:[#allocation8_spill] sm:$0xff]  ;;  %v4135_v49 = vcombine.low %v18447_v39, %v18439_v52  ;;  %v3934_v48 = vcombine.high %v23045_v24, %v23044_v54  ;;  %v4576_v19 = vrot.slane %v4562_v50, %v15305_v28  ;;  %v23056_v21 = vld [vmem:[#allocation11_spill] sm:$0xff] }
 0x524   : > { %v3918_v37 = vcombine.high %v23029_v14, %v17972_v12  ;;  %v3870_v47 = vcombine.high %v23031_v32, %v23030_v17  ;;  %23035 = vst [vmem:[#allocation21_spill] sm:$0xff] %v18443_v6  ;;  %v3900_v12 = vrot.slane %v3886_v27, %v15305_v28  ;;  %23037 = vst [vmem:[#allocation8_spill] sm:$0xff] %v18451_v60  ;;  %v23057_v50 = vld [vmem:[#allocation24_spill] sm:$0xff] }
 0x525   : > { %v4594_v27 = vcombine.high %v23047_v40, %v23046_v10  ;;  %v4546_v14 = vcombine.high %v23049_v59, %v23048_v30  ;;  %v18491_v17 = vrot.slane %v3966_v51, %v15317_v36  ;;  %v18508_v62 = vrot.slane %v3934_v48, %v15317_v36  ;;  %v23054_v51 = vld [vmem:[#allocation36_spill] sm:$0xff]  ;;  %v23058_v48 = vld [vmem:[#allocation29_spill] sm:$0xff] }
 0x526   : > { %v3884_v26 = vrot.slane %v3870_v47, %v15305_v28  ;;  %v3998_v54 = vcombine.high %v23057_v50, %v23056_v21  ;;  %v23060_v40 = vld [vmem:[#allocation41_spill] sm:$0xff]  ;;  %v23081_v47 = vld [vmem:[#allocation51_spill] sm:$0xff]  ;;  %v23094_v21 = vld [vmem:[#allocation62_spill] sm:$0xff] }
 0x527   : > { %6241 = vrot.lane.b32.xlu1 %v17491_v58, %s15172_s18  ;;  %6237 = vrot.lane.b32.xlu0 %v17487_v22, %s15172_s18  ;;  %v3932_v58 = vrot.slane %v3918_v37, %v15305_v28  ;;  %v18455_v22 = vrot.slane %v4085_v13, %v15317_v36  ;;  %v23051_v37 = vld [vmem:[#allocation23_spill] sm:$0xff]  ;;  %v3999_v24 = vcombine.low %v18508_v62, %v18491_v17  ;;  %v23095_v50 = vld [vmem:[#allocation56_spill] sm:$0xff] }
 0x528   : > { %v3949_v16 = vcombine.low %v3884_v26, %v3900_v12  ;;  %v3950_v8 = vcombine.high %v3884_v26, %v3900_v12 }
 0x529   : > { %v3981_v2 = vcombine.low %v3916_v31, %v3932_v58  ;;  %v3982_v13 = vcombine.high %v3916_v31, %v3932_v58  ;;  %v4137_v32 = vcombine.low %v18455_v22, %v18458_v42  ;;  %v23055_v31 = vld [vmem:[#allocation33_spill] sm:$0xff] }
 0x52a   : > { %v18511_v12 = vrot.slane %v3949_v16, %v15317_v36  ;;  %v4426_v35 = vcombine.high %v23055_v31, %v23054_v51  ;;  %v23059_v16 = vld [vmem:[#allocation30_spill] sm:$0xff]  ;;  %v4000_v51 = vcombine.high %v18508_v62, %v18491_v17 }
 0x52b   : > { %6249 = vrot.lane.b32.xlu1 %v17501_v34, %s15172_s18  ;;  %6245 = vrot.lane.b32.xlu0 %v17495_v53, %s15172_s18  ;;  %v4136_v34 = vcombine.high %v18447_v39, %v18439_v52  ;;  %v23050_v53 = vld [vmem:[#allocation26_spill] sm:$0xff]  ;;  %v4608_v52 = vrot.slane %v4594_v27, %v15305_v28  ;;  %v18514_v39 = vrot.slane %v3950_v8, %v15317_v36  ;;  %v23061_v27 = vld [vmem:[#allocation39_spill] sm:$0xff] }
 0x52c   : > { %v4578_v9 = vcombine.high %v23051_v37, %v23050_v53  ;;  %v18520_v26 = vrot.slane %v3981_v2, %v15317_v36  ;;  %v18523_v38 = vrot.slane %v3982_v13, %v15317_v36  ;;  %v4610_v8 = vcombine.high %v23059_v16, %v23058_v48  ;;  %v23063_v53 = vld [vmem:[#allocation28_spill] sm:$0xff] }
 0x52d   : > { %v4458_v2 = vcombine.high %v23061_v27, %v23060_v40  ;;  %v23069_v40 = vld [vmem:[#allocation45_spill] sm:$0xff]  ;;  %v23070_v27 = vld [vmem:[#allocation35_spill] sm:$0xff] }
 0x52e   : > { %v4592_v7 = vrot.slane %v4578_v9, %v15305_v28  ;;  %v23064_v9 = vld [vmem:[#allocation40_spill] sm:$0xff]  ;;  %v4001_v31 = vcombine.low %v18511_v12, %v18520_v26  ;;  %v18561_v17 = vrot.slane %v4610_v8, %v15317_v36 }
 0x52f   : > { %6257 = vrot.lane.b32.xlu1 %v17509_v33, %s15172_s18  ;;  %6253 = vrot.lane.b32.xlu0 %v17505_v0, %s15172_s18  ;;  %v4560_v33 = vrot.slane %v4546_v14, %v15305_v28  ;;  %v23052_v0 = vld [vmem:[#allocation32_spill] sm:$0xff]  ;;  %v23062_v14 = vld [vmem:[#allocation34_spill] sm:$0xff] }
 0x530   : > { %v4642_v58 = vcombine.high %v23053_v55, %v23052_v0  ;;  %v4657_v30 = vcombine.low %v4592_v7, %v4608_v52  ;;  %v4658_v59 = vcombine.high %v4592_v7, %v4608_v52  ;;  %v4410_v37 = vcombine.high %v23063_v53, %v23062_v14  ;;  %v23065_v0 = vld [vmem:[#allocation37_spill] sm:$0xff]  ;;  %v23072_v53 = vld [vmem:[#allocation43_spill] sm:$0xff] }
 0x531   : > { %v4625_v10 = vcombine.low %v4560_v33, %v4576_v19  ;;  %v4626_v13 = vcombine.high %v4560_v33, %v4576_v19  ;;  %v4442_v55 = vcombine.high %v23065_v0, %v23064_v9  ;;  %v4472_v7 = vrot.slane %v4458_v2, %v15305_v28  ;;  %v23071_v2 = vld [vmem:[#allocation38_spill] sm:$0xff]  ;;  %v23075_v0 = vld [vmem:[#allocation47_spill] sm:$0xff]  ;;  %v23077_v52 = vld [vmem:[#allocation53_spill] sm:$0xff] }
 0x532   : > { %v18574_v16 = vrot.slane %v4658_v59, %v15317_v36  ;;  %v23076_v59 = vld [vmem:[#allocation55_spill] sm:$0xff] }
 0x533   : > { %4170 = vrot.lane.b32.xlu1 %v4134_v23, %s15173_s19  ;;  %6261 = vrot.lane.b32.xlu0 %v17518_v29, %s15172_s18  ;;  %v18548_v23 = vrot.slane %v4642_v58, %v15317_v36  ;;  %v4440_v29 = vrot.slane %v4426_v35, %v15305_v28  ;;  %v18564_v62 = vrot.slane %v4625_v10, %v15317_v36  ;;  %v23080_v10 = vld [vmem:[#allocation54_spill] sm:$0xff] }
 0x534   : > { %v4424_v58 = vrot.slane %v4410_v37, %v15305_v28  ;;  %v18568_v35 = vrot.slane %v4657_v30, %v15317_v36  ;;  %v18571_v48 = vrot.slane %v4626_v13, %v15317_v36  ;;  %23067 = vst [vmem:[#allocation20_spill] sm:$0xff] %v18574_v16  ;;  %v23073_v30 = vld [vmem:[#allocation44_spill] sm:$0xff]  ;;  %v23074_v13 = vld [vmem:[#allocation50_spill] sm:$0xff]  ;;  %v5062_v45 = vcombine.high %v23077_v52, %v23076_v59 }
 0x535   : > { %v4474_v37 = vcombine.high %v23073_v30, %v23072_v53  ;;  %v5030_v33 = vcombine.high %v23075_v0, %v23074_v13  ;;  %v5046_v53 = vcombine.high %v23081_v47, %v23080_v10  ;;  %v23085_v0 = vld [vmem:[#allocation59_spill] sm:$0xff]  ;;  %v23089_v52 = vld [vmem:[#allocation58_spill] sm:$0xff]  ;;  %v23092_v13 = vld [vmem:[#allocation69_spill] sm:$0xff] }
 0x536   : > { %23066 = vst [vmem:[#allocation7_spill] sm:$0xff] %v18571_v48  ;;  %v4489_v9 = vcombine.low %v4424_v58, %v4440_v29  ;;  %v23093_v30 = vld [vmem:[#allocation67_spill] sm:$0xff] }
 0x537   : > { %4174 = vrot.lane.b32.xlu1 %v4135_v49, %s15174_s20  ;;  %4142 = vrot.lane.b32.xlu0 %v3998_v54, %s15173_s19  ;;  %v4456_v49 = vrot.slane %v4442_v55, %v15305_v28  ;;  %v23068_v54 = vld [vmem:[#allocation46_spill] sm:$0xff]  ;;  %v4490_v55 = vcombine.high %v4424_v58, %v4440_v29  ;;  %v5044_v47 = vrot.slane %v5030_v33, %v15305_v28 }
 0x538   : > { %v4506_v8 = vcombine.high %v23069_v40, %v23068_v54  ;;  %v23078_v54 = vld [vmem:[#allocation48_spill] sm:$0xff]  ;;  %v23079_v40 = vld [vmem:[#allocation42_spill] sm:$0xff]  ;;  %v18611_v58 = vrot.slane %v4474_v37, %v15317_v36  ;;  %v5060_v37 = vrot.slane %v5046_v53, %v15305_v28 }
 0x539   : > { %v4521_v19 = vcombine.low %v4456_v49, %v4472_v7  ;;  %v4522_v3 = vcombine.high %v4456_v49, %v4472_v7  ;;  %v5014_v14 = vcombine.high %v23079_v40, %v23078_v54  ;;  %v5076_v7 = vrot.slane %v5062_v45, %v15305_v28  ;;  %v23086_v54 = vld [vmem:[#allocation49_spill] sm:$0xff] }
 0x53a   : > { %v18600_v29 = vrot.slane %v4506_v8, %v15317_v36  ;;  %v18614_v49 = vrot.slane %v4489_v9, %v15317_v36  ;;  %v18625_v33 = vrot.slane %v4490_v55, %v15317_v36  ;;  %v23084_v9 = vld [vmem:[#allocation60_spill] sm:$0xff] }
 0x53b   : > { %4178 = vrot.lane.b32.xlu1 %v4136_v34, %s15157_s11  ;;  %4146 = vrot.lane.b32.xlu0 %v3999_v24, %s15174_s20  ;;  %v18622_v8 = vrot.slane %v4521_v19, %v15317_v36  ;;  %v18628_v45 = vrot.slane %v4522_v3, %v15317_v36  ;;  %v5028_v10 = vrot.slane %v5014_v14, %v15305_v28  ;;  %v23090_v24 = vld [vmem:[#allocation64_spill] sm:$0xff]  ;;  %v23091_v34 = vld [vmem:[#allocation61_spill] sm:$0xff] }
 0x53c   : > { %23082 = vst [vmem:[#allocation16_spill] sm:$0xff] %v18625_v33  ;;  %v5110_v59 = vcombine.high %v23085_v0, %v23084_v9  ;;  %v4894_v55 = vcombine.high %v23091_v34, %v23090_v24  ;;  %v4926_v3 = vcombine.high %v23093_v30, %v23092_v13  ;;  %v5125_v60 = vcombine.low %v5060_v37, %v5076_v7  ;;  %v23113_v13 = vld [vmem:[#allocation66_spill] sm:$0xff] }
 0x53d   : > { %23083 = vst [vmem:[#allocation17_spill] sm:$0xff] %v18628_v45  ;;  %v5093_v9 = vcombine.low %v5028_v10, %v5044_v47  ;;  %v5094_v0 = vcombine.high %v5028_v10, %v5044_v47  ;;  %v5126_v40 = vcombine.high %v5060_v37, %v5076_v7  ;;  %v23098_v30 = vcombine.high %v18455_v22, %v18458_v42  ;;  %v23105_v7 = vld [vmem:[#allocation74_spill] sm:$0xff] }
 0x53e   : > { %v4908_v22 = vrot.slane %v4894_v55, %v15305_v28  ;;  %v4940_v42 = vrot.slane %v4926_v3, %v15305_v28  ;;  %v23110_v47 = vld [vmem:[#allocation82_spill] sm:$0xff] }
 0x53f   : > { %4182 = vrot.lane.b32.xlu1 %v4137_v32, %s15175_s23  ;;  %4150 = vrot.lane.b32.xlu0 %v4000_v51, %s15157_s11  ;;  %v23087_v32 = vld [vmem:[#allocation52_spill] sm:$0xff]  ;;  %v23088_v51 = vld [vmem:[#allocation57_spill] sm:$0xff]  ;;  %v18680_v37 = vrot.slane %v5093_v9, %v15317_v36  ;;  %v18686_v55 = vrot.slane %v5094_v0, %v15317_v36  ;;  %v18689_v3 = vrot.slane %v5126_v40, %v15317_v36  ;;  %v23109_v40 = vld [vmem:[#allocation75_spill] sm:$0xff] }
 0x540   : > { %v5078_v19 = vcombine.high %v23089_v52, %v23088_v51  ;;  %v4878_v52 = vcombine.high %v23095_v50, %v23094_v21  ;;  %v23096_v51 = vld [vmem:[#allocation68_spill] sm:$0xff]  ;;  %v23106_v21 = vld [vmem:[#allocation73_spill] sm:$0xff]  ;;  %v23107_v9 = vcombine.low %v18461_v15, %v18469_v61  ;;  %v5498_v0 = vcombine.high %v23109_v40, %v18193_v5  ;;  %v23117_v40 = vld [vmem:[#allocation70_spill] sm:$0xff] }
 0x541   : > { %v18642_v6 = vpop.permute.xlu1 %10238  ;;  %v18644_v14 = vpop.permute.xlu0 %10235  ;;  %v4910_v34 = vcombine.high %v23097_v20, %v23096_v51  ;;  %v18666_v20 = vrot.slane %v5110_v59, %v15317_v36  ;;  %23101 = vst [vmem:[#allocation9_spill] sm:$0xff] %v18680_v37  ;;  %v18683_v59 = vrot.slane %v5125_v60, %v15317_v36  ;;  %23103 = vst [vmem:[#allocation14_spill] sm:$0xff] %v18686_v55  ;;  %v23119_v33 = vld [vmem:[#allocation78_spill] sm:$0xff] }
 0x542   : > { %v18677_v10 = vrot.slane %v5078_v19, %v15317_v36  ;;  %23104 = vst [vmem:[#allocation15_spill] sm:$0xff] %v18689_v3  ;;  %v4892_v51 = vrot.slane %v4878_v52, %v15305_v28  ;;  %v4974_v19 = vcombine.high %v23106_v21, %v23105_v7  ;;  %v23108_v60 = vcombine.high %v18511_v12, %v18520_v26  ;;  %v23111_v52 = vld [vmem:[#allocation80_spill] sm:$0xff]  ;;  %v23114_v7 = vld [vmem:[#allocation71_spill] sm:$0xff]  ;;  %v23125_v21 = vld [vmem:[#allocation85_spill] sm:$0xff] }
 0x543   : > { %4186 = vrot.lane.b32.xlu1 %v23098_v30, %s15176_s25  ;;  %4154 = vrot.lane.b32.xlu0 %v4001_v31, %s15175_s23  ;;  %23099 = vst [vmem:[#allocation3_spill] sm:$0xff] %v18666_v20  ;;  %23102 = vst [vmem:[#allocation22_spill] sm:$0xff] %v18683_v59  ;;  %v4924_v30 = vrot.slane %v4910_v34, %v15305_v28  ;;  %v5530_v24 = vcombine.high %v23111_v52, %v23110_v47  ;;  %v23112_v34 = vld [vmem:[#allocation63_spill] sm:$0xff]  ;;  %v23118_v52 = vld [vmem:[#allocation81_spill] sm:$0xff] }
 0x544   : > { %23100 = vst [vmem:[#allocation18_spill] sm:$0xff] %v18677_v10  ;;  %v4957_v16 = vcombine.low %v4892_v51, %v4908_v22  ;;  %v4958_v48 = vcombine.high %v4892_v51, %v4908_v22  ;;  %v5514_v53 = vcombine.high %v23119_v33, %v23118_v52  ;;  %v23121_v22 = vcombine.low %v18514_v39, %v18523_v38  ;;  %v23126_v3 = vld [vmem:[#allocation87_spill] sm:$0xff]  ;;  %v23127_v55 = vld [vmem:[#allocation86_spill] sm:$0xff]  ;;  %v23128_v59 = vld [vmem:[#allocation12_spill] sm:$0xff] }
 0x545   : > { %v18670_v50 = vpop.permute.xlu1 %10244  ;;  %v18672_v31 = vpop.permute.xlu0 %10241  ;;  %v4989_v45 = vcombine.low %v4924_v30, %v4940_v42  ;;  %v4990_v5 = vcombine.high %v4924_v30, %v4940_v42  ;;  %v18732_v42 = vrot.slane %v4974_v19, %v15317_v36  ;;  %v5512_v30 = vrot.slane %v5498_v0, %v15305_v28  ;;  %v23135_v10 = vld [vmem:[#allocation93_spill] sm:$0xff] }
 0x546   : > { %v18752_v52 = vrot.slane %v4957_v16, %v15317_v36 }
 0x547   : > { %4190 = vrot.lane.b32.xlu1 %v23107_v9, %s15177_s26  ;;  %4158 = vrot.lane.b32.xlu0 %v23108_v60, %s15176_s25  ;;  %v4942_v9 = vcombine.high %v23115_v18, %v23114_v7  ;;  %v23116_v60 = vld [vmem:[#allocation76_spill] sm:$0xff]  ;;  %v23120_v18 = vcombine.high %v18461_v15, %v18469_v61  ;;  %v5544_v7 = vrot.slane %v5530_v24, %v15305_v28  ;;  %v23122_v61 = vld [vmem:[#allocation77_spill] sm:$0xff]  ;;  %v23123_v15 = vld [vmem:[#allocation79_spill] sm:$0xff] }
 0x548   : > { %v5482_v47 = vcombine.high %v23117_v40, %v23116_v60  ;;  %v18755_v0 = vrot.slane %v4989_v45, %v15317_v36  ;;  %v18758_v24 = vrot.slane %v4958_v48, %v15317_v36  ;;  %v18765_v51 = vrot.slane %v4990_v5, %v15317_v36  ;;  %v23129_v48 = vld [vmem:[#allocation6_spill] sm:$0xff]  ;;  %v23134_v5 = vld [vmem:[#allocation83_spill] sm:$0xff] }
 0x549   : > { %v18713_v12 = vpop.permute.xlu1 %10250  ;;  %v18715_v26 = vpop.permute.xlu0 %10247  ;;  %v18749_v40 = vrot.slane %v4942_v9, %v15317_v36  ;;  %v23124_v9 = vld [vmem:[#allocation84_spill] sm:$0xff]  ;;  %v5578_v45 = vcombine.high %v23127_v55, %v23126_v3  ;;  %v23130_v37 = vcombine.high %v23128_v59, %v23129_v48 }
 0x54a   : > { %v5546_v16 = vcombine.high %v23125_v21, %v23124_v9  ;;  %v5394_v21 = vcombine.high %v18252_v44, %v18263_v43  ;;  %v23136_v44 = vld [vmem:[#allocation91_spill] sm:$0xff]  ;;  %v23144_v55 = vld [vmem:[#allocation92_spill] sm:$0xff] }
 0x54b   : > { %4194 = vrot.lane.b32.xlu1 %v23120_v18, %s15178_s27  ;;  %4162 = vrot.lane.b32.xlu0 %v23121_v22, %s15177_s26  ;;  %v5496_v18 = vrot.slane %v5482_v47, %v15305_v28  ;;  %v5528_v22 = vrot.slane %v5514_v53, %v15305_v28  ;;  %v23131_v53 = vcombine.high %v18514_v39, %v18523_v38 }
 0x54c   : > { %v5378_v43 = vcombine.high %v23136_v44, %v23135_v10  ;;  %v18813_v10 = vrot.slane %v5578_v45, %v15317_v36  ;;  %v23138_v44 = vcombine.high %v23071_v2, %v23070_v27  ;;  %v10425_v45 = vcombine.high %v18644_v14, %v18672_v31 }
 0x54d   : > { %v18744_v60 = vpop.permute.xlu1 %10257  ;;  %v18746_v19 = vpop.permute.xlu0 %10253  ;;  %v5561_v47 = vcombine.low %v5496_v18, %v5512_v30  ;;  %v5593_v33 = vcombine.low %v5528_v22, %v5544_v7  ;;  %v5562_v3 = vcombine.high %v5496_v18, %v5512_v30  ;;  %v5594_v9 = vcombine.high %v5528_v22, %v5544_v7 }
 0x54e   : > { %v10424_v30 = vcombine.low %v18644_v14, %v18672_v31  ;;  %v5442_v14 = vcombine.high %v18271_v57, %v18274_v11  ;;  %v10409_v31 = vcombine.high %v18290_v41, %v18642_v6  ;;  %v10456_v2 = vcombine.low %v18715_v26, %v18746_v19 }
 0x54f   : > { %3781 = vrot.lane.b32.xlu1 %v23130_v37, %s15178_s27  ;;  %4166 = vrot.lane.b32.xlu0 %v23131_v53, %s15178_s27  ;;  %v23132_v37 = vld [vmem:[#allocation88_spill] sm:$0xff]  ;;  %v23133_v53 = vld [vmem:[#allocation89_spill] sm:$0xff]  ;;  %v18826_v22 = vrot.slane %v5593_v33, %v15317_v36  ;;  %v18836_v7 = vrot.slane %v5562_v3, %v15317_v36  ;;  %v5392_v33 = vrot.slane %v5378_v43, %v15305_v28 }
 0x550   : > { %v5362_v59 = vcombine.high %v23132_v37, %v18241_v1  ;;  %v5346_v20 = vcombine.high %v23134_v5, %v23133_v53  ;;  %v23137_v1 = vcombine.high %v23087_v32, %v23086_v54  ;;  %v18810_v5 = vrot.slane %v5546_v16, %v15317_v36 }
 0x551   : > { %v18787_v48 = vpop.permute.xlu1 %10263  ;;  %v18789_v39 = vpop.permute.xlu0 %10260  ;;  %v5408_v37 = vrot.slane %v5394_v21, %v15305_v28  ;;  %v10408_v53 = vcombine.low %v18290_v41, %v18642_v6  ;;  %23140 = vst [vmem:[#allocation27_spill] sm:$0xff] %v18826_v22  ;;  %23141 = vst [vmem:[#allocation25_spill] sm:$0xff] %v18836_v7  ;;  %v10432_v38 = vrot.slane %v10424_v30, %v15305_v28  ;;  %v23166_v7 = vld [vmem:[#allocation20_spill] sm:$0xff] }
 0x552   : > { %v5376_v16 = vrot.slane %v5362_v59, %v15305_v28  ;;  %v23143_v59 = vld [vmem:[#allocation90_spill] sm:$0xff]  ;;  %v23145_v3 = vcombine.low %v18611_v58, %v18600_v29  ;;  %v5410_v43 = vcombine.high %v18268_v63, %v18261_v46  ;;  %v23146_v41 = vcombine.low %v18561_v17, %v18548_v23 }
 0x553   : > { %4682 = vrot.lane.b32.xlu1 %v23137_v1, %s15173_s19  ;;  %4710 = vrot.lane.b32.xlu0 %v23138_v44, %s15173_s19  ;;  %v18823_v1 = vrot.slane %v5561_v47, %v15317_v36  ;;  %v18839_v44 = vrot.slane %v5594_v9, %v15317_v36  ;;  %v5360_v47 = vrot.slane %v5346_v20, %v15305_v28 }
 0x554   : > { %v5457_v30 = vcombine.low %v5392_v33, %v5408_v37  ;;  %v10416_v57 = vrot.slane %v10408_v53, %v15305_v28  ;;  %v10439_v20 = vrot.slane %v10425_v45, %v15305_v28  ;;  %v23147_v45 = vcombine.high %v18611_v58, %v18600_v29 }
 0x555   : > { %23139 = vst [vmem:[#allocation13_spill] sm:$0xff] %v18823_v1  ;;  %v18831_v21 = vpop.permute.xlu1 %10269  ;;  %v18833_v18 = vpop.permute.xlu0 %10266  ;;  %23142 = vst [vmem:[#allocation4_spill] sm:$0xff] %v18839_v44  ;;  %v5425_v6 = vcombine.low %v5360_v47, %v5376_v16  ;;  %v5426_v11 = vcombine.high %v5360_v47, %v5376_v16  ;;  %v23148_v16 = vcombine.high %v18561_v17, %v18548_v23  ;;  %v23162_v44 = vld [vmem:[#allocation17_spill] sm:$0xff] }
 0x556   : > { %v10472_v63 = vcombine.low %v10416_v57, %v10432_v38  ;;  %v10473_v53 = vcombine.high %v10416_v57, %v10432_v38  ;;  %v10440_v57 = vcombine.low %v18670_v50, %v18713_v12  ;;  %v18897_v29 = vrot.slane %v5410_v43, %v15317_v36 }
 0x557   : > { %4686 = vrot.lane.b32.xlu1 %v23145_v3, %s15174_s20  ;;  %4714 = vrot.lane.b32.xlu0 %v23146_v41, %s15174_s20  ;;  %v5458_v3 = vcombine.high %v5392_v33, %v5408_v37  ;;  %v10423_v37 = vrot.slane %v10409_v31, %v15305_v28  ;;  %v18884_v33 = vrot.slane %v5442_v14, %v15317_v36 }
 0x558   : > { %v10457_v41 = vcombine.high %v18715_v26, %v18746_v19  ;;  %v18900_v58 = vrot.slane %v5457_v30, %v15317_v36  ;;  %v18907_v38 = vrot.slane %v5425_v6, %v15317_v36  ;;  %v10480_v23 = vrot.slane %v10472_v63, %v15317_v36 }
 0x559   : > { %v18868_v27 = vpop.permute.xlu1 %5771  ;;  %v18870_v9 = vpop.permute.xlu0 %5767  ;;  %v10488_v47 = vcombine.low %v10423_v37, %v10439_v20  ;;  %v10489_v14 = vcombine.high %v10423_v37, %v10439_v20  ;;  %v18910_v26 = vrot.slane %v5458_v3, %v15317_v36  ;;  %v18914_v17 = vrot.slane %v10473_v53, %v15317_v36 }
 0x55a   : > { %23149 = vst [vmem:[#allocation19_spill] sm:$0xff] %v18900_v58  ;;  %23150 = vst [vmem:[#allocation26_spill] sm:$0xff] %v18907_v38  ;;  %v10441_v19 = vcombine.high %v18670_v50, %v18713_v12  ;;  %v10464_v20 = vrot.slane %v10456_v2, %v15305_v28  ;;  %v23152_v43 = vcombine.low %v18614_v49, %v18622_v8 }
 0x55b   : > { %4690 = vrot.lane.b32.xlu1 %v23147_v45, %s15157_s11  ;;  %4718 = vrot.lane.b32.xlu0 %v23148_v16, %s15157_s11  ;;  %23151 = vst [vmem:[#allocation23_spill] sm:$0xff] %v18910_v26  ;;  %v18930_v63 = vrot.slane %v5426_v11, %v15317_v36  ;;  %v10448_v50 = vrot.slane %v10440_v57, %v15305_v28 }
 0x55c   : > { %v10471_v2 = vrot.slane %v10457_v41, %v15305_v28  ;;  %v23154_v12 = vcombine.low %v18564_v62, %v18568_v35  ;;  %v10496_v16 = vrot.slane %v10488_v47, %v15317_v36  ;;  %v10503_v11 = vrot.slane %v10489_v14, %v15317_v36 }
 0x55d   : > { %v18902_v31 = vpop.permute.xlu1 %5779  ;;  %v18904_v45 = vpop.permute.xlu0 %5775  ;;  %23153 = vst [vmem:[#allocation32_spill] sm:$0xff] %v18930_v63  ;;  %v10455_v46 = vrot.slane %v10441_v19, %v15305_v28  ;;  %v10504_v53 = vcombine.low %v10448_v50, %v10464_v20  ;;  %v10505_v3 = vcombine.high %v10448_v50, %v10464_v20  ;;  %v14879_v37 = vcombine.low %v10480_v23, %v18914_v17 }
 0x55e   : > { %v10560_v47 = vcombine.low %v18744_v60, %v18787_v48  ;;  %v10561_v14 = vcombine.high %v18744_v60, %v18787_v48  ;;  %v10544_v6 = vcombine.low %v18304_v56, %v18789_v39  ;;  %v10545_v41 = vcombine.high %v18304_v56, %v18789_v39 }
 0x55f   : > { %4694 = vrot.lane.b32.xlu1 %v23152_v43, %s15175_s23  ;;  %4722 = vrot.lane.b32.xlu0 %v23154_v12, %s15175_s23  ;;  %v23155_v19 = vcombine.high %v18614_v49, %v18622_v8  ;;  %v10520_v20 = vcombine.low %v10455_v46, %v10471_v2  ;;  %v23156_v50 = vmov 0.0   ;;  %v23157_v60 = vcombine.high %v18564_v62, %v18568_v35 }
 0x560   : > { %v10591_v12 = vcombine.high %v18831_v21, %v23156_v50  ;;  %v10576_v30 = vcombine.high %v18833_v18, %v23156_v50  ;;  %v14881_v48 = vcombine.high %v10480_v23, %v18914_v17  ;;  %v10521_v56 = vcombine.high %v10455_v46, %v10471_v2  ;;  %v23161_v50 = vld [vmem:[#allocation16_spill] sm:$0xff] }
 0x561   : > { %v18944_v43 = vpop.permute.xlu1 %5787  ;;  %v18946_v57 = vpop.permute.xlu0 %5783  ;;  %v10598_v39 = vrot.slane %v18831_v21, %v15305_v28  ;;  %v10583_v49 = vrot.slane %v18833_v18, %v15305_v28  ;;  %v14883_v54 = vcombine.low %v10496_v16, %v10503_v11  ;;  %v18984_v32 = vrot.slane %v10504_v53, %v15317_v36 }
 0x562   : > { %v18987_v62 = vrot.slane %v10505_v3, %v15317_v36  ;;  %v18990_v35 = vrot.slane %v14879_v37, %v15305_v28  ;;  %v14885_v46 = vcombine.high %v10496_v16, %v10503_v11  ;;  %v10568_v21 = vrot.slane %v10560_v47, %v15305_v28  ;;  %v23165_v47 = vld [vmem:[#allocation7_spill] sm:$0xff] }
 0x563   : > { %4698 = vrot.lane.b32.xlu1 %v23155_v19, %s15176_s25  ;;  %4726 = vrot.lane.b32.xlu0 %v23157_v60, %s15176_s25  ;;  %23158 = vst [vmem:[#allocation31_spill] sm:$0xff] %v18984_v32  ;;  %v10575_v2 = vrot.slane %v10561_v14, %v15305_v28  ;;  %v10552_v18 = vrot.slane %v10544_v6, %v15305_v28 }
 0x564   : > { %23159 = vst [vmem:[#allocation36_spill] sm:$0xff] %v18987_v62  ;;  %23160 = vst [vmem:[#allocation33_spill] sm:$0xff] %v18990_v35  ;;  %v10559_v60 = vrot.slane %v10545_v41, %v15305_v28  ;;  %v23163_v53 = vcombine.low %v23161_v50, %v23162_v44  ;;  %v19001_v3 = vrot.slane %v10520_v20, %v15317_v36 }
 0x565   : > { %v18979_v8 = vpop.permute.xlu1 %5795  ;;  %v18981_v19 = vpop.permute.xlu0 %5791  ;;  %v10605_v37 = vrot.slane %v10591_v12, %v15305_v28  ;;  %v10590_v35 = vrot.slane %v10576_v30, %v15305_v28  ;;  %v23167_v14 = vcombine.low %v23165_v47, %v23166_v7  ;;  %v19010_v6 = vrot.slane %v14881_v48, %v15305_v28 }
 0x566   : > { %23164 = vst [vmem:[#allocation29_spill] sm:$0xff] %v19001_v3  ;;  %v19013_v41 = vrot.slane %v10521_v56, %v15317_v36  ;;  %v10638_v26 = vcombine.low %v10583_v49, %v10598_v39  ;;  %v19020_v12 = vrot.slane %v14883_v54, %v15305_v28  ;;  %v19023_v30 = vcombine.low %v10480_v23, %v18984_v32 }
 0x567   : > { %4702 = vrot.lane.b32.xlu1 %v23163_v53, %s15177_s26  ;;  %4730 = vrot.lane.b32.xlu0 %v23167_v14, %s15177_s26  ;;  %23168 = vst [vmem:[#allocation30_spill] sm:$0xff] %v19010_v6  ;;  %v10639_v53 = vcombine.high %v10583_v49, %v10598_v39  ;;  %v19026_v14 = vcombine.high %v10480_v23, %v18984_v32 }
 0x568   : > { %23169 = vst [vmem:[#allocation41_spill] sm:$0xff] %v19013_v41  ;;  %23170 = vst [vmem:[#allocation39_spill] sm:$0xff] %v19020_v12  ;;  %v19030_v48 = vcombine.low %v18914_v17, %v18987_v62  ;;  %v19033_v56 = vrot.slane %v14885_v46, %v15305_v28  ;;  %v10606_v39 = vcombine.low %v10552_v18, %v10568_v21 }
 0x569   : > { %v19015_v63 = vpop.permute.xlu1 %10216  ;;  %v19017_v20 = vpop.permute.xlu0 %10213  ;;  %23171 = vst [vmem:[#allocation34_spill] sm:$0xff] %v19023_v30  ;;  %23172 = vst [vmem:[#allocation28_spill] sm:$0xff] %v19026_v14  ;;  %v10607_v49 = vcombine.high %v10552_v18, %v10568_v21  ;;  %v10622_v6 = vcombine.low %v10559_v60, %v10575_v2  ;;  %v10623_v22 = vcombine.high %v10559_v60, %v10575_v2 }
 0x56a   : > { %23173 = vst [vmem:[#allocation40_spill] sm:$0xff] %v19030_v48  ;;  %23174 = vst [vmem:[#allocation37_spill] sm:$0xff] %v19033_v56  ;;  %v23175_v54 = vcombine.high %v23161_v50, %v23162_v44  ;;  %v19041_v23 = vcombine.high %v18914_v17, %v18987_v62  ;;  %v19044_v32 = vcombine.low %v10496_v16, %v19001_v3 }
 0x56b   : > { %v19047_v12 = vcombine.high %v10496_v16, %v19001_v3  ;;  %v10654_v46 = vcombine.low %v10590_v35, %v10605_v37  ;;  %v23179_v21 = vcombine.high %v23165_v47, %v23166_v7  ;;  %v19054_v2 = vcombine.low %v10503_v11, %v19013_v41 }
 0x56c   : > { %4706 = vrot.lane.b32.xlu1 %v23175_v54, %s15178_s27  ;;  %23176 = vst [vmem:[#allocation46_spill] sm:$0xff] %v19041_v23  ;;  %23177 = vst [vmem:[#allocation45_spill] sm:$0xff] %v19044_v32  ;;  %v19057_v44 = vcombine.high %v10503_v11, %v19013_v41  ;;  %v10646_v17 = vrot.slane %v10638_v26, %v15317_v36  ;;  %v10653_v50 = vrot.slane %v10639_v53, %v15317_v36 }
 0x56d   : > { %23178 = vst [vmem:[#allocation43_spill] sm:$0xff] %v19047_v12  ;;  %4734 = vrot.lane.b32.xlu0 %v23179_v21, %s15178_s27  ;;  %23180 = vst [vmem:[#allocation44_spill] sm:$0xff] %v19054_v2  ;;  %v19061_v18 = vpop.permute.xlu1 %10222  ;;  %v19063_v16 = vpop.permute.xlu0 %10219  ;;  %v5965_v60 = vcombine.low %v18868_v27, %v18902_v31  ;;  %v5966_v7 = vcombine.high %v18868_v27, %v18902_v31  ;;  %v5949_v47 = vcombine.low %v18870_v9, %v18904_v45 }
 0x56e   : > { %23181 = vst [vmem:[#allocation50_spill] sm:$0xff] %v19057_v44  ;;  %v5950_v11 = vcombine.high %v18870_v9, %v18904_v45  ;;  %v10614_v26 = vrot.slane %v10606_v39, %v15317_v36  ;;  %v10621_v53 = vrot.slane %v10607_v49, %v15317_v36  ;;  %v10630_v54 = vrot.slane %v10622_v6, %v15317_v36  ;;  %v23191_v45 = vld [vmem:[#allocation3_spill] sm:$0xff] }
 0x56f   : > { %v10637_v21 = vrot.slane %v10623_v22, %v15317_v36  ;;  %v23182_v3 = vcombine.high %v23123_v15, %v23122_v61  ;;  %v10655_v27 = vcombine.high %v10590_v35, %v10605_v37  ;;  %v10662_v31 = vrot.slane %v10654_v46, %v15317_v36 }
 0x570   : > { %v23183_v9 = vcombine.high %v23113_v13, %v23112_v34  ;;  %v19088_v6 = vcombine.low %v10614_v26, %v10646_v17  ;;  %v19090_v22 = vcombine.high %v10614_v26, %v10646_v17  ;;  %v19092_v49 = vcombine.low %v10621_v53, %v10653_v50 }
 0x571   : > { %5150 = vrot.lane.b32.xlu1 %v23182_v3, %s15173_s19  ;;  %v19094_v61 = vcombine.high %v10621_v53, %v10653_v50  ;;  %v19096_v35 = vpop.permute.xlu1 %10228  ;;  %v19098_v3 = vpop.permute.xlu0 %10225  ;;  %v5973_v37 = vrot.slane %v5965_v60, %v15305_v28  ;;  %v5980_v46 = vrot.slane %v5966_v7, %v15305_v28  ;;  %v5964_v39 = vrot.slane %v5950_v11, %v15305_v28  ;;  %v23190_v11 = vld [vmem:[#allocation18_spill] sm:$0xff] }
 0x572   : > { %5178 = vrot.lane.b32.xlu0 %v23183_v9, %s15173_s19  ;;  %23184 = vst [vmem:[#allocation47_spill] sm:$0xff] %v19088_v6  ;;  %23185 = vst [vmem:[#allocation55_spill] sm:$0xff] %v19090_v22  ;;  %v5957_v9 = vrot.slane %v5949_v47, %v15305_v28  ;;  %v5997_v17 = vcombine.low %v18944_v43, %v18979_v8  ;;  %v5998_v26 = vcombine.high %v18944_v43, %v18979_v8 }
 0x573   : > { %23186 = vst [vmem:[#allocation53_spill] sm:$0xff] %v19092_v49  ;;  %23187 = vst [vmem:[#allocation48_spill] sm:$0xff] %v19094_v61  ;;  %v5981_v50 = vcombine.low %v18946_v57, %v18981_v19  ;;  %v5982_v53 = vcombine.high %v18946_v57, %v18981_v19  ;;  %v23188_v60 = vcombine.low %v18749_v40, %v18732_v42  ;;  %v11058_v15 = vrot.slane %v19092_v49, 1 }
 0x574   : > { %v10669_v7 = vrot.slane %v10655_v27, %v15317_v36  ;;  %v19117_v47 = vcombine.low %v10630_v54, %v10662_v31  ;;  %v23192_v34 = vcombine.low %v23190_v11, %v23191_v45  ;;  %v19125_v13 = vcombine.high %v10630_v54, %v10662_v31 }
 0x575   : > { %5154 = vrot.lane.b32.xlu1 %v23188_v60, %s15174_s20  ;;  %v19127_v57 = vpop.permute.xlu1 %5765  ;;  %v19129_v19 = vpop.permute.xlu0 %10231  ;;  %v11048_v60 = vrot.slane %v19088_v6, 1  ;;  %v11053_v27 = vrot.slane %v19090_v22, 1  ;;  %v6013_v41 = vcombine.low %v5957_v9, %v5973_v37  ;;  %v6014_v62 = vcombine.high %v5957_v9, %v5973_v37 }
 0x576   : > { %23189 = vst [vmem:[#allocation42_spill] sm:$0xff] %v19117_v47  ;;  %5182 = vrot.lane.b32.xlu0 %v23192_v34, %s15174_s20  ;;  %23193 = vst [vmem:[#allocation54_spill] sm:$0xff] %v19125_v13  ;;  %v6029_v56 = vcombine.low %v5964_v39, %v5980_v46  ;;  %v11063_v34 = vrot.slane %v19094_v61, 1  ;;  %v6005_v43 = vrot.slane %v5997_v17, %v15305_v28  ;;  %v11068_v17 = vrot.slane %v19117_v47, 1 }
 0x577   : > { %v6012_v54 = vrot.slane %v5998_v26, %v15305_v28  ;;  %v5989_v31 = vrot.slane %v5981_v50, %v15305_v28  ;;  %v5996_v8 = vrot.slane %v5982_v53, %v15305_v28  ;;  %v23194_v6 = vcombine.high %v18749_v40, %v18732_v42 }
 0x578   : > { %v19143_v22 = vcombine.low %v10637_v21, %v10669_v7  ;;  %v19145_v49 = vcombine.high %v10637_v21, %v10669_v7  ;;  %v23197_v37 = vcombine.high %v23190_v11, %v23191_v45  ;;  %v6030_v26 = vcombine.high %v5964_v39, %v5980_v46 }
 0x579   : > { %5158 = vrot.lane.b32.xlu1 %v23194_v6, %s15157_s11  ;;  %v19153_v50 = vpop.permute.xlu1 %5773  ;;  %v19155_v53 = vpop.permute.xlu0 %5769  ;;  %v23198_v42 = vrot.slane %v19023_v30, 1  ;;  %v23200_v21 = vrot.slane %v19026_v14, 1  ;;  %v23202_v45 = vrot.slane %v19030_v48, 1  ;;  %v19173_v39 = vrot.slane %v6013_v41, %v15317_v36 }
 0x57a   : > { %23195 = vst [vmem:[#allocation51_spill] sm:$0xff] %v19143_v22  ;;  %23196 = vst [vmem:[#allocation60_spill] sm:$0xff] %v19145_v49  ;;  %5186 = vrot.lane.b32.xlu0 %v23197_v37, %s15157_s11  ;;  %v19176_v46 = vrot.slane %v6014_v62, %v15317_v36  ;;  %v23205_v11 = vrot.slane %v19041_v23, 1  ;;  %v11073_v37 = vrot.slane %v19125_v13, 1  ;;  %v19189_v41 = vrot.slane %v6029_v56, %v15317_v36  ;;  %v23210_v13 = vld [vmem:[#allocation22_spill] sm:$0xff] }
 0x57b   : > { %v19160_v40 = vsel %vm23199_vm8, %v23198_v42, %v11048_v60  ;;  %v19165_v6 = vsel %vm23201_vm11, %v23200_v21, %v11053_v27  ;;  %v19170_v7 = vsel %vm23203_vm3, %v23202_v45, %v11058_v15  ;;  %23204 = vst [vmem:[#allocation59_spill] sm:$0xff] %v19173_v39  ;;  %v6045_v27 = vcombine.low %v5989_v31, %v6005_v43  ;;  %v23208_v45 = vld [vmem:[#allocation96_spill] sm:$0xff]  ;;  %vm23226_vm8 = vmmov %vm23215_vm1 }
 0x57c   : > { %v19181_v60 = vsel %vm23206_vm12, %v23205_v11, %v11063_v34  ;;  %v6046_v42 = vcombine.high %v5989_v31, %v6005_v43  ;;  %v6061_v21 = vcombine.low %v5996_v8, %v6012_v54  ;;  %v23207_v15 = vcombine.low %v18752_v52, %v18755_v0  ;;  %v23209_v11 = vld [vmem:[#allocation9_spill] sm:$0xff]  ;;  %vm23254_vm11 = vmmov %vm23215_vm1 }
 0x57d   : > { %v6062_v62 = vcombine.high %v5996_v8, %v6012_v54  ;;  %v10272_v9 = vcombine.low %v23208_v45, %v19015_v63  ;;  %v10288_v34 = vcombine.low %v19017_v20, %v19063_v16  ;;  %v23211_v43 = vcombine.low %v23209_v11, %v23210_v13  ;;  %v19202_v47 = vpop.permute.xlu1 %5781  ;;  %v19204_v56 = vpop.permute.xlu0 %5777  ;;  %vm23256_vm3 = vmmov %vm23215_vm1 }
 0x57e   : > { %5162 = vrot.lane.b32.xlu1 %v23207_v15, %s15175_s23  ;;  %v10320_v15 = vcombine.low %v19098_v3, %v19129_v19  ;;  %v19207_v8 = vrot.slane %v6030_v26, %v15317_v36  ;;  %v23212_v54 = vrot.slane %v19044_v32, 1  ;;  %v22649_v1 = vrot.slane %v19054_v2, 1  ;;  %vm23258_vm12 = vmmov %vm23215_vm1 }
 0x57f   : > { %5190 = vrot.lane.b32.xlu0 %v23211_v43, %s15175_s23  ;;  %v10273_v43 = vcombine.high %v23208_v45, %v19015_v63  ;;  %v10289_v31 = vcombine.high %v19017_v20, %v19063_v16  ;;  %v23214_v58 = vrot.slane %v19047_v12, 1  ;;  %v11078_v26 = vrot.slane %v19143_v22, 1 }
 0x580   : > { %v19212_v61 = vsel %vm23213_vm13, %v23212_v54, %v11068_v17  ;;  %v10304_v32 = vcombine.low %v19061_v18, %v19096_v35  ;;  %v23216_v17 = vcombine.high %v18752_v52, %v18755_v0  ;;  %v19232_v63 = vrot.slane %v6045_v27, %v15317_v36  ;;  %vm23260_vm13 = vmmov %vm23215_vm1 }
 0x581   : > { %v19222_v38 = vsel %vm23215_vm1, %v23214_v58, %v11073_v37  ;;  %v19235_v20 = vrot.slane %v6046_v42, %v15317_v36  ;;  %v19238_v16 = vrot.slane %v6061_v21, %v15317_v36  ;;  %v10280_v58 = vrot.slane %v10272_v9, %v15305_v28  ;;  %v19253_v21 = vpop.permute.xlu1 %5789  ;;  %v19255_v9 = vpop.permute.xlu0 %5785 }
 0x582   : > { %5166 = vrot.lane.b32.xlu1 %v23216_v17, %s15176_s25  ;;  %23217 = vst [vmem:[#allocation57_spill] sm:$0xff] %v19232_v63  ;;  %v10296_v37 = vrot.slane %v10288_v34, %v15305_v28  ;;  %v23218_v45 = vcombine.high %v23209_v11, %v23210_v13  ;;  %v19247_v52 = vrot.slane %v6062_v62, %v15317_v36  ;;  %v11083_v0 = vrot.slane %v19145_v49, 1 }
 0x583   : > { %v10321_v27 = vcombine.high %v19098_v3, %v19129_v19  ;;  %v10328_v42 = vrot.slane %v10320_v15, %v15305_v28  ;;  %v11237_v34 = vcombine.low %v19160_v40, %v19170_v7  ;;  %v11253_v13 = vcombine.low %v19165_v6, %v19181_v60  ;;  %v23223_v19 = vld [vmem:[#allocation15_spill] sm:$0xff] }
 0x584   : > { %5194 = vrot.lane.b32.xlu0 %v23218_v45, %s15176_s25  ;;  %23219 = vst [vmem:[#allocation58_spill] sm:$0xff] %v19247_v52  ;;  %v10287_v62 = vrot.slane %v10273_v43, %v15305_v28  ;;  %v10303_v11 = vrot.slane %v10289_v31, %v15305_v28  ;;  %v19266_v3 = vsel %vm23220_vm2, %v22649_v1, %v11078_v26  ;;  %v23222_v1 = vld [vmem:[#allocation14_spill] sm:$0xff]  ;;  %vm23272_vm2 = vmmov %vm23215_vm1 }
 0x585   : > { %v10305_v15 = vcombine.high %v19061_v18, %v19096_v35  ;;  %v10312_v54 = vrot.slane %v10304_v32, %v15305_v28  ;;  %v23221_v17 = vcombine.low %v18758_v24, %v18765_v51  ;;  %v10336_v26 = vcombine.low %v10280_v58, %v10296_v37  ;;  %v19292_v22 = vpop.permute.xlu1 %6235  ;;  %v19294_v43 = vpop.permute.xlu0 %5793 }
 0x586   : > { %v10337_v45 = vcombine.high %v10280_v58, %v10296_v37  ;;  %v23224_v49 = vcombine.low %v23222_v1, %v23223_v19  ;;  %v23225_v18 = vrot.slane %v19057_v44, 1  ;;  %v11245_v58 = vrot.slane %v11237_v34, %v15305_v28 }
 0x587   : > { %5170 = vrot.lane.b32.xlu1 %v23221_v17, %s15177_s26  ;;  %v10335_v17 = vrot.slane %v10321_v27, %v15305_v28  ;;  %v10368_v31 = vcombine.low %v10312_v54, %v10328_v42  ;;  %v11261_v37 = vrot.slane %v11253_v13, %v15305_v28  ;;  %v10353_v63 = vcombine.high %v10287_v62, %v10303_v11 }
 0x588   : > { %5198 = vrot.lane.b32.xlu0 %v23224_v49, %s15177_s26  ;;  %v19289_v35 = vsel %vm23226_vm8, %v23225_v18, %v11083_v0  ;;  %v10352_v49 = vcombine.low %v10287_v62, %v10303_v11  ;;  %v10369_v39 = vcombine.high %v10312_v54, %v10328_v42  ;;  %v10319_v0 = vrot.slane %v10305_v15, %v15305_v28  ;;  %vm23275_vm8 = vmmov %vm23215_vm1 }
 0x589   : > { %v23227_v27 = vcombine.high %v18758_v24, %v18765_v51  ;;  %v11269_v34 = vcombine.low %v19212_v61, %v19266_v3  ;;  %v11285_v13 = vcombine.low %v19222_v38, %v19289_v35  ;;  %v19312_v42 = vrot.slane %v10336_v26, %v15317_v36 }
 0x58a   : > { %v23228_v62 = vcombine.high %v23222_v1, %v23223_v19  ;;  %v11238_v11 = vcombine.high %v19160_v40, %v19170_v7  ;;  %v19325_v15 = vrot.slane %v10337_v45, %v15317_v36  ;;  %v19328_v54 = vrot.slane %v10368_v31, %v15317_v36  ;;  %v19332_v1 = vpop.permute.xlu0 %6239 }
 0x58b   : > { %5174 = vrot.lane.b32.xlu1 %v23227_v27, %s15178_s27  ;;  %v10384_v26 = vcombine.low %v10319_v0, %v10335_v17  ;;  %v19330_v27 = vpop.permute.xlu1 %6243  ;;  %v11301_v19 = vcombine.low %v11245_v58, %v11261_v37  ;;  %v19338_v24 = vrot.slane %v10353_v63, %v15317_v36  ;;  %v19341_v40 = vrot.slane %v10369_v39, %v15317_v36 }
 0x58c   : > { %5202 = vrot.lane.b32.xlu0 %v23228_v62, %s15178_s27  ;;  %23229 = vst [vmem:[#allocation64_spill] sm:$0xff] %v19328_v54  ;;  %v19335_v62 = vrot.slane %v10352_v49, %v15317_v36  ;;  %v11302_v7 = vcombine.high %v11245_v58, %v11261_v37  ;;  %v23233_v31 = vcombine.high %v18284_v4, %v18281_v25 }
 0x58d   : > { %23231 = vst [vmem:[#allocation69_spill] sm:$0xff] %v19338_v24  ;;  %23232 = vst [vmem:[#allocation67_spill] sm:$0xff] %v19341_v40  ;;  %v11277_v45 = vrot.slane %v11269_v34, %v15305_v28  ;;  %v11293_v51 = vrot.slane %v11285_v13, %v15305_v28  ;;  %v11254_v49 = vcombine.high %v19165_v6, %v19181_v60 }
 0x58e   : > { %23230 = vst [vmem:[#allocation61_spill] sm:$0xff] %v19335_v62  ;;  %v11270_v63 = vcombine.high %v19212_v61, %v19266_v3  ;;  %v10385_v18 = vcombine.high %v10319_v0, %v10335_v17  ;;  %v5813_v39 = vcombine.low %v19127_v57, %v19153_v50  ;;  %v5814_v58 = vcombine.high %v19127_v57, %v19153_v50  ;;  %v19373_v3 = vpop.permute.xlu0 %6247 }
 0x58f   : > { %5618 = vrot.lane.b32.xlu1 %v23233_v31, %s15173_s19  ;;  %v23234_v37 = vcombine.high %v23144_v55, %v23143_v59  ;;  %v19362_v34 = vrot.slane %v11238_v11, %v15305_v28  ;;  %v19365_v6 = vrot.slane %v10384_v26, %v15317_v36  ;;  %v19369_v61 = vcombine.low %v19312_v42, %v19328_v54  ;;  %v19371_v60 = vpop.permute.xlu1 %6251 }
 0x590   : > { %v19376_v57 = vrot.slane %v11301_v19, %v15317_v36  ;;  %v19382_v17 = vcombine.high %v19312_v42, %v19328_v54  ;;  %v19386_v0 = vcombine.low %v19325_v15, %v19341_v40  ;;  %v19390_v13 = vcombine.high %v19325_v15, %v19341_v40 }
 0x591   : > { %5646 = vrot.lane.b32.xlu0 %v23234_v37, %s15173_s19  ;;  %23235 = vst [vmem:[#allocation62_spill] sm:$0xff] %v19365_v6  ;;  %23236 = vst [vmem:[#allocation56_spill] sm:$0xff] %v19369_v61  ;;  %v19393_v11 = vrot.slane %v11302_v7, %v15317_v36  ;;  %v5829_v26 = vcombine.low %v19155_v53, %v19204_v56  ;;  %v23242_v19 = vcombine.low %v18897_v29, %v18884_v33 }
 0x592   : > { %23237 = vst [vmem:[#allocation68_spill] sm:$0xff] %v19376_v57  ;;  %23238 = vst [vmem:[#allocation65_spill] sm:$0xff] %v19382_v17  ;;  %v11333_v31 = vcombine.low %v11277_v45, %v11293_v51  ;;  %v19402_v37 = vrot.slane %v11254_v49, %v15305_v28  ;;  %v19405_v32 = vrot.slane %v11270_v63, %v15305_v28  ;;  %v11045_v25 = vrot.slane %v19369_v61, 1 }
 0x593   : > { %23239 = vst [vmem:[#allocation74_spill] sm:$0xff] %v19386_v0  ;;  %23240 = vst [vmem:[#allocation73_spill] sm:$0xff] %v19390_v13  ;;  %5622 = vrot.lane.b32.xlu1 %v23242_v19, %s15174_s20  ;;  %v19408_v50 = vrot.slane %v10385_v18, %v15317_v36  ;;  %v5821_v7 = vrot.slane %v5813_v39, %v15305_v28  ;;  %v19412_v59 = vrot.slane %v5814_v58, %v15305_v28  ;;  %v19426_v39 = vpop.permute.xlu1 %6259  ;;  %v19428_v58 = vpop.permute.xlu0 %6255 }
 0x594   : > { %23241 = vst [vmem:[#allocation75_spill] sm:$0xff] %v19393_v11  ;;  %v23244_v55 = vcombine.low %v18810_v5, %v18813_v10  ;;  %v11334_v19 = vcombine.high %v11277_v45, %v11293_v51  ;;  %v19420_v49 = vcombine.low %v19335_v62, %v19365_v6  ;;  %v5830_v63 = vcombine.high %v19155_v53, %v19204_v56 }
 0x595   : > { %23243 = vst [vmem:[#allocation82_spill] sm:$0xff] %v19408_v50  ;;  %v5861_v18 = vcombine.low %v19255_v9, %v19294_v43  ;;  %v11050_v51 = vrot.slane %v19382_v17, 1  ;;  %v11055_v45 = vrot.slane %v19386_v0, 1  ;;  %v11060_v4 = vrot.slane %v19390_v13, 1 }
 0x596   : > { %5650 = vrot.lane.b32.xlu0 %v23244_v55, %s15174_s20  ;;  %23245 = vst [vmem:[#allocation80_spill] sm:$0xff] %v19420_v49  ;;  %v5862_v55 = vcombine.high %v19255_v9, %v19294_v43  ;;  %v19438_v53 = vcombine.high %v19335_v62, %v19365_v6  ;;  %v5837_v56 = vrot.slane %v5829_v26, %v15305_v28  ;;  %v23253_v6 = vrot.slane %v19023_v30, 1  ;;  %v23267_v62 = vld [vmem:[#allocation45_spill] sm:$0xff] }
 0x597   : > { %v5845_v54 = vcombine.low %v19202_v47, %v19253_v21  ;;  %v23247_v61 = vcombine.high %v18897_v29, %v18884_v33  ;;  %v19448_v9 = vrot.slane %v11333_v31, %v15317_v36  ;;  %v19452_v43 = vcombine.low %v19338_v24, %v19408_v50  ;;  %v19469_v31 = vpop.permute.xlu1 %6233  ;;  %v19471_v17 = vpop.permute.xlu0 %6263 }
 0x598   : > { %23246 = vst [vmem:[#allocation71_spill] sm:$0xff] %v19438_v53  ;;  %v19456_v13 = vcombine.high %v19338_v24, %v19408_v50  ;;  %v5846_v26 = vcombine.high %v19202_v47, %v19253_v21  ;;  %v23251_v0 = vcombine.high %v18810_v5, %v18813_v10  ;;  %v19465_v33 = vrot.slane %v11334_v19, %v15317_v36 }
 0x599   : > { %5626 = vrot.lane.b32.xlu1 %v23247_v61, %s15157_s11  ;;  %23248 = vst [vmem:[#allocation72_spill] sm:$0xff] %v19448_v9  ;;  %23249 = vst [vmem:[#allocation76_spill] sm:$0xff] %v19452_v43  ;;  %v5844_v29 = vrot.slane %v5830_v63, %v15305_v28  ;;  %v5869_v61 = vrot.slane %v5861_v18, %v15305_v28  ;;  %v19476_v47 = vsel %vm23254_vm11, %v11045_v25, %v23253_v6 }
 0x59a   : > { %23250 = vst [vmem:[#allocation70_spill] sm:$0xff] %v19456_v13  ;;  %5654 = vrot.lane.b32.xlu0 %v23251_v0, %s15157_s11  ;;  %23252 = vst [vmem:[#allocation81_spill] sm:$0xff] %v19465_v33  ;;  %v11065_v21 = vrot.slane %v19420_v49, 1  ;;  %v5876_v5 = vrot.slane %v5862_v55, %v15305_v28  ;;  %v23255_v10 = vrot.slane %v19026_v14, 1  ;;  %v23257_v19 = vrot.slane %v19030_v48, 1  ;;  %v23261_v55 = vld [vmem:[#allocation26_spill] sm:$0xff] }
 0x59b   : > { %v23259_v18 = vrot.slane %v19041_v23, 1  ;;  %v5877_v25 = vcombine.low %v5821_v7, %v5837_v56  ;;  %v5878_v6 = vcombine.high %v5821_v7, %v5837_v56  ;;  %v5853_v49 = vrot.slane %v5845_v54, %v15305_v28  ;;  %v23262_v14 = vld [vmem:[#allocation19_spill] sm:$0xff]  ;;  %v19512_v48 = vpop.permute.xlu1 %6241  ;;  %vm23277_vm11 = vmmov %vm23215_vm1 }
 0x59c   : > { %v19483_v0 = vsel %vm23256_vm3, %v11050_v51, %v23255_v10  ;;  %v19488_v63 = vsel %vm23258_vm12, %v11055_v45, %v23257_v19  ;;  %v23263_v50 = vcombine.low %v23261_v55, %v23262_v14  ;;  %v11070_v51 = vrot.slane %v19438_v53, 1  ;;  %v23264_v45 = vld [vmem:[#allocation13_spill] sm:$0xff]  ;;  %v23265_v19 = vld [vmem:[#allocation27_spill] sm:$0xff] }
 0x59d   : > { %v19493_v30 = vsel %vm23260_vm13, %v11060_v4, %v23259_v18  ;;  %v5860_v10 = vrot.slane %v5846_v26, %v15305_v28  ;;  %v23266_v23 = vcombine.low %v23264_v45, %v23265_v19  ;;  %v11075_v7 = vrot.slane %v19452_v43, 1  ;;  %v19514_v26 = vpop.permute.xlu0 %6237 }
 0x59e   : > { %5630 = vrot.lane.b32.xlu1 %v23263_v50, %s15175_s23  ;;  %v11080_v54 = vrot.slane %v19456_v13, 1  ;;  %v5893_v56 = vcombine.low %v19412_v59, %v5844_v29  ;;  %v5894_v50 = vcombine.high %v19412_v59, %v5844_v29  ;;  %v5909_v18 = vcombine.low %v5853_v49, %v5869_v61 }
 0x59f   : > { %5658 = vrot.lane.b32.xlu0 %v23266_v23, %s15175_s23  ;;  %v5910_v53 = vcombine.high %v5853_v49, %v5869_v61  ;;  %v5925_v40 = vcombine.low %v5860_v10, %v5876_v5  ;;  %v23268_v23 = vrot.slane %v23267_v62, 1  ;;  %v11101_v4 = vcombine.low %v19476_v47, %v19488_v63 }
 0x5a0   : > { %v11117_v13 = vcombine.low %v19483_v0, %v19493_v30  ;;  %v6433_v59 = vcombine.low %v19332_v1, %v19373_v3  ;;  %v23269_v49 = vcombine.high %v23261_v55, %v23262_v14  ;;  %v19532_v29 = vrot.slane %v5877_v25, %v15317_v36 }
 0x5a1   : > { %v19519_v24 = vsel %vm23215_vm1, %v11065_v21, %v23268_v23  ;;  %v19535_v61 = vrot.slane %v5878_v6, %v15317_v36  ;;  %v23271_v21 = vrot.slane %v19047_v12, 1  ;;  %v5926_v43 = vcombine.high %v5860_v10, %v5876_v5 }
 0x5a2   : > { %5634 = vrot.lane.b32.xlu1 %v23269_v49, %s15176_s25  ;;  %23270 = vst [vmem:[#allocation78_spill] sm:$0xff] %v19532_v29  ;;  %v6434_v62 = vcombine.high %v19332_v1, %v19373_v3  ;;  %v23273_v14 = vcombine.high %v23264_v45, %v23265_v19  ;;  %v23274_v25 = vrot.slane %v19054_v2, 1  ;;  %v23276_v6 = vrot.slane %v19057_v44, 1  ;;  %v19562_v3 = vpop.permute.xlu1 %6249 }
 0x5a3   : > { %v19540_v23 = vsel %vm23272_vm2, %v11070_v51, %v23271_v21  ;;  %v6417_v5 = vcombine.low %v19292_v22, %v19330_v27  ;;  %v6418_v1 = vcombine.high %v19292_v22, %v19330_v27  ;;  %v19564_v51 = vpop.permute.xlu0 %6245  ;;  %v19567_v10 = vrot.slane %v5909_v18, %v15317_v36  ;;  %v23279_v21 = vld [vmem:[#allocation32_spill] sm:$0xff] }
 0x5a4   : > { %5662 = vrot.lane.b32.xlu0 %v23273_v14, %s15176_s25  ;;  %v19551_v55 = vsel %vm23275_vm8, %v11075_v7, %v23274_v25  ;;  %v19556_v49 = vsel %vm23277_vm11, %v11080_v54, %v23276_v6  ;;  %v19570_v45 = vrot.slane %v5910_v53, %v15317_v36  ;;  %v19573_v19 = vrot.slane %v5893_v56, %v15317_v36  ;;  %v23280_v14 = vld [vmem:[#allocation23_spill] sm:$0xff]  ;;  %v23283_v25 = vld [vmem:[#allocation4_spill] sm:$0xff] }
 0x5a5   : > { %23278 = vst [vmem:[#allocation84_spill] sm:$0xff] %v19567_v10  ;;  %v19576_v7 = vrot.slane %v5925_v40, %v15317_v36  ;;  %v11109_v54 = vrot.slane %v11101_v4, %v15305_v28  ;;  %v11125_v22 = vrot.slane %v11117_v13, %v15305_v28  ;;  %v6441_v27 = vrot.slane %v6433_v59, %v15305_v28  ;;  %v23282_v13 = vld [vmem:[#allocation25_spill] sm:$0xff] }
 0x5a6   : > { %v23281_v18 = vcombine.low %v23279_v21, %v23280_v14  ;;  %v19586_v53 = vrot.slane %v5894_v50, %v15317_v36  ;;  %v11133_v56 = vcombine.low %v19519_v24, %v19551_v55  ;;  %v11149_v40 = vcombine.low %v19540_v23, %v19556_v49  ;;  %v19606_v12 = vpop.permute.xlu1 %6257 }
 0x5a7   : > { %v6448_v4 = vrot.slane %v6434_v62, %v15305_v28  ;;  %v23284_v59 = vcombine.low %v23282_v13, %v23283_v25  ;;  %v19598_v6 = vrot.slane %v5926_v43, %v15317_v36  ;;  %v6425_v44 = vrot.slane %v6417_v5, %v15305_v28  ;;  %v19608_v62 = vpop.permute.xlu0 %6253 }
 0x5a8   : > { %5638 = vrot.lane.b32.xlu1 %v23281_v18, %s15177_s26  ;;  %v6432_v2 = vrot.slane %v6418_v1, %v15305_v28  ;;  %v5943_v43 = vcombine.low %v19535_v61, %v19570_v45  ;;  %v6465_v50 = vcombine.low %v19428_v58, %v19471_v17  ;;  %v11165_v1 = vcombine.low %v11109_v54, %v11125_v22 }
 0x5a9   : > { %5666 = vrot.lane.b32.xlu0 %v23284_v59, %s15177_s26  ;;  %v5942_v59 = vcombine.high %v19532_v29, %v19567_v10  ;;  %v6481_v33 = vcombine.low %v6425_v44, %v6441_v27  ;;  %v6466_v11 = vcombine.high %v19428_v58, %v19471_v17  ;;  %v23285_v29 = vcombine.high %v23279_v21, %v23280_v14 }
 0x5aa   : > { %v11141_v10 = vrot.slane %v11133_v56, %v15305_v28  ;;  %v11157_v9 = vrot.slane %v11149_v40, %v15305_v28  ;;  %v6482_v57 = vcombine.high %v6425_v44, %v6441_v27  ;;  %v6497_v52 = vcombine.low %v6432_v2, %v6448_v4  ;;  %v19638_v21 = vpop.permute.xlu1 %4170 }
 0x5ab   : > { %v6449_v18 = vcombine.low %v19371_v60, %v19426_v39  ;;  %v23286_v5 = vcombine.high %v23282_v13, %v23283_v25  ;;  %v6498_v58 = vcombine.high %v6432_v2, %v6448_v4  ;;  %v19640_v14 = vpop.permute.xlu0 %6261  ;;  %v11166_v44 = vcombine.high %v11109_v54, %v11125_v22  ;;  %v23290_v4 = vld [vmem:[#allocation59_spill] sm:$0xff]  ;;  %v23291_v25 = vld [vmem:[#allocation57_spill] sm:$0xff] }
 0x5ac   : > { %5642 = vrot.lane.b32.xlu1 %v23285_v29, %s15178_s27  ;;  %v6450_v29 = vcombine.high %v19371_v60, %v19426_v39  ;;  %v23287_v27 = vcombine.high %v19222_v38, %v19289_v35  ;;  %v6473_v40 = vrot.slane %v6465_v50, %v15305_v28  ;;  %v19654_v60 = vrot.slane %v11165_v1, %v15317_v36 }
 0x5ad   : > { %5670 = vrot.lane.b32.xlu0 %v23286_v5, %s15178_s27  ;;  %v6480_v39 = vrot.slane %v6466_v11, %v15305_v28  ;;  %v19659_v54 = vrot.slane %v6481_v33, %v15317_v36  ;;  %v11197_v38 = vcombine.low %v11141_v10, %v11157_v9  ;;  %v11198_v35 = vcombine.high %v11141_v10, %v11157_v9 }
 0x5ae   : > { %v19646_v56 = vrot.slane %v23287_v27, %v15305_v28  ;;  %23288 = vst [vmem:[#allocation85_spill] sm:$0xff] %v19654_v60  ;;  %v6457_v22 = vrot.slane %v6449_v18, %v15305_v28  ;;  %v23292_v50 = vcombine.high %v23290_v4, %v23291_v25  ;;  %v19667_v5 = vrot.slane %v6482_v57, %v15317_v36 }
 0x5af   : > { %23289 = vst [vmem:[#allocation87_spill] sm:$0xff] %v19659_v54  ;;  %v19670_v1 = vrot.slane %v6497_v52, %v15317_v36  ;;  %v11317_v11 = vcombine.low %v19362_v34, %v19402_v37  ;;  %v6464_v33 = vrot.slane %v6450_v29, %v15305_v28  ;;  %v19677_v9 = vpop.permute.xlu0 %4142  ;;  %v19680_v10 = vrot.slane %v6498_v58, %v15317_v36 }
 0x5b0   : > { %6086 = vrot.lane.b32.xlu1 %v5942_v59, %s15173_s19  ;;  %v19675_v59 = vpop.permute.xlu1 %4174  ;;  %v19683_v18 = vrot.slane %v11166_v44, %v15317_v36  ;;  %v11349_v57 = vcombine.low %v19405_v32, %v19646_v56  ;;  %v6513_v52 = vcombine.low %v6457_v22, %v6473_v40  ;;  %v6514_v27 = vcombine.high %v6457_v22, %v6473_v40 }
 0x5b1   : > { %6114 = vrot.lane.b32.xlu0 %v23292_v50, %s15173_s19  ;;  %v11102_v50 = vcombine.high %v19476_v47, %v19488_v63  ;;  %v11118_v29 = vcombine.high %v19483_v0, %v19493_v30  ;;  %v6529_v2 = vcombine.low %v6464_v33, %v6480_v39  ;;  %v6297_v13 = vcombine.low %v19514_v26, %v19564_v51 }
 0x5b2   : > { %v19695_v58 = vrot.slane %v11197_v38, %v15317_v36  ;;  %v19698_v44 = vrot.slane %v11198_v35, %v15317_v36  ;;  %v6530_v17 = vcombine.high %v6464_v33, %v6480_v39  ;;  %v6281_v40 = vcombine.low %v19469_v31, %v19512_v48 }
 0x5b3   : > { %v6298_v47 = vcombine.high %v19514_v26, %v19564_v51  ;;  %v23294_v30 = vcombine.low %v19176_v46, %v19235_v20  ;;  %v19709_v0 = vrot.slane %v11317_v11, %v15317_v36  ;;  %v6282_v63 = vcombine.high %v19469_v31, %v19512_v48  ;;  %v19715_v39 = vpop.permute.xlu0 %4146 }
 0x5b4   : > { %6090 = vrot.lane.b32.xlu1 %v5943_v43, %s15174_s20  ;;  %23293 = vst [vmem:[#allocation86_spill] sm:$0xff] %v19695_v58  ;;  %v19713_v43 = vpop.permute.xlu1 %4178  ;;  %v19718_v38 = vrot.slane %v11349_v57, %v15317_v36  ;;  %v11134_v26 = vcombine.high %v19519_v24, %v19551_v55  ;;  %v11150_v51 = vcombine.high %v19540_v23, %v19556_v49  ;;  %v23306_v55 = vld [vmem:[#allocation5_spill] sm:$0xff]  ;;  %vm23362_vm3 = vcmask 1045504  }
 0x5b5   : > { %6118 = vrot.lane.b32.xlu0 %v23294_v30, %s15174_s20  ;;  %23295 = vst [vmem:[#allocation12_spill] sm:$0xff] %v19709_v0  ;;  %v19725_v35 = vrot.slane %v6513_v52, %v15317_v36  ;;  %v19728_v22 = vrot.slane %v6514_v27, %v15317_v36  ;;  %v19731_v48 = vrot.slane %v11102_v50, %v15305_v28  ;;  %vm23364_vm12 = vmmov %vm23362_vm3 }
 0x5b6   : > { %23296 = vst [vmem:[#allocation6_spill] sm:$0xff] %v19718_v38  ;;  %v19734_v31 = vrot.slane %v11118_v29, %v15305_v28  ;;  %v6305_v11 = vrot.slane %v6297_v13, %v15305_v28  ;;  %v23298_v24 = vcombine.high %v19535_v61, %v19570_v45  ;;  %v19742_v23 = vrot.slane %v6529_v2, %v15317_v36  ;;  %vm23367_vm13 = vmmov %vm23362_vm3 }
 0x5b7   : > { %23297 = vst [vmem:[#allocation88_spill] sm:$0xff] %v19725_v35  ;;  %v6289_v33 = vrot.slane %v6281_v40, %v15305_v28  ;;  %v6312_v57 = vrot.slane %v6298_v47, %v15305_v28  ;;  %v23299_v13 = vcombine.high %v19176_v46, %v19235_v20  ;;  %v19755_v61 = vrot.slane %v6530_v17, %v15317_v36  ;;  %v19762_v50 = vpop.permute.xlu0 %4150  ;;  %vm23369_vm1 = vmmov %vm23362_vm3 }
 0x5b8   : > { %6094 = vrot.lane.b32.xlu1 %v23298_v24, %s15157_s11  ;;  %v6296_v2 = vrot.slane %v6282_v63, %v15305_v28  ;;  %v6329_v52 = vcombine.low %v19608_v62, %v19640_v14  ;;  %v4183_v27 = vpop.permute.xlu1 %4182  ;;  %v19765_v29 = vrot.slane %v11134_v26, %v15305_v28  ;;  %v19768_v46 = vrot.slane %v11150_v51, %v15305_v28  ;;  %vm23382_vm2 = vmmov %vm23369_vm1 }
 0x5b9   : > { %6122 = vrot.lane.b32.xlu0 %v23299_v13, %s15157_s11  ;;  %v11181_v47 = vcombine.low %v19731_v48, %v19734_v31  ;;  %v6345_v30 = vcombine.low %v6289_v33, %v6305_v11  ;;  %v6313_v63 = vcombine.low %v19562_v3, %v19606_v12  ;;  %v23300_v26 = vcombine.low %v19573_v19, %v19576_v7  ;;  %vm23385_vm8 = vmmov %vm23369_vm1 }
 0x5ba   : > { %v6549_v24 = vcombine.low %v19670_v1, %v19742_v23  ;;  %v6346_v13 = vcombine.high %v6289_v33, %v6305_v11  ;;  %v6361_v40 = vcombine.low %v6296_v2, %v6312_v57  ;;  %v6362_v45 = vcombine.high %v6296_v2, %v6312_v57  ;;  %v23305_v2 = vld [vmem:[#allocation10_spill] sm:$0xff]  ;;  %vm23387_vm11 = vmmov %vm23369_vm1 }
 0x5bb   : > { %v23301_v49 = vcombine.low %v19189_v41, %v19238_v16  ;;  %v6337_v17 = vrot.slane %v6329_v52, %v15305_v28  ;;  %v4155_v20 = vpop.permute.xlu0 %4154  ;;  %v11213_v33 = vcombine.low %v19765_v29, %v19768_v46  ;;  %v6330_v52 = vcombine.high %v19608_v62, %v19640_v14 }
 0x5bc   : > { %6098 = vrot.lane.b32.xlu1 %v23300_v26, %s15175_s23  ;;  %v6314_v26 = vcombine.high %v19562_v3, %v19606_v12  ;;  %v4187_v51 = vpop.permute.xlu1 %4186  ;;  %v11318_v12 = vcombine.high %v19362_v34, %v19402_v37  ;;  %v6321_v3 = vrot.slane %v6313_v63, %v15305_v28  ;;  %v23303_v11 = vcombine.high %v19573_v19, %v19576_v7 }
 0x5bd   : > { %6126 = vrot.lane.b32.xlu0 %v23301_v49, %s15175_s23  ;;  %v19804_v49 = vrot.slane %v11181_v47, %v15317_v36  ;;  %v19818_v57 = vrot.slane %v6345_v30, %v15317_v36  ;;  %v11350_v47 = vcombine.high %v19405_v32, %v19646_v56  ;;  %v23307_v34 = vcombine.low %v23305_v2, %v23306_v55  ;;  %v23316_v2 = vld [vmem:[#allocation58_spill] sm:$0xff] }
 0x5be   : > { %v23308_v62 = vcombine.high %v19189_v41, %v19238_v16  ;;  %v19832_v19 = vrot.slane %v6346_v13, %v15317_v36  ;;  %v19835_v7 = vrot.slane %v6361_v40, %v15317_v36  ;;  %v19838_v14 = vrot.slane %v6362_v45, %v15317_v36 }
 0x5bf   : > { %23302 = vst [vmem:[#allocation89_spill] sm:$0xff] %v19804_v49  ;;  %23304 = vst [vmem:[#allocation83_spill] sm:$0xff] %v19818_v57  ;;  %v4204_v37 = vsel %vm3784_vm4, %v23307_v34, %v19638_v21  ;;  %v19841_v32 = vrot.slane %v6314_v26, %v15305_v28  ;;  %v6377_v56 = vcombine.low %v6321_v3, %v6337_v17  ;;  %v4159_v30 = vpop.permute.xlu0 %4158  ;;  %v23391_v49 = vld [vmem:[#allocation48_spill] sm:$0xff] }
 0x5c0   : > { %6102 = vrot.lane.b32.xlu1 %v23303_v11, %s15176_s25  ;;  %v4205_v21 = vsel %vm3786_vm5, %v4204_v37, %v19675_v59  ;;  %v4191_v55 = vpop.permute.xlu1 %4190  ;;  %v19846_v41 = vrot.slane %v11213_v33, %v15317_v36  ;;  %v19851_v40 = vrot.slane %v11318_v12, %v15317_v36  ;;  %v11182_v45 = vcombine.high %v19731_v48, %v19734_v31  ;;  %v23313_v31 = vld [vmem:[#allocation24_spill] sm:$0xff] }
 0x5c1   : > { %6130 = vrot.lane.b32.xlu0 %v23308_v62, %s15176_s25  ;;  %v4206_v16 = vsel %vm561_vm15, %v4205_v21, %v19713_v43  ;;  %v11214_v63 = vcombine.high %v19765_v29, %v19768_v46  ;;  %v19858_v13 = vrot.slane %v6330_v52, %v15305_v28  ;;  %v23311_v26 = vcombine.low %v19586_v53, %v19598_v6  ;;  %v23314_v29 = vld [vmem:[#allocation11_spill] sm:$0xff]  ;;  %v23319_v21 = vld [vmem:[#allocation69_spill] sm:$0xff] }
 0x5c2   : > { %23309 = vst [vmem:[#allocation93_spill] sm:$0xff] %v19846_v41  ;;  %23310 = vst [vmem:[#allocation91_spill] sm:$0xff] %v19851_v40  ;;  %v4207_v59 = vsel %vm3789_vm9, %v4206_v16, %v4183_v27  ;;  %v19866_v43 = vrot.slane %v11350_v47, %v15317_v36  ;;  %v14871_v11 = vcombine.low %v19312_v42, %v19325_v15  ;;  %v23351_v16 = vld [vmem:[#allocation74_spill] sm:$0xff]  ;;  %v23360_v40 = vld [vmem:[#allocation80_spill] sm:$0xff] }
 0x5c3   : > { %v6378_v48 = vcombine.high %v6321_v3, %v6337_v17  ;;  %v23315_v46 = vcombine.low %v23313_v31, %v23314_v29  ;;  %v4208_v27 = vsel %vm3791_vm10, %v4207_v59, %v4187_v51  ;;  %v23317_v12 = vcombine.low %v19207_v8, %v23316_v2  ;;  %v4163_v34 = vpop.permute.xlu0 %4162 }
 0x5c4   : > { %6106 = vrot.lane.b32.xlu1 %v23311_v26, %s15177_s26  ;;  %23312 = vst [vmem:[#allocation16_spill] sm:$0xff] %v19866_v43  ;;  %v14873_v52 = vcombine.high %v19312_v42, %v19325_v15  ;;  %v4209_v17 = vsel %vm3793_vm14, %v4208_v27, %v4191_v55  ;;  %v4195_v3 = vpop.permute.xlu1 %4194  ;;  %v19886_v37 = vrot.slane %v6377_v56, %v15317_v36  ;;  %v23320_v42 = vld [vmem:[#allocation61_spill] sm:$0xff]  ;;  %v14817_v27 = vld [vmem:[%s22412_s2 + $0x8] sm:$0xff]  ;;  %v23359_v43 = vld [vmem:[#allocation46_spill] sm:$0xff] }
 0x5c5   : > { %v4197_v33 = vsel %vm3784_vm4, %v23315_v46, %v19677_v9  ;;  %6134 = vrot.lane.b32.xlu0 %v23317_v12, %s15177_s26  ;;  %v4210_v62 = vsel %vm3795_vm0, %v4209_v17, %v4195_v3  ;;  %v14875_v15 = vcombine.low %v23320_v42, %v23319_v21  ;;  %v23321_v56 = vcombine.high %v19586_v53, %v19598_v6 }
 0x5c6   : > { %v4198_v47 = vsel %vm3786_vm5, %v4197_v33, %v19715_v39  ;;  %23318 = vst [vmem:[#allocation17_spill] sm:$0xff] %v19886_v37  ;;  %v14877_v39 = vcombine.high %v23320_v42, %v23319_v21  ;;  %4216 = vmatprep.subr.mxu0 %v4210_v62  ;;  %v23323_v26 = vcombine.high %v19207_v8, %v23316_v2  ;;  %v23329_v21 = vld [vmem:[#allocation30_spill] sm:$0xff]  ;;  %v23330_v42 = vld [vmem:[#allocation33_spill] sm:$0xff] }
 0x5c7   : > { %v4199_v51 = vsel %vm561_vm15, %v4198_v47, %v19762_v50  ;;  %v19905_v50 = vrot.slane %v11182_v45, %v15317_v36  ;;  %v10686_v31 = vrot.slane %v14871_v11, %v15305_v28  ;;  %v10702_v53 = vrot.slane %v14873_v52, %v15305_v28  ;;  %v4167_v46 = vpop.permute.xlu0 %4166  ;;  %v23327_v47 = vld [vmem:[#allocation64_spill] sm:$0xff] }
 0x5c8   : > { %v4200_v55 = vsel %vm3789_vm9, %v4199_v51, %v4155_v20  ;;  %6110 = vrot.lane.b32.xlu1 %v23321_v56, %s15178_s27  ;;  %v6392_v20 = vrot.slane %v6378_v48, %v15317_v36  ;;  %v6393_v6 = vcombine.low %v19841_v32, %v19858_v13  ;;  %v3782_v45 = vpop.permute.xlu1 %3781  ;;  %v19921_v33 = vrot.slane %v11214_v63, %v15317_v36  ;;  %v23325_v48 = vld [vmem:[#allocation8_spill] sm:$0xff]  ;;  %v23326_v63 = vld [vmem:[#allocation67_spill] sm:$0xff] }
 0x5c9   : > { %23322 = vst [vmem:[#allocation7_spill] sm:$0xff] %v19905_v50  ;;  %v4201_v59 = vsel %vm3791_vm10, %v4200_v55, %v4159_v30  ;;  %6138 = vrot.lane.b32.xlu0 %v23323_v26, %s15178_s27  ;;  %v6410_v30 = vcombine.high %v19818_v57, %v19886_v37  ;;  %v3803_v11 = vsel %vm3795_vm0, %v23325_v48, %v3782_v45  ;;  %v23332_v55 = vld [vmem:[#allocation39_spill] sm:$0xff]  ;;  %v23353_v57 = vld [vmem:[#allocation34_spill] sm:$0xff]  ;;  %v23371_v50 = vld [vmem:[#allocation45_spill] sm:$0xff] }
 0x5ca   : > { %v4202_v29 = vsel %vm3793_vm14, %v4201_v59, %v4163_v34  ;;  %23324 = vst [vmem:[#allocation20_spill] sm:$0xff] %v19921_v33  ;;  %v10718_v2 = vrot.slane %v14875_v15, %v15305_v28  ;;  %v10734_v12 = vrot.slane %v14877_v39, %v15305_v28  ;;  %v6394_v52 = vcombine.high %v19841_v32, %v19858_v13  ;;  %v23331_v39 = vld [vmem:[#allocation37_spill] sm:$0xff] }
 0x5cb   : > { %v4203_v8 = vsel %vm3795_vm0, %v4202_v29, %v4167_v46  ;;  %v14872_v17 = vcombine.low %v23327_v47, %v23326_v63  ;;  %v14874_v3 = vcombine.high %v23327_v47, %v23326_v63  ;;  %v23328_v34 = vcombine.high %v19659_v54, %v19725_v35  ;;  %v23333_v29 = vld [vmem:[#allocation21_spill] sm:$0xff]  ;;  %v19955_v45 = vpop.permute.xlu0 %4710 }
 0x5cc   : > { %6554 = vrot.lane.b32.xlu1 %v6410_v30, %s15173_s19  ;;  %4217 = vmatpush1.msra.mxu0 %v4203_v8  ;;  %v6411_v51 = vcombine.low %v19832_v19, %v6392_v20  ;;  %v10742_v13 = vcombine.low %v10686_v31, %v10702_v53  ;;  %v19945_v62 = vpop.permute.xlu1 %4682  ;;  %v10878_v15 = vcombine.low %v23330_v42, %v23329_v21  ;;  %v23334_v46 = vmov 0.0  }
 0x5cd   : > { %6582 = vrot.lane.b32.xlu0 %v23328_v34, %s15173_s19  ;;  %4290 = vmatprep.subr.mxu0 %v3803_v11  ;;  %v10910_v56 = vcombine.low %v23332_v55, %v23331_v39  ;;  %v10743_v59 = vcombine.high %v10686_v31, %v10702_v53  ;;  %v10879_v26 = vcombine.high %v23330_v42, %v23329_v21  ;;  %v23335_v53 = vld [vmem:[#allocation82_spill] sm:$0xff]  ;;  %v11594_v37 = vrot.slane %v23353_v57, 2 }
 0x5ce   : > { %14818 = vmatmul.mubr.msk.f32.vlgmr.msra.gmra.mrb[2].mxu0 %vm569_vm7, %v14817_v27  ;;  %v10774_v30 = vcombine.low %v10718_v2, %v10734_v12  ;;  %v10775_v8 = vcombine.high %v10718_v2, %v10734_v12  ;;  %v10911_v48 = vcombine.high %v23332_v55, %v23331_v39  ;;  %v19962_v11 = vrot.slane %v14872_v17, %v15305_v28  ;;  %v23336_v27 = vld [vmem:[#allocation62_spill] sm:$0xff]  ;;  %v3804_v55 = vld [vmem:[%s22412_s2] sm:$0xff] }
 0x5cf   : > { %4291 = vmatpush1.msra.mxu0 %v23333_v29  ;;  %4354 = vmatprep.mubr.f32.mxu0 %v23334_v46  ;;  %v19965_v31 = vrot.slane %v14874_v3, %v15305_v28  ;;  %v14876_v63 = vcombine.low %v23336_v27, %v23335_v53  ;;  %v14878_v47 = vcombine.high %v23336_v27, %v23335_v53  ;;  %v23345_v27 = vld [vmem:[#allocation36_spill] sm:$0xff] }
 0x5d0   : > { %6558 = vrot.lane.b32.xlu1 %v6411_v51, %s15174_s20  ;;  %v23337_v2 = vcombine.low %v19667_v5, %v19728_v22  ;;  %v19976_v12 = vrot.slane %v6393_v6, %v15317_v36  ;;  %v19979_v17 = vrot.slane %v6394_v52, %v15317_v36  ;;  %v19985_v51 = vpop.permute.xlu1 %4686  ;;  %v6412_v21 = vcombine.high %v19832_v19, %v6392_v20  ;;  %v19997_v52 = vpop.permute.xlu0 %4714 }
 0x5d1   : > { %v19989_v42 = vrot.slane %v10742_v13, %v15317_v36  ;;  %v19992_v39 = vrot.slane %v10878_v15, %v15317_v36  ;;  %v19995_v6 = vrot.slane %v10910_v56, %v15317_v36  ;;  %v20003_v29 = vrot.slane %v10774_v30, %v15317_v36 }
 0x5d2   : > { %6586 = vrot.lane.b32.xlu0 %v23337_v2, %s15174_s20  ;;  %v20006_v19 = vrot.slane %v10743_v59, %v15317_v36  ;;  %v20009_v20 = vrot.slane %v10775_v8, %v15317_v36  ;;  %v20012_v13 = vrot.slane %v10879_v26, %v15317_v36  ;;  %v20016_v15 = vrot.slane %v10911_v48, %v15317_v36 }
 0x5d3   : > { %23338 = vst [vmem:[#allocation18_spill] sm:$0xff] %v19989_v42  ;;  %23339 = vst [vmem:[#allocation3_spill] sm:$0xff] %v19992_v39  ;;  %v20019_v56 = vrot.slane %v14876_v63, %v15305_v28  ;;  %v20022_v30 = vrot.slane %v14878_v47, %v15305_v28  ;;  %v10758_v59 = vcombine.low %v19962_v11, %v19965_v31  ;;  %v23346_v63 = vld [vmem:[#allocation31_spill] sm:$0xff] }
 0x5d4   : > { %23340 = vst [vmem:[#allocation96_spill] sm:$0xff] %v19995_v6  ;;  %23341 = vst [vmem:[#allocation9_spill] sm:$0xff] %v20003_v29  ;;  %6562 = vrot.lane.b32.xlu1 %v6412_v21, %s15157_s11  ;;  %v23344_v8 = vcombine.high %v19667_v5, %v19728_v22  ;;  %v6413_v26 = vcombine.low %v19835_v7, %v19976_v12  ;;  %v6414_v48 = vcombine.high %v19835_v7, %v19976_v12  ;;  %v20038_v2 = vpop.permute.xlu1 %4690  ;;  %v23347_v7 = vld [vmem:[#allocation41_spill] sm:$0xff]  ;;  %v20049_v34 = vpop.permute.xlu0 %4718  ;;  %v23355_v6 = vld [vmem:[#allocation40_spill] sm:$0xff] }
 0x5d5   : > { %23342 = vst [vmem:[#allocation22_spill] sm:$0xff] %v20006_v19  ;;  %23343 = vst [vmem:[#allocation14_spill] sm:$0xff] %v20009_v20  ;;  %v14880_v47 = vcombine.low %v23346_v63, %v23345_v27  ;;  %v14882_v22 = vcombine.high %v23346_v63, %v23345_v27  ;;  %v23348_v12 = vld [vmem:[#allocation29_spill] sm:$0xff]  ;;  %v20066_v53 = vrot.slane %v10758_v59, %v15317_v36  ;;  %v11603_v63 = vrot.slane %v23351_v16, 2  ;;  %v23354_v20 = vld [vmem:[#allocation28_spill] sm:$0xff] }
 0x5d6   : > { %6590 = vrot.lane.b32.xlu0 %v23344_v8, %s15157_s11  ;;  %14819 = vmatmul.mubr.msk.f32.vlgmr.msra.gmra.mrb[2].mxu0 %vm569_vm7, %v3804_v55  ;;  %v14884_v8 = vcombine.low %v23348_v12, %v23347_v7  ;;  %v14886_v3 = vcombine.high %v23348_v12, %v23347_v7  ;;  %v10790_v32 = vcombine.low %v20019_v56, %v20022_v30  ;;  %v23350_v27 = vld [vmem:[#allocation65_spill] sm:$0xff]  ;;  %v11599_v19 = vrot.slane %v23354_v20, 2  ;;  %v23357_v29 = vld [vmem:[#allocation72_spill] sm:$0xff]  ;;  %v23368_v21 = vld [vmem:[#allocation71_spill] sm:$0xff] }
 0x5d7   : > { %4820 = vmatprep.mubr.f32.mxu0 %v23334_v46  ;;  %v20075_v7 = vrot.slane %v14880_v47, %v15305_v28  ;;  %v11598_v55 = vrot.slane %v23350_v27, 2  ;;  %v20081_v59 = vrot.slane %v14882_v22, %v15305_v28  ;;  %v23356_v22 = vld [vmem:[#allocation68_spill] sm:$0xff]  ;;  %v23361_v33 = vcombine.high %v19670_v1, %v19742_v23  ;;  %v23375_v16 = vld [vmem:[#allocation49_spill] sm:$0xff] }
 0x5d8   : > { %6566 = vrot.lane.b32.xlu1 %v6413_v26, %s15175_s23  ;;  %v23349_v26 = vld [vmem:[#allocation56_spill] sm:$0xff]  ;;  %v4695_v9 = vpop.permute.xlu1 %4694  ;;  %v20084_v5 = vrot.slane %v14884_v8, %v15305_v28  ;;  %v4723_v47 = vpop.permute.xlu0 %4722  ;;  %v20090_v35 = vrot.slane %v14886_v3, %v15305_v28  ;;  %v23358_v8 = vcombine.high %v23356_v22, %v23357_v29  ;;  %v20100_v42 = vrot.slane %v10790_v32, %v15317_v36 }
 0x5d9   : > { %v11593_v12 = vrot.slane %v23349_v26, 2  ;;  %v11609_v3 = vrot.slane %v23359_v43, 2  ;;  %v23366_v32 = vrot.slane %v23355_v6, 2  ;;  %v11618_v29 = vrot.slane %v23368_v21, 2  ;;  %v23372_v23 = vld [vmem:[#allocation76_spill] sm:$0xff]  ;;  %v23377_v21 = vld [vmem:[#allocation43_spill] sm:$0xff] }
 0x5da   : > { %6594 = vrot.lane.b32.xlu0 %v6549_v24, %s15175_s23  ;;  %v23352_v24 = vld [vmem:[#allocation73_spill] sm:$0xff]  ;;  %v11614_v1 = vrot.slane %v23371_v50, 2  ;;  %v11619_v26 = vrot.slane %v23377_v21, 2  ;;  %v23378_v50 = vld [vmem:[#allocation38_spill] sm:$0xff] }
 0x5db   : > { %v11608_v54 = vrot.slane %v23352_v24, 2  ;;  %v11613_v24 = vrot.slane %v23360_v40, 2  ;;  %v20111_v39 = vsel %vm23362_vm3, %v11593_v12, %v11594_v37  ;;  %v20119_v22 = vsel %vm23367_vm13, %v11603_v63, %v23366_v32  ;;  %v23373_v12 = vld [vmem:[#allocation70_spill] sm:$0xff]  ;;  %vm23388_vm3 = vmmov %vm23369_vm1 }
 0x5dc   : > { %11402 = vrot.lane.b32.xlu1 %v23358_v8, %s15173_s19  ;;  %23363 = vst [vmem:[#allocation15_spill] sm:$0xff] %v20111_v39  ;;  %v20114_v8 = vsel %vm23364_vm12, %v11598_v55, %v11599_v19  ;;  %v4699_v43 = vpop.permute.xlu1 %4698  ;;  %v11628_v20 = vrot.slane %v23373_v12, 2  ;;  %v23374_v55 = vld [vmem:[#allocation52_spill] sm:$0xff]  ;;  %v4727_v63 = vpop.permute.xlu0 %4726  ;;  %v23384_v32 = vld [vmem:[#allocation50_spill] sm:$0xff]  ;;  %v20154_v21 = vsel %vm23385_vm8, %v11618_v29, %v11619_v26  ;;  %v23389_v29 = vld [vmem:[#allocation55_spill] sm:$0xff] }
 0x5dd   : > { %23365 = vst [vmem:[#allocation26_spill] sm:$0xff] %v20114_v8  ;;  %v20123_v40 = vsel %vm23369_vm1, %v11608_v54, %v11609_v3  ;;  %v23376_v57 = vcombine.low %v23374_v55, %v23375_v16  ;;  %v23381_v16 = vcombine.low %v19680_v10, %v19755_v61  ;;  %v11629_v54 = vrot.slane %v23384_v32, 2  ;;  %vm23400_vm12 = vmmov %vm23369_vm1 }
 0x5de   : > { %6598 = vrot.lane.b32.xlu0 %v23361_v33, %s15176_s25  ;;  %23370 = vst [vmem:[#allocation19_spill] sm:$0xff] %v20123_v40  ;;  %v11623_v33 = vrot.slane %v23372_v23, 2  ;;  %v23379_v23 = vld [vmem:[#allocation35_spill] sm:$0xff]  ;;  %v11601_v32 = vrot.slane %v23389_v29, 2  ;;  %vm23401_vm13 = vmmov %vm23369_vm1 }
 0x5df   : > { %v4737_v27 = vsel %vm3784_vm4, %v23376_v57, %v19945_v62  ;;  %v23380_v4 = vcombine.low %v23378_v50, %v23379_v23  ;;  %v20148_v57 = vsel %vm23382_vm2, %v11613_v24, %v11614_v1  ;;  %v23383_v62 = vld [vmem:[#allocation44_spill] sm:$0xff]  ;;  %v11665_v50 = vcombine.low %v20114_v8, %v20123_v40  ;;  %v23393_v8 = vld [vmem:[#allocation81_spill] sm:$0xff]  ;;  %v23395_v40 = vld [vmem:[#allocation42_spill] sm:$0xff] }
 0x5e0   : > { %6602 = vrot.lane.b32.xlu1 %v23381_v16, %s15177_s26  ;;  %v11624_v55 = vrot.slane %v23383_v62, 2  ;;  %v4738_v24 = vsel %vm3786_vm5, %v4737_v27, %v19985_v51  ;;  %v4703_v16 = vpop.permute.xlu1 %4702  ;;  %v4731_v0 = vpop.permute.xlu0 %4730  ;;  %v11611_v51 = vrot.slane %v23391_v49, 2  ;;  %v23397_v49 = vcombine.high %v19654_v60, %v19695_v58  ;;  %vm23404_vm2 = vmmov %vm23369_vm1 }
 0x5e1   : > { %v4744_v12 = vsel %vm3784_vm4, %v23380_v4, %v19955_v45  ;;  %v11649_v4 = vcombine.low %v20111_v39, %v20119_v22  ;;  %v23386_v45 = vld [vmem:[#allocation47_spill] sm:$0xff]  ;;  %v4739_v38 = vsel %vm561_vm15, %v4738_v24, %v20038_v2  ;;  %v20205_v60 = vsel %vm23401_vm13, %v11599_v19, %v11601_v32  ;;  %vm23405_vm8 = vmmov %vm23369_vm1 }
 0x5e2   : > { %6570 = vrot.lane.b32.xlu0 %v6414_v48, %s15176_s25  ;;  %v11596_v23 = vrot.slane %v23386_v45, 2  ;;  %v20164_v62 = vsel %vm23387_vm11, %v11623_v33, %v11624_v55  ;;  %v20167_v48 = vsel %vm23388_vm3, %v11628_v20, %v11629_v54  ;;  %v4745_v25 = vsel %vm3786_vm5, %v4744_v12, %v19997_v52  ;;  %v23390_v45 = vld [vmem:[#allocation53_spill] sm:$0xff]  ;;  %v23392_v20 = vld [vmem:[#allocation75_spill] sm:$0xff]  ;;  %v23396_v12 = vld [vmem:[#allocation54_spill] sm:$0xff] }
 0x5e3   : > { %v11606_v41 = vrot.slane %v23390_v45, 2  ;;  %v4746_v27 = vsel %vm561_vm15, %v4745_v25, %v20049_v34  ;;  %v4740_v33 = vsel %vm3789_vm9, %v4739_v38, %v4695_v9  ;;  %v23394_v29 = vcombine.low %v23392_v20, %v23393_v8  ;;  %v23398_v25 = vld [vmem:[#allocation51_spill] sm:$0xff]  ;;  %v23399_v9 = vld [vmem:[#allocation60_spill] sm:$0xff]  ;;  %vm23407_vm11 = vmmov %vm23369_vm1 }
 0x5e4   : > { %v11616_v52 = vrot.slane %v23395_v40, 2  ;;  %v11621_v39 = vrot.slane %v23396_v12, 2  ;;  %v4747_v2 = vsel %vm3789_vm9, %v4746_v27, %v4723_v47  ;;  %v4741_v24 = vsel %vm3791_vm10, %v4740_v33, %v4699_v43  ;;  %v4707_v40 = vpop.permute.xlu1 %4706  ;;  %vm23408_vm3 = vmmov %vm23369_vm1 }
 0x5e5   : > { %11406 = vrot.lane.b32.xlu1 %v23394_v29, %s15174_s20  ;;  %v11626_v38 = vrot.slane %v23398_v25, 2  ;;  %v11631_v34 = vrot.slane %v23399_v9, 2  ;;  %v4748_v45 = vsel %vm3791_vm10, %v4747_v2, %v4727_v63  ;;  %v4742_v29 = vsel %vm3793_vm14, %v4741_v24, %v4703_v16 }
 0x5e6   : > { %11374 = vrot.lane.b32.xlu0 %v23397_v49, %s15173_s19  ;;  %v11681_v12 = vcombine.low %v20148_v57, %v20164_v62  ;;  %v11697_v43 = vcombine.low %v20154_v21, %v20167_v48  ;;  %v4749_v47 = vsel %vm3793_vm14, %v4748_v45, %v4731_v0  ;;  %v4743_v27 = vsel %vm3795_vm0, %v4742_v29, %v4707_v40  ;;  %v4735_v49 = vpop.permute.xlu0 %4734  ;;  %v14820_v0 = vld [vmem:[%s22412_s2 + $0x10] sm:$0xff] }
 0x5e7   : > { %v20202_v33 = vsel %vm23400_vm12, %v11594_v37, %v11596_v23  ;;  %v23402_v63 = vcombine.high %v19680_v10, %v19755_v61  ;;  %v4750_v16 = vsel %vm3795_vm0, %v4749_v47, %v4735_v49  ;;  %v23403_v40 = vrot.slane %v23355_v6, 2  ;;  %vm23409_vm12 = vmmov %vm23369_vm1 }
 0x5e8   : > { %v20221_v37 = vsel %vm23404_vm2, %v11609_v3, %v11611_v51  ;;  %v20224_v19 = vsel %vm23405_vm8, %v11614_v1, %v11616_v52  ;;  %v23406_v10 = vcombine.low %v19838_v14, %v19979_v17  ;;  %4756 = vmatprep.subr.mxu0 %v4750_v16  ;;  %v20231_v61 = vsel %vm23407_vm11, %v11619_v26, %v11621_v39  ;;  %v20239_v3 = vpop.permute.xlu1 %5150 }
 0x5e9   : > { %6606 = vrot.lane.b32.xlu1 %v23402_v63, %s15178_s27  ;;  %v20218_v45 = vsel %vm23369_vm1, %v23403_v40, %v11606_v41  ;;  %v20234_v32 = vsel %vm23408_vm3, %v11624_v55, %v11626_v38  ;;  %v20237_v41 = vsel %vm23409_vm12, %v11629_v54, %v11631_v34  ;;  %4757 = vmatpush1.msra.mxu0 %v4743_v27  ;;  %vm23457_vm13 = vcmask 1044480  }
 0x5ea   : > { %6574 = vrot.lane.b32.xlu0 %v23406_v10, %s15177_s26  ;;  %v10895_v1 = vcombine.high %v20075_v7, %v20081_v59  ;;  %v10927_v23 = vcombine.high %v20084_v5, %v20090_v35  ;;  %v11657_v51 = vrot.slane %v11649_v4, %v15305_v28  ;;  %v11673_v39 = vrot.slane %v11665_v50, %v15305_v28  ;;  %v20247_v26 = vpop.permute.xlu0 %5178  ;;  %vm23462_vm1 = vmmov %vm23457_vm13 }
 0x5eb   : > { %14821 = vmatmul.mubr.msk.f32.vlgmr.msra.gmra.mrb[2].mxu0 %vm569_vm7, %v14820_v0  ;;  %v11689_v54 = vrot.slane %v11681_v12, %v15305_v28  ;;  %v11705_v55 = vrot.slane %v11697_v43, %v15305_v28  ;;  %v11785_v52 = vcombine.low %v20202_v33, %v20218_v45  ;;  %v11801_v2 = vcombine.low %v20205_v60, %v20221_v37  ;;  %vm23465_vm2 = vmmov %vm23462_vm1 }
 0x5ec   : > { %v23410_v4 = vcombine.high %v23392_v20, %v23393_v8  ;;  %v11817_v24 = vcombine.low %v20224_v19, %v20234_v32  ;;  %v11833_v12 = vcombine.low %v20231_v61, %v20237_v41  ;;  %5288 = vmatprep.mubr.f32.mxu0 %v23334_v46  ;;  %v23411_v38 = vcombine.low %v19683_v18, %v19698_v44  ;;  %vm23473_vm8 = vmmov %vm23462_vm1 }
 0x5ed   : > { %v23412_v8 = vcombine.low %v20075_v7, %v20081_v59  ;;  %v23413_v34 = vcombine.low %v20084_v5, %v20090_v35  ;;  %v23414_v43 = vcombine.high %v19962_v11, %v19965_v31  ;;  %v23415_v27 = vcombine.high %v20019_v56, %v20022_v30  ;;  %v20295_v7 = vpop.permute.xlu1 %5154  ;;  %v23450_v35 = vld [vmem:[#allocation66_spill] sm:$0xff]  ;;  %vm23476_vm11 = vmmov %vm23462_vm1 }
 0x5ee   : > { %11410 = vrot.lane.b32.xlu1 %v23410_v4, %s15157_s11  ;;  %11378 = vrot.lane.b32.xlu0 %v23411_v38, %s15174_s20  ;;  %v20302_v5 = vrot.slane %v10895_v1, %v15317_v36  ;;  %v20305_v11 = vrot.slane %v10927_v23, %v15317_v36  ;;  %v20307_v31 = vpop.permute.xlu0 %5182  ;;  %v11713_v63 = vcombine.low %v11657_v51, %v11673_v39  ;;  %vm23478_vm3 = vmmov %vm23462_vm1 }
 0x5ef   : > { %v20275_v20 = vrot.slane %v23412_v8, %v15317_v36  ;;  %v20281_v29 = vrot.slane %v23413_v34, %v15317_v36  ;;  %v20287_v47 = vrot.slane %v23414_v43, %v15317_v36  ;;  %v20293_v49 = vrot.slane %v23415_v27, %v15317_v36  ;;  %vm23479_vm12 = vmmov %vm23462_vm1 }
 0x5f0   : > { %23416 = vst [vmem:[#allocation13_spill] sm:$0xff] %v20305_v11  ;;  %v11745_v56 = vcombine.low %v11689_v54, %v11705_v55  ;;  %v11793_v30 = vrot.slane %v11785_v52, %v15305_v28  ;;  %v11809_v16 = vrot.slane %v11801_v2, %v15305_v28  ;;  %v23417_v0 = vcombine.high %v19683_v18, %v19698_v44  ;;  %v23446_v52 = vld [vmem:[#allocation79_spill] sm:$0xff] }
 0x5f1   : > { %v11825_v40 = vrot.slane %v11817_v24, %v15305_v28  ;;  %v11841_v10 = vrot.slane %v11833_v12, %v15305_v28  ;;  %v11714_v1 = vcombine.high %v11657_v51, %v11673_v39  ;;  %v11746_v23 = vcombine.high %v11689_v54, %v11705_v55  ;;  %v20329_v24 = vpop.permute.xlu1 %5158  ;;  %v23419_v51 = vld [vmem:[#allocation15_spill] sm:$0xff] }
 0x5f2   : > { %11382 = vrot.lane.b32.xlu1 %v23417_v0, %s15157_s11  ;;  %v23418_v4 = vcombine.high %v19838_v14, %v19979_v17  ;;  %v11650_v39 = vcombine.high %v23419_v51, %v20119_v22  ;;  %v23420_v54 = vld [vmem:[#allocation19_spill] sm:$0xff]  ;;  %v23421_v14 = vld [vmem:[#allocation26_spill] sm:$0xff]  ;;  %v11682_v55 = vcombine.high %v20148_v57, %v20164_v62  ;;  %v11698_v12 = vcombine.high %v20154_v21, %v20167_v48  ;;  %v20339_v38 = vpop.permute.xlu0 %5186  ;;  %v23424_v22 = vld [vmem:[#allocation89_spill] sm:$0xff] }
 0x5f3   : > { %v11666_v17 = vcombine.high %v23421_v14, %v23420_v54  ;;  %v20342_v8 = vrot.slane %v11713_v63, %v15317_v36  ;;  %v20345_v34 = vrot.slane %v11745_v56, %v15317_v36  ;;  %v11849_v43 = vcombine.low %v11793_v30, %v11809_v16  ;;  %v23425_v0 = vld [vmem:[#allocation93_spill] sm:$0xff]  ;;  %v23429_v63 = vld [vmem:[#allocation12_spill] sm:$0xff]  ;;  %v23430_v56 = vld [vmem:[#allocation6_spill] sm:$0xff] }
 0x5f4   : > { %6578 = vrot.lane.b32.xlu0 %v23418_v4, %s15178_s27  ;;  %v11850_v27 = vcombine.high %v11793_v30, %v11809_v16  ;;  %v23426_v4 = vcombine.low %v23424_v22, %v23425_v0  ;;  %v11881_v62 = vcombine.low %v11825_v40, %v11841_v10  ;;  %v20354_v21 = vrot.slane %v11714_v1, %v15317_v36 }
 0x5f5   : > { %23422 = vst [vmem:[#allocation27_spill] sm:$0xff] %v20342_v8  ;;  %23423 = vst [vmem:[#allocation32_spill] sm:$0xff] %v20345_v34  ;;  %v20357_v48 = vrot.slane %v11746_v23, %v15317_v36  ;;  %v23431_v51 = vcombine.low %v23429_v63, %v23430_v56  ;;  %v11786_v44 = vcombine.high %v20202_v33, %v20218_v45  ;;  %v5163_v1 = vpop.permute.xlu1 %5162  ;;  %v23449_v45 = vld [vmem:[#allocation28_spill] sm:$0xff]  ;;  %v23470_v8 = vld [vmem:[#allocation43_spill] sm:$0xff] }
 0x5f6   : > { %11386 = vrot.lane.b32.xlu1 %v23426_v4, %s15175_s23  ;;  %23427 = vst [vmem:[#allocation23_spill] sm:$0xff] %v20354_v21  ;;  %v11882_v4 = vcombine.high %v11825_v40, %v11841_v10  ;;  %v20370_v57 = vrot.slane %v11650_v39, %v15305_v28  ;;  %v20373_v23 = vrot.slane %v11666_v17, %v15305_v28  ;;  %v5191_v30 = vpop.permute.xlu0 %5190  ;;  %v23440_v40 = vld [vmem:[#allocation56_spill] sm:$0xff]  ;;  %v22767_v16 = vrot.slane %v23449_v45, 3 }
 0x5f7   : > { %23428 = vst [vmem:[#allocation25_spill] sm:$0xff] %v20357_v48  ;;  %v20376_v18 = vrot.slane %v11682_v55, %v15305_v28  ;;  %v20384_v10 = vrot.slane %v11849_v43, %v15317_v36  ;;  %v20389_v14 = vrot.slane %v11850_v27, %v15317_v36  ;;  %v23438_v17 = vcombine.high %v23424_v22, %v23425_v0  ;;  %v23453_v48 = vld [vmem:[#allocation7_spill] sm:$0xff] }
 0x5f8   : > { %11414 = vrot.lane.b32.xlu0 %v23431_v51, %s15175_s23  ;;  %v20379_v51 = vrot.slane %v11698_v12, %v15305_v28  ;;  %v20396_v55 = vrot.slane %v11881_v62, %v15317_v36  ;;  %v12069_v2 = vrot.slane %v23440_v40, 3  ;;  %v23441_v27 = vcombine.high %v23429_v63, %v23430_v56  ;;  %v23443_v62 = vld [vmem:[#allocation65_spill] sm:$0xff]  ;;  %v23444_v63 = vld [vmem:[#allocation34_spill] sm:$0xff]  ;;  %v23451_v56 = vld [vmem:[#allocation63_spill] sm:$0xff] }
 0x5f9   : > { %23434 = vst [vmem:[#allocation4_spill] sm:$0xff] %v20384_v10  ;;  %23437 = vst [vmem:[#allocation10_spill] sm:$0xff] %v20389_v14  ;;  %v20408_v39 = vrot.slane %v11882_v4, %v15317_v36  ;;  %v20411_v22 = vrot.slane %v11786_v44, %v15305_v28  ;;  %v5167_v12 = vpop.permute.xlu1 %5166  ;;  %v23447_v44 = vld [vmem:[#allocation77_spill] sm:$0xff]  ;;  %v11818_v33 = vcombine.high %v20224_v19, %v20234_v32  ;;  %v23464_v21 = vrot.slane %v23355_v6, 3  ;;  %v23471_v40 = vld [vmem:[#allocation70_spill] sm:$0xff] }
 0x5fa   : > { %11390 = vrot.lane.b32.xlu1 %v23438_v17, %s15176_s25  ;;  %23439 = vst [vmem:[#allocation5_spill] sm:$0xff] %v20396_v55  ;;  %v12074_v17 = vrot.slane %v23443_v62, 3  ;;  %v23448_v59 = vcombine.low %v23446_v52, %v23447_v44  ;;  %v5195_v0 = vpop.permute.xlu0 %5194  ;;  %v11834_v43 = vcombine.high %v20231_v61, %v20237_v41  ;;  %v23452_v54 = vcombine.low %v23450_v35, %v23451_v56  ;;  %v23454_v52 = vld [vmem:[#allocation20_spill] sm:$0xff]  ;;  %v23458_v32 = vld [vmem:[#allocation73_spill] sm:$0xff]  ;;  %v23459_v35 = vld [vmem:[#allocation91_spill] sm:$0xff] }
 0x5fb   : > { %23442 = vst [vmem:[#allocation24_spill] sm:$0xff] %v20408_v39  ;;  %v23455_v44 = vcombine.low %v23453_v48, %v23454_v52  ;;  %v12084_v41 = vrot.slane %v23458_v32, 3  ;;  %v12104_v11 = vrot.slane %v23471_v40, 3 }
 0x5fc   : > { %11418 = vrot.lane.b32.xlu0 %v23441_v27, %s15176_s25  ;;  %v23445_v27 = vld [vmem:[#allocation74_spill] sm:$0xff]  ;;  %v5205_v50 = vsel %vm3784_vm4, %v23448_v59, %v20239_v3  ;;  %v5212_v58 = vsel %vm3784_vm4, %v23452_v54, %v20247_v26  ;;  %v23456_v3 = vrot.slane %v23444_v63, 3  ;;  %v23460_v54 = vld [vmem:[#allocation16_spill] sm:$0xff] }
 0x5fd   : > { %v12079_v4 = vrot.slane %v23445_v27, 3  ;;  %v5206_v59 = vsel %vm3786_vm5, %v5205_v50, %v20295_v7  ;;  %v5213_v26 = vsel %vm3786_vm5, %v5212_v58, %v20307_v31  ;;  %v23461_v56 = vcombine.low %v23459_v35, %v23460_v54  ;;  %v5171_v61 = vpop.permute.xlu1 %5170  ;;  %v23466_v7 = vld [vmem:[#allocation46_spill] sm:$0xff]  ;;  %v23467_v31 = vld [vmem:[#allocation71_spill] sm:$0xff]  ;;  %v23468_v27 = vld [vmem:[#allocation76_spill] sm:$0xff] }
 0x5fe   : > { %11394 = vrot.lane.b32.xlu1 %v23455_v44, %s15177_s26  ;;  %v20444_v19 = vsel %vm23457_vm13, %v12069_v2, %v23456_v3  ;;  %v20459_v2 = vsel %vm23462_vm1, %v12074_v17, %v22767_v16  ;;  %v23463_v44 = vld [vmem:[#allocation80_spill] sm:$0xff]  ;;  %v12085_v58 = vrot.slane %v23466_v7, 3  ;;  %v12094_v32 = vrot.slane %v23467_v31, 3  ;;  %v5199_v34 = vpop.permute.xlu0 %5198  ;;  %v23469_v17 = vld [vmem:[#allocation45_spill] sm:$0xff]  ;;  %vm23480_vm13 = vmmov %vm23462_vm1 }
 0x5ff   : > { %v12089_v3 = vrot.slane %v23463_v44, 3  ;;  %v20465_v50 = vsel %vm23465_vm2, %v12079_v4, %v23464_v21  ;;  %v12099_v62 = vrot.slane %v23468_v27, 3  ;;  %v12090_v16 = vrot.slane %v23469_v17, 3  ;;  %vm23497_vm2 = vmmov %vm23462_vm1 }
 0x600   : > { %11422 = vrot.lane.b32.xlu0 %v23461_v56, %s15177_s26  ;;  %v5207_v56 = vsel %vm561_vm15, %v5206_v59, %v20329_v24  ;;  %v12095_v44 = vrot.slane %v23470_v8, 3  ;;  %v5214_v21 = vsel %vm561_vm15, %v5213_v26, %v20339_v38  ;;  %v23472_v7 = vcombine.high %v23453_v48, %v23454_v52  ;;  %v23474_v24 = vld [vmem:[#allocation44_spill] sm:$0xff]  ;;  %v23477_v26 = vld [vmem:[#allocation50_spill] sm:$0xff] }
 0x601   : > { %v5208_v4 = vsel %vm3789_vm9, %v5207_v56, %v5163_v1  ;;  %v20483_v27 = vsel %vm23473_vm8, %v12084_v41, %v12085_v58  ;;  %v12100_v59 = vrot.slane %v23474_v24, 3  ;;  %v5215_v17 = vsel %vm3789_vm9, %v5214_v21, %v5191_v30  ;;  %v23481_v21 = vld [vmem:[#allocation42_spill] sm:$0xff]  ;;  %vm23498_vm8 = vmmov %vm23462_vm1 }
 0x602   : > { %11398 = vrot.lane.b32.xlu1 %v23472_v7, %s15178_s27  ;;  %v5209_v8 = vsel %vm3791_vm10, %v5208_v4, %v5167_v12  ;;  %v23475_v38 = vcombine.high %v23459_v35, %v23460_v54  ;;  %v20493_v1 = vsel %vm23476_vm11, %v12089_v3, %v12090_v16  ;;  %v12105_v48 = vrot.slane %v23477_v26, 3  ;;  %v5175_v7 = vpop.permute.xlu1 %5174  ;;  %v5203_v54 = vpop.permute.xlu0 %5202  ;;  %v23492_v26 = vld [vmem:[#allocation48_spill] sm:$0xff]  ;;  %vm23499_vm11 = vmmov %vm23462_vm1 }
 0x603   : > { %v5216_v52 = vsel %vm3791_vm10, %v5215_v17, %v5195_v0  ;;  %v5210_v41 = vsel %vm3793_vm14, %v5209_v8, %v5171_v61  ;;  %v20499_v56 = vsel %vm23478_vm3, %v12094_v32, %v12095_v44  ;;  %v20502_v30 = vsel %vm23479_vm12, %v12099_v62, %v12100_v59  ;;  %v23482_v0 = vld [vmem:[#allocation18_spill] sm:$0xff]  ;;  %v23483_v8 = vld [vmem:[#allocation9_spill] sm:$0xff]  ;;  %vm23502_vm3 = vmmov %vm23462_vm1 }
 0x604   : > { %11426 = vrot.lane.b32.xlu0 %v23475_v38, %s15178_s27  ;;  %v5217_v12 = vsel %vm3793_vm14, %v5216_v52, %v5199_v34  ;;  %v5211_v35 = vsel %vm3795_vm0, %v5210_v41, %v5175_v7  ;;  %v20507_v3 = vsel %vm23480_vm13, %v12104_v11, %v12105_v48  ;;  %v12092_v4 = vrot.slane %v23481_v21, 3  ;;  %v14822_v62 = vld [vmem:[%s22412_s2 + $0x18] sm:$0xff]  ;;  %v23486_v52 = vld [vmem:[#allocation3_spill] sm:$0xff]  ;;  %v23487_v41 = vld [vmem:[#allocation96_spill] sm:$0xff] }
 0x605   : > { %v23484_v61 = vcombine.high %v23482_v0, %v23483_v8  ;;  %v5218_v32 = vsel %vm3795_vm0, %v5217_v12, %v5203_v54  ;;  %v23485_v34 = vld [vmem:[#allocation54_spill] sm:$0xff]  ;;  %v12102_v38 = vrot.slane %v23398_v25, 3  ;;  %v12107_v11 = vrot.slane %v23399_v9, 3  ;;  %v23489_v0 = vld [vmem:[#allocation47_spill] sm:$0xff]  ;;  %v23491_v54 = vld [vmem:[#allocation53_spill] sm:$0xff] }
 0x606   : > { %v12097_v17 = vrot.slane %v23485_v34, 3  ;;  %v23488_v7 = vcombine.high %v23486_v52, %v23487_v41  ;;  %5224 = vmatprep.subr.mxu0 %v5218_v32  ;;  %v23490_v8 = vld [vmem:[#allocation55_spill] sm:$0xff]  ;;  %v12082_v21 = vrot.slane %v23491_v54, 3  ;;  %v12087_v24 = vrot.slane %v23492_v26, 3  ;;  %v20529_v34 = vpop.permute.xlu1 %5618  ;;  %v20544_v41 = vpop.permute.xlu0 %5646  ;;  %v23495_v26 = vld [vmem:[#allocation14_spill] sm:$0xff]  ;;  %vm23504_vm12 = vmmov %vm23462_vm1 }
 0x607   : > { %10951 = vrot.lane.b32.xlu1 %v23484_v61, %s15173_s19  ;;  %v12072_v61 = vrot.slane %v23489_v0, 3  ;;  %v12077_v12 = vrot.slane %v23490_v8, 3  ;;  %5225 = vmatpush1.msra.mxu0 %v5211_v35  ;;  %v23493_v9 = vcombine.high %v20205_v60, %v20221_v37  ;;  %v12125_v32 = vcombine.low %v20444_v19, %v20465_v50  ;;  %vm23506_vm13 = vmmov %vm23462_vm1 }
 0x608   : > { %10979 = vrot.lane.b32.xlu0 %v23488_v7, %s15173_s19  ;;  %v20538_v7 = vrot.slane %v11818_v33, %v15305_v28  ;;  %v12141_v52 = vcombine.low %v20459_v2, %v20483_v27  ;;  %14823 = vmatmul.mubr.msk.f32.vlgmr.msra.gmra.mrb[2].mxu0 %vm569_vm7, %v14822_v62  ;;  %v11848_v35 = vrot.slane %v11834_v43, %v15305_v28  ;;  %v23494_v33 = vld [vmem:[#allocation22_spill] sm:$0xff] }
 0x609   : > { %v20535_v25 = vrot.slane %v23493_v9, %v15305_v28  ;;  %v12157_v60 = vcombine.low %v20493_v1, %v20502_v30  ;;  %v12173_v9 = vcombine.low %v20499_v56, %v20507_v3  ;;  %v20553_v37 = vsel %vm23462_vm1, %v12090_v16, %v12092_v4  ;;  %5756 = vmatprep.mubr.f32.mxu0 %v23334_v46 }
 0x60a   : > { %v23496_v54 = vcombine.low %v23494_v33, %v23495_v26  ;;  %v20560_v8 = vsel %vm23497_vm2, %v12095_v44, %v12097_v17  ;;  %v20563_v62 = vsel %vm23498_vm8, %v12100_v59, %v12102_v38  ;;  %v20566_v43 = vsel %vm23499_vm11, %v12105_v48, %v12107_v11  ;;  %v20591_v11 = vpop.permute.xlu1 %5622 }
 0x60b   : > { %v23500_v16 = vcombine.low %v20012_v13, %v20016_v15  ;;  %v23501_v4 = vrot.slane %v23444_v63, 3  ;;  %v23503_v44 = vrot.slane %v23449_v45, 3  ;;  %v23505_v48 = vrot.slane %v23355_v6, 3 }
 0x60c   : > { %10955 = vrot.lane.b32.xlu1 %v23496_v54, %s15174_s20  ;;  %v20589_v38 = vsel %vm23462_vm1, %v12085_v58, %v12087_v24  ;;  %v12293_v58 = vcombine.low %v20553_v37, %v20563_v62  ;;  %v12309_v24 = vcombine.low %v20560_v8, %v20566_v43  ;;  %v23507_v0 = vcombine.high %v23494_v33, %v23495_v26 }
 0x60d   : > { %10983 = vrot.lane.b32.xlu0 %v23500_v16, %s15174_s20  ;;  %v20576_v54 = vsel %vm23502_vm3, %v23501_v4, %v12072_v61  ;;  %v20581_v59 = vsel %vm23504_vm12, %v23503_v44, %v12077_v12  ;;  %v20586_v17 = vsel %vm23506_vm13, %v23505_v48, %v12082_v21  ;;  %v11730_v16 = vcombine.high %v20370_v57, %v20373_v23  ;;  %v20599_v44 = vpop.permute.xlu0 %5650 }
 0x60e   : > { %v11762_v61 = vcombine.high %v20376_v18, %v20379_v51  ;;  %v12133_v4 = vrot.slane %v12125_v32, %v15305_v28  ;;  %v12149_v12 = vrot.slane %v12141_v52, %v15305_v28  ;;  %v12165_v21 = vrot.slane %v12157_v60, %v15305_v28 }
 0x60f   : > { %v12181_v48 = vrot.slane %v12173_v9, %v15305_v28  ;;  %v11897_v32 = vcombine.low %v20538_v7, %v11848_v35  ;;  %v12261_v60 = vcombine.low %v20576_v54, %v20586_v17  ;;  %v12277_v9 = vcombine.low %v20581_v59, %v20589_v38 }
 0x610   : > { %10959 = vrot.lane.b32.xlu1 %v23507_v0, %s15157_s11  ;;  %v23508_v46 = vcombine.high %v20012_v13, %v20016_v15  ;;  %v23509_v0 = vcombine.low %v20370_v57, %v20373_v23  ;;  %v23510_v52 = vcombine.low %v20376_v18, %v20379_v51  ;;  %v11865_v45 = vcombine.low %v20411_v22, %v20535_v25  ;;  %v20638_v13 = vpop.permute.xlu1 %5626 }
 0x611   : > { %v20644_v15 = vrot.slane %v11762_v61, %v15317_v36  ;;  %v11866_v57 = vcombine.high %v20411_v22, %v20535_v25  ;;  %v11898_v23 = vcombine.high %v20538_v7, %v11848_v35  ;;  %v12189_v18 = vcombine.low %v12133_v4, %v12149_v12 }
 0x612   : > { %10987 = vrot.lane.b32.xlu0 %v23508_v46, %s15157_s11  ;;  %v20628_v33 = vrot.slane %v23509_v0, %v15317_v36  ;;  %v20634_v6 = vrot.slane %v23510_v52, %v15317_v36  ;;  %v20641_v46 = vrot.slane %v11730_v16, %v15317_v36  ;;  %v20649_v0 = vpop.permute.xlu0 %5654  ;;  %v12221_v51 = vcombine.low %v12165_v21, %v12181_v48 }
 0x613   : > { %v12301_v52 = vrot.slane %v12293_v58, %v15305_v28  ;;  %v12317_v26 = vrot.slane %v12309_v24, %v15305_v28  ;;  %v23511_v16 = vcombine.low %v20066_v53, %v20100_v42  ;;  %v20660_v25 = vrot.slane %v11897_v32, %v15317_v36  ;;  %v23534_v24 = vld [vmem:[#allocation90_spill] sm:$0xff] }
 0x614   : > { %v12269_v22 = vrot.slane %v12261_v60, %v15305_v28  ;;  %v12285_v7 = vrot.slane %v12277_v9, %v15305_v28  ;;  %v23512_v35 = vcombine.low %v20275_v20, %v20281_v29  ;;  %v12222_v61 = vcombine.high %v12165_v21, %v12181_v48  ;;  %v5631_v39 = vpop.permute.xlu1 %5630 }
 0x615   : > { %10963 = vrot.lane.b32.xlu1 %v23511_v16, %s15175_s23  ;;  %v12190_v16 = vcombine.high %v12133_v4, %v12149_v12  ;;  %v20673_v32 = vrot.slane %v11865_v45, %v15317_v36  ;;  %v20678_v9 = vrot.slane %v11866_v57, %v15317_v36  ;;  %v20686_v4 = vrot.slane %v12189_v18, %v15317_v36 }
 0x616   : > { %10991 = vrot.lane.b32.xlu0 %v23512_v35, %s15175_s23  ;;  %v20681_v35 = vrot.slane %v11898_v23, %v15317_v36  ;;  %v5659_v14 = vpop.permute.xlu0 %5658  ;;  %v20689_v12 = vrot.slane %v12221_v51, %v15317_v36  ;;  %v12357_v45 = vcombine.low %v12301_v52, %v12317_v26  ;;  %v23515_v21 = vcombine.high %v20066_v53, %v20100_v42 }
 0x617   : > { %23513 = vst [vmem:[#allocation11_spill] sm:$0xff] %v20686_v4  ;;  %v12325_v57 = vcombine.low %v12269_v22, %v12285_v7  ;;  %v12326_v23 = vcombine.high %v12269_v22, %v12285_v7  ;;  %v12126_v58 = vcombine.high %v20444_v19, %v20465_v50  ;;  %v23516_v18 = vcombine.high %v20275_v20, %v20281_v29  ;;  %v23555_v20 = vld [vmem:[#allocation43_spill] sm:$0xff] }
 0x618   : > { %23514 = vst [vmem:[#allocation58_spill] sm:$0xff] %v20689_v12  ;;  %v20706_v60 = vrot.slane %v12190_v16, %v15317_v36  ;;  %v20709_v42 = vrot.slane %v12222_v61, %v15317_v36  ;;  %v12358_v53 = vcombine.high %v12301_v52, %v12317_v26  ;;  %v12142_v7 = vcombine.high %v20459_v2, %v20483_v27  ;;  %v23527_v16 = vld [vmem:[#allocation95_spill] sm:$0xff]  ;;  %v23556_v52 = vld [vmem:[#allocation44_spill] sm:$0xff] }
 0x619   : > { %10967 = vrot.lane.b32.xlu1 %v23515_v21, %s15176_s25  ;;  %v5635_v21 = vpop.permute.xlu1 %5634  ;;  %v20722_v61 = vrot.slane %v12357_v45, %v15317_v36  ;;  %v12158_v22 = vcombine.high %v20493_v1, %v20502_v30  ;;  %v23524_v29 = vcombine.low %v20287_v47, %v20293_v49  ;;  %v20733_v27 = vrot.slane %v12325_v57, %v15317_v36  ;;  %v23528_v1 = vld [vmem:[#allocation94_spill] sm:$0xff] }
 0x61a   : > { %10995 = vrot.lane.b32.xlu0 %v23516_v18, %s15176_s25  ;;  %23517 = vst [vmem:[#allocation69_spill] sm:$0xff] %v20706_v60  ;;  %23518 = vst [vmem:[#allocation61_spill] sm:$0xff] %v20709_v42  ;;  %v5663_v18 = vpop.permute.xlu0 %5662  ;;  %v20736_v2 = vrot.slane %v12326_v23, %v15317_v36  ;;  %v20739_v45 = vrot.slane %v12126_v58, %v15305_v28  ;;  %v12174_v51 = vcombine.high %v20499_v56, %v20507_v3  ;;  %v23533_v3 = vld [vmem:[#allocation92_spill] sm:$0xff] }
 0x61b   : > { %23521 = vst [vmem:[#allocation8_spill] sm:$0xff] %v20722_v61  ;;  %23525 = vst [vmem:[#allocation67_spill] sm:$0xff] %v20733_v27  ;;  %v23529_v30 = vcombine.low %v23527_v16, %v23528_v1  ;;  %v20755_v58 = vrot.slane %v12358_v53, %v15317_v36  ;;  %v23535_v16 = vcombine.low %v23533_v3, %v23534_v24  ;;  %v23536_v23 = vld [vmem:[#allocation56_spill] sm:$0xff]  ;;  %v23551_v24 = vld [vmem:[#allocation23_spill] sm:$0xff]  ;;  %v12571_v26 = vrot.slane %v23555_v20, 4 }
 0x61c   : > { %23526 = vst [vmem:[#allocation64_spill] sm:$0xff] %v20736_v2  ;;  %v12545_v48 = vrot.slane %v23536_v23, 4  ;;  %v23564_v2 = vld [vmem:[#allocation53_spill] sm:$0xff]  ;;  %v23572_v60 = vld [vmem:[#allocation60_spill] sm:$0xff] }
 0x61d   : > { %10971 = vrot.lane.b32.xlu1 %v23524_v29, %s15177_s26  ;;  %v5673_v19 = vsel %vm3784_vm4, %v23529_v30, %v20529_v34  ;;  %v23530_v29 = vld [vmem:[#allocation13_spill] sm:$0xff]  ;;  %23532 = vst [vmem:[#allocation30_spill] sm:$0xff] %v20755_v58  ;;  %v5680_v34 = vsel %vm3784_vm4, %v23535_v16, %v20544_v41  ;;  %v5639_v30 = vpop.permute.xlu1 %5638  ;;  %v20777_v41 = vrot.slane %v12158_v22, %v15305_v28 }
 0x61e   : > { %v23531_v57 = vcombine.low %v20302_v5, %v23530_v29  ;;  %v5674_v1 = vsel %vm3786_vm5, %v5673_v19, %v20591_v11  ;;  %v5681_v53 = vsel %vm3786_vm5, %v5680_v34, %v20599_v44  ;;  %v5667_v50 = vpop.permute.xlu0 %5666  ;;  %v20787_v44 = vrot.slane %v12174_v51, %v15305_v28 }
 0x61f   : > { %v5675_v56 = vsel %vm561_vm15, %v5674_v1, %v20638_v13  ;;  %v5682_v11 = vsel %vm561_vm15, %v5681_v53, %v20649_v0  ;;  %v12294_v13 = vcombine.high %v20553_v37, %v20563_v62  ;;  %v23538_v0 = vcombine.high %v20302_v5, %v23530_v29 }
 0x620   : > { %10999 = vrot.lane.b32.xlu0 %v23531_v57, %s15177_s26  ;;  %v20767_v57 = vrot.slane %v12142_v7, %v15305_v28  ;;  %v5676_v19 = vsel %vm3789_vm9, %v5675_v56, %v5631_v39  ;;  %v23537_v7 = vcombine.high %v20287_v47, %v20293_v49  ;;  %v5683_v3 = vsel %vm3789_vm9, %v5682_v11, %v5659_v14  ;;  %v23544_v11 = vld [vmem:[#allocation74_spill] sm:$0xff] }
 0x621   : > { %v5677_v22 = vsel %vm3791_vm10, %v5676_v19, %v5635_v21  ;;  %v12310_v47 = vcombine.high %v20560_v8, %v20566_v43  ;;  %v5684_v49 = vsel %vm3791_vm10, %v5683_v3, %v5663_v18  ;;  %v5643_v37 = vpop.permute.xlu1 %5642  ;;  %v12262_v56 = vcombine.high %v20576_v54, %v20586_v17  ;;  %v23539_v43 = vld [vmem:[#allocation27_spill] sm:$0xff]  ;;  %v23540_v18 = vld [vmem:[#allocation32_spill] sm:$0xff]  ;;  %v23550_v14 = vld [vmem:[#allocation46_spill] sm:$0xff] }
 0x622   : > { %10975 = vrot.lane.b32.xlu1 %v23537_v7, %s15178_s27  ;;  %v5678_v51 = vsel %vm3793_vm14, %v5677_v22, %v5639_v30  ;;  %v12205_v62 = vcombine.low %v20739_v45, %v20767_v57  ;;  %v5685_v5 = vsel %vm3793_vm14, %v5684_v49, %v5667_v50  ;;  %v5671_v29 = vpop.permute.xlu0 %5670  ;;  %v12278_v8 = vcombine.high %v20581_v59, %v20589_v38  ;;  %v14824_v50 = vld [vmem:[%s22412_s2 + $0x20] sm:$0xff]  ;;  %v23543_v38 = vld [vmem:[#allocation65_spill] sm:$0xff]  ;;  %v23546_v22 = vld [vmem:[#allocation80_spill] sm:$0xff] }
 0x623   : > { %v5679_v21 = vsel %vm3795_vm0, %v5678_v51, %v5643_v37  ;;  %v23541_v16 = vcombine.high %v23539_v43, %v23540_v18  ;;  %v5686_v34 = vsel %vm3795_vm0, %v5685_v5, %v5671_v29  ;;  %v12237_v1 = vcombine.low %v20777_v41, %v20787_v44  ;;  %v23545_v7 = vld [vmem:[#allocation73_spill] sm:$0xff]  ;;  %v23547_v51 = vld [vmem:[#allocation76_spill] sm:$0xff] }
 0x624   : > { %11003 = vrot.lane.b32.xlu0 %v23538_v0, %s15178_s27  ;;  %v20824_v30 = vrot.slane %v12294_v13, %v15305_v28  ;;  %v12546_v54 = vrot.slane %v23444_v63, 4  ;;  %v23542_v59 = vcombine.high %v20384_v10, %v20396_v55  ;;  %5692 = vmatprep.subr.mxu0 %v5686_v34  ;;  %v20832_v17 = vrot.slane %v12310_v47, %v15305_v28  ;;  %v23552_v10 = vld [vmem:[#allocation25_spill] sm:$0xff] }
 0x625   : > { %v12550_v53 = vrot.slane %v23543_v38, 4  ;;  %v12555_v19 = vrot.slane %v23544_v11, 4  ;;  %v12560_v3 = vrot.slane %v23545_v7, 4  ;;  %5693 = vmatpush1.msra.mxu0 %v5679_v21  ;;  %v20837_v13 = vpop.permute.xlu1 %6086  ;;  %v12565_v0 = vrot.slane %v23546_v22, 4  ;;  %v23549_v21 = vld [vmem:[#allocation40_spill] sm:$0xff]  ;;  %v23554_v43 = vld [vmem:[#allocation45_spill] sm:$0xff] }
 0x626   : > { %11922 = vrot.lane.b32.xlu1 %v23541_v16, %s15173_s19  ;;  %v12570_v49 = vrot.slane %v23467_v31, 4  ;;  %v12575_v37 = vrot.slane %v23547_v51, 4  ;;  %v12580_v5 = vrot.slane %v23471_v40, 4  ;;  %v20843_v29 = vpop.permute.xlu0 %6114  ;;  %14825 = vmatmul.mubr.msk.f32.vlgmr.msra.gmra.mrb[2].mxu0 %vm569_vm7, %v14824_v50  ;;  %v20847_v47 = vsel %vm835_vm6, %v12545_v48, %v12546_v54  ;;  %v23548_v16 = vld [vmem:[#allocation28_spill] sm:$0xff]  ;;  %v23557_v40 = vld [vmem:[#allocation50_spill] sm:$0xff]  ;;  %v23563_v7 = vld [vmem:[#allocation55_spill] sm:$0xff] }
 0x627   : > { %v12551_v34 = vrot.slane %v23548_v16, 4  ;;  %v12561_v39 = vrot.slane %v23550_v14, 4  ;;  %v23553_v55 = vcombine.low %v23551_v24, %v23552_v10  ;;  %v12566_v18 = vrot.slane %v23554_v43, 4  ;;  %v23558_v51 = vld [vmem:[#allocation10_spill] sm:$0xff]  ;;  %v23559_v31 = vld [vmem:[#allocation24_spill] sm:$0xff] }
 0x628   : > { %11950 = vrot.lane.b32.xlu0 %v23542_v59, %s15173_s19  ;;  %v12556_v59 = vrot.slane %v23549_v21, 4  ;;  %v12576_v50 = vrot.slane %v23556_v52, 4  ;;  %v12581_v48 = vrot.slane %v23557_v40, 4  ;;  %v23560_v22 = vcombine.low %v23558_v51, %v23559_v31  ;;  %v23565_v38 = vld [vmem:[#allocation48_spill] sm:$0xff] }
 0x629   : > { %v20865_v14 = vsel %vm835_vm6, %v12550_v53, %v12551_v34  ;;  %v23561_v43 = vmov 0.0   ;;  %v20874_v20 = vpop.permute.xlu1 %6090  ;;  %v20877_v40 = vsel %vm835_vm6, %v12565_v0, %v12566_v18  ;;  %v20880_v52 = vsel %vm835_vm6, %v12570_v49, %v12571_v26 }
 0x62a   : > { %11926 = vrot.lane.b32.xlu1 %v23553_v55, %s15174_s20  ;;  %v20868_v21 = vsel %vm835_vm6, %v12555_v19, %v12556_v59  ;;  %v20871_v55 = vsel %vm835_vm6, %v12560_v3, %v12561_v39  ;;  %6224 = vmatprep.mubr.f32.mxu0 %v23561_v43  ;;  %v20886_v53 = vsel %vm835_vm6, %v12580_v5, %v12581_v48  ;;  %v20888_v19 = vpop.permute.xlu0 %6118  ;;  %v23562_v3 = vld [vmem:[#allocation47_spill] sm:$0xff]  ;;  %v12553_v58 = vrot.slane %v23563_v7, 4 }
 0x62b   : > { %v12548_v16 = vrot.slane %v23562_v3, 4  ;;  %v12558_v11 = vrot.slane %v23564_v2, 4  ;;  %v12563_v0 = vrot.slane %v23565_v38, 4  ;;  %v23566_v49 = vcombine.high %v23551_v24, %v23552_v10 }
 0x62c   : > { %11954 = vrot.lane.b32.xlu0 %v23560_v22, %s15174_s20  ;;  %v20883_v22 = vsel %vm835_vm6, %v12575_v37, %v12576_v50  ;;  %v20899_v37 = vrot.slane %v12205_v62, %v15317_v36  ;;  %v12276_v5 = vrot.slane %v12262_v56, %v15305_v28  ;;  %v12292_v43 = vrot.slane %v12278_v8, %v15305_v28 }
 0x62d   : > { %v12206_v3 = vcombine.high %v20739_v45, %v20767_v57  ;;  %v23567_v2 = vcombine.high %v23558_v51, %v23559_v31  ;;  %v12601_v38 = vcombine.low %v20847_v47, %v20868_v21  ;;  %v12617_v10 = vcombine.low %v20865_v14, %v20871_v55  ;;  %v20917_v56 = vpop.permute.xlu1 %6094 }
 0x62e   : > { %11930 = vrot.lane.b32.xlu1 %v23566_v49, %s15157_s11  ;;  %v12633_v24 = vcombine.low %v20877_v40, %v20883_v22  ;;  %v12649_v62 = vcombine.low %v20880_v52, %v20886_v53  ;;  %v20920_v45 = vrot.slane %v12237_v1, %v15317_v36  ;;  %v12373_v31 = vcombine.low %v20824_v30, %v20832_v17  ;;  %v20928_v8 = vpop.permute.xlu0 %6122 }
 0x62f   : > { %v12374_v57 = vcombine.high %v20824_v30, %v20832_v17  ;;  %v20931_v51 = vsel %vm835_vm6, %v12546_v54, %v12548_v16  ;;  %v20934_v49 = vsel %vm835_vm6, %v12551_v34, %v12553_v58  ;;  %v20937_v1 = vsel %vm835_vm6, %v12556_v59, %v12558_v11  ;;  %v23570_v17 = vld [vmem:[#allocation54_spill] sm:$0xff]  ;;  %v23571_v54 = vld [vmem:[#allocation51_spill] sm:$0xff] }
 0x630   : > { %11958 = vrot.lane.b32.xlu0 %v23567_v2, %s15157_s11  ;;  %v12238_v2 = vcombine.high %v20777_v41, %v20787_v44  ;;  %v20940_v7 = vsel %vm835_vm6, %v12561_v39, %v12563_v0  ;;  %v23568_v41 = vcombine.low %v20628_v33, %v20634_v6  ;;  %v23569_v44 = vld [vmem:[#allocation42_spill] sm:$0xff]  ;;  %v12573_v42 = vrot.slane %v23570_v17, 4  ;;  %v23589_v17 = vld [vmem:[#allocation57_spill] sm:$0xff] }
 0x631   : > { %v12568_v30 = vrot.slane %v23569_v44, 4  ;;  %v12578_v16 = vrot.slane %v23571_v54, 4  ;;  %v12583_v58 = vrot.slane %v23572_v60, 4  ;;  %v23573_v11 = vcombine.low %v20673_v32, %v20660_v25 }
 0x632   : > { %11934 = vrot.lane.b32.xlu1 %v23568_v41, %s15175_s23  ;;  %v20955_v39 = vrot.slane %v12601_v38, %v15305_v28  ;;  %v20958_v34 = vrot.slane %v12617_v10, %v15305_v28  ;;  %v20961_v59 = vrot.slane %v12633_v24, %v15305_v28  ;;  %v20964_v0 = vrot.slane %v12649_v62, %v15305_v28  ;;  %v6099_v41 = vpop.permute.xlu1 %6098 }
 0x633   : > { %v12341_v54 = vcombine.low %v12276_v5, %v12292_v43  ;;  %v20969_v63 = vrot.slane %v12206_v3, %v15317_v36  ;;  %v20972_v38 = vrot.slane %v12238_v2, %v15317_v36  ;;  %v20975_v10 = vrot.slane %v12373_v31, %v15317_v36 }
 0x634   : > { %11962 = vrot.lane.b32.xlu0 %v23573_v11, %s15175_s23  ;;  %v6127_v11 = vpop.permute.xlu0 %6126  ;;  %v12342_v24 = vcombine.high %v12276_v5, %v12292_v43  ;;  %v12737_v62 = vcombine.low %v20931_v51, %v20937_v1  ;;  %v12753_v23 = vcombine.low %v20934_v49, %v20940_v7  ;;  %v23577_v44 = vcombine.high %v20628_v33, %v20634_v6  ;;  %v23582_v6 = vld [vmem:[#allocation78_spill] sm:$0xff] }
 0x635   : > { %23576 = vst [vmem:[#allocation33_spill] sm:$0xff] %v20972_v38  ;;  %v20986_v3 = vsel %vm835_vm6, %v12566_v18, %v12568_v30  ;;  %v20989_v2 = vsel %vm835_vm6, %v12571_v26, %v12573_v42  ;;  %v20992_v31 = vsel %vm835_vm6, %v12576_v50, %v12578_v16  ;;  %v20995_v43 = vsel %vm835_vm6, %v12581_v48, %v12583_v58  ;;  %v23583_v48 = vld [vmem:[#allocation84_spill] sm:$0xff] }
 0x636   : > { %11938 = vrot.lane.b32.xlu1 %v23577_v44, %s15176_s25  ;;  %v23578_v5 = vcombine.high %v20673_v32, %v20660_v25  ;;  %v21004_v33 = vrot.slane %v12374_v57, %v15317_v36  ;;  %v12665_v42 = vcombine.low %v20955_v39, %v20958_v34  ;;  %v12697_v26 = vcombine.low %v20961_v59, %v20964_v0  ;;  %v6103_v18 = vpop.permute.xlu1 %6102 }
 0x637   : > { %v21011_v50 = vrot.slane %v12341_v54, %v15317_v36  ;;  %v21020_v16 = vrot.slane %v12342_v24, %v15317_v36  ;;  %v12769_v54 = vcombine.low %v20986_v3, %v20992_v31  ;;  %v23581_v32 = vcombine.low %v20641_v46, %v20644_v15 }
 0x638   : > { %11966 = vrot.lane.b32.xlu0 %v23578_v5, %s15176_s25  ;;  %v6131_v30 = vpop.permute.xlu0 %6130  ;;  %v12785_v5 = vcombine.low %v20989_v2, %v20995_v43  ;;  %v12745_v25 = vrot.slane %v12737_v62, %v15305_v28  ;;  %v12761_v58 = vrot.slane %v12753_v23, %v15305_v28  ;;  %v23584_v44 = vcombine.low %v23582_v6, %v23583_v48  ;;  %v23588_v23 = vld [vmem:[#allocation59_spill] sm:$0xff] }
 0x639   : > { %v21050_v24 = vrot.slane %v12665_v42, %v15317_v36  ;;  %v21053_v62 = vrot.slane %v12697_v26, %v15317_v36  ;;  %v23590_v6 = vcombine.low %v23588_v23, %v23589_v17  ;;  %v12698_v42 = vcombine.high %v20961_v59, %v20964_v0 }
 0x63a   : > { %11942 = vrot.lane.b32.xlu1 %v23581_v32, %s15177_s26  ;;  %v6141_v60 = vsel %vm3784_vm4, %v23584_v44, %v20837_v13  ;;  %v23585_v32 = vcombine.low %v20678_v9, %v20681_v35  ;;  %v6107_v44 = vpop.permute.xlu1 %6106  ;;  %v12777_v17 = vrot.slane %v12769_v54, %v15305_v28  ;;  %v23592_v0 = vcombine.high %v20678_v9, %v20681_v35 }
 0x63b   : > { %23586 = vst [vmem:[#allocation37_spill] sm:$0xff] %v21050_v24  ;;  %23587 = vst [vmem:[#allocation39_spill] sm:$0xff] %v21053_v62  ;;  %v6148_v13 = vsel %vm3784_vm4, %v23590_v6, %v20843_v29  ;;  %v6142_v48 = vsel %vm3786_vm5, %v6141_v60, %v20874_v20  ;;  %v12793_v29 = vrot.slane %v12785_v5, %v15305_v28  ;;  %vm23620_vm6 = vcmask 1042432  }
 0x63c   : > { %11970 = vrot.lane.b32.xlu0 %v23585_v32, %s15177_s26  ;;  %v12666_v32 = vcombine.high %v20955_v39, %v20958_v34  ;;  %v6149_v26 = vsel %vm3786_vm5, %v6148_v13, %v20888_v19  ;;  %v6143_v57 = vsel %vm561_vm15, %v6142_v48, %v20917_v56  ;;  %v6135_v38 = vpop.permute.xlu0 %6134  ;;  %v23591_v39 = vcombine.high %v20641_v46, %v20644_v15  ;;  %vm23621_vm2 = vmmov %vm23620_vm6 }
 0x63d   : > { %v6150_v60 = vsel %vm561_vm15, %v6149_v26, %v20928_v8  ;;  %v6144_v20 = vsel %vm3789_vm9, %v6143_v57, %v6099_v41  ;;  %v12801_v34 = vcombine.low %v12745_v25, %v12761_v58  ;;  %v12602_v19 = vcombine.high %v20847_v47, %v20868_v21  ;;  %vm23623_vm8 = vmmov %vm23621_vm2 }
 0x63e   : > { %11946 = vrot.lane.b32.xlu1 %v23591_v39, %s15178_s27  ;;  %v6151_v56 = vsel %vm3789_vm9, %v6150_v60, %v6127_v11  ;;  %v6145_v59 = vsel %vm3791_vm10, %v6144_v20, %v6103_v18  ;;  %v12802_v8 = vcombine.high %v12745_v25, %v12761_v58  ;;  %v12618_v41 = vcombine.high %v20865_v14, %v20871_v55  ;;  %v6111_v57 = vpop.permute.xlu1 %6110  ;;  %v14826_v58 = vld [vmem:[%s22412_s2 + $0x28] sm:$0xff]  ;;  %v23601_v20 = vld [vmem:[#allocation69_spill] sm:$0xff]  ;;  %vm23627_vm11 = vmmov %vm23621_vm2 }
 0x63f   : > { %v6152_v46 = vsel %vm3791_vm10, %v6151_v56, %v6131_v30  ;;  %v6146_v15 = vsel %vm3793_vm14, %v6145_v59, %v6107_v44  ;;  %v21092_v47 = vrot.slane %v12666_v32, %v15317_v36  ;;  %v21095_v21 = vrot.slane %v12698_v42, %v15317_v36  ;;  %v23599_v44 = vld [vmem:[#allocation34_spill] sm:$0xff]  ;;  %v23602_v39 = vld [vmem:[#allocation61_spill] sm:$0xff]  ;;  %vm23631_vm3 = vmmov %vm23621_vm2 }
 0x640   : > { %11974 = vrot.lane.b32.xlu0 %v23592_v0, %s15178_s27  ;;  %v6153_v11 = vsel %vm3793_vm14, %v6152_v46, %v6135_v38  ;;  %v6147_v9 = vsel %vm3795_vm0, %v6146_v15, %v6111_v57  ;;  %v6139_v35 = vpop.permute.xlu0 %6138  ;;  %v12833_v18 = vcombine.low %v12777_v17, %v12793_v29  ;;  %v12834_v25 = vcombine.high %v12777_v17, %v12793_v29  ;;  %v23605_v0 = vld [vmem:[#allocation65_spill] sm:$0xff]  ;;  %v23607_v15 = vld [vmem:[#allocation64_spill] sm:$0xff]  ;;  %v23617_v30 = vld [vmem:[#allocation70_spill] sm:$0xff] }
 0x641   : > { %23593 = vst [vmem:[#allocation21_spill] sm:$0xff] %v21092_v47  ;;  %23594 = vst [vmem:[#allocation82_spill] sm:$0xff] %v21095_v21  ;;  %v23595_v14 = vcombine.high %v20686_v4, %v20689_v12  ;;  %v6154_v55 = vsel %vm3795_vm0, %v6153_v11, %v6139_v35  ;;  %v12634_v38 = vcombine.high %v20877_v40, %v20883_v22  ;;  %v23604_v59 = vmov 0.0   ;;  %v23610_v35 = vld [vmem:[#allocation73_spill] sm:$0xff]  ;;  %v23614_v17 = vld [vmem:[#allocation80_spill] sm:$0xff] }
 0x642   : > { %v12650_v54 = vcombine.high %v20880_v52, %v20886_v53  ;;  %v23596_v5 = vcombine.high %v20733_v27, %v20722_v61  ;;  %6160 = vmatprep.subr.mxu0 %v6154_v55  ;;  %v21120_v6 = vrot.slane %v12602_v19, %v15305_v28  ;;  %v21123_v13 = vrot.slane %v12618_v41, %v15305_v28  ;;  %v21125_v40 = vpop.permute.xlu1 %6554  ;;  %v23598_v53 = vld [vmem:[#allocation56_spill] sm:$0xff]  ;;  %v23606_v41 = vld [vmem:[#allocation74_spill] sm:$0xff]  ;;  %v23624_v4 = vld [vmem:[#allocation45_spill] sm:$0xff] }
 0x643   : > { %12398 = vrot.lane.b32.xlu1 %v23595_v14, %s15173_s19  ;;  %6161 = vmatpush1.msra.mxu0 %v6147_v9  ;;  %v21128_v52 = vrot.slane %v12801_v34, %v15317_v36  ;;  %v21131_v22 = vrot.slane %v12802_v8, %v15317_v36  ;;  %v13021_v48 = vrot.slane %v23598_v53, 5  ;;  %v21138_v26 = vrot.slane %v12833_v18, %v15317_v36  ;;  %v23611_v55 = vld [vmem:[#allocation28_spill] sm:$0xff]  ;;  %vm23633_vm12 = vmmov %vm23621_vm2 }
 0x644   : > { %12426 = vrot.lane.b32.xlu0 %v23596_v5, %s15173_s19  ;;  %v21135_v42 = vpop.permute.xlu0 %6582  ;;  %v21143_v29 = vrot.slane %v12834_v25, %v15317_v36  ;;  %14827 = vmatmul.mubr.msk.f32.vlgmr.msra.gmra.mrb[2].mxu0 %vm569_vm7, %v14826_v58  ;;  %v12738_v60 = vcombine.high %v20931_v51, %v20937_v1  ;;  %v23603_v34 = vcombine.low %v23601_v20, %v23602_v39  ;;  %v13026_v8 = vrot.slane %v23605_v0, 5  ;;  %v23608_v51 = vld [vmem:[#allocation30_spill] sm:$0xff]  ;;  %vm23635_vm13 = vmmov %vm23621_vm2 }
 0x645   : > { %23597 = vst [vmem:[#allocation62_spill] sm:$0xff] %v21128_v52  ;;  %23600 = vst [vmem:[#allocation36_spill] sm:$0xff] %v21138_v26  ;;  %v21153_v19 = vrot.slane %v12634_v38, %v15305_v28  ;;  %v21156_v56 = vrot.slane %v12650_v54, %v15305_v28  ;;  %6692 = vmatprep.mubr.f32.mxu0 %v23604_v59  ;;  %v13031_v46 = vrot.slane %v23606_v41, 5  ;;  %v13036_v18 = vrot.slane %v23610_v35, 5  ;;  %v23612_v38 = vld [vmem:[#allocation40_spill] sm:$0xff]  ;;  %v23613_v5 = vld [vmem:[#allocation46_spill] sm:$0xff] }
 0x646   : > { %v23609_v1 = vcombine.low %v23607_v15, %v23608_v51  ;;  %v12681_v57 = vcombine.low %v21120_v6, %v21123_v13  ;;  %v12754_v11 = vcombine.high %v20934_v49, %v20940_v7  ;;  %v12770_v9 = vcombine.high %v20986_v3, %v20992_v31  ;;  %v21172_v25 = vpop.permute.xlu1 %6558  ;;  %v23615_v49 = vld [vmem:[#allocation71_spill] sm:$0xff]  ;;  %v23616_v3 = vld [vmem:[#allocation76_spill] sm:$0xff]  ;;  %v23630_v59 = vld [vmem:[#allocation50_spill] sm:$0xff] }
 0x647   : > { %12402 = vrot.lane.b32.xlu1 %v23603_v34, %s15174_s20  ;;  %v12786_v14 = vcombine.high %v20989_v2, %v20995_v43  ;;  %v22800_v58 = vrot.slane %v23611_v55, 5  ;;  %v13041_v7 = vrot.slane %v23614_v17, 5  ;;  %v13046_v23 = vrot.slane %v23615_v49, 5  ;;  %vm23637_vm1 = vmmov %vm23621_vm2  ;;  %v23643_v35 = vld [vmem:[#allocation55_spill] sm:$0xff]  ;;  %v23645_v41 = vld [vmem:[#allocation48_spill] sm:$0xff] }
 0x648   : > { %12430 = vrot.lane.b32.xlu0 %v23609_v1, %s15174_s20  ;;  %v21179_v1 = vpop.permute.xlu0 %6586  ;;  %v13051_v31 = vrot.slane %v23616_v3, 5  ;;  %v13056_v32 = vrot.slane %v23617_v30, 5  ;;  %v23618_v2 = vcombine.high %v23601_v20, %v23602_v39  ;;  %v23619_v43 = vrot.slane %v23599_v44, 5 }
 0x649   : > { %v21197_v34 = vsel %vm23621_vm2, %v13026_v8, %v22800_v58  ;;  %v23622_v27 = vrot.slane %v23612_v38, 5  ;;  %v22801_v12 = vrot.slane %v23624_v4, 5  ;;  %v23625_v20 = vcombine.high %v23607_v15, %v23608_v51  ;;  %vm23657_vm2 = vmmov %vm23637_vm1 }
 0x64a   : > { %v21192_v54 = vsel %vm23620_vm6, %v13021_v48, %v23619_v43  ;;  %v23626_v48 = vrot.slane %v23613_v5, 5  ;;  %v23629_v43 = vld [vmem:[#allocation44_spill] sm:$0xff]  ;;  %v13057_v30 = vrot.slane %v23630_v59, 5  ;;  %v12713_v15 = vcombine.low %v21153_v19, %v21156_v56  ;;  %vm23654_vm6 = vmmov %vm23637_vm1 }
 0x64b   : > { %12406 = vrot.lane.b32.xlu1 %v23618_v2, %s15157_s11  ;;  %v21202_v61 = vsel %vm23623_vm8, %v13031_v46, %v23622_v27  ;;  %v23628_v2 = vld [vmem:[#allocation43_spill] sm:$0xff]  ;;  %v13052_v58 = vrot.slane %v23629_v43, 5  ;;  %v21217_v27 = vpop.permute.xlu1 %6562  ;;  %v21224_v51 = vrot.slane %v12738_v60, %v15305_v28  ;;  %v23639_v60 = vcombine.low %v20899_v37, %v20920_v45  ;;  %vm23660_vm8 = vmmov %vm23637_vm1 }
 0x64c   : > { %12434 = vrot.lane.b32.xlu0 %v23625_v20, %s15157_s11  ;;  %v21212_v39 = vsel %vm23627_vm11, %v13036_v18, %v23626_v48  ;;  %v13047_v8 = vrot.slane %v23628_v2, 5  ;;  %v21227_v18 = vrot.slane %v12754_v11, %v15305_v28  ;;  %v21229_v20 = vpop.permute.xlu0 %6590  ;;  %v21234_v48 = vsel %vm23631_vm3, %v13041_v7, %v22801_v12  ;;  %vm23662_vm11 = vmmov %vm23637_vm1 }
 0x64d   : > { %23632 = vst [vmem:[#allocation31_spill] sm:$0xff] %v21234_v48  ;;  %v21240_v46 = vsel %vm23635_vm13, %v13051_v31, %v13052_v58  ;;  %v21243_v43 = vsel %vm23637_vm1, %v13056_v32, %v13057_v30  ;;  %v12784_v11 = vrot.slane %v12770_v9, %v15305_v28  ;;  %v12800_v2 = vrot.slane %v12786_v14, %v15305_v28  ;;  %vm23668_vm3 = vmmov %vm23637_vm1 }
 0x64e   : > { %v21237_v59 = vsel %vm23633_vm12, %v13046_v23, %v13047_v8  ;;  %23636 = vst [vmem:[#allocation29_spill] sm:$0xff] %v21240_v46  ;;  %23638 = vst [vmem:[#allocation52_spill] sm:$0xff] %v21243_v43  ;;  %v13077_v7 = vcombine.low %v21192_v54, %v21202_v61  ;;  %v13093_v23 = vcombine.low %v21197_v34, %v21212_v39 }
 0x64f   : > { %23634 = vst [vmem:[#allocation41_spill] sm:$0xff] %v21237_v59  ;;  %12410 = vrot.lane.b32.xlu1 %v23639_v60, %s15175_s23  ;;  %v23640_v32 = vcombine.low %v21011_v50, %v20975_v10  ;;  %v21264_v9 = vrot.slane %v12681_v57, %v15317_v36  ;;  %v12682_v14 = vcombine.high %v21120_v6, %v21123_v13  ;;  %v21268_v12 = vpop.permute.xlu1 %6566  ;;  %v23642_v57 = vld [vmem:[#allocation47_spill] sm:$0xff]  ;;  %v13029_v6 = vrot.slane %v23643_v35, 5  ;;  %v23644_v13 = vld [vmem:[#allocation53_spill] sm:$0xff]  ;;  %vm23669_vm12 = vmmov %vm23637_vm1 }
 0x650   : > { %23641 = vst [vmem:[#allocation49_spill] sm:$0xff] %v21268_v12  ;;  %v21271_v49 = vrot.slane %v12713_v15, %v15317_v36  ;;  %v13109_v31 = vcombine.low %v21234_v48, %v21240_v46  ;;  %v13125_v60 = vcombine.low %v21237_v59, %v21243_v43  ;;  %v21279_v3 = vpop.permute.xlu0 %6594  ;;  %v13024_v17 = vrot.slane %v23642_v57, 5  ;;  %v23649_v57 = vld [vmem:[#allocation54_spill] sm:$0xff]  ;;  %v23651_v46 = vld [vmem:[#allocation60_spill] sm:$0xff]  ;;  %vm23670_vm13 = vmmov %vm23637_vm1 }
 0x651   : > { %12438 = vrot.lane.b32.xlu0 %v23640_v32, %s15175_s23  ;;  %v12817_v32 = vcombine.low %v21224_v51, %v21227_v18  ;;  %v13034_v12 = vrot.slane %v23644_v13, 5  ;;  %v13039_v15 = vrot.slane %v23645_v41, 5  ;;  %v23646_v0 = vcombine.high %v20899_v37, %v20920_v45  ;;  %v23648_v41 = vld [vmem:[#allocation42_spill] sm:$0xff]  ;;  %v23650_v45 = vld [vmem:[#allocation51_spill] sm:$0xff] }
 0x652   : > { %v12849_v21 = vcombine.low %v12784_v11, %v12800_v2  ;;  %v12714_v48 = vcombine.high %v21153_v19, %v21156_v56  ;;  %v21292_v59 = vrot.slane %v13077_v7, %v15305_v28  ;;  %v21295_v43 = vrot.slane %v13093_v23, %v15305_v28 }
 0x653   : > { %12414 = vrot.lane.b32.xlu1 %v23646_v0, %s15176_s25  ;;  %v23647_v13 = vcombine.high %v21011_v50, %v20975_v10  ;;  %v13044_v35 = vrot.slane %v23648_v41, 5  ;;  %v13049_v37 = vrot.slane %v23649_v57, 5  ;;  %v13054_v0 = vrot.slane %v23650_v45, 5  ;;  %v21305_v19 = vpop.permute.xlu1 %11402 }
 0x654   : > { %v13059_v47 = vrot.slane %v23651_v46, 5  ;;  %23652 = vst [vmem:[#allocation38_spill] sm:$0xff] %v21305_v19  ;;  %v21308_v56 = vrot.slane %v12682_v14, %v15317_v36  ;;  %v12850_v7 = vcombine.high %v12784_v11, %v12800_v2  ;;  %v21311_v23 = vrot.slane %v13109_v31, %v15305_v28  ;;  %v6599_v50 = vpop.permute.xlu0 %6598 }
 0x655   : > { %12442 = vrot.lane.b32.xlu0 %v23647_v13, %s15176_s25  ;;  %v21314_v10 = vrot.slane %v13125_v60, %v15305_v28  ;;  %v23653_v13 = vrot.slane %v23599_v44, 5  ;;  %v23656_v46 = vrot.slane %v23611_v55, 5  ;;  %v23659_v14 = vrot.slane %v23612_v38, 5  ;;  %v23664_v60 = vld [vmem:[#allocation33_spill] sm:$0xff] }
 0x656   : > { %v23661_v11 = vrot.slane %v23613_v5, 5 }
 0x657   : > { %v21319_v57 = vsel %vm23654_vm6, %v23653_v13, %v13024_v17  ;;  %v21324_v19 = vsel %vm23657_vm2, %v23656_v46, %v13029_v6  ;;  %v21329_v2 = vsel %vm23660_vm8, %v23659_v14, %v13034_v12  ;;  %v23665_v17 = vcombine.low %v20969_v63, %v23664_v60 }
 0x658   : > { %23655 = vst [vmem:[#allocation35_spill] sm:$0xff] %v21319_v57  ;;  %23658 = vst [vmem:[#allocation75_spill] sm:$0xff] %v21324_v19  ;;  %v21334_v31 = vsel %vm23662_vm11, %v23661_v11, %v13039_v15  ;;  %v21341_v13 = vrot.slane %v12849_v21, %v15317_v36  ;;  %v21344_v46 = vrot.slane %v12714_v48, %v15317_v36  ;;  %v23667_v14 = vrot.slane %v23624_v4, 5 }
 0x659   : > { %23663 = vst [vmem:[#allocation81_spill] sm:$0xff] %v21334_v31  ;;  %12418 = vrot.lane.b32.xlu1 %v23665_v17, %s15177_s26  ;;  %v12818_v12 = vcombine.high %v21224_v51, %v21227_v18  ;;  %v13141_v6 = vcombine.low %v21292_v59, %v21295_v43  ;;  %v23666_v15 = vcombine.low %v21020_v16, %v21004_v33  ;;  %v6603_v18 = vpop.permute.xlu1 %6602  ;;  %vm23696_vm6 = vcmask 1041408  }
 0x65a   : > { %v21357_v11 = vsel %vm23668_vm3, %v23667_v14, %v13044_v35  ;;  %v21360_v21 = vsel %vm23669_vm12, %v13047_v8, %v13049_v37  ;;  %v21363_v48 = vsel %vm23670_vm13, %v13052_v58, %v13054_v0  ;;  %v21366_v51 = vsel %vm23637_vm1, %v13057_v30, %v13059_v47  ;;  %v6571_v37 = vpop.permute.xlu0 %6570  ;;  %v23673_v58 = vld [vmem:[#allocation88_spill] sm:$0xff]  ;;  %vm23698_vm2 = vmmov %vm23696_vm6 }
 0x65b   : > { %12446 = vrot.lane.b32.xlu0 %v23666_v15, %s15177_s26  ;;  %v13173_v15 = vcombine.low %v21311_v23, %v21314_v10  ;;  %v13213_v35 = vcombine.low %v21319_v57, %v21329_v2  ;;  %v13229_v8 = vcombine.low %v21324_v19, %v21334_v31  ;;  %v21379_v47 = vrot.slane %v12817_v32, %v15317_v36  ;;  %vm23702_vm8 = vmmov %vm23698_vm2 }
 0x65c   : > { %v21384_v0 = vrot.slane %v12850_v7, %v15317_v36  ;;  %v23671_v14 = vcombine.high %v20969_v63, %v23664_v60  ;;  %v21393_v19 = vrot.slane %v12818_v12, %v15317_v36  ;;  %v13245_v32 = vcombine.low %v21357_v11, %v21363_v48  ;;  %v23672_v7 = vld [vmem:[#allocation87_spill] sm:$0xff]  ;;  %vm23705_vm11 = vmmov %vm23698_vm2 }
 0x65d   : > { %v13261_v30 = vcombine.low %v21360_v21, %v21366_v51  ;;  %v23674_v31 = vcombine.low %v23672_v7, %v23673_v58  ;;  %v23675_v63 = vcombine.high %v21020_v16, %v21004_v33  ;;  %v21417_v58 = vpop.permute.xlu1 %11406  ;;  %v21423_v33 = vrot.slane %v13213_v35, %v15305_v28  ;;  %v23679_v35 = vld [vmem:[#allocation17_spill] sm:$0xff]  ;;  %vm23711_vm3 = vmmov %vm23698_vm2 }
 0x65e   : > { %12422 = vrot.lane.b32.xlu1 %v23671_v14, %s15178_s27  ;;  %v21413_v14 = vrot.slane %v13141_v6, %v15317_v36  ;;  %v21426_v16 = vrot.slane %v13229_v8, %v15305_v28  ;;  %v21430_v7 = vpop.permute.xlu0 %11374  ;;  %v21450_v12 = vrot.slane %v13245_v32, %v15305_v28  ;;  %v23694_v6 = vld [vmem:[#allocation73_spill] sm:$0xff]  ;;  %vm23712_vm12 = vmmov %vm23698_vm2 }
 0x65f   : > { %v6616_v57 = vsel %vm3784_vm4, %v23674_v31, %v21135_v42  ;;  %12450 = vrot.lane.b32.xlu0 %v23675_v63, %s15178_s27  ;;  %v21420_v42 = vrot.slane %v13173_v15, %v15317_v36  ;;  %23676 = vst [vmem:[#allocation15_spill] sm:$0xff] %v21423_v33  ;;  %v23678_v15 = vld [vmem:[#allocation83_spill] sm:$0xff]  ;;  %vm23719_vm13 = vmmov %vm23698_vm2 }
 0x660   : > { %v6617_v17 = vsel %vm3786_vm5, %v6616_v57, %v21179_v1  ;;  %23677 = vst [vmem:[#allocation19_spill] sm:$0xff] %v21426_v16  ;;  %v23680_v63 = vcombine.low %v23678_v15, %v23679_v35  ;;  %v21453_v1 = vrot.slane %v13261_v30, %v15305_v28  ;;  %v13497_v15 = vrot.slane %v23598_v53, 6  ;;  %vm23720_vm1 = vmmov %vm23698_vm2 }
 0x661   : > { %v6618_v31 = vsel %vm561_vm15, %v6617_v17, %v21229_v20  ;;  %v23681_v17 = vcombine.high %v21050_v24, %v21053_v62  ;;  %v6607_v35 = vpop.permute.xlu1 %6606  ;;  %v13078_v53 = vcombine.high %v21192_v54, %v21202_v61  ;;  %v23689_v54 = vcombine.low %v21131_v22, %v21143_v29 }
 0x662   : > { %v6609_v8 = vsel %vm3784_vm4, %v23680_v63, %v21125_v40  ;;  %v6619_v20 = vsel %vm3789_vm9, %v6618_v31, %v21279_v3  ;;  %v23682_v40 = vcombine.high %v21128_v52, %v21138_v26  ;;  %v13142_v3 = vcombine.high %v21292_v59, %v21295_v43 }
 0x663   : > { %12874 = vrot.lane.b32.xlu1 %v23681_v17, %s15173_s19  ;;  %v6620_v57 = vsel %vm3791_vm10, %v6619_v20, %v6599_v50  ;;  %v13174_v31 = vcombine.high %v21311_v23, %v21314_v10  ;;  %v6610_v32 = vsel %vm3786_vm5, %v6609_v8, %v21172_v25  ;;  %v13277_v63 = vcombine.low %v21423_v33, %v21426_v16  ;;  %v6575_v20 = vpop.permute.xlu0 %6574  ;;  %v23683_v10 = vld [vmem:[#allocation21_spill] sm:$0xff] }
 0x664   : > { %12902 = vrot.lane.b32.xlu0 %v23682_v40, %s15173_s19  ;;  %v6621_v30 = vsel %vm3793_vm14, %v6620_v57, %v6603_v18  ;;  %v6611_v23 = vsel %vm561_vm15, %v6610_v32, %v21217_v27  ;;  %v23684_v18 = vld [vmem:[#allocation82_spill] sm:$0xff]  ;;  %v13309_v8 = vcombine.low %v21450_v12, %v21453_v1  ;;  %v23686_v17 = vld [vmem:[#allocation29_spill] sm:$0xff]  ;;  %v23687_v40 = vld [vmem:[#allocation31_spill] sm:$0xff]  ;;  %v21495_v27 = vrot.slane %v13142_v3, %v15317_v36 }
 0x665   : > { %v6622_v59 = vsel %vm3795_vm0, %v6621_v30, %v6607_v35  ;;  %v23685_v57 = vcombine.low %v23683_v10, %v23684_v18  ;;  %v23688_v35 = vld [vmem:[#allocation65_spill] sm:$0xff]  ;;  %v21498_v32 = vrot.slane %v13174_v31, %v15317_v36  ;;  %v21504_v25 = vpop.permute.xlu1 %11410  ;;  %v13512_v3 = vrot.slane %v23694_v6, 6 }
 0x666   : > { %6628 = vmatprep.subr.mxu0 %v6622_v59  ;;  %v13502_v61 = vrot.slane %v23688_v35, 6  ;;  %23690 = vst [vmem:[#allocation26_spill] sm:$0xff] %v21495_v27  ;;  %v23693_v50 = vld [vmem:[#allocation49_spill] sm:$0xff]  ;;  %v21507_v35 = vrot.slane %v13277_v63, %v15317_v36  ;;  %v13310_v59 = vcombine.high %v21450_v12, %v21453_v1  ;;  %v23699_v63 = vld [vmem:[#allocation80_spill] sm:$0xff] }
 0x667   : > { %12878 = vrot.lane.b32.xlu1 %v23685_v57, %s15174_s20  ;;  %23691 = vst [vmem:[#allocation89_spill] sm:$0xff] %v21498_v32  ;;  %v23692_v57 = vld [vmem:[#allocation74_spill] sm:$0xff]  ;;  %v6612_v30 = vsel %vm3789_vm9, %v6611_v23, %v23693_v50  ;;  %v21512_v31 = vpop.permute.xlu0 %11378  ;;  %v13508_v23 = vrot.slane %v23612_v38, 6  ;;  %v23700_v12 = vld [vmem:[#allocation76_spill] sm:$0xff]  ;;  %v23717_v33 = vld [vmem:[#allocation53_spill] sm:$0xff]  ;;  %v21579_v32 = vrot.slane %v13309_v8, %v15317_v36 }
 0x668   : > { %12906 = vrot.lane.b32.xlu0 %v23689_v54, %s15174_s20  ;;  %v13507_v43 = vrot.slane %v23692_v57, 6  ;;  %v13503_v54 = vrot.slane %v23611_v55, 6  ;;  %v6613_v60 = vsel %vm3791_vm10, %v6612_v30, %v6571_v37  ;;  %v23695_v57 = vrot.slane %v23599_v44, 6  ;;  %v23718_v27 = vld [vmem:[#allocation48_spill] sm:$0xff] }
 0x669   : > { %v23697_v55 = vcombine.high %v23683_v10, %v23684_v18  ;;  %v13513_v37 = vrot.slane %v23613_v5, 6  ;;  %v13517_v30 = vrot.slane %v23699_v63, 6  ;;  %v13527_v1 = vrot.slane %v23700_v12, 6  ;;  %v23703_v18 = vld [vmem:[#allocation71_spill] sm:$0xff]  ;;  %v21543_v52 = vpop.permute.xlu1 %11382  ;;  %v23706_v12 = vld [vmem:[#allocation44_spill] sm:$0xff] }
 0x66a   : > { %v21519_v50 = vsel %vm23696_vm6, %v13497_v15, %v23695_v57  ;;  %v21527_v6 = vsel %vm23698_vm2, %v13502_v61, %v13503_v54  ;;  %v23701_v15 = vcombine.high %v21131_v22, %v21143_v29  ;;  %v21537_v38 = vsel %vm23702_vm8, %v13507_v43, %v13508_v23  ;;  %v23704_v61 = vld [vmem:[#allocation43_spill] sm:$0xff]  ;;  %v23707_v22 = vld [vmem:[#allocation70_spill] sm:$0xff]  ;;  %vm23721_vm6 = vmmov %vm23720_vm1 }
 0x66b   : > { %12882 = vrot.lane.b32.xlu1 %v23697_v55, %s15157_s11  ;;  %v13518_v10 = vrot.slane %v23624_v4, 6  ;;  %v13522_v57 = vrot.slane %v23703_v18, 6  ;;  %v13523_v55 = vrot.slane %v23704_v61, 6  ;;  %v6614_v5 = vsel %vm3793_vm14, %v6613_v60, %v6575_v20  ;;  %v14828_v4 = vld [vmem:[%s22412_s2 + $0x30] sm:$0xff]  ;;  %v23708_v18 = vld [vmem:[#allocation54_spill] sm:$0xff]  ;;  %v23709_v20 = vld [vmem:[#allocation60_spill] sm:$0xff] }
 0x66c   : > { %12910 = vrot.lane.b32.xlu0 %v23701_v15, %s15157_s11  ;;  %v21546_v63 = vsel %vm23705_vm11, %v13512_v3, %v13513_v37  ;;  %v13528_v26 = vrot.slane %v23706_v12, 6  ;;  %v13532_v29 = vrot.slane %v23707_v22, 6  ;;  %v6579_v15 = vpop.permute.xlu0 %6578  ;;  %v13520_v43 = vrot.slane %v23648_v41, 6  ;;  %v23713_v41 = vld [vmem:[#allocation50_spill] sm:$0xff]  ;;  %vm23722_vm2 = vmmov %vm23720_vm1 }
 0x66d   : > { %v13525_v61 = vrot.slane %v23708_v18, 6  ;;  %v13530_v60 = vrot.slane %v23650_v45, 6  ;;  %v13535_v24 = vrot.slane %v23709_v20, 6  ;;  %v6615_v3 = vsel %vm3795_vm0, %v6614_v5, %v6579_v15  ;;  %v23715_v5 = vld [vmem:[#allocation47_spill] sm:$0xff]  ;;  %vm23724_vm8 = vmmov %vm23720_vm1 }
 0x66e   : > { %v23710_v12 = vcombine.low %v21264_v9, %v21271_v49  ;;  %v21563_v22 = vsel %vm23711_vm3, %v13517_v30, %v13518_v10  ;;  %v21566_v62 = vsel %vm23712_vm12, %v13527_v1, %v13528_v26  ;;  %v13533_v16 = vrot.slane %v23713_v41, 6  ;;  %6629 = vmatpush1.msra.mxu0 %v6615_v3  ;;  %v23716_v18 = vld [vmem:[#allocation55_spill] sm:$0xff]  ;;  %v11387_v1 = vpop.permute.xlu1 %11386  ;;  %vm23725_vm11 = vmmov %vm23720_vm1 }
 0x66f   : > { %v23714_v45 = vcombine.low %v21379_v47, %v21341_v13  ;;  %v13500_v15 = vrot.slane %v23715_v5, 6  ;;  %v13505_v20 = vrot.slane %v23716_v18, 6  ;;  %v13515_v30 = vrot.slane %v23718_v27, 6  ;;  %14829 = vmatmul.mubr.msk.f32.vlgmr.msra.gmra.mrb[2].mxu0 %vm569_vm7, %v14828_v4  ;;  %vm23731_vm3 = vmmov %vm23720_vm1  ;;  %v23737_v18 = vld [vmem:[#allocation41_spill] sm:$0xff] }
 0x670   : > { %12886 = vrot.lane.b32.xlu1 %v23710_v12, %s15175_s23  ;;  %v13510_v12 = vrot.slane %v23717_v33, 6  ;;  %v21582_v41 = vrot.slane %v13078_v53, %v15305_v28  ;;  %v21588_v3 = vsel %vm23720_vm1, %v13532_v29, %v13533_v16  ;;  %v11415_v5 = vpop.permute.xlu0 %11414  ;;  %v21591_v33 = vsel %vm23721_vm6, %v13518_v10, %v13520_v43  ;;  %vm23732_vm12 = vmmov %vm23720_vm1 }
 0x671   : > { %12914 = vrot.lane.b32.xlu0 %v23714_v45, %s15175_s23  ;;  %v21585_v45 = vsel %vm23719_vm13, %v13522_v57, %v13523_v55  ;;  %v21594_v27 = vsel %vm23722_vm2, %v13523_v55, %v13525_v61  ;;  %v21597_v4 = vsel %vm23724_vm8, %v13528_v26, %v13530_v60  ;;  %v21600_v8 = vsel %vm23725_vm11, %v13533_v16, %v13535_v24  ;;  %vm23733_vm13 = vmmov %vm23720_vm1 }
 0x672   : > { %23723 = vst [vmem:[#allocation93_spill] sm:$0xff] %v21594_v27  ;;  %23726 = vst [vmem:[#allocation12_spill] sm:$0xff] %v21600_v8  ;;  %v23727_v53 = vmov 0.0   ;;  %v23728_v57 = vcombine.high %v21264_v9, %v21271_v49  ;;  %v21608_v29 = vrot.slane %v13310_v59, %v15317_v36  ;;  %v13553_v10 = vcombine.low %v21519_v50, %v21537_v38  ;;  %v11391_v61 = vpop.permute.xlu1 %11390 }
 0x673   : > { %11512 = vmatprep.mubr.f32.mxu0 %v23727_v53  ;;  %v13569_v26 = vcombine.low %v21527_v6, %v21546_v63  ;;  %v13585_v24 = vcombine.low %v21563_v22, %v21566_v62  ;;  %v23729_v16 = vcombine.high %v21379_v47, %v21341_v13  ;;  %v23730_v49 = vrot.slane %v23599_v44, 6 }
 0x674   : > { %12890 = vrot.lane.b32.xlu1 %v23728_v57, %s15176_s25  ;;  %v21626_v59 = vsel %vm23732_vm12, %v13503_v54, %v13505_v20  ;;  %v21629_v55 = vsel %vm23733_vm13, %v13508_v23, %v13510_v12  ;;  %v21632_v43 = vsel %vm23720_vm1, %v13513_v37, %v13515_v30  ;;  %v23734_v13 = vcombine.high %v21197_v34, %v21212_v39  ;;  %v11419_v60 = vpop.permute.xlu0 %11418  ;;  %v23736_v39 = vld [vmem:[#allocation52_spill] sm:$0xff]  ;;  %v23738_v12 = vld [vmem:[#allocation35_spill] sm:$0xff]  ;;  %v23739_v57 = vld [vmem:[#allocation38_spill] sm:$0xff] }
 0x675   : > { %12918 = vrot.lane.b32.xlu0 %v23729_v16, %s15176_s25  ;;  %v21623_v9 = vsel %vm23731_vm3, %v23730_v49, %v13500_v15  ;;  %v13601_v44 = vcombine.low %v21585_v45, %v21588_v3  ;;  %v13721_v54 = vcombine.low %v21591_v33, %v21597_v4  ;;  %v13737_v23 = vcombine.low %v21594_v27, %v21600_v8  ;;  %v23740_v16 = vld [vmem:[#allocation68_spill] sm:$0xff] }
 0x676   : > { %v21638_v47 = vrot.slane %v23734_v13, %v15305_v28  ;;  %v13342_v37 = vcombine.high %v21507_v35, %v21579_v32  ;;  %v23735_v15 = vcombine.high %v23687_v40, %v23686_v17  ;;  %v13126_v20 = vcombine.high %v23737_v18, %v23736_v39  ;;  %v23741_v49 = vld [vmem:[#allocation72_spill] sm:$0xff]  ;;  %v23744_v17 = vld [vmem:[#allocation81_spill] sm:$0xff]  ;;  %v23745_v40 = vld [vmem:[#allocation75_spill] sm:$0xff] }
 0x677   : > { %v13214_v30 = vcombine.high %v23738_v12, %v21329_v2  ;;  %v23742_v13 = vcombine.low %v23740_v16, %v23741_v49  ;;  %v23743_v8 = vcombine.low %v21308_v56, %v21344_v46  ;;  %v13689_v39 = vcombine.low %v21623_v9, %v21629_v55  ;;  %v23746_v18 = vld [vmem:[#allocation85_spill] sm:$0xff]  ;;  %v23747_v12 = vld [vmem:[#allocation86_spill] sm:$0xff] }
 0x678   : > { %v21652_v34 = vrot.slane %v23735_v15, %v15305_v28  ;;  %v13230_v15 = vcombine.high %v23745_v40, %v23744_v17  ;;  %v13705_v2 = vcombine.low %v21626_v59, %v21632_v43  ;;  %v23748_v16 = vcombine.low %v23746_v18, %v23747_v12  ;;  %v11395_v18 = vpop.permute.xlu1 %11394 }
 0x679   : > { %v11436_v27 = vsel %vm3784_vm4, %v23742_v13, %v23739_v57  ;;  %12894 = vrot.lane.b32.xlu1 %v23743_v8, %s15177_s26  ;;  %v23749_v49 = vcombine.low %v21393_v19, %v21384_v0  ;;  %v21683_v8 = vrot.slane %v13553_v10, %v15305_v28  ;;  %v21686_v13 = vrot.slane %v13569_v26, %v15305_v28 }
 0x67a   : > { %v11429_v57 = vsel %vm3784_vm4, %v23748_v16, %v21430_v7  ;;  %v21689_v17 = vrot.slane %v13585_v24, %v15305_v28  ;;  %v21694_v7 = vrot.slane %v13601_v44, %v15305_v28  ;;  %v21697_v12 = vrot.slane %v13721_v54, %v15305_v28  ;;  %v11423_v24 = vpop.permute.xlu0 %11422 }
 0x67b   : > { %12922 = vrot.lane.b32.xlu0 %v23749_v49, %s15177_s26  ;;  %v11430_v40 = vsel %vm3786_vm5, %v11429_v57, %v21512_v31  ;;  %v21700_v16 = vrot.slane %v13737_v23, %v15305_v28  ;;  %v11437_v10 = vsel %vm3786_vm5, %v11436_v27, %v21417_v58  ;;  %v13246_v31 = vcombine.high %v21357_v11, %v21363_v48  ;;  %v23753_v49 = vld [vmem:[#allocation89_spill] sm:$0xff] }
 0x67c   : > { %v11431_v26 = vsel %vm561_vm15, %v11430_v40, %v21543_v52  ;;  %v13262_v44 = vcombine.high %v21360_v21, %v21366_v51  ;;  %v11438_v54 = vsel %vm561_vm15, %v11437_v10, %v21504_v25  ;;  %v23750_v23 = vcombine.high %v21308_v56, %v21344_v46  ;;  %v23754_v40 = vld [vmem:[#allocation26_spill] sm:$0xff]  ;;  %v23755_v10 = vld [vmem:[#allocation15_spill] sm:$0xff] }
 0x67d   : > { %v11432_v57 = vsel %vm3789_vm9, %v11431_v26, %v11387_v1  ;;  %v21718_v58 = vrot.slane %v13689_v39, %v15305_v28  ;;  %v21721_v52 = vrot.slane %v13705_v2, %v15305_v28  ;;  %v11439_v11 = vsel %vm3789_vm9, %v11438_v54, %v11415_v5  ;;  %v11399_v1 = vpop.permute.xlu1 %11398  ;;  %v23756_v26 = vld [vmem:[#allocation19_spill] sm:$0xff] }
 0x67e   : > { %12898 = vrot.lane.b32.xlu1 %v23750_v23, %s15178_s27  ;;  %v11433_v21 = vsel %vm3791_vm10, %v11432_v57, %v11391_v61  ;;  %v23751_v48 = vcombine.high %v21393_v19, %v21384_v0  ;;  %v21730_v51 = vrot.slane %v13126_v20, %v15305_v28  ;;  %v13617_v56 = vcombine.low %v21683_v8, %v21686_v13  ;;  %v11427_v61 = vpop.permute.xlu0 %11426 }
 0x67f   : > { %v11440_v46 = vsel %vm3791_vm10, %v11439_v11, %v11419_v60  ;;  %v11434_v25 = vsel %vm3793_vm14, %v11433_v21, %v11395_v18  ;;  %v13649_v5 = vcombine.low %v21689_v17, %v21694_v7  ;;  %v13785_v27 = vcombine.low %v21697_v12, %v21700_v16 }
 0x680   : > { %12926 = vrot.lane.b32.xlu0 %v23751_v48, %s15178_s27  ;;  %v11441_v19 = vsel %vm3793_vm14, %v11440_v46, %v11423_v24  ;;  %v11435_v0 = vsel %vm3795_vm0, %v11434_v25, %v11399_v1  ;;  %v13260_v20 = vrot.slane %v13246_v31, %v15305_v28  ;;  %v13276_v39 = vrot.slane %v13262_v44, %v15305_v28  ;;  %v14887_v44 = vld [vmem:[%s22414_s4 + $0x8] sm:$0xff] }
 0x681   : > { %v23752_v60 = vcombine.high %v21413_v14, %v21420_v42  ;;  %v11442_v2 = vsel %vm3795_vm0, %v11441_v19, %v11427_v61  ;;  %v13207_v18 = vcombine.low %v23754_v40, %v23753_v49  ;;  %v23757_v24 = vcombine.high %v23755_v10, %v23756_v26  ;;  %v21765_v21 = vpop.permute.xlu1 %10951 }
 0x682   : > { %v13753_v31 = vcombine.low %v21718_v58, %v21721_v52  ;;  %11448 = vmatprep.subr.mxu0 %v11442_v2  ;;  %v13157_v57 = vcombine.low %v21582_v41, %v21638_v47  ;;  %v13228_v23 = vrot.slane %v13214_v30, %v15305_v28  ;;  %v13244_v11 = vrot.slane %v13230_v15, %v15305_v28  ;;  %v21778_v1 = vpop.permute.xlu0 %10979 }
 0x683   : > { %13350 = vrot.lane.b32.xlu1 %v23752_v60, %s15173_s19  ;;  %v13292_v54 = vrot.slane %v23757_v24, %v15317_v36  ;;  %11449 = vmatpush1.msra.mxu0 %v11435_v0  ;;  %v13189_v48 = vcombine.low %v21652_v34, %v21730_v51  ;;  %v21770_v46 = vrot.slane %v13617_v56, %v15317_v36 }
 0x684   : > { %13378 = vrot.lane.b32.xlu0 %v13342_v37, %s15173_s19  ;;  %v21773_v25 = vrot.slane %v13649_v5, %v15317_v36  ;;  %v21776_v37 = vrot.slane %v13785_v27, %v15317_v36  ;;  %v13325_v15 = vcombine.low %v13260_v20, %v13276_v39  ;;  %14888 = vmatmul.mubr.msk.f32.vlgmr.msra.gmra.mrb[4].mxu0 %vm569_vm7, %v14887_v44 }
 0x685   : > { %v13343_v30 = vcombine.low %v13292_v54, %v21608_v29  ;;  %v21784_v19 = vrot.slane %v13753_v31, %v15317_v36  ;;  %11586 = vmatprep.mubr.f32.mxu0 %v23727_v53  ;;  %v13208_v56 = vcombine.high %v23754_v40, %v23753_v49  ;;  %v13293_v5 = vcombine.low %v13228_v23, %v13244_v11  ;;  %v10956_v61 = vpop.permute.xlu1 %10955 }
 0x686   : > { %v13205_v27 = vcombine.low %v21413_v14, %v21420_v42  ;;  %v13165_v60 = vrot.slane %v13157_v57, %v15317_v36  ;;  %v13197_v2 = vrot.slane %v13189_v48, %v15317_v36  ;;  %v10984_v26 = vpop.permute.xlu0 %10983  ;;  %v13344_v49 = vcombine.high %v13292_v54, %v21608_v29 }
 0x687   : > { %13354 = vrot.lane.b32.xlu1 %v13207_v18, %s15174_s20  ;;  %v13333_v40 = vrot.slane %v13325_v15, %v15317_v36  ;;  %v13301_v24 = vrot.slane %v13293_v5, %v15317_v36  ;;  %v13158_v57 = vcombine.high %v21582_v41, %v21638_v47  ;;  %v13190_v48 = vcombine.high %v21652_v34, %v21730_v51 }
 0x688   : > { %13382 = vrot.lane.b32.xlu0 %v13343_v30, %s15174_s20  ;;  %v13209_v44 = vcombine.low %v13165_v60, %v13197_v2  ;;  %v13326_v18 = vcombine.high %v13260_v20, %v13276_v39  ;;  %v13294_v29 = vcombine.high %v13228_v23, %v13244_v11  ;;  %v13210_v15 = vcombine.high %v13165_v60, %v13197_v2  ;;  %v23758_v39 = vld [vmem:[#allocation9_spill] sm:$0xff]  ;;  %v23759_v23 = vld [vmem:[#allocation18_spill] sm:$0xff] }
 0x689   : > { %v10960_v31 = vpop.permute.xlu1 %10959  ;;  %v13345_v10 = vcombine.low %v13301_v24, %v13333_v40  ;;  %v13204_v5 = vrot.slane %v13190_v48, %v15317_v36  ;;  %v13346_v0 = vcombine.high %v13301_v24, %v13333_v40  ;;  %v13618_v47 = vcombine.high %v21683_v8, %v21686_v13  ;;  %v23761_v8 = vld [vmem:[#allocation3_spill] sm:$0xff] }
 0x68a   : > { %v10988_v30 = vpop.permute.xlu0 %10987  ;;  %v13340_v41 = vrot.slane %v13326_v18, %v15317_v36  ;;  %v13308_v34 = vrot.slane %v13294_v29, %v15317_v36  ;;  %v13650_v51 = vcombine.high %v21689_v17, %v21694_v7  ;;  %v13554_v20 = vcombine.high %v21519_v50, %v21537_v38 }
 0x68b   : > { %13358 = vrot.lane.b32.xlu1 %v13208_v56, %s15157_s11  ;;  %v13172_v56 = vrot.slane %v13158_v57, %v15317_v36  ;;  %v10806_v11 = vcombine.low %v23759_v23, %v23758_v39  ;;  %v13786_v18 = vcombine.high %v21697_v12, %v21700_v16  ;;  %v13682_v50 = vcombine.high %v21770_v46, %v21773_v25 }
 0x68c   : > { %13386 = vrot.lane.b32.xlu0 %v13344_v49, %s15157_s11  ;;  %v13347_v40 = vcombine.low %v13308_v34, %v13340_v41  ;;  %v21833_v38 = vrot.slane %v13618_v47, %v15317_v36  ;;  %v13570_v17 = vcombine.high %v21527_v6, %v21546_v63  ;;  %v13586_v7 = vcombine.high %v21563_v22, %v21566_v62 }
 0x68d   : > { %v10964_v54 = vpop.permute.xlu1 %10963  ;;  %v13211_v2 = vcombine.low %v13172_v56, %v13204_v5  ;;  %v13212_v24 = vcombine.high %v13172_v56, %v13204_v5  ;;  %v11006_v12 = vsel %vm3784_vm4, %v10806_v11, %v21765_v21  ;;  %v13664_v16 = vrot.slane %v13650_v51, %v15317_v36  ;;  %v23763_v5 = vld [vmem:[#allocation93_spill] sm:$0xff] }
 0x68e   : > { %v10992_v49 = vpop.permute.xlu0 %10991  ;;  %v13754_v57 = vcombine.high %v21718_v58, %v21721_v52  ;;  %v21846_v48 = vrot.slane %v13554_v20, %v15305_v28  ;;  %v11007_v6 = vsel %vm3786_vm5, %v11006_v12, %v10956_v61  ;;  %v13800_v62 = vrot.slane %v13786_v18, %v15317_v36  ;;  %v23762_v52 = vld [vmem:[#allocation12_spill] sm:$0xff] }
 0x68f   : > { %13362 = vrot.lane.b32.xlu1 %v13209_v44, %s15175_s23  ;;  %v13348_v44 = vcombine.high %v13308_v34, %v13340_v41  ;;  %v13602_v22 = vcombine.high %v21585_v45, %v21588_v3  ;;  %v13722_v58 = vcombine.high %v21591_v33, %v21597_v4  ;;  %v13738_v41 = vcombine.high %v23763_v5, %v23762_v52 }
 0x690   : > { %13390 = vrot.lane.b32.xlu0 %v13345_v10, %s15175_s23  ;;  %v23760_v10 = vld [vmem:[#allocation96_spill] sm:$0xff]  ;;  %v13584_v47 = vrot.slane %v13570_v17, %v15305_v28  ;;  %v13600_v45 = vrot.slane %v13586_v7, %v15305_v28  ;;  %v13690_v33 = vcombine.high %v21623_v9, %v21629_v55  ;;  %v13706_v4 = vcombine.high %v21626_v59, %v21632_v43  ;;  %v11020_v43 = vld [vmem:[%s22414_s4] sm:$0xff] }
 0x691   : > { %v10968_v60 = vpop.permute.xlu1 %10967  ;;  %v10942_v13 = vcombine.low %v23761_v8, %v23760_v10  ;;  %v13818_v34 = vcombine.high %v21784_v19, %v21776_v37  ;;  %v13736_v9 = vrot.slane %v13722_v58, %v15305_v28  ;;  %v13752_v55 = vrot.slane %v13738_v41, %v15305_v28 }
 0x692   : > { %v13768_v23 = vrot.slane %v13754_v57, %v15317_v36  ;;  %v13704_v11 = vrot.slane %v13690_v33, %v15305_v28  ;;  %v13683_v18 = vcombine.low %v21833_v38, %v13664_v16  ;;  %v13633_v10 = vcombine.low %v21846_v48, %v13584_v47  ;;  %v23765_v33 = vld [vmem:[#allocation27_spill] sm:$0xff] }
 0x693   : > { %13366 = vrot.lane.b32.xlu1 %v13210_v15, %s15176_s25  ;;  %v11013_v29 = vsel %vm3784_vm4, %v10942_v13, %v21778_v1  ;;  %v11008_v15 = vsel %vm561_vm15, %v11007_v6, %v10960_v31 }
 0x694   : > { %13394 = vrot.lane.b32.xlu0 %v13346_v0, %s15176_s25  ;;  %v10996_v0 = vpop.permute.xlu0 %10995  ;;  %v11014_v21 = vsel %vm3786_vm5, %v11013_v29, %v10984_v26  ;;  %v11009_v61 = vsel %vm3789_vm9, %v11008_v15, %v10964_v54  ;;  %v13641_v17 = vrot.slane %v13633_v10, %v15317_v36  ;;  %v13820_v57 = vcombine.high %v13768_v23, %v13800_v62 }
 0x695   : > { %v10972_v63 = vpop.permute.xlu1 %10971  ;;  %v11015_v1 = vsel %vm561_vm15, %v11014_v21, %v10988_v30  ;;  %v11010_v26 = vsel %vm3791_vm10, %v11009_v61, %v10968_v60  ;;  %v13720_v60 = vrot.slane %v13706_v4, %v15305_v28  ;;  %v13634_v21 = vcombine.high %v21846_v48, %v13584_v47 }
 0x696   : > { %v11016_v3 = vsel %vm3789_vm9, %v11015_v1, %v10992_v49  ;;  %v11011_v30 = vsel %vm3793_vm14, %v11010_v26, %v10972_v63  ;;  %v13616_v49 = vrot.slane %v13602_v22, %v15305_v28  ;;  %v23764_v26 = vld [vmem:[#allocation32_spill] sm:$0xff] }
 0x697   : > { %13370 = vrot.lane.b32.xlu1 %v13211_v2, %s15177_s26  ;;  %v11017_v31 = vsel %vm3791_vm10, %v11016_v3, %v10996_v0  ;;  %v13819_v0 = vcombine.low %v13768_v23, %v13800_v62  ;;  %v13770_v62 = vcombine.high %v13704_v11, %v13720_v60  ;;  %v13648_v5 = vrot.slane %v13634_v21, %v15317_v36 }
 0x698   : > { %13398 = vrot.lane.b32.xlu0 %v13347_v40, %s15177_s26  ;;  %v11000_v56 = vpop.permute.xlu0 %10999  ;;  %v13665_v8 = vcombine.low %v13600_v45, %v13616_v49  ;;  %v13801_v40 = vcombine.low %v13736_v9, %v13752_v55  ;;  %v13666_v15 = vcombine.high %v13600_v45, %v13616_v49  ;;  %v11777_v4 = vcombine.low %v23765_v33, %v23764_v26 }
 0x699   : > { %v10976_v54 = vpop.permute.xlu1 %10975  ;;  %v11018_v51 = vsel %vm3793_vm14, %v11017_v31, %v11000_v56  ;;  %v13802_v56 = vcombine.high %v13736_v9, %v13752_v55  ;;  %v13784_v48 = vrot.slane %v13770_v62, %v15317_v36 }
 0x69a   : > { %v11012_v20 = vsel %vm3795_vm0, %v11011_v30, %v10976_v54  ;;  %v13673_v7 = vrot.slane %v13665_v8, %v15317_v36  ;;  %v13809_v29 = vrot.slane %v13801_v40, %v15317_v36  ;;  %v13680_v41 = vrot.slane %v13666_v15, %v15317_v36  ;;  %v23766_v54 = vld [vmem:[#allocation5_spill] sm:$0xff] }
 0x69b   : > { %13374 = vrot.lane.b32.xlu1 %v13212_v24, %s15178_s27  ;;  %v13769_v24 = vcombine.low %v13704_v11, %v13720_v60  ;;  %v13816_v3 = vrot.slane %v13802_v56, %v15317_v36 }
 0x69c   : > { %13402 = vrot.lane.b32.xlu0 %v13348_v44, %s15178_s27  ;;  %v11004_v39 = vpop.permute.xlu0 %11003  ;;  %v13685_v22 = vcombine.low %v13641_v17, %v13673_v7  ;;  %v13686_v52 = vcombine.high %v13641_v17, %v13673_v7  ;;  %v13687_v45 = vcombine.low %v13648_v5, %v13680_v41  ;;  %v13688_v55 = vcombine.high %v13648_v5, %v13680_v41  ;;  %v14890_v17 = vld [vmem:[%s22414_s4 + $0x10] sm:$0xff] }
 0x69d   : > { %v11019_v59 = vsel %vm3795_vm0, %v11018_v51, %v11004_v39  ;;  %v11923_v2 = vpop.permute.xlu1 %11922  ;;  %v13777_v6 = vrot.slane %v13769_v24, %v15317_v36  ;;  %v13823_v30 = vcombine.low %v13784_v48, %v13816_v3  ;;  %v13824_v11 = vcombine.high %v13784_v48, %v13816_v3 }
 0x69e   : > { %11522 = vmatprep.subr.mxu0 %v11019_v59  ;;  %v11977_v51 = vsel %vm3784_vm4, %v11777_v4, %v11923_v2 }
 0x69f   : > { %13826 = vrot.lane.b32.xlu1 %v13682_v50, %s15173_s19  ;;  %11523 = vmatpush1.msra.mxu0 %v11012_v20  ;;  %v13684_v50 = vcombine.high %v21833_v38, %v13664_v16  ;;  %v13821_v16 = vcombine.low %v13777_v6, %v13809_v29  ;;  %v13822_v61 = vcombine.high %v13777_v6, %v13809_v29 }
 0x6a0   : > { %13854 = vrot.lane.b32.xlu0 %v13818_v34, %s15173_s19  ;;  %v11951_v13 = vpop.permute.xlu0 %11950  ;;  %14889 = vmatmul.mubr.msk.f32.vlgmr.msra.gmra.mrb[4].mxu0 %vm569_vm7, %v11020_v43  ;;  %v23767_v34 = vld [vmem:[#allocation4_spill] sm:$0xff] }
 0x6a1   : > { %12060 = vmatprep.mubr.f32.mxu0 %v23727_v53  ;;  %v11927_v44 = vpop.permute.xlu1 %11926  ;;  %v11913_v49 = vcombine.low %v23767_v34, %v23766_v54 }
 0x6a2   : > { %v11978_v39 = vsel %vm3786_vm5, %v11977_v51, %v11927_v44 }
 0x6a3   : > { %13830 = vrot.lane.b32.xlu1 %v13683_v18, %s15174_s20  ;;  %v11984_v20 = vsel %vm3784_vm4, %v11913_v49, %v11951_v13 }
 0x6a4   : > { %13858 = vrot.lane.b32.xlu0 %v13819_v0, %s15174_s20  ;;  %v11955_v12 = vpop.permute.xlu0 %11954 }
 0x6a5   : > { %v11931_v63 = vpop.permute.xlu1 %11930  ;;  %v11985_v59 = vsel %vm3786_vm5, %v11984_v20, %v11955_v12 }
 0x6a6   : > { %v11979_v43 = vsel %vm561_vm15, %v11978_v39, %v11931_v63 }
 0x6a7   : > { %13834 = vrot.lane.b32.xlu1 %v13684_v50, %s15157_s11 }
 0x6a8   : > { %13862 = vrot.lane.b32.xlu0 %v13820_v57, %s15157_s11  ;;  %v11959_v38 = vpop.permute.xlu0 %11958 }
 0x6a9   : > { %v11935_v58 = vpop.permute.xlu1 %11934  ;;  %v11986_v60 = vsel %vm561_vm15, %v11985_v59, %v11959_v38  ;;  %v23768_v38 = vld [vmem:[#allocation58_spill] sm:$0xff] }
 0x6aa   : > { %v11980_v18 = vsel %vm3789_vm9, %v11979_v43, %v11935_v58  ;;  %v23770_v58 = vld [vmem:[#allocation8_spill] sm:$0xff] }
 0x6ab   : > { %13838 = vrot.lane.b32.xlu1 %v13685_v22, %s15175_s23 }
 0x6ac   : > { %13866 = vrot.lane.b32.xlu0 %v13821_v16, %s15175_s23  ;;  %v11963_v1 = vpop.permute.xlu0 %11962  ;;  %v23769_v16 = vld [vmem:[#allocation11_spill] sm:$0xff] }
 0x6ad   : > { %v11939_v47 = vpop.permute.xlu1 %11938  ;;  %v11987_v2 = vsel %vm3789_vm9, %v11986_v60, %v11963_v1  ;;  %v12253_v56 = vcombine.low %v23769_v16, %v23768_v38 }
 0x6ae   : > { %v11981_v10 = vsel %vm3791_vm10, %v11980_v18, %v11939_v47 }
 0x6af   : > { %13842 = vrot.lane.b32.xlu1 %v13686_v52, %s15176_s25  ;;  %v23771_v52 = vld [vmem:[#allocation67_spill] sm:$0xff] }
 0x6b0   : > { %13870 = vrot.lane.b32.xlu0 %v13822_v61, %s15176_s25  ;;  %v11967_v31 = vpop.permute.xlu0 %11966  ;;  %v12389_v5 = vcombine.low %v23771_v52, %v23770_v58 }
 0x6b1   : > { %v11943_v9 = vpop.permute.xlu1 %11942  ;;  %v11988_v8 = vsel %vm3791_vm10, %v11987_v2, %v11967_v31 }
 0x6b2   : > { %v11982_v13 = vsel %vm3793_vm14, %v11981_v10, %v11943_v9  ;;  %v14892_v9 = vld [vmem:[%s22414_s4 + $0x18] sm:$0xff] }
 0x6b3   : > { %13846 = vrot.lane.b32.xlu1 %v13687_v45, %s15177_s26 }
 0x6b4   : > { %13874 = vrot.lane.b32.xlu0 %v13823_v30, %s15177_s26  ;;  %v11971_v23 = vpop.permute.xlu0 %11970 }
 0x6b5   : > { %v11947_v0 = vpop.permute.xlu1 %11946  ;;  %v11989_v40 = vsel %vm3793_vm14, %v11988_v8, %v11971_v23  ;;  %v23772_v8 = vld [vmem:[#allocation39_spill] sm:$0xff] }
 0x6b6   : > { %v11983_v24 = vsel %vm3795_vm0, %v11982_v13, %v11947_v0  ;;  %v23773_v13 = vld [vmem:[#allocation37_spill] sm:$0xff] }
 0x6b7   : > { %13850 = vrot.lane.b32.xlu1 %v13688_v55, %s15178_s27  ;;  %v12729_v0 = vcombine.low %v23773_v13, %v23772_v8 }
 0x6b8   : > { %13878 = vrot.lane.b32.xlu0 %v13824_v11, %s15178_s27  ;;  %v11975_v44 = vpop.permute.xlu0 %11974 }
 0x6b9   : > { %v11990_v50 = vsel %vm3795_vm0, %v11989_v40, %v11975_v44  ;;  %v12399_v7 = vpop.permute.xlu1 %12398  ;;  %v23775_v44 = vld [vmem:[#allocation62_spill] sm:$0xff] }
 0x6ba   : > { %11996 = vmatprep.subr.mxu0 %v11990_v50  ;;  %v12453_v41 = vsel %vm3784_vm4, %v12253_v56, %v12399_v7 }
 0x6bb   : > { %11997 = vmatpush1.msra.mxu0 %v11983_v24  ;;  %v23774_v24 = vld [vmem:[#allocation36_spill] sm:$0xff] }
 0x6bc   : > { %v12427_v12 = vpop.permute.xlu0 %12426  ;;  %14891 = vmatmul.mubr.msk.f32.vlgmr.msra.gmra.mrb[4].mxu0 %vm569_vm7, %v14890_v17  ;;  %v12865_v50 = vcombine.low %v23775_v44, %v23774_v24 }
 0x6bd   : > { %12536 = vmatprep.mubr.f32.mxu0 %v23727_v53  ;;  %v12403_v57 = vpop.permute.xlu1 %12402  ;;  %v12460_v1 = vsel %vm3784_vm4, %v12389_v5, %v12427_v12 }
 0x6be   : > { %v12454_v61 = vsel %vm3786_vm5, %v12453_v41, %v12403_v57 }
 0x6c0   : > { %v12431_v29 = vpop.permute.xlu0 %12430 }
 0x6c1   : > { %v12407_v6 = vpop.permute.xlu1 %12406  ;;  %v12461_v48 = vsel %vm3786_vm5, %v12460_v1, %v12431_v29  ;;  %v14894_v1 = vld [vmem:[%s22414_s4 + $0x20] sm:$0xff] }
 0x6c2   : > { %v12455_v47 = vsel %vm561_vm15, %v12454_v61, %v12407_v6 }
 0x6c4   : > { %v12435_v63 = vpop.permute.xlu0 %12434 }
 0x6c5   : > { %v12411_v22 = vpop.permute.xlu1 %12410  ;;  %v12462_v26 = vsel %vm561_vm15, %v12461_v48, %v12435_v63 }
 0x6c6   : > { %v12456_v33 = vsel %vm3789_vm9, %v12455_v47, %v12411_v22 }
 0x6c8   : > { %v12439_v21 = vpop.permute.xlu0 %12438 }
 0x6c9   : > { %v12415_v15 = vpop.permute.xlu1 %12414  ;;  %v12463_v4 = vsel %vm3789_vm9, %v12462_v26, %v12439_v21 }
 0x6ca   : > { %v12457_v31 = vsel %vm3791_vm10, %v12456_v33, %v12415_v15 }
 0x6cc   : > { %v12443_v62 = vpop.permute.xlu0 %12442 }
 0x6cd   : > { %v12419_v3 = vpop.permute.xlu1 %12418  ;;  %v12464_v30 = vsel %vm3791_vm10, %v12463_v4, %v12443_v62 }
 0x6ce   : > { %v12458_v54 = vsel %vm3793_vm14, %v12457_v31, %v12419_v3 }
 0x6d0   : > { %v12447_v45 = vpop.permute.xlu0 %12446 }
 0x6d1   : > { %v12423_v34 = vpop.permute.xlu1 %12422  ;;  %v12465_v49 = vsel %vm3793_vm14, %v12464_v30, %v12447_v45 }
 0x6d2   : > { %v12459_v51 = vsel %vm3795_vm0, %v12458_v54, %v12423_v34  ;;  %v23776_v34 = vcombine.low %v21507_v35, %v21579_v32 }
 0x6d4   : > { %v12451_v20 = vpop.permute.xlu0 %12450 }
 0x6d5   : > { %v12466_v39 = vsel %vm3795_vm0, %v12465_v49, %v12451_v20  ;;  %v12875_v55 = vpop.permute.xlu1 %12874 }
 0x6d6   : > { %12472 = vmatprep.subr.mxu0 %v12466_v39  ;;  %v12929_v17 = vsel %vm3784_vm4, %v12729_v0, %v12875_v55 }
 0x6d7   : > { %12473 = vmatpush1.msra.mxu0 %v12459_v51 }
 0x6d8   : > { %v12903_v59 = vpop.permute.xlu0 %12902  ;;  %14893 = vmatmul.mubr.msk.f32.vlgmr.msra.gmra.mrb[4].mxu0 %vm569_vm7, %v14892_v9 }
 0x6d9   : > { %13012 = vmatprep.mubr.f32.mxu0 %v23727_v53  ;;  %v12879_v43 = vpop.permute.xlu1 %12878  ;;  %v12936_v7 = vsel %vm3784_vm4, %v12865_v50, %v12903_v59 }
 0x6da   : > { %v12930_v12 = vsel %vm3786_vm5, %v12929_v17, %v12879_v43 }
 0x6dc   : > { %v12907_v23 = vpop.permute.xlu0 %12906 }
 0x6dd   : > { %v12883_v11 = vpop.permute.xlu1 %12882  ;;  %v12937_v29 = vsel %vm3786_vm5, %v12936_v7, %v12907_v23 }
 0x6de   : > { %v12931_v6 = vsel %vm561_vm15, %v12930_v12, %v12883_v11  ;;  %v23777_v12 = vcombine.low %v21770_v46, %v21773_v25 }
 0x6e0   : > { %v12911_v60 = vpop.permute.xlu0 %12910 }
 0x6e1   : > { %v12938_v22 = vsel %vm561_vm15, %v12937_v29, %v12911_v60  ;;  %v23778_v29 = vcombine.low %v21784_v19, %v21776_v37 }
 0x6e2   : > { %v12887_v18 = vpop.permute.xlu1 %12886 }
 0x6e3   : > { %v12932_v21 = vsel %vm3789_vm9, %v12931_v6, %v12887_v18 }
 0x6e4   : > { %v12915_v2 = vpop.permute.xlu0 %12914 }
 0x6e5   : > { %v12939_v15 = vsel %vm3789_vm9, %v12938_v22, %v12915_v2  ;;  %v14896_v2 = vld [vmem:[%s22414_s4 + $0x28] sm:$0xff] }
 0x6e6   : > { %v12891_v10 = vpop.permute.xlu1 %12890 }
 0x6e7   : > { %v12933_v38 = vsel %vm3791_vm10, %v12932_v21, %v12891_v10 }
 0x6e8   : > { %v12919_v40 = vpop.permute.xlu0 %12918 }
 0x6e9   : > { %v12940_v16 = vsel %vm3791_vm10, %v12939_v15, %v12919_v40 }
 0x6eb   : > { %v12895_v57 = vpop.permute.xlu1 %12894 }
 0x6ec   : > { %v12934_v56 = vsel %vm3793_vm14, %v12933_v38, %v12895_v57 }
 0x6ed   : > { %v12923_v63 = vpop.permute.xlu0 %12922 }
 0x6ee   : > { %v12941_v58 = vsel %vm3793_vm14, %v12940_v16, %v12923_v63 }
 0x6f0   : > { %v12899_v62 = vpop.permute.xlu1 %12898 }
 0x6f1   : > { %v12935_v52 = vsel %vm3795_vm0, %v12934_v56, %v12899_v62 }
 0x6f2   : > { %v12927_v5 = vpop.permute.xlu0 %12926 }
 0x6f3   : > { %v12942_v41 = vsel %vm3795_vm0, %v12941_v58, %v12927_v5 }
 0x6f4   : > { %12948 = vmatprep.subr.mxu0 %v12942_v41  ;;  %v14898_v41 = vld [vmem:[%s22414_s4 + $0x30] sm:$0xff] }
 0x6f5   : > { %12949 = vmatpush1.msra.mxu0 %v12935_v52  ;;  %v13351_v61 = vpop.permute.xlu1 %13350 }
 0x6f6   : > { %v13379_v3 = vpop.permute.xlu0 %13378  ;;  %14895 = vmatmul.mubr.msk.f32.vlgmr.msra.gmra.mrb[4].mxu0 %vm569_vm7, %v14894_v1  ;;  %v13405_v54 = vsel %vm3784_vm4, %v13205_v27, %v13351_v61 }
 0x6f7   : > { %13488 = vmatprep.mubr.f32.mxu0 %v23727_v53  ;;  %v13412_v49 = vsel %vm3784_vm4, %v23776_v34, %v13379_v3 }
 0x6f9   : > { %v13355_v48 = vpop.permute.xlu1 %13354 }
 0x6fa   : > { %v13383_v47 = vpop.permute.xlu0 %13382  ;;  %v13406_v51 = vsel %vm3786_vm5, %v13405_v54, %v13355_v48 }
 0x6fb   : > { %v13413_v39 = vsel %vm3786_vm5, %v13412_v49, %v13383_v47 }
 0x6fd   : > { %v13359_v45 = vpop.permute.xlu1 %13358 }
 0x6fe   : > { %v13387_v26 = vpop.permute.xlu0 %13386  ;;  %v13407_v9 = vsel %vm561_vm15, %v13406_v51, %v13359_v45 }
 0x6ff   : > { %v13414_v59 = vsel %vm561_vm15, %v13413_v39, %v13387_v26 }
 0x701   : > { %v13363_v33 = vpop.permute.xlu1 %13362 }
 0x702   : > { %v13391_v4 = vpop.permute.xlu0 %13390  ;;  %v13408_v43 = vsel %vm3789_vm9, %v13407_v9, %v13363_v33 }
 0x703   : > { %v13415_v14 = vsel %vm3789_vm9, %v13414_v59, %v13391_v4 }
 0x705   : > { %v13367_v31 = vpop.permute.xlu1 %13366 }
 0x706   : > { %v13395_v30 = vpop.permute.xlu0 %13394  ;;  %v13409_v42 = vsel %vm3791_vm10, %v13408_v43, %v13367_v31 }
 0x707   : > { %v13416_v32 = vsel %vm3791_vm10, %v13415_v14, %v13395_v30 }
 0x709   : > { %v13371_v20 = vpop.permute.xlu1 %13370 }
 0x70a   : > { %v13399_v55 = vpop.permute.xlu0 %13398  ;;  %v13410_v35 = vsel %vm3793_vm14, %v13409_v42, %v13371_v20 }
 0x70b   : > { %v13417_v23 = vsel %vm3793_vm14, %v13416_v32, %v13399_v55 }
 0x70d   : > { %v13375_v27 = vpop.permute.xlu1 %13374 }
 0x70e   : > { %v13411_v11 = vsel %vm3795_vm0, %v13410_v35, %v13375_v27  ;;  %v13403_v60 = vpop.permute.xlu0 %13402 }
 0x70f   : > { %v13418_v18 = vsel %vm3795_vm0, %v13417_v23, %v13403_v60 }
 0x710   : > { %13424 = vmatprep.subr.mxu0 %v13418_v18 }
 0x711   : > { %13425 = vmatpush1.msra.mxu0 %v13411_v11  ;;  %v13827_v10 = vpop.permute.xlu1 %13826 }
 0x712   : > { %v13855_v8 = vpop.permute.xlu0 %13854  ;;  %14897 = vmatmul.mubr.msk.f32.vlgmr.msra.gmra.mrb[4].mxu0 %vm569_vm7, %v14896_v2  ;;  %v13881_v57 = vsel %vm3784_vm4, %v23777_v12, %v13827_v10 }
 0x713   : > { %13964 = vmatprep.mubr.f32.mxu0 %v23727_v53  ;;  %v13888_v6 = vsel %vm3784_vm4, %v23778_v29, %v13855_v8 }
 0x715   : > { %v13831_v13 = vpop.permute.xlu1 %13830 }
 0x716   : > { %v13859_v0 = vpop.permute.xlu0 %13858  ;;  %v13882_v53 = vsel %vm3786_vm5, %v13881_v57, %v13831_v13 }
 0x717   : > { %v13889_v22 = vsel %vm3786_vm5, %v13888_v6, %v13859_v0 }
 0x719   : > { %v13835_v40 = vpop.permute.xlu1 %13834 }
 0x71a   : > { %v13863_v24 = vpop.permute.xlu0 %13862  ;;  %v13883_v21 = vsel %vm561_vm15, %v13882_v53, %v13835_v40 }
 0x71b   : > { %v13890_v38 = vsel %vm561_vm15, %v13889_v22, %v13863_v24 }
 0x71d   : > { %v13839_v44 = vpop.permute.xlu1 %13838 }
 0x71e   : > { %v13867_v50 = vpop.permute.xlu0 %13866  ;;  %v13884_v16 = vsel %vm3789_vm9, %v13883_v21, %v13839_v44 }
 0x71f   : > { %v13891_v46 = vsel %vm3789_vm9, %v13890_v38, %v13867_v50 }
 0x721   : > { %v13843_v17 = vpop.permute.xlu1 %13842 }
 0x722   : > { %v13871_v7 = vpop.permute.xlu0 %13870  ;;  %v13885_v25 = vsel %vm3791_vm10, %v13884_v16, %v13843_v17 }
 0x723   : > { %v13892_v37 = vsel %vm3791_vm10, %v13891_v46, %v13871_v7 }
 0x725   : > { %v13847_v63 = vpop.permute.xlu1 %13846 }
 0x726   : > { %v13875_v15 = vpop.permute.xlu0 %13874  ;;  %v13886_v19 = vsel %vm3793_vm14, %v13885_v25, %v13847_v63 }
 0x727   : > { %v13893_v62 = vsel %vm3793_vm14, %v13892_v37, %v13875_v15 }
 0x729   : > { %v13851_v56 = vpop.permute.xlu1 %13850 }
 0x72a   : > { %v13887_v58 = vsel %vm3795_vm0, %v13886_v19, %v13851_v56  ;;  %v13879_v52 = vpop.permute.xlu0 %13878 }
 0x72b   : > { %v13894_v5 = vsel %vm3795_vm0, %v13893_v62, %v13879_v52 }
 0x72c   : > { %13900 = vmatprep.subr.mxu0 %v13894_v5 }
 0x72d   : > { %13901 = vmatpush1.msra.mxu0 %v13887_v58 }
 0x72e   : > { %14899 = vmatmul.mubr.msk.f32.vlgmr.msra.gmra.mrb[4].mxu0 %vm569_vm7, %v14898_v41  ;;  %vm14660_vm7 = vcmask 7168  }
 0x742   : > { %v6694_v1 = vpop.f32.mrb[2].mxu0 }
 0x743   : > { %6705 = vrot.lane.b32.xlu1 %v6694_v1, %s15177_s26  ;;  %6702 = vrot.lane.b32.xlu0 %v6694_v1, %s15178_s27  ;;  %v22036_v61 = vpop.f32.mrb[3].mxu0 }
 0x747   : > { %6711 = vrot.lane.b32.xlu1 %v6694_v1, %s15175_s23  ;;  %6708 = vrot.lane.b32.xlu0 %v6694_v1, %s15176_s25 }
 0x74b   : > { %6717 = vrot.lane.b32.xlu1 %v6694_v1, %s15174_s20  ;;  %6714 = vrot.lane.b32.xlu0 %v6694_v1, %s15157_s11 }
 0x74f   : > { %6724 = vrot.lane.b32.xlu1 %v22036_v61, %s15178_s27  ;;  %6720 = vrot.lane.b32.xlu0 %v6694_v1, %s15173_s19 }
 0x753   : > { %6730 = vrot.lane.b32.xlu1 %v22036_v61, %s15176_s25  ;;  %6727 = vrot.lane.b32.xlu0 %v22036_v61, %s15177_s26 }
 0x757   : > { %6736 = vrot.lane.b32.xlu1 %v22036_v61, %s15157_s11  ;;  %6733 = vrot.lane.b32.xlu0 %v22036_v61, %s15175_s23 }
 0x75b   : > { %6742 = vrot.lane.b32.xlu1 %v22036_v61, %s15173_s19  ;;  %6739 = vrot.lane.b32.xlu0 %v22036_v61, %s15174_s20 }
 0x7b5   : > { %v6706_v47 = vpop.permute.xlu1 %6705  ;;  %v6703_v45 = vpop.permute.xlu0 %6702 }
 0x7b6   : > { %v6745_v43 = vcombine.low %v6694_v1, %v6706_v47  ;;  %v6746_v14 = vcombine.high %v6694_v1, %v6706_v47 }
 0x7b8   : > { %v6753_v2 = vrot.slane %v6745_v43, %v15305_v28  ;;  %v6760_v10 = vrot.slane %v6746_v14, %v15305_v28 }
 0x7b9   : > { %v6712_v26 = vpop.permute.xlu1 %6711  ;;  %v6709_v33 = vpop.permute.xlu0 %6708 }
 0x7ba   : > { %v6761_v55 = vcombine.low %v6703_v45, %v6709_v33  ;;  %v6762_v59 = vcombine.high %v6703_v45, %v6709_v33 }
 0x7bc   : > { %v6769_v60 = vrot.slane %v6761_v55, %v15305_v28  ;;  %v6776_v18 = vrot.slane %v6762_v59, %v15305_v28 }
 0x7bd   : > { %v6718_v4 = vpop.permute.xlu1 %6717  ;;  %v6715_v31 = vpop.permute.xlu0 %6714 }
 0x7be   : > { %v6777_v39 = vcombine.low %v6712_v26, %v6718_v4  ;;  %v6778_v42 = vcombine.high %v6712_v26, %v6718_v4  ;;  %v6809_v57 = vcombine.low %v6753_v2, %v6769_v60  ;;  %v6810_v29 = vcombine.high %v6753_v2, %v6769_v60 }
 0x7bf   : > { %v6825_v6 = vcombine.low %v6760_v10, %v6776_v18  ;;  %v6826_v53 = vcombine.high %v6760_v10, %v6776_v18 }
 0x7c0   : > { %v6785_v35 = vrot.slane %v6777_v39, %v15305_v28  ;;  %v6792_v8 = vrot.slane %v6778_v42, %v15305_v28  ;;  %v22112_v5 = vrot.slane %v6809_v57, %v15317_v36  ;;  %v22115_v41 = vrot.slane %v6810_v29, %v15317_v36 }
 0x7c1   : > { %v6725_v30 = vpop.permute.xlu1 %6724  ;;  %v6721_v54 = vpop.permute.xlu0 %6720  ;;  %v22118_v1 = vrot.slane %v6825_v6, %v15317_v36 }
 0x7c2   : > { %v6793_v9 = vcombine.low %v6715_v31, %v6721_v54  ;;  %v6794_v32 = vcombine.high %v6715_v31, %v6721_v54 }
 0x7c4   : > { %v6801_v27 = vrot.slane %v6793_v9, %v15305_v28  ;;  %v6808_v13 = vrot.slane %v6794_v32, %v15305_v28 }
 0x7c5   : > { %v6731_v34 = vpop.permute.xlu1 %6730  ;;  %v6728_v49 = vpop.permute.xlu0 %6727 }
 0x7c6   : > { %v6841_v0 = vcombine.low %v6785_v35, %v6801_v27  ;;  %v6842_v40 = vcombine.high %v6785_v35, %v6801_v27  ;;  %v6897_v50 = vcombine.low %v6725_v30, %v6731_v34  ;;  %v6898_v17 = vcombine.high %v6725_v30, %v6731_v34 }
 0x7c7   : > { %v6881_v7 = vcombine.low %v22036_v61, %v6728_v49  ;;  %v6882_v12 = vcombine.high %v22036_v61, %v6728_v49  ;;  %v6857_v63 = vcombine.low %v6792_v8, %v6808_v13  ;;  %v6858_v22 = vcombine.high %v6792_v8, %v6808_v13 }
 0x7c8   : > { %v22100_v38 = vrot.slane %v6841_v0, %v15317_v36  ;;  %v22103_v16 = vrot.slane %v6842_v40, %v15317_v36  ;;  %v6905_v37 = vrot.slane %v6897_v50, %v15305_v28  ;;  %v6912_v19 = vrot.slane %v6898_v17, %v15305_v28 }
 0x7c9   : > { %v6737_v51 = vpop.permute.xlu1 %6736  ;;  %v6734_v20 = vpop.permute.xlu0 %6733  ;;  %v6889_v56 = vrot.slane %v6881_v7, %v15305_v28  ;;  %v6896_v62 = vrot.slane %v6882_v12, %v15305_v28  ;;  %v22121_v61 = vrot.slane %v6826_v53, %v15317_v36  ;;  %v22124_v47 = vrot.slane %v6857_v63, %v15317_v36 }
 0x7ca   : > { %v22127_v45 = vrot.slane %v6858_v22, %v15317_v36  ;;  %v6873_v4 = vcombine.low %v22112_v5, %v22100_v38  ;;  %v6874_v31 = vcombine.high %v22112_v5, %v22100_v38  ;;  %v6875_v30 = vcombine.low %v22115_v41, %v22103_v16 }
 0x7cb   : > { %v6876_v34 = vcombine.high %v22115_v41, %v22103_v16  ;;  %v6945_v49 = vcombine.low %v6889_v56, %v6905_v37  ;;  %v6962_v55 = vcombine.high %v6896_v62, %v6912_v19 }
 0x7cc   : > { %v6879_v60 = vcombine.low %v22121_v61, %v22127_v45  ;;  %v6880_v2 = vcombine.high %v22121_v61, %v22127_v45 }
 0x7cd   : > { %v6743_v23 = vpop.permute.xlu1 %6742  ;;  %v6740_v11 = vpop.permute.xlu0 %6739  ;;  %v22153_v10 = vrot.slane %v6945_v49, %v15317_v36 }
 0x7ce   : > { %v6929_v24 = vcombine.low %v6737_v51, %v6743_v23  ;;  %v6913_v44 = vcombine.low %v6734_v20, %v6740_v11  ;;  %v6930_v21 = vcombine.high %v6737_v51, %v6743_v23  ;;  %v6914_v15 = vcombine.high %v6734_v20, %v6740_v11 }
 0x7cf   : > { %v6946_v51 = vcombine.high %v6889_v56, %v6905_v37  ;;  %v6961_v20 = vcombine.low %v6896_v62, %v6912_v19  ;;  %v6877_v23 = vcombine.low %v22118_v1, %v22124_v47  ;;  %v6878_v11 = vcombine.high %v22118_v1, %v22124_v47 }
 0x7d0   : > { %v6937_v46 = vrot.slane %v6929_v24, %v15305_v28  ;;  %v6921_v25 = vrot.slane %v6913_v44, %v15305_v28  ;;  %v6944_v26 = vrot.slane %v6930_v21, %v15305_v28  ;;  %v6928_v33 = vrot.slane %v6914_v15, %v15305_v28 }
 0x7d1   : > { %v22158_v40 = vrot.slane %v6946_v51, %v15317_v36  ;;  %v22161_v24 = vrot.slane %v6961_v20, %v15317_v36  ;;  %v22164_v44 = vrot.slane %v6962_v55, %v15317_v36 }
 0x7d2   : > { %v6977_v54 = vcombine.low %v6921_v25, %v6937_v46  ;;  %v6978_v59 = vcombine.high %v6921_v25, %v6937_v46  ;;  %v6993_v42 = vcombine.low %v6928_v33, %v6944_v26  ;;  %v6994_v32 = vcombine.high %v6928_v33, %v6944_v26 }
 0x7d4   : > { %v22148_v18 = vrot.slane %v6977_v54, %v15317_v36  ;;  %v22167_v50 = vrot.slane %v6978_v59, %v15317_v36  ;;  %v22170_v17 = vrot.slane %v6993_v42, %v15317_v36  ;;  %v22173_v7 = vrot.slane %v6994_v32, %v15317_v36 }
 0x7d6   : > { %v7009_v29 = vcombine.low %v22153_v10, %v22148_v18  ;;  %v7010_v6 = vcombine.high %v22153_v10, %v22148_v18  ;;  %v7011_v19 = vcombine.low %v22158_v40, %v22167_v50  ;;  %v7012_v56 = vcombine.high %v22158_v40, %v22167_v50 }
 0x7d7   : > { %v7014_v26 = vcombine.high %v22161_v24, %v22170_v17  ;;  %v7015_v33 = vcombine.low %v22164_v44, %v22173_v7  ;;  %v7016_v54 = vcombine.high %v22164_v44, %v22173_v7 }
 0x801   : > { %v22057_v3 = vpop.f32.mrb[4].mxu0 }
 0x802   : > { %13977 = vrot.lane.b32.xlu1 %v22057_v3, %s15177_s26  ;;  %13974 = vrot.lane.b32.xlu0 %v22057_v3, %s15178_s27  ;;  %v22063_v48 = vpop.f32.mrb[5].mxu0 }
 0x806   : > { %13983 = vrot.lane.b32.xlu1 %v22057_v3, %s15175_s23  ;;  %13980 = vrot.lane.b32.xlu0 %v22057_v3, %s15176_s25 }
 0x80a   : > { %13989 = vrot.lane.b32.xlu1 %v22057_v3, %s15174_s20  ;;  %13986 = vrot.lane.b32.xlu0 %v22057_v3, %s15157_s11 }
 0x80e   : > { %13992 = vrot.lane.b32.xlu0 %v22057_v3, %s15173_s19  ;;  %13996 = vrot.lane.b32.xlu1 %v22063_v48, %s15178_s27 }
 0x812   : > { %13999 = vrot.lane.b32.xlu0 %v22063_v48, %s15177_s26  ;;  %14002 = vrot.lane.b32.xlu1 %v22063_v48, %s15176_s25 }
 0x816   : > { %14005 = vrot.lane.b32.xlu0 %v22063_v48, %s15175_s23  ;;  %14008 = vrot.lane.b32.xlu1 %v22063_v48, %s15157_s11 }
 0x81a   : > { %14011 = vrot.lane.b32.xlu0 %v22063_v48, %s15174_s20  ;;  %14014 = vrot.lane.b32.xlu1 %v22063_v48, %s15173_s19 }
 0x874   : > { %v13978_v58 = vpop.permute.xlu1 %13977  ;;  %v13975_v52 = vpop.permute.xlu0 %13974 }
 0x875   : > { %v14017_v35 = vcombine.low %v22057_v3, %v13978_v58  ;;  %v14018_v27 = vcombine.high %v22057_v3, %v13978_v58 }
 0x877   : > { %v14025_v12 = vrot.slane %v14017_v35, %v15305_v28  ;;  %v14032_v57 = vrot.slane %v14018_v27, %v15305_v28 }
 0x878   : > { %v13984_v39 = vpop.permute.xlu1 %13983  ;;  %v13981_v9 = vpop.permute.xlu0 %13980 }
 0x879   : > { %v14033_v43 = vcombine.low %v13975_v52, %v13981_v9  ;;  %v14034_v14 = vcombine.high %v13975_v52, %v13981_v9  ;;  %v7013_v52 = vcombine.low %v22161_v24, %v22170_v17 }
 0x87b   : > { %v14041_v3 = vrot.slane %v14033_v43, %v15305_v28  ;;  %v14048_v8 = vrot.slane %v14034_v14, %v15305_v28 }
 0x87c   : > { %v13990_v13 = vpop.permute.xlu1 %13989  ;;  %v13987_v0 = vpop.permute.xlu0 %13986 }
 0x87d   : > { %v14049_v53 = vcombine.low %v13984_v39, %v13990_v13  ;;  %v14050_v63 = vcombine.high %v13984_v39, %v13990_v13  ;;  %v14081_v22 = vcombine.low %v14025_v12, %v14041_v3  ;;  %v14082_v21 = vcombine.high %v14025_v12, %v14041_v3 }
 0x87e   : > { %v14097_v15 = vcombine.low %v14032_v57, %v14048_v8  ;;  %v14098_v46 = vcombine.high %v14032_v57, %v14048_v8 }
 0x87f   : > { %v14057_v49 = vrot.slane %v14049_v53, %v15305_v28  ;;  %v14064_v51 = vrot.slane %v14050_v63, %v15305_v28  ;;  %v14089_v9 = vrot.slane %v14081_v22, %v15317_v36  ;;  %v14096_v55 = vrot.slane %v14082_v21, %v15317_v36 }
 0x880   : > { %v13997_v25 = vpop.permute.xlu1 %13996  ;;  %v13993_v37 = vpop.permute.xlu0 %13992  ;;  %v14105_v59 = vrot.slane %v14097_v15, %v15317_v36  ;;  %v14112_v43 = vrot.slane %v14098_v46, %v15317_v36 }
 0x881   : > { %v14065_v62 = vcombine.low %v13987_v0, %v13993_v37  ;;  %v14066_v58 = vcombine.high %v13987_v0, %v13993_v37 }
 0x883   : > { %v14073_v20 = vrot.slane %v14065_v62, %v15305_v28  ;;  %v14080_v39 = vrot.slane %v14066_v58, %v15305_v28 }
 0x884   : > { %v14003_v14 = vpop.permute.xlu1 %14002  ;;  %v14000_v42 = vpop.permute.xlu0 %13999 }
 0x885   : > { %v14113_v32 = vcombine.low %v14057_v49, %v14073_v20  ;;  %v14114_v35 = vcombine.high %v14057_v49, %v14073_v20  ;;  %v14129_v27 = vcombine.low %v14064_v51, %v14080_v39  ;;  %v14130_v3 = vcombine.high %v14064_v51, %v14080_v39 }
 0x886   : > { %v14169_v8 = vcombine.low %v13997_v25, %v14003_v14  ;;  %v14170_v13 = vcombine.high %v13997_v25, %v14003_v14  ;;  %v14153_v0 = vcombine.low %v22063_v48, %v14000_v42  ;;  %v14154_v12 = vcombine.high %v22063_v48, %v14000_v42 }
 0x887   : > { %v14121_v57 = vrot.slane %v14113_v32, %v15317_v36  ;;  %v14128_v53 = vrot.slane %v14114_v35, %v15317_v36  ;;  %v14137_v63 = vrot.slane %v14129_v27, %v15317_v36  ;;  %v14144_v22 = vrot.slane %v14130_v3, %v15317_v36 }
 0x888   : > { %v14177_v21 = vrot.slane %v14169_v8, %v15305_v28  ;;  %v14184_v15 = vrot.slane %v14170_v13, %v15305_v28  ;;  %v14161_v46 = vrot.slane %v14153_v0, %v15305_v28  ;;  %v14168_v25 = vrot.slane %v14154_v12, %v15305_v28  ;;  %v14009_v37 = vpop.permute.xlu1 %14008  ;;  %v14006_v62 = vpop.permute.xlu0 %14005 }
 0x889   : > { %v14145_v58 = vcombine.low %v14089_v9, %v14121_v57  ;;  %v14146_v48 = vcombine.high %v14089_v9, %v14121_v57  ;;  %v14147_v49 = vcombine.low %v14096_v55, %v14128_v53  ;;  %v14148_v51 = vcombine.high %v14096_v55, %v14128_v53 }
 0x88a   : > { %v14149_v20 = vcombine.low %v14105_v59, %v14137_v63  ;;  %v14150_v39 = vcombine.high %v14105_v59, %v14137_v63  ;;  %v14151_v14 = vcombine.low %v14112_v43, %v14144_v22  ;;  %v14152_v42 = vcombine.high %v14112_v43, %v14144_v22 }
 0x88b   : > { %v22214_v32 = vadd.f32 %v14145_v58, %v6873_v4  ;;  %v22219_v35 = vadd.f32 %v14146_v48, %v6874_v31  ;;  %v22224_v9 = vadd.f32 %v14147_v49, %v6875_v30  ;;  %v22229_v55 = vadd.f32 %v14148_v51, %v6876_v34 }
 0x88c   : > { %v22234_v4 = vadd.f32 %v14149_v20, %v6877_v23  ;;  %v22239_v38 = vadd.f32 %v14150_v39, %v6878_v11  ;;  %v22244_v5 = vadd.f32 %v14151_v14, %v6879_v60  ;;  %v22249_v16 = vadd.f32 %v14152_v42, %v6880_v2  ;;  %v14015_v30 = vpop.permute.xlu1 %14014  ;;  %v14012_v34 = vpop.permute.xlu0 %14011 }
 0x88d   : > { %v14305_v41 = vcombine.low %v22214_v32, %v22224_v9  ;;  %v14306_v31 = vcombine.high %v22214_v32, %v22224_v9  ;;  %v14321_v1 = vcombine.low %v22219_v35, %v22229_v55  ;;  %v14322_v47 = vcombine.high %v22219_v35, %v22229_v55 }
 0x88e   : > { %v14337_v23 = vcombine.low %v22234_v4, %v22244_v5  ;;  %v14338_v61 = vcombine.high %v22234_v4, %v22244_v5  ;;  %v14353_v45 = vcombine.low %v22239_v38, %v22249_v16  ;;  %v14354_v11 = vcombine.high %v22239_v38, %v22249_v16 }
 0x88f   : > { %v14217_v60 = vcombine.low %v14161_v46, %v14177_v21  ;;  %v14218_v2 = vcombine.high %v14161_v46, %v14177_v21  ;;  %v14233_v59 = vcombine.low %v14168_v25, %v14184_v15  ;;  %v14234_v43 = vcombine.high %v14168_v25, %v14184_v15 }
 0x890   : > { %v14201_v27 = vcombine.low %v14009_v37, %v14015_v30  ;;  %v14202_v3 = vcombine.high %v14009_v37, %v14015_v30  ;;  %v14185_v8 = vcombine.low %v14006_v62, %v14012_v34  ;;  %v14186_v13 = vcombine.high %v14006_v62, %v14012_v34 }
 0x891   : > { %v14225_v0 = vrot.slane %v14217_v60, %v15317_v36  ;;  %v14232_v12 = vrot.slane %v14218_v2, %v15317_v36  ;;  %v14241_v57 = vrot.slane %v14233_v59, %v15317_v36  ;;  %v14248_v53 = vrot.slane %v14234_v43, %v15317_v36 }
 0x892   : > { %v14209_v63 = vrot.slane %v14201_v27, %v15305_v28  ;;  %v14216_v22 = vrot.slane %v14202_v3, %v15305_v28  ;;  %v14193_v21 = vrot.slane %v14185_v8, %v15305_v28  ;;  %v14200_v15 = vrot.slane %v14186_v13, %v15305_v28 }
 0x893   : > { %v14313_v46 = vrot.slane %v14305_v41, %v15305_v28  ;;  %v14329_v25 = vrot.slane %v14321_v1, %v15305_v28  ;;  %v14345_v37 = vrot.slane %v14337_v23, %v15305_v28  ;;  %v14361_v62 = vrot.slane %v14353_v45, %v15305_v28 }
 0x894   : > { %v14249_v58 = vcombine.low %v14193_v21, %v14209_v63  ;;  %v14250_v48 = vcombine.high %v14193_v21, %v14209_v63  ;;  %v14265_v49 = vcombine.low %v14200_v15, %v14216_v22  ;;  %v14266_v51 = vcombine.high %v14200_v15, %v14216_v22 }
 0x895   : > { %v14369_v20 = vcombine.low %v14313_v46, %v14329_v25  ;;  %v14401_v39 = vcombine.low %v14345_v37, %v14361_v62  ;;  %v14370_v14 = vcombine.high %v14313_v46, %v14329_v25  ;;  %v14402_v42 = vcombine.high %v14345_v37, %v14361_v62 }
 0x896   : > { %v14257_v30 = vrot.slane %v14249_v58, %v15317_v36  ;;  %v14264_v34 = vrot.slane %v14250_v48, %v15317_v36  ;;  %v14273_v41 = vrot.slane %v14265_v49, %v15317_v36  ;;  %v14280_v1 = vrot.slane %v14266_v51, %v15317_v36 }
 0x897   : > { %v22284_v23 = vrot.slane %v14369_v20, %v15317_v36  ;;  %v22287_v45 = vrot.slane %v14401_v39, %v15317_v36  ;;  %v22290_v60 = vrot.slane %v14370_v14, %v15317_v36  ;;  %v22293_v2 = vrot.slane %v14402_v42, %v15317_v36 }
 0x898   : > { %v14281_v59 = vcombine.low %v14225_v0, %v14257_v30  ;;  %v14282_v43 = vcombine.high %v14225_v0, %v14257_v30  ;;  %v14283_v27 = vcombine.low %v14232_v12, %v14264_v34  ;;  %v14284_v3 = vcombine.high %v14232_v12, %v14264_v34 }
 0x899   : > { %v14285_v8 = vcombine.low %v14241_v57, %v14273_v41  ;;  %v14286_v13 = vcombine.high %v14241_v57, %v14273_v41  ;;  %v14287_v63 = vcombine.low %v14248_v53, %v14280_v1  ;;  %v14288_v22 = vcombine.high %v14248_v53, %v14280_v1 }
 0x89a   : > { %v14290_v21 = vadd.f32 %v14281_v59, %v7009_v29  ;;  %v14292_v15 = vadd.f32 %v14282_v43, %v7010_v6  ;;  %v14294_v46 = vadd.f32 %v14283_v27, %v7011_v19  ;;  %v14296_v0 = vadd.f32 %v14284_v3, %v7012_v56 }
 0x89b   : > { %v14298_v12 = vadd.f32 %v14285_v8, %v7013_v52  ;;  %v14300_v29 = vadd.f32 %v14286_v13, %v7014_v26  ;;  %v14302_v18 = vadd.f32 %v14287_v63, %v7015_v33  ;;  %v14304_v10 = vadd.f32 %v14288_v22, %v7016_v54 }
 0x89c   : > { %v14441_v6 = vcombine.low %v14290_v21, %v14294_v46  ;;  %v14442_v19 = vcombine.high %v14290_v21, %v14294_v46  ;;  %v14457_v40 = vcombine.low %v14292_v15, %v14296_v0  ;;  %v14458_v50 = vcombine.high %v14292_v15, %v14296_v0 }
 0x89d   : > { %v14473_v56 = vcombine.low %v14298_v12, %v14302_v18  ;;  %v14474_v57 = vcombine.high %v14298_v12, %v14302_v18  ;;  %v14489_v53 = vcombine.low %v14300_v29, %v14304_v10  ;;  %v14490_v52 = vcombine.high %v14300_v29, %v14304_v10 }
 0x89e   : > { %v14434_v24 = vcombine.high %v22284_v23, %v22287_v45  ;;  %v14435_v17 = vcombine.low %v22290_v60, %v22293_v2  ;;  %v14436_v26 = vcombine.high %v22290_v60, %v22293_v2  ;;  %v14320_v44 = vrot.slane %v14306_v31, %v15305_v28 }
 0x89f   : > { %v14336_v7 = vrot.slane %v14322_v47, %v15305_v28  ;;  %v14352_v33 = vrot.slane %v14338_v61, %v15305_v28  ;;  %v14368_v54 = vrot.slane %v14354_v11, %v15305_v28  ;;  %v14449_v25 = vrot.slane %v14441_v6, %v15305_v28 }
 0x8a0   : > { %14578 = vrot.lane.b32.xlu0 %v14434_v24, %s15173_s19  ;;  %v14465_v32 = vrot.slane %v14457_v40, %v15305_v28  ;;  %v14481_v9 = vrot.slane %v14473_v56, %v15305_v28  ;;  %v14497_v35 = vrot.slane %v14489_v53, %v15305_v28  ;;  %v14456_v55 = vrot.slane %v14442_v19, %v15305_v28 }
 0x8a1   : > { %v14385_v31 = vcombine.low %v14320_v44, %v14336_v7  ;;  %v14417_v4 = vcombine.low %v14352_v33, %v14368_v54  ;;  %v14386_v5 = vcombine.high %v14320_v44, %v14336_v7  ;;  %v14418_v47 = vcombine.high %v14352_v33, %v14368_v54 }
 0x8a2   : > { %v14505_v61 = vcombine.low %v14449_v25, %v14465_v32  ;;  %v14537_v37 = vcombine.low %v14481_v9, %v14497_v35  ;;  %v14506_v38 = vcombine.high %v14449_v25, %v14465_v32  ;;  %v14538_v16 = vcombine.high %v14481_v9, %v14497_v35 }
 0x8a3   : > { %v14393_v11 = vrot.slane %v14385_v31, %v15317_v36  ;;  %v14425_v62 = vrot.slane %v14417_v4, %v15317_v36  ;;  %v14400_v58 = vrot.slane %v14386_v5, %v15317_v36  ;;  %v14432_v48 = vrot.slane %v14418_v47, %v15317_v36 }
 0x8a4   : > { %14582 = vrot.lane.b32.xlu0 %v14435_v17, %s15174_s20  ;;  %v22353_v49 = vrot.slane %v14505_v61, %v15317_v36  ;;  %v22356_v51 = vrot.slane %v14537_v37, %v15317_v36  ;;  %v14520_v20 = vrot.slane %v14506_v38, %v15317_v36  ;;  %v14552_v39 = vrot.slane %v14538_v16, %v15317_v36 }
 0x8a5   : > { %v14437_v14 = vcombine.low %v14393_v11, %v14425_v62  ;;  %v14438_v42 = vcombine.high %v14393_v11, %v14425_v62  ;;  %v14439_v30 = vcombine.low %v14400_v58, %v14432_v48  ;;  %v14440_v34 = vcombine.high %v14400_v58, %v14432_v48 }
 0x8a6   : > { %v14570_v41 = vcombine.high %v22353_v49, %v22356_v51  ;;  %v14571_v1 = vcombine.low %v14520_v20, %v14552_v39  ;;  %v14572_v60 = vcombine.high %v14520_v20, %v14552_v39  ;;  %v14472_v2 = vrot.slane %v14458_v50, %v15305_v28 }
 0x8a7   : > { %v14488_v59 = vrot.slane %v14474_v57, %v15305_v28  ;;  %v14504_v43 = vrot.slane %v14490_v52, %v15305_v28  ;;  %v14433_v27 = vcombine.low %v22284_v23, %v22287_v45  ;;  %v14569_v3 = vcombine.low %v22353_v49, %v22356_v51 }
 0x8a8   : > { %14586 = vrot.lane.b32.xlu0 %v14436_v26, %s15157_s11  ;;  %14606 = vrot.lane.b32.xlu1 %v14570_v41, %s15173_s19  ;;  %v14521_v8 = vcombine.low %v14456_v55, %v14472_v2  ;;  %v14522_v13 = vcombine.high %v14456_v55, %v14472_v2 }
 0x8a9   : > { %v14553_v63 = vcombine.low %v14488_v59, %v14504_v43  ;;  %v14554_v22 = vcombine.high %v14488_v59, %v14504_v43 }
 0x8aa   : > { %v14529_v21 = vrot.slane %v14521_v8, %v15317_v36  ;;  %v14536_v15 = vrot.slane %v14522_v13, %v15317_v36 }
 0x8ab   : > { %v14561_v28 = vrot.slane %v14553_v63, %v15317_v36  ;;  %v14568_v46 = vrot.slane %v14554_v22, %v15317_v36 }
 0x8ac   : > { %14590 = vrot.lane.b32.xlu0 %v14437_v14, %s15175_s23  ;;  %14610 = vrot.lane.b32.xlu1 %v14571_v1, %s15174_s20 }
 0x8ad   : > { %v14573_v23 = vcombine.low %v14529_v21, %v14561_v28  ;;  %v14574_v45 = vcombine.high %v14529_v21, %v14561_v28  ;;  %v14575_v0 = vcombine.low %v14536_v15, %v14568_v46  ;;  %v14576_v12 = vcombine.high %v14536_v15, %v14568_v46 }
 0x8b0   : > { %14594 = vrot.lane.b32.xlu0 %v14438_v42, %s15176_s25  ;;  %14614 = vrot.lane.b32.xlu1 %v14572_v60, %s15157_s11  ;;  %s14903_s11 = sshll.u32 %s23780_s22, 4 }
 0x8b4   : > { %14598 = vrot.lane.b32.xlu0 %v14439_v30, %s15177_s26  ;;  %14618 = vrot.lane.b32.xlu1 %v14573_v23, %s15175_s23  ;;  %s258_s23 = scalar_lea.vmem %s22415_s5, %s14903_s11 }
 0x8b8   : > { %14602 = vrot.lane.b32.xlu0 %v14440_v34, %s15178_s27  ;;  %14622 = vrot.lane.b32.xlu1 %v14574_v45, %s15176_s25  ;;  %s14759_s25 = sshll.u32 %s23780_s22, 3 }
 0x8b9   : > { %s262_s24 = scalar_lea.vmem %s22416_s6, %s14759_s25 }
 0x8bc   : > { %14626 = vrot.lane.b32.xlu1 %v14575_v0, %s15177_s26 }
 0x8c0   : > { %14630 = vrot.lane.b32.xlu1 %v14576_v12, %s15178_s27 }
 0x912   : > { %v14579_v36 = vpop.permute.xlu0 %14578 }
 0x913   : > { %v14633_v56 = vsel %vm3784_vm4, %v14433_v27, %v14579_v36 }
 0x916   : > { %v14583_v29 = vpop.permute.xlu0 %14582 }
 0x917   : > { %v14634_v57 = vsel %vm3786_vm5, %v14633_v56, %v14583_v29 }
 0x91a   : > { %v14587_v18 = vpop.permute.xlu0 %14586  ;;  %v14607_v10 = vpop.permute.xlu1 %14606 }
 0x91b   : > { %v14635_v24 = vsel %vm561_vm15, %v14634_v57, %v14587_v18  ;;  %v14640_v25 = vsel %vm3784_vm4, %v14569_v3, %v14607_v10 }
 0x91e   : > { %v14591_v6 = vpop.permute.xlu0 %14590  ;;  %v14611_v19 = vpop.permute.xlu1 %14610 }
 0x91f   : > { %v14636_v17 = vsel %vm3789_vm9, %v14635_v24, %v14591_v6  ;;  %v14641_v32 = vsel %vm3786_vm5, %v14640_v25, %v14611_v19 }
 0x922   : > { %v14595_v40 = vpop.permute.xlu0 %14594  ;;  %v14615_v50 = vpop.permute.xlu1 %14614 }
 0x923   : > { %v14637_v26 = vsel %vm3791_vm10, %v14636_v17, %v14595_v40  ;;  %v14642_v35 = vsel %vm561_vm15, %v14641_v32, %v14615_v50  ;;  %vm14662_vm15 = vcmask 15360  }
 0x926   : > { %v14599_v53 = vpop.permute.xlu0 %14598  ;;  %v14619_v52 = vpop.permute.xlu1 %14618 }
 0x927   : > { %v14638_v44 = vsel %vm3793_vm14, %v14637_v26, %v14599_v53  ;;  %v14643_v55 = vsel %vm3789_vm9, %v14642_v35, %v14619_v52 }
 0x92a   : > { %v14603_v7 = vpop.permute.xlu0 %14602  ;;  %v14623_v33 = vpop.permute.xlu1 %14622 }
 0x92b   : > { %v14639_v54 = vsel %vm3795_vm0, %v14638_v44, %v14603_v7  ;;  %v14644_v31 = vsel %vm3791_vm10, %v14643_v55, %v14623_v33 }
 0x92c   : > { %14647 = vst [vmem:[%s258_s23] sm:$0xff] %v14639_v54 }
 0x92e   : > { %v14627_v9 = vpop.permute.xlu1 %14626 }
 0x92f   : > { %v14645_v4 = vsel %vm3793_vm14, %v14644_v31, %v14627_v9 }
 0x932   : > { %v14631_v5 = vpop.permute.xlu1 %14630 }
 0x933   : > { %v14646_v47 = vsel %vm3795_vm0, %v14645_v4, %v14631_v5 }
 0x934   : > { %14648 = vst [vmem:[%s258_s23 + $0x8] sm:$0xff] %v14646_v47  ;;  %v14649_v61 = vadd.f32 %v14646_v47, %v14639_v54 }
 0x936   : > { %14650 = vadd.xlane.f32.xlu0 %v14649_v61 }
 0x9c3   : > { %v14651_v37 = vpop.xlane.xlu0 %14650 }
 0x9c4   : > { %v14652_v38 = vmul.f32 0.00390625, %v14651_v37 }
 0x9c6   : > { %v14653_v16 = vsub.f32 %v14639_v54, %v14652_v38  ;;  %v14654_v11 = vsub.f32 %v14646_v47, %v14652_v38 }
 0x9c8   : > { %v14655_v62 = vmul.f32 %v14653_v16, %v14653_v16  ;;  %v14656_v58 = vmul.f32 %v14654_v11, %v14654_v11 }
 0x9ca   : > { %v14657_v48 = vadd.f32 %v14656_v58, %v14655_v62 }
 0x9cc   : > { %14658 = vadd.xlane.f32.xlu1 %v14657_v48 }
 0xa59   : > { %v14659_v49 = vpop.xlane.xlu1 %14658 }
 0xa5a   : > { %v14661_v51 = vsel %vm14660_vm7, %v14651_v37, %v14659_v49 }
 0xa5b   : > { %14663 = vst.msk [vmem:[%s262_s24] sm:$0xff] %vm14662_vm15, %v14661_v51 }
 0xa5c PF: > { %s17_s21 = sadd.s32 1, %s15145_s21  }
 0xa5d   : > { %p14_p4 = scmp.ge.s32.totalorder %s17_s21, 4  }
 0xa5f   :  { %16 = sbr.rel (!%p14_p4) target bundleno = 1 (0x1), region = 106 }

</bundles_post_ra>
